<compile_context>
chip_gen: v5e
topology: v5e:2x2
jax: 0.10.0
libtpu: 0.0.40
codegen_flags: <defaults>
</compile_context>

<pallas_src>
import functools
import math

import jax
import jax.numpy as jnp
from jax import lax
from jax.experimental import pallas as pl
from jax.experimental.pallas import tpu as pltpu


NUM_HEADS = 8


# --------------------------------------------------------------------------
# In-kernel helpers
# --------------------------------------------------------------------------
def _ln(x, g, b, eps=1e-5):
    m = jnp.mean(x, axis=-1, keepdims=True)
    c = x - m
    v = jnp.mean(c * c, axis=-1, keepdims=True)
    return c * lax.rsqrt(v + eps) * g + b


def _mha_heads(q, k, v, num_heads, scale):
    """q: (Lq, d), k/v: (Lk, d) f32 -> (Lq, d) f32.

    Per-head attention via a static python loop over lane slices of the already
    projected activations; output is re-assembled as a lane-dense (Lq, H*dh) slab.
    No (B*H, L, dh) HBM relayouts."""
    d = q.shape[-1]
    dh = d // num_heads
    outs = []
    for h in range(num_heads):
        sl = slice(h * dh, (h + 1) * dh)
        qh = q[:, sl]
        kh = k[:, sl]
        vh = v[:, sl]
        s = lax.dot_general(qh, kh, (((1,), (1,)), ((), ())),
                            preferred_element_type=jnp.float32) * scale   # (Lq, Lk)
        m = jnp.max(s, axis=-1, keepdims=True)
        p = jnp.exp(s - m)
        denom = jnp.sum(p, axis=-1, keepdims=True)
        p = p * pl.reciprocal(denom, approx=True)       # EUP slot, ~free
        outs.append(jnp.dot(p, vh, preferred_element_type=jnp.float32))
    return jnp.concatenate(outs, axis=-1)


def _bf16_dot(x, w_ref, b_ref):
    """x (f32) @ bf16-weight-ref + f32 bias, accumulated in f32 on the MXU."""
    return (jnp.dot(x.astype(jnp.bfloat16), w_ref[...],
                    preferred_element_type=jnp.float32) + b_ref[...])


# --------------------------------------------------------------------------
# Fused Pallas kernels
# --------------------------------------------------------------------------
def _lang_tf_enc_kernel(ker_ref, lang_ref,
                        wq_ref, bq_ref, wkv_ref, bkv_ref, wo_ref, bo_ref,
                        ng_ref, nb_ref, wker_ref, bker_ref,
                        out_ref, *, num_heads):
    # TODO(synk): lang_tf_enc definition not provided with the module; assumed
    # multi-head cross-attention (kernel queries, language keys/values) with
    # residual + LayerNorm.  fc_ker is fused on the tail of this kernel.
    x = ker_ref[0]                        # (nq, d) f32
    lf = lang_ref[0]                      # (ll, d) f32
    d = x.shape[-1]
    scale = 1.0 / math.sqrt(d // num_heads)

    q = _bf16_dot(x, wq_ref, bq_ref)                     # (nq, d)
    kv = _bf16_dot(lf, wkv_ref, bkv_ref)                 # (ll, 2d)  (K || V fused)
    k = kv[:, :d]
    v = kv[:, d:]

    o = _mha_heads(q, k, v, num_heads, scale)            # (nq, d)
    attn = _bf16_dot(o, wo_ref, bo_ref)
    y = _ln(x + attn, ng_ref[...], nb_ref[...])
    out_ref[0] = _bf16_dot(y, wker_ref, bker_ref)        # fc_ker -> (nq, 2*feat)


def _encoder_layer_kernel(src_ref, pos_ref,
                          wqk_ref, bqk_ref, wv_ref, bv_ref, wo_ref, bo_ref,
                          n1g_ref, n1b_ref,
                          w1_ref, b1_ref, w2_ref, b2_ref,
                          n2g_ref, n2b_ref,
                          out_ref, *, num_heads):
    # DETR TransformerEncoderLayer, normalize_before=False, eval mode (dropout = id).
    x = src_ref[0]                        # (hw, d) f32
    d = x.shape[-1]
    scale = 1.0 / math.sqrt(d // num_heads)

    qk_in = x + pos_ref[0]
    qk = _bf16_dot(qk_in, wqk_ref, bqk_ref)              # (hw, 2d)  (Q || K fused)
    q = qk[:, :d]
    k = qk[:, d:]
    v = _bf16_dot(x, wv_ref, bv_ref)                     # value is src (no pos)

    o = _mha_heads(q, k, v, num_heads, scale)
    attn = _bf16_dot(o, wo_ref, bo_ref)
    x = _ln(x + attn, n1g_ref[...], n1b_ref[...])

    h1 = jax.nn.relu(_bf16_dot(x, w1_ref, b1_ref))       # FFN fused in same kernel
    h2 = _bf16_dot(h1, w2_ref, b2_ref)
    out_ref[0] = _ln(x + h2, n2g_ref[...], n2b_ref[...])


def _enc_norm_vis_proj_kernel(src_ref, g_ref, b_ref, wvis_ref, bvis_ref,
                              visu_ref, proj_ref):
    # Final encoder LayerNorm fused with fc_vis (two outputs: visu_feat_ and its
    # 2*feat projection, so visu_feat_ is only read once from HBM downstream).
    x = _ln(src_ref[0], g_ref[...], b_ref[...])
    visu_ref[0] = x
    proj_ref[0] = _bf16_dot(x, wvis_ref, bvis_ref)


def _klm_gate_kernel(kerp_ref, visp_ref,
                     kg_ref, kb_ref, vg_ref, vb_ref,
                     wcs_ref, bcs_ref, cg_ref, cb_ref, sg_ref, sb_ref,
                     wout_ref, bout_ref, og_ref, ob_ref,
                     out_ref, ch_acc, sp_acc, *, feat, hw):
    # Streams the (nq, hw, feat) outer product over hw tiles (grid axis 1,
    # "arbitrary") accumulating the two hw-reductions in VMEM scratch.
    h = pl.program_id(1)

    @pl.when(h == 0)
    def _():
        ch_acc[...] = jnp.zeros_like(ch_acc)
        sp_acc[...] = jnp.zeros_like(sp_acc)

    kerp = kerp_ref[0]                    # (nq, 2*feat) resident across hw tiles
    visp = visp_ref[0]                    # (ht, 2*feat) current hw tile
    kin = kerp[:, :feat]
    vin = visp[:, :feat]
    vout = visp[:, feat:]
    nq = kin.shape[0]
    ht = vin.shape[0]

    kin_n = _ln(kin, kg_ref[...], kb_ref[...])            # ker_norm  (cheap, per tile)
    vin_n = _ln(vin, vg_ref[...], vb_ref[...])            # vis_norm

    gate = kin_n[:, None, :] * vin_n[None, :, :]          # (nq, ht, feat)
    gate2 = gate.reshape(nq * ht, feat)

    # channel_fc || spatial_fc fused into one (feat, 2*feat) matmul.
    cs = _bf16_dot(gate2, wcs_ref, bcs_ref)               # (nq*ht, 2*feat)
    ch = _ln(cs[:, :feat], cg_ref[...], cb_ref[...]).reshape(nq, ht, feat)
    sp = jax.nn.sigmoid(
        _ln(cs[:, feat:], sg_ref[...], sb_ref[...])).reshape(nq, ht, feat)

    ch_acc[...] += jnp.sum(ch, axis=1)                               # sum over hw tile
    sp_acc[...] += jnp.sum((1.0 + sp) * vout[None, :, :], axis=1)

    @pl.when(h == pl.num_programs(1) - 1)
    def _():
        inv_hw = 1.0 / float(hw)                           # static constant
        kout = kerp[:, feat:]
        channel_gate = (1.0 + jax.nn.sigmoid(ch_acc[...] * inv_hw)) * kout
        spatial_gate = sp_acc[...] * inv_hw
        g = (channel_gate + spatial_gate) * 0.5
        o = _bf16_dot(g, wout_ref, bout_ref)               # out_fc
        out_ref[0] = jax.nn.relu(_ln(o, og_ref[...], ob_ref[...]))


# --------------------------------------------------------------------------
# pallas_call wrappers
# --------------------------------------------------------------------------
def _wspec1(a):   # weight / bias / LN param spec for a 1-D grid (batch,)
    return pl.BlockSpec(a.shape, lambda b: (0, 0))


def _wspec2(a):   # weight / bias / LN param spec for a 2-D grid (batch, hw_tile)
    return pl.BlockSpec(a.shape, lambda b, h: (0, 0))


def lang_tf_enc_block(kernel, lang_feat, pp):
    bs, nq, d = kernel.shape
    ll = lang_feat.shape[1]
    n_out = pp["wker"].shape[1]
    weights = [pp["wq"], pp["bq"], pp["wkv"], pp["bkv"], pp["wo"], pp["bo"],
               pp["ng"], pp["nb"], pp["wker"], pp["bker"]]
    return pl.pallas_call(
        functools.partial(_lang_tf_enc_kernel, num_heads=NUM_HEADS),
        grid=(bs,),
        in_specs=[pl.BlockSpec((1, nq, d), lambda b: (b, 0, 0)),
                  pl.BlockSpec((1, ll, d), lambda b: (b, 0, 0))]
                 + [_wspec1(w) for w in weights],
        out_specs=pl.BlockSpec((1, nq, n_out), lambda b: (b, 0, 0)),
        out_shape=jax.ShapeDtypeStruct((bs, nq, n_out), jnp.float32),
        compiler_params=pltpu.CompilerParams(dimension_semantics=("parallel",)),
    )(kernel, lang_feat, *weights)


def encoder_layer_block(src, pos, pp):
    bs, hw, d = src.shape
    weights = [pp["wqk"], pp["bqk"], pp["wv"], pp["bv"], pp["wo"], pp["bo"],
               pp["n1g"], pp["n1b"], pp["w1"], pp["b1"], pp["w2"], pp["b2"],
               pp["n2g"], pp["n2b"]]
    return pl.pallas_call(
        functools.partial(_encoder_layer_kernel, num_heads=NUM_HEADS),
        grid=(bs,),
        in_specs=[pl.BlockSpec((1, hw, d), lambda b: (b, 0, 0)),
                  pl.BlockSpec((1, hw, d), lambda b: (0, 0, 0))]   # shared pos embed
                 + [_wspec1(w) for w in weights],
        out_specs=pl.BlockSpec((1, hw, d), lambda b: (b, 0, 0)),
        out_shape=jax.ShapeDtypeStruct((bs, hw, d), jnp.float32),
        compiler_params=pltpu.CompilerParams(dimension_semantics=("parallel",)),
    )(src, pos, *weights)


def enc_norm_vis_proj_block(src, pp):
    bs, hw, d = src.shape
    n_out = pp["wvis"].shape[1]
    weights = [pp["ng"], pp["nb"], pp["wvis"], pp["bvis"]]
    return pl.pallas_call(
        _enc_norm_vis_proj_kernel,
        grid=(bs,),
        in_specs=[pl.BlockSpec((1, hw, d), lambda b: (b, 0, 0))]
                 + [_wspec1(w) for w in weights],
        out_specs=(pl.BlockSpec((1, hw, d), lambda b: (b, 0, 0)),
                   pl.BlockSpec((1, hw, n_out), lambda b: (b, 0, 0))),
        out_shape=(jax.ShapeDtypeStruct((bs, hw, d), jnp.float32),
                   jax.ShapeDtypeStruct((bs, hw, n_out), jnp.float32)),
        compiler_params=pltpu.CompilerParams(dimension_semantics=("parallel",)),
    )(src, *weights)


def _pick_hw_tile(hw, nq, feat):
    """hw chunk for the streamed gate: multiple of 8 dividing hw, sized so the
    (nq*HT, feat) f32 intermediates stay ~4 MiB (VMEM-safe on v7x)."""
    if hw % 8 != 0 or hw <= 8:
        return hw
    max_rows = max(8, (4 * 1024 * 1024) // (4 * max(feat, 1) * max(nq, 1)))
    max_rows = min(max_rows, hw // 2)
    ht = 8
    for cand in range(8, hw, 8):
        if hw % cand == 0 and cand <= max_rows:
            ht = cand
    return ht


def klm_gate_block(ker_proj, vis_proj, pp, f_dim, feat_dim):
    bs, nq, _ = ker_proj.shape
    hw = vis_proj.shape[1]
    ht = _pick_hw_tile(hw, nq, feat_dim)
    n_ht = hw // ht
    weights = [pp["ker_g"], pp["ker_b"], pp["vis_g"], pp["vis_b"],
               pp["w_cs"], pp["b_cs"], pp["ch_g"], pp["ch_b"],
               pp["sp_g"], pp["sp_b"], pp["w_out"], pp["b_out"],
               pp["on_g"], pp["on_b"]]
    return pl.pallas_call(
        functools.partial(_klm_gate_kernel, feat=feat_dim, hw=hw),
        grid=(bs, n_ht),
        in_specs=[pl.BlockSpec((1, nq, 2 * feat_dim), lambda b, h: (b, 0, 0)),
                  pl.BlockSpec((1, ht, 2 * feat_dim), lambda b, h: (b, h, 0))]
                 + [_wspec2(w) for w in weights],
        out_specs=pl.BlockSpec((1, nq, f_dim), lambda b, h: (b, 0, 0)),
        out_shape=jax.ShapeDtypeStruct((bs, nq, f_dim), jnp.float32),
        scratch_shapes=[pltpu.VMEM((nq, feat_dim), jnp.float32),
                        pltpu.VMEM((nq, feat_dim), jnp.float32)],
        compiler_params=pltpu.CompilerParams(
            dimension_semantics=("parallel", "arbitrary")),
    )(ker_proj, vis_proj, *weights)


# --------------------------------------------------------------------------
# Plain-JAX glue (constant pos embedding, module composition)
# --------------------------------------------------------------------------
def position_embedding_sine(hw, d_model):
    # TODO(synk): PositionEmbeddingSine source not provided; assumed DETR-style
    # 2D sine embedding on a sqrt(hw) x sqrt(hw) grid.  Computed once, outside jit.
    num_pos_feats = d_model // 2
    side = int(round(math.sqrt(hw)))
    scale = 2 * math.pi
    eps = 1e-6
    y = jnp.arange(1, side + 1, dtype=jnp.float32)
    x = jnp.arange(1, side + 1, dtype=jnp.float32)
    y_embed = jnp.tile(y[:, None], (1, side))
    x_embed = jnp.tile(x[None, :], (side, 1))
    y_embed = y_embed / (y_embed[-1:, :] + eps) * scale
    x_embed = x_embed / (x_embed[:, -1:] + eps) * scale
    dim_t = jnp.arange(num_pos_feats, dtype=jnp.float32)
    dim_t = 10000.0 ** (2.0 * (dim_t // 2) / num_pos_feats)
    pos_x = x_embed[:, :, None] / dim_t
    pos_y = y_embed[:, :, None] / dim_t
    pos_x = jnp.stack(
        [jnp.sin(pos_x[:, :, 0::2]), jnp.cos(pos_x[:, :, 1::2])], axis=3
    ).reshape(side, side, -1)
    pos_y = jnp.stack(
        [jnp.sin(pos_y[:, :, 0::2]), jnp.cos(pos_y[:, :, 1::2])], axis=3
    ).reshape(side, side, -1)
    pos = jnp.concatenate([pos_y, pos_x], axis=2).reshape(hw, d_model)
    return pos.reshape(1, hw, d_model)


def klm_forward(pp, kernel, lang_feat, visu_feat, pos_embed, *, f_dim, feat_dim):
    # kernel: (bs, nq, f_dim), lang_feat: (bs, ll, f_dim), visu_feat: (bs, f_dim, hw)
    ker_proj = lang_tf_enc_block(kernel, lang_feat, pp["lang_tf_enc"])   # (bs,nq,2F)

    src = jnp.transpose(visu_feat, (0, 2, 1))                            # (bs, hw, c)
    for lp in pp["enc_layers"]:
        src = encoder_layer_block(src, pos_embed, lp)
    visu_out, vis_proj = enc_norm_vis_proj_block(src, pp["final"])       # (bs,hw,c),(bs,hw,2F)

    gate_feat = klm_gate_block(ker_proj, vis_proj, pp["gate"], f_dim, feat_dim)
    return gate_feat, jnp.transpose(visu_out, (0, 2, 1))                 # (bs,nq,F),(bs,c,hw)


# --------------------------------------------------------------------------
# Parameter init (PyTorch conventions) and one-time kernel-layout preparation
# --------------------------------------------------------------------------
def init_params(key, f_dim, feat_dim):
    keys = iter(jax.random.split(key, 64))

    def lin(n_out, n_in):
        w = jax.random.normal(next(keys), (n_out, n_in), jnp.float32) / math.sqrt(n_in)
        return w, jnp.zeros((n_out,), jnp.float32)

    def norm(d):
        return jnp.ones((d,), jnp.float32), jnp.zeros((d,), jnp.float32)

    def mha_p(d):
        # NOTE: when loading real PyTorch weights, slice nn.MultiheadAttention's
        # packed in_proj_weight in (q, k, v) row order into these.
        wq, bq = lin(d, d)
        wk, bk = lin(d, d)
        wv, bv = lin(d, d)
        wo, bo = lin(d, d)
        return dict(wq=wq, bq=bq, wk=wk, bk=bk, wv=wv, bv=bv, wo=wo, bo=bo)

    def enc_layer_p(d):
        n1g, n1b = norm(d)
        n2g, n2b = norm(d)
        l1w, l1b = lin(d, d)   # dim_feedforward == f_dim (per module spec)
        l2w, l2b = lin(d, d)
        return dict(attn=mha_p(d), lin1_w=l1w, lin1_b=l1b, lin2_w=l2w, lin2_b=l2b,
                    norm1_g=n1g, norm1_b=n1b, norm2_g=n2g, norm2_b=n2b)

    lte_ng, lte_nb = norm(f_dim)
    enc_ng, enc_nb = norm(f_dim)
    fc_ker_w, fc_ker_b = lin(2 * feat_dim, f_dim)
    fc_vis_w, fc_vis_b = lin(2 * feat_dim, f_dim)
    kng, knb = norm(feat_dim)
    vng, vnb = norm(feat_dim)
    cw, cb = lin(feat_dim, feat_dim)
    cng, cnb = norm(feat_dim)
    sw, sb = lin(feat_dim, feat_dim)
    sng, snb = norm(feat_dim)
    ow, ob = lin(f_dim, feat_dim)
    ong, onb = norm(f_dim)

    return dict(
        lang_tf_enc=dict(attn=mha_p(f_dim), norm_g=lte_ng, norm_b=lte_nb),
        enc_layers=[enc_layer_p(f_dim) for _ in range(2)],
        enc_norm_g=enc_ng, enc_norm_b=enc_nb,
        fc_ker_w=fc_ker_w, fc_ker_b=fc_ker_b,
        fc_vis_w=fc_vis_w, fc_vis_b=fc_vis_b,
        ker_norm_g=kng, ker_norm_b=knb,
        vis_norm_g=vng, vis_norm_b=vnb,
        channel_fc_w=cw, channel_fc_b=cb,
        channel_norm_g=cng, channel_norm_b=cnb,
        spatial_fc_w=sw, spatial_fc_b=sb,
        spatial_norm_g=sng, spatial_norm_b=snb,
        out_fc_w=ow, out_fc_b=ob,
        out_norm_g=ong, out_norm_b=onb,
    )


def prepare_params(p, f_dim, feat_dim):
    """One-time weight packing: transpose torch (N_out, N_in) -> (K, N), cast
    matmul weights to bf16, reshape biases / LN params to (1, N) f32, and
    concatenate the fused weight blocks (K||V, Q||K, channel||spatial)."""
    del f_dim, feat_dim

    def w_t(w):
        return jnp.asarray(w, jnp.float32).T.astype(jnp.bfloat16)

    def row(b):
        return jnp.asarray(b, jnp.float32).reshape(1, -1)

    a = p["lang_tf_enc"]["attn"]
    lang_tf = dict(
        wq=w_t(a["wq"]), bq=row(a["bq"]),
        wkv=jnp.concatenate([w_t(a["wk"]), w_t(a["wv"])], axis=1),
        bkv=jnp.concatenate([row(a["bk"]), row(a["bv"])], axis=1),
        wo=w_t(a["wo"]), bo=row(a["bo"]),
        ng=row(p["lang_tf_enc"]["norm_g"]), nb=row(p["lang_tf_enc"]["norm_b"]),
        wker=w_t(p["fc_ker_w"]), bker=row(p["fc_ker_b"]),
    )

    enc_layers = []
    for lp in p["enc_layers"]:
        a = lp["attn"]
        enc_layers.append(dict(
            wqk=jnp.concatenate([w_t(a["wq"]), w_t(a["wk"])], axis=1),
            bqk=jnp.concatenate([row(a["bq"]), row(a["bk"])], axis=1),
            wv=w_t(a["wv"]), bv=row(a["bv"]),
            wo=w_t(a["wo"]), bo=row(a["bo"]),
            n1g=row(lp["norm1_g"]), n1b=row(lp["norm1_b"]),
            w1=w_t(lp["lin1_w"]), b1=row(lp["lin1_b"]),
            w2=w_t(lp["lin2_w"]), b2=row(lp["lin2_b"]),
            n2g=row(lp["norm2_g"]), n2b=row(lp["norm2_b"]),
        ))

    final = dict(ng=row(p["enc_norm_g"]), nb=row(p["enc_norm_b"]),
                 wvis=w_t(p["fc_vis_w"]), bvis=row(p["fc_vis_b"]))

    gate = dict(
        ker_g=row(p["ker_norm_g"]), ker_b=row(p["ker_norm_b"]),
        vis_g=row(p["vis_norm_g"]), vis_b=row(p["vis_norm_b"]),
        w_cs=jnp.concatenate([w_t(p["channel_fc_w"]), w_t(p["spatial_fc_w"])], axis=1),
        b_cs=jnp.concatenate([row(p["channel_fc_b"]), row(p["spatial_fc_b"])], axis=1),
        ch_g=row(p["channel_norm_g"]), ch_b=row(p["channel_norm_b"]),
        sp_g=row(p["spatial_norm_g"]), sp_b=row(p["spatial_norm_b"]),
        w_out=w_t(p["out_fc_w"]), b_out=row(p["out_fc_b"]),
        on_g=row(p["out_norm_g"]), on_b=row(p["out_norm_b"]),
    )
    return dict(lang_tf_enc=lang_tf, enc_layers=enc_layers, final=final, gate=gate)


# --------------------------------------------------------------------------
if __name__ == "__main__":
    f_dim, feat_dim = 32, 32
    bs, nq, ll, hw = 2, 4, 8, 16   # hw = 4x4 spatial grid

    key = jax.random.PRNGKey(0)
    kp, k1, k2, k3 = jax.random.split(key, 4)
    params = init_params(kp, f_dim, feat_dim)
    pp = prepare_params(params, f_dim, feat_dim)     # one-time bf16 (K,N) packing
    pos = position_embedding_sine(hw, f_dim)         # constant, computed once

    kernel = jax.random.normal(k1, (bs, nq, f_dim), jnp.float32)
    lang_feat = jax.random.normal(k2, (bs, ll, f_dim), jnp.float32)
    visu_feat = jax.random.normal(k3, (bs, f_dim, hw), jnp.float32)

    fwd = jax.jit(functools.partial(klm_forward, f_dim=f_dim, feat_dim=feat_dim))
    gate_feat, visu_out = fwd(pp, kernel, lang_feat, visu_feat, pos)
    jax.block_until_ready((gate_feat, visu_out))

    assert gate_feat.shape == (bs, nq, f_dim)
    assert visu_out.shape == (bs, f_dim, hw)
    assert bool(jnp.all(jnp.isfinite(gate_feat))) and bool(jnp.all(gate_feat >= 0.0))
    assert bool(jnp.all(jnp.isfinite(visu_out)))
    print("KERNEL_OK")
</pallas_src>

<mosaic_0001>
module attributes {stable_mosaic.version = 11 : i64} {
  func.func @_lang_tf_enc_kernel(%arg0: i32, %arg1: memref<1x4x32xf32, #tpu.memory_space<vmem>>, %arg2: memref<1x8x32xf32, #tpu.memory_space<vmem>>, %arg3: memref<32x32xbf16, #tpu.memory_space<vmem>>, %arg4: memref<1x32xf32, #tpu.memory_space<vmem>>, %arg5: memref<32x64xbf16, #tpu.memory_space<vmem>>, %arg6: memref<1x64xf32, #tpu.memory_space<vmem>>, %arg7: memref<32x32xbf16, #tpu.memory_space<vmem>>, %arg8: memref<1x32xf32, #tpu.memory_space<vmem>>, %arg9: memref<1x32xf32, #tpu.memory_space<vmem>>, %arg10: memref<1x32xf32, #tpu.memory_space<vmem>>, %arg11: memref<32x64xbf16, #tpu.memory_space<vmem>>, %arg12: memref<1x64xf32, #tpu.memory_space<vmem>>, %arg13: memref<1x4x64xf32, #tpu.memory_space<vmem>>) attributes {dimension_semantics = [#tpu.dimension_semantics<parallel>], iteration_bounds = array<i64: 2>, scalar_prefetch = 0 : i64, scratch_operands = 0 : i64, tpu.core_type = #tpu.core_type<tc>, window_params = [{transform_indices = @transform_0, window_bounds = array<i64: 1, 4, 32>}, {transform_indices = @transform_1, window_bounds = array<i64: 1, 8, 32>}, {pipeline_mode = #tpu.pipeline_mode<synchronous>, transform_indices = @transform_2, window_bounds = array<i64: 32, 32>}, {pipeline_mode = #tpu.pipeline_mode<synchronous>, transform_indices = @transform_3, window_bounds = array<i64: 1, 32>}, {pipeline_mode = #tpu.pipeline_mode<synchronous>, transform_indices = @transform_4, window_bounds = array<i64: 32, 64>}, {pipeline_mode = #tpu.pipeline_mode<synchronous>, transform_indices = @transform_5, window_bounds = array<i64: 1, 64>}, {pipeline_mode = #tpu.pipeline_mode<synchronous>, transform_indices = @transform_6, window_bounds = array<i64: 32, 32>}, {pipeline_mode = #tpu.pipeline_mode<synchronous>, transform_indices = @transform_7, window_bounds = array<i64: 1, 32>}, {pipeline_mode = #tpu.pipeline_mode<synchronous>, transform_indices = @transform_8, window_bounds = array<i64: 1, 32>}, {pipeline_mode = #tpu.pipeline_mode<synchronous>, transform_indices = @transform_9, window_bounds = array<i64: 1, 32>}, {pipeline_mode = #tpu.pipeline_mode<synchronous>, transform_indices = @transform_10, window_bounds = array<i64: 32, 64>}, {pipeline_mode = #tpu.pipeline_mode<synchronous>, transform_indices = @transform_11, window_bounds = array<i64: 1, 64>}, {transform_indices = @transform_12, window_bounds = array<i64: 1, 4, 64>}]} {
    %c0 = arith.constant 0 : index
    %c0_0 = arith.constant 0 : index
    %c0_1 = arith.constant 0 : index
    %0 = vector.load %arg1[%c0, %c0_0, %c0_1] : memref<1x4x32xf32, #tpu.memory_space<vmem>>, vector<1x4x32xf32>
    %1 = vector.shape_cast %0 : vector<1x4x32xf32> to vector<4x32xf32>
    %c0_2 = arith.constant 0 : index
    %c0_3 = arith.constant 0 : index
    %c0_4 = arith.constant 0 : index
    %2 = vector.load %arg2[%c0_2, %c0_3, %c0_4] : memref<1x8x32xf32, #tpu.memory_space<vmem>>, vector<1x8x32xf32>
    %3 = vector.shape_cast %2 : vector<1x8x32xf32> to vector<8x32xf32>
    %4 = arith.truncf %1 : vector<4x32xf32> to vector<4x32xbf16>
    %c0_5 = arith.constant 0 : index
    %c0_6 = arith.constant 0 : index
    %5 = vector.load %arg3[%c0_5, %c0_6] : memref<32x32xbf16, #tpu.memory_space<vmem>>, vector<32x32xbf16>
    %cst = arith.constant dense<0.000000e+00> : vector<4x32xf32>
    %6 = tpu.matmul %4, %5, %cst {dimension_numbers = #tpu.dot_dimension_numbers<[1], [0], [0], [1], [0, 0, 1, 1], [], []>} : vector<4x32xbf16>, vector<32x32xbf16>, vector<4x32xf32> -> vector<4x32xf32>
    %c0_7 = arith.constant 0 : index
    %c0_8 = arith.constant 0 : index
    %7 = vector.load %arg4[%c0_7, %c0_8] : memref<1x32xf32, #tpu.memory_space<vmem>>, vector<1x32xf32>
    %8 = vector.broadcast %7 : vector<1x32xf32> to vector<4x32xf32>
    %9 = arith.addf %6, %8 : vector<4x32xf32>
    %10 = arith.truncf %3 : vector<8x32xf32> to vector<8x32xbf16>
    %c0_9 = arith.constant 0 : index
    %c0_10 = arith.constant 0 : index
    %11 = vector.load %arg5[%c0_9, %c0_10] : memref<32x64xbf16, #tpu.memory_space<vmem>>, vector<32x64xbf16>
    %cst_11 = arith.constant dense<0.000000e+00> : vector<8x64xf32>
    %12 = tpu.matmul %10, %11, %cst_11 {dimension_numbers = #tpu.dot_dimension_numbers<[1], [0], [0], [1], [0, 0, 1, 1], [], []>} : vector<8x32xbf16>, vector<32x64xbf16>, vector<8x64xf32> -> vector<8x64xf32>
    %c0_12 = arith.constant 0 : index
    %c0_13 = arith.constant 0 : index
    %13 = vector.load %arg6[%c0_12, %c0_13] : memref<1x64xf32, #tpu.memory_space<vmem>>, vector<1x64xf32>
    %14 = vector.broadcast %13 : vector<1x64xf32> to vector<8x64xf32>
    %15 = arith.addf %12, %14 : vector<8x64xf32>
    %16 = vector.extract_strided_slice %15 {offsets = [0, 0], sizes = [8, 32], strides = [1, 1]} : vector<8x64xf32> to vector<8x32xf32>
    %17 = vector.extract_strided_slice %15 {offsets = [0, 32], sizes = [8, 32], strides = [1, 1]} : vector<8x64xf32> to vector<8x32xf32>
    %18 = vector.extract_strided_slice %9 {offsets = [0, 0], sizes = [4, 4], strides = [1, 1]} : vector<4x32xf32> to vector<4x4xf32>
    %19 = vector.extract_strided_slice %16 {offsets = [0, 0], sizes = [8, 4], strides = [1, 1]} : vector<8x32xf32> to vector<8x4xf32>
    %20 = vector.extract_strided_slice %17 {offsets = [0, 0], sizes = [8, 4], strides = [1, 1]} : vector<8x32xf32> to vector<8x4xf32>
    %cst_14 = arith.constant dense<0.000000e+00> : vector<4x8xf32>
    %21 = tpu.matmul %18, %19, %cst_14 {dimension_numbers = #tpu.dot_dimension_numbers<[1], [1], [0], [0], [0, 0, 1, 0], [], []>} : vector<4x4xf32>, vector<8x4xf32>, vector<4x8xf32> -> vector<4x8xf32>
    %cst_15 = arith.constant 5.000000e-01 : f32
    %22 = vector.broadcast %cst_15 : f32 to vector<4x8xf32>
    %23 = arith.mulf %21, %22 : vector<4x8xf32>
    %cst_16 = arith.constant dense<0xFF800000> : vector<4xf32>
    %24 = vector.multi_reduction <maximumf>, %23, %cst_16 [1] : vector<4x8xf32> to vector<4xf32>
    %25 = vector.shape_cast %24 : vector<4xf32> to vector<4x1xf32>
    %26 = vector.broadcast %25 : vector<4x1xf32> to vector<4x8xf32>
    %27 = arith.subf %23, %26 : vector<4x8xf32>
    %28 = math.exp %27 : vector<4x8xf32>
    %cst_17 = arith.constant dense<0.000000e+00> : vector<4xf32>
    %29 = vector.multi_reduction <add>, %28, %cst_17 [1] : vector<4x8xf32> to vector<4xf32>
    %30 = vector.shape_cast %29 : vector<4xf32> to vector<4x1xf32>
    %31 = tpu.reciprocal %30 {approx = true} : vector<4x1xf32> -> vector<4x1xf32>
    %32 = vector.broadcast %31 : vector<4x1xf32> to vector<4x8xf32>
    %33 = arith.mulf %28, %32 : vector<4x8xf32>
    %cst_18 = arith.constant dense<0.000000e+00> : vector<4x4xf32>
    %34 = tpu.matmul %33, %20, %cst_18 {dimension_numbers = #tpu.dot_dimension_numbers<[1], [0], [0], [1], [0, 0, 1, 1], [], []>} : vector<4x8xf32>, vector<8x4xf32>, vector<4x4xf32> -> vector<4x4xf32>
    %35 = vector.extract_strided_slice %9 {offsets = [0, 4], sizes = [4, 4], strides = [1, 1]} : vector<4x32xf32> to vector<4x4xf32>
    %36 = vector.extract_strided_slice %16 {offsets = [0, 4], sizes = [8, 4], strides = [1, 1]} : vector<8x32xf32> to vector<8x4xf32>
    %37 = vector.extract_strided_slice %17 {offsets = [0, 4], sizes = [8, 4], strides = [1, 1]} : vector<8x32xf32> to vector<8x4xf32>
    %cst_19 = arith.constant dense<0.000000e+00> : vector<4x8xf32>
    %38 = tpu.matmul %35, %36, %cst_19 {dimension_numbers = #tpu.dot_dimension_numbers<[1], [1], [0], [0], [0, 0, 1, 0], [], []>} : vector<4x4xf32>, vector<8x4xf32>, vector<4x8xf32> -> vector<4x8xf32>
    %cst_20 = arith.constant 5.000000e-01 : f32
    %39 = vector.broadcast %cst_20 : f32 to vector<4x8xf32>
    %40 = arith.mulf %38, %39 : vector<4x8xf32>
    %cst_21 = arith.constant dense<0xFF800000> : vector<4xf32>
    %41 = vector.multi_reduction <maximumf>, %40, %cst_21 [1] : vector<4x8xf32> to vector<4xf32>
    %42 = vector.shape_cast %41 : vector<4xf32> to vector<4x1xf32>
    %43 = vector.broadcast %42 : vector<4x1xf32> to vector<4x8xf32>
    %44 = arith.subf %40, %43 : vector<4x8xf32>
    %45 = math.exp %44 : vector<4x8xf32>
    %cst_22 = arith.constant dense<0.000000e+00> : vector<4xf32>
    %46 = vector.multi_reduction <add>, %45, %cst_22 [1] : vector<4x8xf32> to vector<4xf32>
    %47 = vector.shape_cast %46 : vector<4xf32> to vector<4x1xf32>
    %48 = tpu.reciprocal %47 {approx = true} : vector<4x1xf32> -> vector<4x1xf32>
    %49 = vector.broadcast %48 : vector<4x1xf32> to vector<4x8xf32>
    %50 = arith.mulf %45, %49 : vector<4x8xf32>
    %cst_23 = arith.constant dense<0.000000e+00> : vector<4x4xf32>
    %51 = tpu.matmul %50, %37, %cst_23 {dimension_numbers = #tpu.dot_dimension_numbers<[1], [0], [0], [1], [0, 0, 1, 1], [], []>} : vector<4x8xf32>, vector<8x4xf32>, vector<4x4xf32> -> vector<4x4xf32>
    %52 = vector.extract_strided_slice %9 {offsets = [0, 8], sizes = [4, 4], strides = [1, 1]} : vector<4x32xf32> to vector<4x4xf32>
    %53 = vector.extract_strided_slice %16 {offsets = [0, 8], sizes = [8, 4], strides = [1, 1]} : vector<8x32xf32> to vector<8x4xf32>
    %54 = vector.extract_strided_slice %17 {offsets = [0, 8], sizes = [8, 4], strides = [1, 1]} : vector<8x32xf32> to vector<8x4xf32>
    %cst_24 = arith.constant dense<0.000000e+00> : vector<4x8xf32>
    %55 = tpu.matmul %52, %53, %cst_24 {dimension_numbers = #tpu.dot_dimension_numbers<[1], [1], [0], [0], [0, 0, 1, 0], [], []>} : vector<4x4xf32>, vector<8x4xf32>, vector<4x8xf32> -> vector<4x8xf32>
    %cst_25 = arith.constant 5.000000e-01 : f32
    %56 = vector.broadcast %cst_25 : f32 to vector<4x8xf32>
    %57 = arith.mulf %55, %56 : vector<4x8xf32>
    %cst_26 = arith.constant dense<0xFF800000> : vector<4xf32>
    %58 = vector.multi_reduction <maximumf>, %57, %cst_26 [1] : vector<4x8xf32> to vector<4xf32>
    %59 = vector.shape_cast %58 : vector<4xf32> to vector<4x1xf32>
    %60 = vector.broadcast %59 : vector<4x1xf32> to vector<4x8xf32>
    %61 = arith.subf %57, %60 : vector<4x8xf32>
    %62 = math.exp %61 : vector<4x8xf32>
    %cst_27 = arith.constant dense<0.000000e+00> : vector<4xf32>
    %63 = vector.multi_reduction <add>, %62, %cst_27 [1] : vector<4x8xf32> to vector<4xf32>
    %64 = vector.shape_cast %63 : vector<4xf32> to vector<4x1xf32>
    %65 = tpu.reciprocal %64 {approx = true} : vector<4x1xf32> -> vector<4x1xf32>
    %66 = vector.broadcast %65 : vector<4x1xf32> to vector<4x8xf32>
    %67 = arith.mulf %62, %66 : vector<4x8xf32>
    %cst_28 = arith.constant dense<0.000000e+00> : vector<4x4xf32>
    %68 = tpu.matmul %67, %54, %cst_28 {dimension_numbers = #tpu.dot_dimension_numbers<[1], [0], [0], [1], [0, 0, 1, 1], [], []>} : vector<4x8xf32>, vector<8x4xf32>, vector<4x4xf32> -> vector<4x4xf32>
    %69 = vector.extract_strided_slice %9 {offsets = [0, 12], sizes = [4, 4], strides = [1, 1]} : vector<4x32xf32> to vector<4x4xf32>
    %70 = vector.extract_strided_slice %16 {offsets = [0, 12], sizes = [8, 4], strides = [1, 1]} : vector<8x32xf32> to vector<8x4xf32>
    %71 = vector.extract_strided_slice %17 {offsets = [0, 12], sizes = [8, 4], strides = [1, 1]} : vector<8x32xf32> to vector<8x4xf32>
    %cst_29 = arith.constant dense<0.000000e+00> : vector<4x8xf32>
    %72 = tpu.matmul %69, %70, %cst_29 {dimension_numbers = #tpu.dot_dimension_numbers<[1], [1], [0], [0], [0, 0, 1, 0], [], []>} : vector<4x4xf32>, vector<8x4xf32>, vector<4x8xf32> -> vector<4x8xf32>
    %cst_30 = arith.constant 5.000000e-01 : f32
    %73 = vector.broadcast %cst_30 : f32 to vector<4x8xf32>
    %74 = arith.mulf %72, %73 : vector<4x8xf32>
    %cst_31 = arith.constant dense<0xFF800000> : vector<4xf32>
    %75 = vector.multi_reduction <maximumf>, %74, %cst_31 [1] : vector<4x8xf32> to vector<4xf32>
    %76 = vector.shape_cast %75 : vector<4xf32> to vector<4x1xf32>
    %77 = vector.broadcast %76 : vector<4x1xf32> to vector<4x8xf32>
    %78 = arith.subf %74, %77 : vector<4x8xf32>
    %79 = math.exp %78 : vector<4x8xf32>
    %cst_32 = arith.constant dense<0.000000e+00> : vector<4xf32>
    %80 = vector.multi_reduction <add>, %79, %cst_32 [1] : vector<4x8xf32> to vector<4xf32>
    %81 = vector.shape_cast %80 : vector<4xf32> to vector<4x1xf32>
    %82 = tpu.reciprocal %81 {approx = true} : vector<4x1xf32> -> vector<4x1xf32>
    %83 = vector.broadcast %82 : vector<4x1xf32> to vector<4x8xf32>
    %84 = arith.mulf %79, %83 : vector<4x8xf32>
    %cst_33 = arith.constant dense<0.000000e+00> : vector<4x4xf32>
    %85 = tpu.matmul %84, %71, %cst_33 {dimension_numbers = #tpu.dot_dimension_numbers<[1], [0], [0], [1], [0, 0, 1, 1], [], []>} : vector<4x8xf32>, vector<8x4xf32>, vector<4x4xf32> -> vector<4x4xf32>
    %86 = vector.extract_strided_slice %9 {offsets = [0, 16], sizes = [4, 4], strides = [1, 1]} : vector<4x32xf32> to vector<4x4xf32>
    %87 = vector.extract_strided_slice %16 {offsets = [0, 16], sizes = [8, 4], strides = [1, 1]} : vector<8x32xf32> to vector<8x4xf32>
    %88 = vector.extract_strided_slice %17 {offsets = [0, 16], sizes = [8, 4], strides = [1, 1]} : vector<8x32xf32> to vector<8x4xf32>
    %cst_34 = arith.constant dense<0.000000e+00> : vector<4x8xf32>
    %89 = tpu.matmul %86, %87, %cst_34 {dimension_numbers = #tpu.dot_dimension_numbers<[1], [1], [0], [0], [0, 0, 1, 0], [], []>} : vector<4x4xf32>, vector<8x4xf32>, vector<4x8xf32> -> vector<4x8xf32>
    %cst_35 = arith.constant 5.000000e-01 : f32
    %90 = vector.broadcast %cst_35 : f32 to vector<4x8xf32>
    %91 = arith.mulf %89, %90 : vector<4x8xf32>
    %cst_36 = arith.constant dense<0xFF800000> : vector<4xf32>
    %92 = vector.multi_reduction <maximumf>, %91, %cst_36 [1] : vector<4x8xf32> to vector<4xf32>
    %93 = vector.shape_cast %92 : vector<4xf32> to vector<4x1xf32>
    %94 = vector.broadcast %93 : vector<4x1xf32> to vector<4x8xf32>
    %95 = arith.subf %91, %94 : vector<4x8xf32>
    %96 = math.exp %95 : vector<4x8xf32>
    %cst_37 = arith.constant dense<0.000000e+00> : vector<4xf32>
    %97 = vector.multi_reduction <add>, %96, %cst_37 [1] : vector<4x8xf32> to vector<4xf32>
    %98 = vector.shape_cast %97 : vector<4xf32> to vector<4x1xf32>
    %99 = tpu.reciprocal %98 {approx = true} : vector<4x1xf32> -> vector<4x1xf32>
    %100 = vector.broadcast %99 : vector<4x1xf32> to vector<4x8xf32>
    %101 = arith.mulf %96, %100 : vector<4x8xf32>
    %cst_38 = arith.constant dense<0.000000e+00> : vector<4x4xf32>
    %102 = tpu.matmul %101, %88, %cst_38 {dimension_numbers = #tpu.dot_dimension_numbers<[1], [0], [0], [1], [0, 0, 1, 1], [], []>} : vector<4x8xf32>, vector<8x4xf32>, vector<4x4xf32> -> vector<4x4xf32>
    %103 = vector.extract_strided_slice %9 {offsets = [0, 20], sizes = [4, 4], strides = [1, 1]} : vector<4x32xf32> to vector<4x4xf32>
    %104 = vector.extract_strided_slice %16 {offsets = [0, 20], sizes = [8, 4], strides = [1, 1]} : vector<8x32xf32> to vector<8x4xf32>
    %105 = vector.extract_strided_slice %17 {offsets = [0, 20], sizes = [8, 4], strides = [1, 1]} : vector<8x32xf32> to vector<8x4xf32>
    %cst_39 = arith.constant dense<0.000000e+00> : vector<4x8xf32>
    %106 = tpu.matmul %103, %104, %cst_39 {dimension_numbers = #tpu.dot_dimension_numbers<[1], [1], [0], [0], [0, 0, 1, 0], [], []>} : vector<4x4xf32>, vector<8x4xf32>, vector<4x8xf32> -> vector<4x8xf32>
    %cst_40 = arith.constant 5.000000e-01 : f32
    %107 = vector.broadcast %cst_40 : f32 to vector<4x8xf32>
    %108 = arith.mulf %106, %107 : vector<4x8xf32>
    %cst_41 = arith.constant dense<0xFF800000> : vector<4xf32>
    %109 = vector.multi_reduction <maximumf>, %108, %cst_41 [1] : vector<4x8xf32> to vector<4xf32>
    %110 = vector.shape_cast %109 : vector<4xf32> to vector<4x1xf32>
    %111 = vector.broadcast %110 : vector<4x1xf32> to vector<4x8xf32>
    %112 = arith.subf %108, %111 : vector<4x8xf32>
    %113 = math.exp %112 : vector<4x8xf32>
    %cst_42 = arith.constant dense<0.000000e+00> : vector<4xf32>
    %114 = vector.multi_reduction <add>, %113, %cst_42 [1] : vector<4x8xf32> to vector<4xf32>
    %115 = vector.shape_cast %114 : vector<4xf32> to vector<4x1xf32>
    %116 = tpu.reciprocal %115 {approx = true} : vector<4x1xf32> -> vector<4x1xf32>
    %117 = vector.broadcast %116 : vector<4x1xf32> to vector<4x8xf32>
    %118 = arith.mulf %113, %117 : vector<4x8xf32>
    %cst_43 = arith.constant dense<0.000000e+00> : vector<4x4xf32>
    %119 = tpu.matmul %118, %105, %cst_43 {dimension_numbers = #tpu.dot_dimension_numbers<[1], [0], [0], [1], [0, 0, 1, 1], [], []>} : vector<4x8xf32>, vector<8x4xf32>, vector<4x4xf32> -> vector<4x4xf32>
    %120 = vector.extract_strided_slice %9 {offsets = [0, 24], sizes = [4, 4], strides = [1, 1]} : vector<4x32xf32> to vector<4x4xf32>
    %121 = vector.extract_strided_slice %16 {offsets = [0, 24], sizes = [8, 4], strides = [1, 1]} : vector<8x32xf32> to vector<8x4xf32>
    %122 = vector.extract_strided_slice %17 {offsets = [0, 24], sizes = [8, 4], strides = [1, 1]} : vector<8x32xf32> to vector<8x4xf32>
    %cst_44 = arith.constant dense<0.000000e+00> : vector<4x8xf32>
    %123 = tpu.matmul %120, %121, %cst_44 {dimension_numbers = #tpu.dot_dimension_numbers<[1], [1], [0], [0], [0, 0, 1, 0], [], []>} : vector<4x4xf32>, vector<8x4xf32>, vector<4x8xf32> -> vector<4x8xf32>
    %cst_45 = arith.constant 5.000000e-01 : f32
    %124 = vector.broadcast %cst_45 : f32 to vector<4x8xf32>
    %125 = arith.mulf %123, %124 : vector<4x8xf32>
    %cst_46 = arith.constant dense<0xFF800000> : vector<4xf32>
    %126 = vector.multi_reduction <maximumf>, %125, %cst_46 [1] : vector<4x8xf32> to vector<4xf32>
    %127 = vector.shape_cast %126 : vector<4xf32> to vector<4x1xf32>
    %128 = vector.broadcast %127 : vector<4x1xf32> to vector<4x8xf32>
    %129 = arith.subf %125, %128 : vector<4x8xf32>
    %130 = math.exp %129 : vector<4x8xf32>
    %cst_47 = arith.constant dense<0.000000e+00> : vector<4xf32>
    %131 = vector.multi_reduction <add>, %130, %cst_47 [1] : vector<4x8xf32> to vector<4xf32>
    %132 = vector.shape_cast %131 : vector<4xf32> to vector<4x1xf32>
    %133 = tpu.reciprocal %132 {approx = true} : vector<4x1xf32> -> vector<4x1xf32>
    %134 = vector.broadcast %133 : vector<4x1xf32> to vector<4x8xf32>
    %135 = arith.mulf %130, %134 : vector<4x8xf32>
    %cst_48 = arith.constant dense<0.000000e+00> : vector<4x4xf32>
    %136 = tpu.matmul %135, %122, %cst_48 {dimension_numbers = #tpu.dot_dimension_numbers<[1], [0], [0], [1], [0, 0, 1, 1], [], []>} : vector<4x8xf32>, vector<8x4xf32>, vector<4x4xf32> -> vector<4x4xf32>
    %137 = vector.extract_strided_slice %9 {offsets = [0, 28], sizes = [4, 4], strides = [1, 1]} : vector<4x32xf32> to vector<4x4xf32>
    %138 = vector.extract_strided_slice %16 {offsets = [0, 28], sizes = [8, 4], strides = [1, 1]} : vector<8x32xf32> to vector<8x4xf32>
    %139 = vector.extract_strided_slice %17 {offsets = [0, 28], sizes = [8, 4], strides = [1, 1]} : vector<8x32xf32> to vector<8x4xf32>
    %cst_49 = arith.constant dense<0.000000e+00> : vector<4x8xf32>
    %140 = tpu.matmul %137, %138, %cst_49 {dimension_numbers = #tpu.dot_dimension_numbers<[1], [1], [0], [0], [0, 0, 1, 0], [], []>} : vector<4x4xf32>, vector<8x4xf32>, vector<4x8xf32> -> vector<4x8xf32>
    %cst_50 = arith.constant 5.000000e-01 : f32
    %141 = vector.broadcast %cst_50 : f32 to vector<4x8xf32>
    %142 = arith.mulf %140, %141 : vector<4x8xf32>
    %cst_51 = arith.constant dense<0xFF800000> : vector<4xf32>
    %143 = vector.multi_reduction <maximumf>, %142, %cst_51 [1] : vector<4x8xf32> to vector<4xf32>
    %144 = vector.shape_cast %143 : vector<4xf32> to vector<4x1xf32>
    %145 = vector.broadcast %144 : vector<4x1xf32> to vector<4x8xf32>
    %146 = arith.subf %142, %145 : vector<4x8xf32>
    %147 = math.exp %146 : vector<4x8xf32>
    %cst_52 = arith.constant dense<0.000000e+00> : vector<4xf32>
    %148 = vector.multi_reduction <add>, %147, %cst_52 [1] : vector<4x8xf32> to vector<4xf32>
    %149 = vector.shape_cast %148 : vector<4xf32> to vector<4x1xf32>
    %150 = tpu.reciprocal %149 {approx = true} : vector<4x1xf32> -> vector<4x1xf32>
    %151 = vector.broadcast %150 : vector<4x1xf32> to vector<4x8xf32>
    %152 = arith.mulf %147, %151 : vector<4x8xf32>
    %cst_53 = arith.constant dense<0.000000e+00> : vector<4x4xf32>
    %153 = tpu.matmul %152, %139, %cst_53 {dimension_numbers = #tpu.dot_dimension_numbers<[1], [0], [0], [1], [0, 0, 1, 1], [], []>} : vector<4x8xf32>, vector<8x4xf32>, vector<4x4xf32> -> vector<4x4xf32>
    %154 = tpu.concatenate %34, %51, %68, %85, %102, %119, %136, %153 in 1 : vector<4x4xf32>, vector<4x4xf32>, vector<4x4xf32>, vector<4x4xf32>, vector<4x4xf32>, vector<4x4xf32>, vector<4x4xf32>, vector<4x4xf32> -> vector<4x32xf32>
    %155 = arith.truncf %154 : vector<4x32xf32> to vector<4x32xbf16>
    %c0_54 = arith.constant 0 : index
    %c0_55 = arith.constant 0 : index
    %156 = vector.load %arg7[%c0_54, %c0_55] : memref<32x32xbf16, #tpu.memory_space<vmem>>, vector<32x32xbf16>
    %cst_56 = arith.constant dense<0.000000e+00> : vector<4x32xf32>
    %157 = tpu.matmul %155, %156, %cst_56 {dimension_numbers = #tpu.dot_dimension_numbers<[1], [0], [0], [1], [0, 0, 1, 1], [], []>} : vector<4x32xbf16>, vector<32x32xbf16>, vector<4x32xf32> -> vector<4x32xf32>
    %c0_57 = arith.constant 0 : index
    %c0_58 = arith.constant 0 : index
    %158 = vector.load %arg8[%c0_57, %c0_58] : memref<1x32xf32, #tpu.memory_space<vmem>>, vector<1x32xf32>
    %159 = vector.broadcast %158 : vector<1x32xf32> to vector<4x32xf32>
    %160 = arith.addf %157, %159 : vector<4x32xf32>
    %161 = arith.addf %1, %160 : vector<4x32xf32>
    %c0_59 = arith.constant 0 : index
    %c0_60 = arith.constant 0 : index
    %162 = vector.load %arg9[%c0_59, %c0_60] : memref<1x32xf32, #tpu.memory_space<vmem>>, vector<1x32xf32>
    %c0_61 = arith.constant 0 : index
    %c0_62 = arith.constant 0 : index
    %163 = vector.load %arg10[%c0_61, %c0_62] : memref<1x32xf32, #tpu.memory_space<vmem>>, vector<1x32xf32>
    %cst_63 = arith.constant dense<0.000000e+00> : vector<4xf32>
    %164 = vector.multi_reduction <add>, %161, %cst_63 [1] : vector<4x32xf32> to vector<4xf32>
    %165 = vector.shape_cast %164 : vector<4xf32> to vector<4x1xf32>
    %cst_64 = arith.constant 3.200000e+01 : f32
    %166 = vector.broadcast %cst_64 : f32 to vector<4x1xf32>
    %167 = arith.divf %165, %166 : vector<4x1xf32>
    %168 = vector.broadcast %167 : vector<4x1xf32> to vector<4x32xf32>
    %169 = arith.subf %161, %168 : vector<4x32xf32>
    %170 = arith.mulf %169, %169 : vector<4x32xf32>
    %cst_65 = arith.constant dense<0.000000e+00> : vector<4xf32>
    %171 = vector.multi_reduction <add>, %170, %cst_65 [1] : vector<4x32xf32> to vector<4xf32>
    %172 = vector.shape_cast %171 : vector<4xf32> to vector<4x1xf32>
    %cst_66 = arith.constant 3.200000e+01 : f32
    %173 = vector.broadcast %cst_66 : f32 to vector<4x1xf32>
    %174 = arith.divf %172, %173 : vector<4x1xf32>
    %cst_67 = arith.constant 9.99999974E-6 : f32
    %175 = vector.broadcast %cst_67 : f32 to vector<4x1xf32>
    %176 = arith.addf %174, %175 : vector<4x1xf32>
    %177 = math.rsqrt %176 : vector<4x1xf32>
    %178 = vector.broadcast %177 : vector<4x1xf32> to vector<4x32xf32>
    %179 = arith.mulf %169, %178 : vector<4x32xf32>
    %180 = vector.broadcast %162 : vector<1x32xf32> to vector<4x32xf32>
    %181 = arith.mulf %179, %180 : vector<4x32xf32>
    %182 = vector.broadcast %163 : vector<1x32xf32> to vector<4x32xf32>
    %183 = arith.addf %181, %182 : vector<4x32xf32>
    %184 = arith.truncf %183 : vector<4x32xf32> to vector<4x32xbf16>
    %c0_68 = arith.constant 0 : index
    %c0_69 = arith.constant 0 : index
    %185 = vector.load %arg11[%c0_68, %c0_69] : memref<32x64xbf16, #tpu.memory_space<vmem>>, vector<32x64xbf16>
    %cst_70 = arith.constant dense<0.000000e+00> : vector<4x64xf32>
    %186 = tpu.matmul %184, %185, %cst_70 {dimension_numbers = #tpu.dot_dimension_numbers<[1], [0], [0], [1], [0, 0, 1, 1], [], []>} : vector<4x32xbf16>, vector<32x64xbf16>, vector<4x64xf32> -> vector<4x64xf32>
    %c0_71 = arith.constant 0 : index
    %c0_72 = arith.constant 0 : index
    %187 = vector.load %arg12[%c0_71, %c0_72] : memref<1x64xf32, #tpu.memory_space<vmem>>, vector<1x64xf32>
    %188 = vector.broadcast %187 : vector<1x64xf32> to vector<4x64xf32>
    %189 = arith.addf %186, %188 : vector<4x64xf32>
    %c0_73 = arith.constant 0 : index
    %c0_74 = arith.constant 0 : index
    %c0_75 = arith.constant 0 : index
    %190 = vector.load %arg13[%c0_73, %c0_74, %c0_75] : memref<1x4x64xf32, #tpu.memory_space<vmem>>, vector<1x4x64xf32>
    %191 = vector.shape_cast %190 : vector<1x4x64xf32> to vector<4x64xf32>
    %192 = vector.shape_cast %189 : vector<4x64xf32> to vector<1x4x64xf32>
    tpu.vector_store %arg13[%c0_73, %c0_74, %c0_75], %192 {strides = array<i32>} : memref<1x4x64xf32, #tpu.memory_space<vmem>>, vector<1x4x64xf32>,
    return
  }
  func.func @transform_0(%arg0: i32) -> (i32, i32, i32) {
    %c0_i32 = arith.constant 0 : i32
    %c0_i32_0 = arith.constant 0 : i32
    %c0_i32_1 = arith.constant 0 : i32
    return %arg0, %c0_i32, %c0_i32_0 : i32, i32, i32
  }
  func.func @transform_1(%arg0: i32) -> (i32, i32, i32) {
    %c0_i32 = arith.constant 0 : i32
    %c0_i32_0 = arith.constant 0 : i32
    %c0_i32_1 = arith.constant 0 : i32
    return %arg0, %c0_i32, %c0_i32_0 : i32, i32, i32
  }
  func.func @transform_2(%arg0: i32) -> (i32, i32) {
    %c0_i32 = arith.constant 0 : i32
    %c0_i32_0 = arith.constant 0 : i32
    %c0_i32_1 = arith.constant 0 : i32
    return %c0_i32, %c0_i32_0 : i32, i32
  }
  func.func @transform_3(%arg0: i32) -> (i32, i32) {
    %c0_i32 = arith.constant 0 : i32
    %c0_i32_0 = arith.constant 0 : i32
    %c0_i32_1 = arith.constant 0 : i32
    return %c0_i32, %c0_i32_0 : i32, i32
  }
  func.func @transform_4(%arg0: i32) -> (i32, i32) {
    %c0_i32 = arith.constant 0 : i32
    %c0_i32_0 = arith.constant 0 : i32
    %c0_i32_1 = arith.constant 0 : i32
    return %c0_i32, %c0_i32_0 : i32, i32
  }
  func.func @transform_5(%arg0: i32) -> (i32, i32) {
    %c0_i32 = arith.constant 0 : i32
    %c0_i32_0 = arith.constant 0 : i32
    %c0_i32_1 = arith.constant 0 : i32
    return %c0_i32, %c0_i32_0 : i32, i32
  }
  func.func @transform_6(%arg0: i32) -> (i32, i32) {
    %c0_i32 = arith.constant 0 : i32
    %c0_i32_0 = arith.constant 0 : i32
    %c0_i32_1 = arith.constant 0 : i32
    return %c0_i32, %c0_i32_0 : i32, i32
  }
  func.func @transform_7(%arg0: i32) -> (i32, i32) {
    %c0_i32 = arith.constant 0 : i32
    %c0_i32_0 = arith.constant 0 : i32
    %c0_i32_1 = arith.constant 0 : i32
    return %c0_i32, %c0_i32_0 : i32, i32
  }
  func.func @transform_8(%arg0: i32) -> (i32, i32) {
    %c0_i32 = arith.constant 0 : i32
    %c0_i32_0 = arith.constant 0 : i32
    %c0_i32_1 = arith.constant 0 : i32
    return %c0_i32, %c0_i32_0 : i32, i32
  }
  func.func @transform_9(%arg0: i32) -> (i32, i32) {
    %c0_i32 = arith.constant 0 : i32
    %c0_i32_0 = arith.constant 0 : i32
    %c0_i32_1 = arith.constant 0 : i32
    return %c0_i32, %c0_i32_0 : i32, i32
  }
  func.func @transform_10(%arg0: i32) -> (i32, i32) {
    %c0_i32 = arith.constant 0 : i32
    %c0_i32_0 = arith.constant 0 : i32
    %c0_i32_1 = arith.constant 0 : i32
    return %c0_i32, %c0_i32_0 : i32, i32
  }
  func.func @transform_11(%arg0: i32) -> (i32, i32) {
    %c0_i32 = arith.constant 0 : i32
    %c0_i32_0 = arith.constant 0 : i32
    %c0_i32_1 = arith.constant 0 : i32
    return %c0_i32, %c0_i32_0 : i32, i32
  }
  func.func @transform_12(%arg0: i32) -> (i32, i32, i32) {
    %c0_i32 = arith.constant 0 : i32
    %c0_i32_0 = arith.constant 0 : i32
    %c0_i32_1 = arith.constant 0 : i32
    return %arg0, %c0_i32, %c0_i32_0 : i32, i32, i32
  }
}

module attributes {stable_mosaic.version = 11 : i64} {
  func.func @_encoder_layer_kernel(%arg0: i32, %arg1: memref<1x16x32xf32, #tpu.memory_space<vmem>>, %arg2: memref<1x16x32xf32, #tpu.memory_space<vmem>>, %arg3: memref<32x64xbf16, #tpu.memory_space<vmem>>, %arg4: memref<1x64xf32, #tpu.memory_space<vmem>>, %arg5: memref<32x32xbf16, #tpu.memory_space<vmem>>, %arg6: memref<1x32xf32, #tpu.memory_space<vmem>>, %arg7: memref<32x32xbf16, #tpu.memory_space<vmem>>, %arg8: memref<1x32xf32, #tpu.memory_space<vmem>>, %arg9: memref<1x32xf32, #tpu.memory_space<vmem>>, %arg10: memref<1x32xf32, #tpu.memory_space<vmem>>, %arg11: memref<32x32xbf16, #tpu.memory_space<vmem>>, %arg12: memref<1x32xf32, #tpu.memory_space<vmem>>, %arg13: memref<32x32xbf16, #tpu.memory_space<vmem>>, %arg14: memref<1x32xf32, #tpu.memory_space<vmem>>, %arg15: memref<1x32xf32, #tpu.memory_space<vmem>>, %arg16: memref<1x32xf32, #tpu.memory_space<vmem>>, %arg17: memref<1x16x32xf32, #tpu.memory_space<vmem>>) attributes {dimension_semantics = [#tpu.dimension_semantics<parallel>], iteration_bounds = array<i64: 2>, scalar_prefetch = 0 : i64, scratch_operands = 0 : i64, tpu.core_type = #tpu.core_type<tc>, window_params = [{transform_indices = @transform_0, window_bounds = array<i64: 1, 16, 32>}, {pipeline_mode = #tpu.pipeline_mode<synchronous>, transform_indices = @transform_1, window_bounds = array<i64: 1, 16, 32>}, {pipeline_mode = #tpu.pipeline_mode<synchronous>, transform_indices = @transform_2, window_bounds = array<i64: 32, 64>}, {pipeline_mode = #tpu.pipeline_mode<synchronous>, transform_indices = @transform_3, window_bounds = array<i64: 1, 64>}, {pipeline_mode = #tpu.pipeline_mode<synchronous>, transform_indices = @transform_4, window_bounds = array<i64: 32, 32>}, {pipeline_mode = #tpu.pipeline_mode<synchronous>, transform_indices = @transform_5, window_bounds = array<i64: 1, 32>}, {pipeline_mode = #tpu.pipeline_mode<synchronous>, transform_indices = @transform_6, window_bounds = array<i64: 32, 32>}, {pipeline_mode = #tpu.pipeline_mode<synchronous>, transform_indices = @transform_7, window_bounds = array<i64: 1, 32>}, {pipeline_mode = #tpu.pipeline_mode<synchronous>, transform_indices = @transform_8, window_bounds = array<i64: 1, 32>}, {pipeline_mode = #tpu.pipeline_mode<synchronous>, transform_indices = @transform_9, window_bounds = array<i64: 1, 32>}, {pipeline_mode = #tpu.pipeline_mode<synchronous>, transform_indices = @transform_10, window_bounds = array<i64: 32, 32>}, {pipeline_mode = #tpu.pipeline_mode<synchronous>, transform_indices = @transform_11, window_bounds = array<i64: 1, 32>}, {pipeline_mode = #tpu.pipeline_mode<synchronous>, transform_indices = @transform_12, window_bounds = array<i64: 32, 32>}, {pipeline_mode = #tpu.pipeline_mode<synchronous>, transform_indices = @transform_13, window_bounds = array<i64: 1, 32>}, {pipeline_mode = #tpu.pipeline_mode<synchronous>, transform_indices = @transform_14, window_bounds = array<i64: 1, 32>}, {pipeline_mode = #tpu.pipeline_mode<synchronous>, transform_indices = @transform_15, window_bounds = array<i64: 1, 32>}, {transform_indices = @transform_16, window_bounds = array<i64: 1, 16, 32>}]} {
    %c0 = arith.constant 0 : index
    %c0_0 = arith.constant 0 : index
    %c0_1 = arith.constant 0 : index
    %0 = vector.load %arg1[%c0, %c0_0, %c0_1] : memref<1x16x32xf32, #tpu.memory_space<vmem>>, vector<1x16x32xf32>
    %1 = vector.shape_cast %0 : vector<1x16x32xf32> to vector<16x32xf32>
    %c0_2 = arith.constant 0 : index
    %c0_3 = arith.constant 0 : index
    %c0_4 = arith.constant 0 : index
    %2 = vector.load %arg2[%c0_2, %c0_3, %c0_4] : memref<1x16x32xf32, #tpu.memory_space<vmem>>, vector<1x16x32xf32>
    %3 = vector.shape_cast %2 : vector<1x16x32xf32> to vector<16x32xf32>
    %4 = arith.addf %1, %3 : vector<16x32xf32>
    %5 = arith.truncf %4 : vector<16x32xf32> to vector<16x32xbf16>
    %c0_5 = arith.constant 0 : index
    %c0_6 = arith.constant 0 : index
    %6 = vector.load %arg3[%c0_5, %c0_6] : memref<32x64xbf16, #tpu.memory_space<vmem>>, vector<32x64xbf16>
    %cst = arith.constant dense<0.000000e+00> : vector<16x64xf32>
    %7 = tpu.matmul %5, %6, %cst {dimension_numbers = #tpu.dot_dimension_numbers<[1], [0], [0], [1], [0, 0, 1, 1], [], []>} : vector<16x32xbf16>, vector<32x64xbf16>, vector<16x64xf32> -> vector<16x64xf32>
    %c0_7 = arith.constant 0 : index
    %c0_8 = arith.constant 0 : index
    %8 = vector.load %arg4[%c0_7, %c0_8] : memref<1x64xf32, #tpu.memory_space<vmem>>, vector<1x64xf32>
    %9 = vector.broadcast %8 : vector<1x64xf32> to vector<16x64xf32>
    %10 = arith.addf %7, %9 : vector<16x64xf32>
    %11 = vector.extract_strided_slice %10 {offsets = [0, 0], sizes = [16, 32], strides = [1, 1]} : vector<16x64xf32> to vector<16x32xf32>
    %12 = vector.extract_strided_slice %10 {offsets = [0, 32], sizes = [16, 32], strides = [1, 1]} : vector<16x64xf32> to vector<16x32xf32>
    %13 = arith.truncf %1 : vector<16x32xf32> to vector<16x32xbf16>
    %c0_9 = arith.constant 0 : index
    %c0_10 = arith.constant 0 : index
    %14 = vector.load %arg5[%c0_9, %c0_10] : memref<32x32xbf16, #tpu.memory_space<vmem>>, vector<32x32xbf16>
    %cst_11 = arith.constant dense<0.000000e+00> : vector<16x32xf32>
    %15 = tpu.matmul %13, %14, %cst_11 {dimension_numbers = #tpu.dot_dimension_numbers<[1], [0], [0], [1], [0, 0, 1, 1], [], []>} : vector<16x32xbf16>, vector<32x32xbf16>, vector<16x32xf32> -> vector<16x32xf32>
    %c0_12 = arith.constant 0 : index
    %c0_13 = arith.constant 0 : index
    %16 = vector.load %arg6[%c0_12, %c0_13] : memref<1x32xf32, #tpu.memory_space<vmem>>, vector<1x32xf32>
    %17 = vector.broadcast %16 : vector<1x32xf32> to vector<16x32xf32>
    %18 = arith.addf %15, %17 : vector<16x32xf32>
    %19 = vector.extract_strided_slice %11 {offsets = [0, 0], sizes = [16, 4], strides = [1, 1]} : vector<16x32xf32> to vector<16x4xf32>
    %20 = vector.extract_strided_slice %12 {offsets = [0, 0], sizes = [16, 4], strides = [1, 1]} : vector<16x32xf32> to vector<16x4xf32>
    %21 = vector.extract_strided_slice %18 {offsets = [0, 0], sizes = [16, 4], strides = [1, 1]} : vector<16x32xf32> to vector<16x4xf32>
    %cst_14 = arith.constant dense<0.000000e+00> : vector<16x16xf32>
    %22 = tpu.matmul %19, %20, %cst_14 {dimension_numbers = #tpu.dot_dimension_numbers<[1], [1], [0], [0], [0, 0, 1, 0], [], []>} : vector<16x4xf32>, vector<16x4xf32>, vector<16x16xf32> -> vector<16x16xf32>
    %cst_15 = arith.constant 5.000000e-01 : f32
    %23 = vector.broadcast %cst_15 : f32 to vector<16x16xf32>
    %24 = arith.mulf %22, %23 : vector<16x16xf32>
    %cst_16 = arith.constant dense<0xFF800000> : vector<16xf32>
    %25 = vector.multi_reduction <maximumf>, %24, %cst_16 [1] : vector<16x16xf32> to vector<16xf32>
    %26 = vector.shape_cast %25 : vector<16xf32> to vector<16x1xf32>
    %27 = vector.broadcast %26 : vector<16x1xf32> to vector<16x16xf32>
    %28 = arith.subf %24, %27 : vector<16x16xf32>
    %29 = math.exp %28 : vector<16x16xf32>
    %cst_17 = arith.constant dense<0.000000e+00> : vector<16xf32>
    %30 = vector.multi_reduction <add>, %29, %cst_17 [1] : vector<16x16xf32> to vector<16xf32>
    %31 = vector.shape_cast %30 : vector<16xf32> to vector<16x1xf32>
    %32 = tpu.reciprocal %31 {approx = true} : vector<16x1xf32> -> vector<16x1xf32>
    %33 = vector.broadcast %32 : vector<16x1xf32> to vector<16x16xf32>
    %34 = arith.mulf %29, %33 : vector<16x16xf32>
    %cst_18 = arith.constant dense<0.000000e+00> : vector<16x4xf32>
    %35 = tpu.matmul %34, %21, %cst_18 {dimension_numbers = #tpu.dot_dimension_numbers<[1], [0], [0], [1], [0, 0, 1, 1], [], []>} : vector<16x16xf32>, vector<16x4xf32>, vector<16x4xf32> -> vector<16x4xf32>
    %36 = vector.extract_strided_slice %11 {offsets = [0, 4], sizes = [16, 4], strides = [1, 1]} : vector<16x32xf32> to vector<16x4xf32>
    %37 = vector.extract_strided_slice %12 {offsets = [0, 4], sizes = [16, 4], strides = [1, 1]} : vector<16x32xf32> to vector<16x4xf32>
    %38 = vector.extract_strided_slice %18 {offsets = [0, 4], sizes = [16, 4], strides = [1, 1]} : vector<16x32xf32> to vector<16x4xf32>
    %cst_19 = arith.constant dense<0.000000e+00> : vector<16x16xf32>
    %39 = tpu.matmul %36, %37, %cst_19 {dimension_numbers = #tpu.dot_dimension_numbers<[1], [1], [0], [0], [0, 0, 1, 0], [], []>} : vector<16x4xf32>, vector<16x4xf32>, vector<16x16xf32> -> vector<16x16xf32>
    %cst_20 = arith.constant 5.000000e-01 : f32
    %40 = vector.broadcast %cst_20 : f32 to vector<16x16xf32>
    %41 = arith.mulf %39, %40 : vector<16x16xf32>
    %cst_21 = arith.constant dense<0xFF800000> : vector<16xf32>
    %42 = vector.multi_reduction <maximumf>, %41, %cst_21 [1] : vector<16x16xf32> to vector<16xf32>
    %43 = vector.shape_cast %42 : vector<16xf32> to vector<16x1xf32>
    %44 = vector.broadcast %43 : vector<16x1xf32> to vector<16x16xf32>
    %45 = arith.subf %41, %44 : vector<16x16xf32>
    %46 = math.exp %45 : vector<16x16xf32>
    %cst_22 = arith.constant dense<0.000000e+00> : vector<16xf32>
    %47 = vector.multi_reduction <add>, %46, %cst_22 [1] : vector<16x16xf32> to vector<16xf32>
    %48 = vector.shape_cast %47 : vector<16xf32> to vector<16x1xf32>
    %49 = tpu.reciprocal %48 {approx = true} : vector<16x1xf32> -> vector<16x1xf32>
    %50 = vector.broadcast %49 : vector<16x1xf32> to vector<16x16xf32>
    %51 = arith.mulf %46, %50 : vector<16x16xf32>
    %cst_23 = arith.constant dense<0.000000e+00> : vector<16x4xf32>
    %52 = tpu.matmul %51, %38, %cst_23 {dimension_numbers = #tpu.dot_dimension_numbers<[1], [0], [0], [1], [0, 0, 1, 1], [], []>} : vector<16x16xf32>, vector<16x4xf32>, vector<16x4xf32> -> vector<16x4xf32>
    %53 = vector.extract_strided_slice %11 {offsets = [0, 8], sizes = [16, 4], strides = [1, 1]} : vector<16x32xf32> to vector<16x4xf32>
    %54 = vector.extract_strided_slice %12 {offsets = [0, 8], sizes = [16, 4], strides = [1, 1]} : vector<16x32xf32> to vector<16x4xf32>
    %55 = vector.extract_strided_slice %18 {offsets = [0, 8], sizes = [16, 4], strides = [1, 1]} : vector<16x32xf32> to vector<16x4xf32>
    %cst_24 = arith.constant dense<0.000000e+00> : vector<16x16xf32>
    %56 = tpu.matmul %53, %54, %cst_24 {dimension_numbers = #tpu.dot_dimension_numbers<[1], [1], [0], [0], [0, 0, 1, 0], [], []>} : vector<16x4xf32>, vector<16x4xf32>, vector<16x16xf32> -> vector<16x16xf32>
    %cst_25 = arith.constant 5.000000e-01 : f32
    %57 = vector.broadcast %cst_25 : f32 to vector<16x16xf32>
    %58 = arith.mulf %56, %57 : vector<16x16xf32>
    %cst_26 = arith.constant dense<0xFF800000> : vector<16xf32>
    %59 = vector.multi_reduction <maximumf>, %58, %cst_26 [1] : vector<16x16xf32> to vector<16xf32>
    %60 = vector.shape_cast %59 : vector<16xf32> to vector<16x1xf32>
    %61 = vector.broadcast %60 : vector<16x1xf32> to vector<16x16xf32>
    %62 = arith.subf %58, %61 : vector<16x16xf32>
    %63 = math.exp %62 : vector<16x16xf32>
    %cst_27 = arith.constant dense<0.000000e+00> : vector<16xf32>
    %64 = vector.multi_reduction <add>, %63, %cst_27 [1] : vector<16x16xf32> to vector<16xf32>
    %65 = vector.shape_cast %64 : vector<16xf32> to vector<16x1xf32>
    %66 = tpu.reciprocal %65 {approx = true} : vector<16x1xf32> -> vector<16x1xf32>
    %67 = vector.broadcast %66 : vector<16x1xf32> to vector<16x16xf32>
    %68 = arith.mulf %63, %67 : vector<16x16xf32>
    %cst_28 = arith.constant dense<0.000000e+00> : vector<16x4xf32>
    %69 = tpu.matmul %68, %55, %cst_28 {dimension_numbers = #tpu.dot_dimension_numbers<[1], [0], [0], [1], [0, 0, 1, 1], [], []>} : vector<16x16xf32>, vector<16x4xf32>, vector<16x4xf32> -> vector<16x4xf32>
    %70 = vector.extract_strided_slice %11 {offsets = [0, 12], sizes = [16, 4], strides = [1, 1]} : vector<16x32xf32> to vector<16x4xf32>
    %71 = vector.extract_strided_slice %12 {offsets = [0, 12], sizes = [16, 4], strides = [1, 1]} : vector<16x32xf32> to vector<16x4xf32>
    %72 = vector.extract_strided_slice %18 {offsets = [0, 12], sizes = [16, 4], strides = [1, 1]} : vector<16x32xf32> to vector<16x4xf32>
    %cst_29 = arith.constant dense<0.000000e+00> : vector<16x16xf32>
    %73 = tpu.matmul %70, %71, %cst_29 {dimension_numbers = #tpu.dot_dimension_numbers<[1], [1], [0], [0], [0, 0, 1, 0], [], []>} : vector<16x4xf32>, vector<16x4xf32>, vector<16x16xf32> -> vector<16x16xf32>
    %cst_30 = arith.constant 5.000000e-01 : f32
    %74 = vector.broadcast %cst_30 : f32 to vector<16x16xf32>
    %75 = arith.mulf %73, %74 : vector<16x16xf32>
    %cst_31 = arith.constant dense<0xFF800000> : vector<16xf32>
    %76 = vector.multi_reduction <maximumf>, %75, %cst_31 [1] : vector<16x16xf32> to vector<16xf32>
    %77 = vector.shape_cast %76 : vector<16xf32> to vector<16x1xf32>
    %78 = vector.broadcast %77 : vector<16x1xf32> to vector<16x16xf32>
    %79 = arith.subf %75, %78 : vector<16x16xf32>
    %80 = math.exp %79 : vector<16x16xf32>
    %cst_32 = arith.constant dense<0.000000e+00> : vector<16xf32>
    %81 = vector.multi_reduction <add>, %80, %cst_32 [1] : vector<16x16xf32> to vector<16xf32>
    %82 = vector.shape_cast %81 : vector<16xf32> to vector<16x1xf32>
    %83 = tpu.reciprocal %82 {approx = true} : vector<16x1xf32> -> vector<16x1xf32>
    %84 = vector.broadcast %83 : vector<16x1xf32> to vector<16x16xf32>
    %85 = arith.mulf %80, %84 : vector<16x16xf32>
    %cst_33 = arith.constant dense<0.000000e+00> : vector<16x4xf32>
    %86 = tpu.matmul %85, %72, %cst_33 {dimension_numbers = #tpu.dot_dimension_numbers<[1], [0], [0], [1], [0, 0, 1, 1], [], []>} : vector<16x16xf32>, vector<16x4xf32>, vector<16x4xf32> -> vector<16x4xf32>
    %87 = vector.extract_strided_slice %11 {offsets = [0, 16], sizes = [16, 4], strides = [1, 1]} : vector<16x32xf32> to vector<16x4xf32>
    %88 = vector.extract_strided_slice %12 {offsets = [0, 16], sizes = [16, 4], strides = [1, 1]} : vector<16x32xf32> to vector<16x4xf32>
    %89 = vector.extract_strided_slice %18 {offsets = [0, 16], sizes = [16, 4], strides = [1, 1]} : vector<16x32xf32> to vector<16x4xf32>
    %cst_34 = arith.constant dense<0.000000e+00> : vector<16x16xf32>
    %90 = tpu.matmul %87, %88, %cst_34 {dimension_numbers = #tpu.dot_dimension_numbers<[1], [1], [0], [0], [0, 0, 1, 0], [], []>} : vector<16x4xf32>, vector<16x4xf32>, vector<16x16xf32> -> vector<16x16xf32>
    %cst_35 = arith.constant 5.000000e-01 : f32
    %91 = vector.broadcast %cst_35 : f32 to vector<16x16xf32>
    %92 = arith.mulf %90, %91 : vector<16x16xf32>
    %cst_36 = arith.constant dense<0xFF800000> : vector<16xf32>
    %93 = vector.multi_reduction <maximumf>, %92, %cst_36 [1] : vector<16x16xf32> to vector<16xf32>
    %94 = vector.shape_cast %93 : vector<16xf32> to vector<16x1xf32>
    %95 = vector.broadcast %94 : vector<16x1xf32> to vector<16x16xf32>
    %96 = arith.subf %92, %95 : vector<16x16xf32>
    %97 = math.exp %96 : vector<16x16xf32>
    %cst_37 = arith.constant dense<0.000000e+00> : vector<16xf32>
    %98 = vector.multi_reduction <add>, %97, %cst_37 [1] : vector<16x16xf32> to vector<16xf32>
    %99 = vector.shape_cast %98 : vector<16xf32> to vector<16x1xf32>
    %100 = tpu.reciprocal %99 {approx = true} : vector<16x1xf32> -> vector<16x1xf32>
    %101 = vector.broadcast %100 : vector<16x1xf32> to vector<16x16xf32>
    %102 = arith.mulf %97, %101 : vector<16x16xf32>
    %cst_38 = arith.constant dense<0.000000e+00> : vector<16x4xf32>
    %103 = tpu.matmul %102, %89, %cst_38 {dimension_numbers = #tpu.dot_dimension_numbers<[1], [0], [0], [1], [0, 0, 1, 1], [], []>} : vector<16x16xf32>, vector<16x4xf32>, vector<16x4xf32> -> vector<16x4xf32>
    %104 = vector.extract_strided_slice %11 {offsets = [0, 20], sizes = [16, 4], strides = [1, 1]} : vector<16x32xf32> to vector<16x4xf32>
    %105 = vector.extract_strided_slice %12 {offsets = [0, 20], sizes = [16, 4], strides = [1, 1]} : vector<16x32xf32> to vector<16x4xf32>
    %106 = vector.extract_strided_slice %18 {offsets = [0, 20], sizes = [16, 4], strides = [1, 1]} : vector<16x32xf32> to vector<16x4xf32>
    %cst_39 = arith.constant dense<0.000000e+00> : vector<16x16xf32>
    %107 = tpu.matmul %104, %105, %cst_39 {dimension_numbers = #tpu.dot_dimension_numbers<[1], [1], [0], [0], [0, 0, 1, 0], [], []>} : vector<16x4xf32>, vector<16x4xf32>, vector<16x16xf32> -> vector<16x16xf32>
    %cst_40 = arith.constant 5.000000e-01 : f32
    %108 = vector.broadcast %cst_40 : f32 to vector<16x16xf32>
    %109 = arith.mulf %107, %108 : vector<16x16xf32>
    %cst_41 = arith.constant dense<0xFF800000> : vector<16xf32>
    %110 = vector.multi_reduction <maximumf>, %109, %cst_41 [1] : vector<16x16xf32> to vector<16xf32>
    %111 = vector.shape_cast %110 : vector<16xf32> to vector<16x1xf32>
    %112 = vector.broadcast %111 : vector<16x1xf32> to vector<16x16xf32>
    %113 = arith.subf %109, %112 : vector<16x16xf32>
    %114 = math.exp %113 : vector<16x16xf32>
    %cst_42 = arith.constant dense<0.000000e+00> : vector<16xf32>
    %115 = vector.multi_reduction <add>, %114, %cst_42 [1] : vector<16x16xf32> to vector<16xf32>
    %116 = vector.shape_cast %115 : vector<16xf32> to vector<16x1xf32>
    %117 = tpu.reciprocal %116 {approx = true} : vector<16x1xf32> -> vector<16x1xf32>
    %118 = vector.broadcast %117 : vector<16x1xf32> to vector<16x16xf32>
    %119 = arith.mulf %114, %118 : vector<16x16xf32>
    %cst_43 = arith.constant dense<0.000000e+00> : vector<16x4xf32>
    %120 = tpu.matmul %119, %106, %cst_43 {dimension_numbers = #tpu.dot_dimension_numbers<[1], [0], [0], [1], [0, 0, 1, 1], [], []>} : vector<16x16xf32>, vector<16x4xf32>, vector<16x4xf32> -> vector<16x4xf32>
    %121 = vector.extract_strided_slice %11 {offsets = [0, 24], sizes = [16, 4], strides = [1, 1]} : vector<16x32xf32> to vector<16x4xf32>
    %122 = vector.extract_strided_slice %12 {offsets = [0, 24], sizes = [16, 4], strides = [1, 1]} : vector<16x32xf32> to vector<16x4xf32>
    %123 = vector.extract_strided_slice %18 {offsets = [0, 24], sizes = [16, 4], strides = [1, 1]} : vector<16x32xf32> to vector<16x4xf32>
    %cst_44 = arith.constant dense<0.000000e+00> : vector<16x16xf32>
    %124 = tpu.matmul %121, %122, %cst_44 {dimension_numbers = #tpu.dot_dimension_numbers<[1], [1], [0], [0], [0, 0, 1, 0], [], []>} : vector<16x4xf32>, vector<16x4xf32>, vector<16x16xf32> -> vector<16x16xf32>
    %cst_45 = arith.constant 5.000000e-01 : f32
    %125 = vector.broadcast %cst_45 : f32 to vector<16x16xf32>
    %126 = arith.mulf %124, %125 : vector<16x16xf32>
    %cst_46 = arith.constant dense<0xFF800000> : vector<16xf32>
    %127 = vector.multi_reduction <maximumf>, %126, %cst_46 [1] : vector<16x16xf32> to vector<16xf32>
    %128 = vector.shape_cast %127 : vector<16xf32> to vector<16x1xf32>
    %129 = vector.broadcast %128 : vector<16x1xf32> to vector<16x16xf32>
    %130 = arith.subf %126, %129 : vector<16x16xf32>
    %131 = math.exp %130 : vector<16x16xf32>
    %cst_47 = arith.constant dense<0.000000e+00> : vector<16xf32>
    %132 = vector.multi_reduction <add>, %131, %cst_47 [1] : vector<16x16xf32> to vector<16xf32>
    %133 = vector.shape_cast %132 : vector<16xf32> to vector<16x1xf32>
    %134 = tpu.reciprocal %133 {approx = true} : vector<16x1xf32> -> vector<16x1xf32>
    %135 = vector.broadcast %134 : vector<16x1xf32> to vector<16x16xf32>
    %136 = arith.mulf %131, %135 : vector<16x16xf32>
    %cst_48 = arith.constant dense<0.000000e+00> : vector<16x4xf32>
    %137 = tpu.matmul %136, %123, %cst_48 {dimension_numbers = #tpu.dot_dimension_numbers<[1], [0], [0], [1], [0, 0, 1, 1], [], []>} : vector<16x16xf32>, vector<16x4xf32>, vector<16x4xf32> -> vector<16x4xf32>
    %138 = vector.extract_strided_slice %11 {offsets = [0, 28], sizes = [16, 4], strides = [1, 1]} : vector<16x32xf32> to vector<16x4xf32>
    %139 = vector.extract_strided_slice %12 {offsets = [0, 28], sizes = [16, 4], strides = [1, 1]} : vector<16x32xf32> to vector<16x4xf32>
    %140 = vector.extract_strided_slice %18 {offsets = [0, 28], sizes = [16, 4], strides = [1, 1]} : vector<16x32xf32> to vector<16x4xf32>
    %cst_49 = arith.constant dense<0.000000e+00> : vector<16x16xf32>
    %141 = tpu.matmul %138, %139, %cst_49 {dimension_numbers = #tpu.dot_dimension_numbers<[1], [1], [0], [0], [0, 0, 1, 0], [], []>} : vector<16x4xf32>, vector<16x4xf32>, vector<16x16xf32> -> vector<16x16xf32>
    %cst_50 = arith.constant 5.000000e-01 : f32
    %142 = vector.broadcast %cst_50 : f32 to vector<16x16xf32>
    %143 = arith.mulf %141, %142 : vector<16x16xf32>
    %cst_51 = arith.constant dense<0xFF800000> : vector<16xf32>
    %144 = vector.multi_reduction <maximumf>, %143, %cst_51 [1] : vector<16x16xf32> to vector<16xf32>
    %145 = vector.shape_cast %144 : vector<16xf32> to vector<16x1xf32>
    %146 = vector.broadcast %145 : vector<16x1xf32> to vector<16x16xf32>
    %147 = arith.subf %143, %146 : vector<16x16xf32>
    %148 = math.exp %147 : vector<16x16xf32>
    %cst_52 = arith.constant dense<0.000000e+00> : vector<16xf32>
    %149 = vector.multi_reduction <add>, %148, %cst_52 [1] : vector<16x16xf32> to vector<16xf32>
    %150 = vector.shape_cast %149 : vector<16xf32> to vector<16x1xf32>
    %151 = tpu.reciprocal %150 {approx = true} : vector<16x1xf32> -> vector<16x1xf32>
    %152 = vector.broadcast %151 : vector<16x1xf32> to vector<16x16xf32>
    %153 = arith.mulf %148, %152 : vector<16x16xf32>
    %cst_53 = arith.constant dense<0.000000e+00> : vector<16x4xf32>
    %154 = tpu.matmul %153, %140, %cst_53 {dimension_numbers = #tpu.dot_dimension_numbers<[1], [0], [0], [1], [0, 0, 1, 1], [], []>} : vector<16x16xf32>, vector<16x4xf32>, vector<16x4xf32> -> vector<16x4xf32>
    %155 = tpu.concatenate %35, %52, %69, %86, %103, %120, %137, %154 in 1 : vector<16x4xf32>, vector<16x4xf32>, vector<16x4xf32>, vector<16x4xf32>, vector<16x4xf32>, vector<16x4xf32>, vector<16x4xf32>, vector<16x4xf32> -> vector<16x32xf32>
    %156 = arith.truncf %155 : vector<16x32xf32> to vector<16x32xbf16>
    %c0_54 = arith.constant 0 : index
    %c0_55 = arith.constant 0 : index
    %157 = vector.load %arg7[%c0_54, %c0_55] : memref<32x32xbf16, #tpu.memory_space<vmem>>, vector<32x32xbf16>
    %cst_56 = arith.constant dense<0.000000e+00> : vector<16x32xf32>
    %158 = tpu.matmul %156, %157, %cst_56 {dimension_numbers = #tpu.dot_dimension_numbers<[1], [0], [0], [1], [0, 0, 1, 1], [], []>} : vector<16x32xbf16>, vector<32x32xbf16>, vector<16x32xf32> -> vector<16x32xf32>
    %c0_57 = arith.constant 0 : index
    %c0_58 = arith.constant 0 : index
    %159 = vector.load %arg8[%c0_57, %c0_58] : memref<1x32xf32, #tpu.memory_space<vmem>>, vector<1x32xf32>
    %160 = vector.broadcast %159 : vector<1x32xf32> to vector<16x32xf32>
    %161 = arith.addf %158, %160 : vector<16x32xf32>
    %162 = arith.addf %1, %161 : vector<16x32xf32>
    %c0_59 = arith.constant 0 : index
    %c0_60 = arith.constant 0 : index
    %163 = vector.load %arg9[%c0_59, %c0_60] : memref<1x32xf32, #tpu.memory_space<vmem>>, vector<1x32xf32>
    %c0_61 = arith.constant 0 : index
    %c0_62 = arith.constant 0 : index
    %164 = vector.load %arg10[%c0_61, %c0_62] : memref<1x32xf32, #tpu.memory_space<vmem>>, vector<1x32xf32>
    %cst_63 = arith.constant dense<0.000000e+00> : vector<16xf32>
    %165 = vector.multi_reduction <add>, %162, %cst_63 [1] : vector<16x32xf32> to vector<16xf32>
    %166 = vector.shape_cast %165 : vector<16xf32> to vector<16x1xf32>
    %cst_64 = arith.constant 3.200000e+01 : f32
    %167 = vector.broadcast %cst_64 : f32 to vector<16x1xf32>
    %168 = arith.divf %166, %167 : vector<16x1xf32>
    %169 = vector.broadcast %168 : vector<16x1xf32> to vector<16x32xf32>
    %170 = arith.subf %162, %169 : vector<16x32xf32>
    %171 = arith.mulf %170, %170 : vector<16x32xf32>
    %cst_65 = arith.constant dense<0.000000e+00> : vector<16xf32>
    %172 = vector.multi_reduction <add>, %171, %cst_65 [1] : vector<16x32xf32> to vector<16xf32>
    %173 = vector.shape_cast %172 : vector<16xf32> to vector<16x1xf32>
    %cst_66 = arith.constant 3.200000e+01 : f32
    %174 = vector.broadcast %cst_66 : f32 to vector<16x1xf32>
    %175 = arith.divf %173, %174 : vector<16x1xf32>
    %cst_67 = arith.constant 9.99999974E-6 : f32
    %176 = vector.broadcast %cst_67 : f32 to vector<16x1xf32>
    %177 = arith.addf %175, %176 : vector<16x1xf32>
    %178 = math.rsqrt %177 : vector<16x1xf32>
    %179 = vector.broadcast %178 : vector<16x1xf32> to vector<16x32xf32>
    %180 = arith.mulf %170, %179 : vector<16x32xf32>
    %181 = vector.broadcast %163 : vector<1x32xf32> to vector<16x32xf32>
    %182 = arith.mulf %180, %181 : vector<16x32xf32>
    %183 = vector.broadcast %164 : vector<1x32xf32> to vector<16x32xf32>
    %184 = arith.addf %182, %183 : vector<16x32xf32>
    %185 = arith.truncf %184 : vector<16x32xf32> to vector<16x32xbf16>
    %c0_68 = arith.constant 0 : index
    %c0_69 = arith.constant 0 : index
    %186 = vector.load %arg11[%c0_68, %c0_69] : memref<32x32xbf16, #tpu.memory_space<vmem>>, vector<32x32xbf16>
    %cst_70 = arith.constant dense<0.000000e+00> : vector<16x32xf32>
    %187 = tpu.matmul %185, %186, %cst_70 {dimension_numbers = #tpu.dot_dimension_numbers<[1], [0], [0], [1], [0, 0, 1, 1], [], []>} : vector<16x32xbf16>, vector<32x32xbf16>, vector<16x32xf32> -> vector<16x32xf32>
    %c0_71 = arith.constant 0 : index
    %c0_72 = arith.constant 0 : index
    %188 = vector.load %arg12[%c0_71, %c0_72] : memref<1x32xf32, #tpu.memory_space<vmem>>, vector<1x32xf32>
    %189 = vector.broadcast %188 : vector<1x32xf32> to vector<16x32xf32>
    %190 = arith.addf %187, %189 : vector<16x32xf32>
    %cst_73 = arith.constant 0.000000e+00 : f32
    %191 = vector.broadcast %cst_73 : f32 to vector<16x32xf32>
    %192 = arith.maximumf %190, %191 : vector<16x32xf32>
    %193 = arith.truncf %192 : vector<16x32xf32> to vector<16x32xbf16>
    %c0_74 = arith.constant 0 : index
    %c0_75 = arith.constant 0 : index
    %194 = vector.load %arg13[%c0_74, %c0_75] : memref<32x32xbf16, #tpu.memory_space<vmem>>, vector<32x32xbf16>
    %cst_76 = arith.constant dense<0.000000e+00> : vector<16x32xf32>
    %195 = tpu.matmul %193, %194, %cst_76 {dimension_numbers = #tpu.dot_dimension_numbers<[1], [0], [0], [1], [0, 0, 1, 1], [], []>} : vector<16x32xbf16>, vector<32x32xbf16>, vector<16x32xf32> -> vector<16x32xf32>
    %c0_77 = arith.constant 0 : index
    %c0_78 = arith.constant 0 : index
    %196 = vector.load %arg14[%c0_77, %c0_78] : memref<1x32xf32, #tpu.memory_space<vmem>>, vector<1x32xf32>
    %197 = vector.broadcast %196 : vector<1x32xf32> to vector<16x32xf32>
    %198 = arith.addf %195, %197 : vector<16x32xf32>
    %199 = arith.addf %184, %198 : vector<16x32xf32>
    %c0_79 = arith.constant 0 : index
    %c0_80 = arith.constant 0 : index
    %200 = vector.load %arg15[%c0_79, %c0_80] : memref<1x32xf32, #tpu.memory_space<vmem>>, vector<1x32xf32>
    %c0_81 = arith.constant 0 : index
    %c0_82 = arith.constant 0 : index
    %201 = vector.load %arg16[%c0_81, %c0_82] : memref<1x32xf32, #tpu.memory_space<vmem>>, vector<1x32xf32>
    %cst_83 = arith.constant dense<0.000000e+00> : vector<16xf32>
    %202 = vector.multi_reduction <add>, %199, %cst_83 [1] : vector<16x32xf32> to vector<16xf32>
    %203 = vector.shape_cast %202 : vector<16xf32> to vector<16x1xf32>
    %cst_84 = arith.constant 3.200000e+01 : f32
    %204 = vector.broadcast %cst_84 : f32 to vector<16x1xf32>
    %205 = arith.divf %203, %204 : vector<16x1xf32>
    %206 = vector.broadcast %205 : vector<16x1xf32> to vector<16x32xf32>
    %207 = arith.subf %199, %206 : vector<16x32xf32>
    %208 = arith.mulf %207, %207 : vector<16x32xf32>
    %cst_85 = arith.constant dense<0.000000e+00> : vector<16xf32>
    %209 = vector.multi_reduction <add>, %208, %cst_85 [1] : vector<16x32xf32> to vector<16xf32>
    %210 = vector.shape_cast %209 : vector<16xf32> to vector<16x1xf32>
    %cst_86 = arith.constant 3.200000e+01 : f32
    %211 = vector.broadcast %cst_86 : f32 to vector<16x1xf32>
    %212 = arith.divf %210, %211 : vector<16x1xf32>
    %cst_87 = arith.constant 9.99999974E-6 : f32
    %213 = vector.broadcast %cst_87 : f32 to vector<16x1xf32>
    %214 = arith.addf %212, %213 : vector<16x1xf32>
    %215 = math.rsqrt %214 : vector<16x1xf32>
    %216 = vector.broadcast %215 : vector<16x1xf32> to vector<16x32xf32>
    %217 = arith.mulf %207, %216 : vector<16x32xf32>
    %218 = vector.broadcast %200 : vector<1x32xf32> to vector<16x32xf32>
    %219 = arith.mulf %217, %218 : vector<16x32xf32>
    %220 = vector.broadcast %201 : vector<1x32xf32> to vector<16x32xf32>
    %221 = arith.addf %219, %220 : vector<16x32xf32>
    %c0_88 = arith.constant 0 : index
    %c0_89 = arith.constant 0 : index
    %c0_90 = arith.constant 0 : index
    %222 = vector.load %arg17[%c0_88, %c0_89, %c0_90] : memref<1x16x32xf32, #tpu.memory_space<vmem>>, vector<1x16x32xf32>
    %223 = vector.shape_cast %222 : vector<1x16x32xf32> to vector<16x32xf32>
    %224 = vector.shape_cast %221 : vector<16x32xf32> to vector<1x16x32xf32>
    tpu.vector_store %arg17[%c0_88, %c0_89, %c0_90], %224 {strides = array<i32>} : memref<1x16x32xf32, #tpu.memory_space<vmem>>, vector<1x16x32xf32>,
    return
  }
  func.func @transform_0(%arg0: i32) -> (i32, i32, i32) {
    %c0_i32 = arith.constant 0 : i32
    %c0_i32_0 = arith.constant 0 : i32
    %c0_i32_1 = arith.constant 0 : i32
    return %arg0, %c0_i32, %c0_i32_0 : i32, i32, i32
  }
  func.func @transform_1(%arg0: i32) -> (i32, i32, i32) {
    %c0_i32 = arith.constant 0 : i32
    %c0_i32_0 = arith.constant 0 : i32
    %c0_i32_1 = arith.constant 0 : i32
    %c0_i32_2 = arith.constant 0 : i32
    return %c0_i32, %c0_i32_0, %c0_i32_1 : i32, i32, i32
  }
  func.func @transform_2(%arg0: i32) -> (i32, i32) {
    %c0_i32 = arith.constant 0 : i32
    %c0_i32_0 = arith.constant 0 : i32
    %c0_i32_1 = arith.constant 0 : i32
    return %c0_i32, %c0_i32_0 : i32, i32
  }
  func.func @transform_3(%arg0: i32) -> (i32, i32) {
    %c0_i32 = arith.constant 0 : i32
    %c0_i32_0 = arith.constant 0 : i32
    %c0_i32_1 = arith.constant 0 : i32
    return %c0_i32, %c0_i32_0 : i32, i32
  }
  func.func @transform_4(%arg0: i32) -> (i32, i32) {
    %c0_i32 = arith.constant 0 : i32
    %c0_i32_0 = arith.constant 0 : i32
    %c0_i32_1 = arith.constant 0 : i32
    return %c0_i32, %c0_i32_0 : i32, i32
  }
  func.func @transform_5(%arg0: i32) -> (i32, i32) {
    %c0_i32 = arith.constant 0 : i32
    %c0_i32_0 = arith.constant 0 : i32
    %c0_i32_1 = arith.constant 0 : i32
    return %c0_i32, %c0_i32_0 : i32, i32
  }
  func.func @transform_6(%arg0: i32) -> (i32, i32) {
    %c0_i32 = arith.constant 0 : i32
    %c0_i32_0 = arith.constant 0 : i32
    %c0_i32_1 = arith.constant 0 : i32
    return %c0_i32, %c0_i32_0 : i32, i32
  }
  func.func @transform_7(%arg0: i32) -> (i32, i32) {
    %c0_i32 = arith.constant 0 : i32
    %c0_i32_0 = arith.constant 0 : i32
    %c0_i32_1 = arith.constant 0 : i32
    return %c0_i32, %c0_i32_0 : i32, i32
  }
  func.func @transform_8(%arg0: i32) -> (i32, i32) {
    %c0_i32 = arith.constant 0 : i32
    %c0_i32_0 = arith.constant 0 : i32
    %c0_i32_1 = arith.constant 0 : i32
    return %c0_i32, %c0_i32_0 : i32, i32
  }
  func.func @transform_9(%arg0: i32) -> (i32, i32) {
    %c0_i32 = arith.constant 0 : i32
    %c0_i32_0 = arith.constant 0 : i32
    %c0_i32_1 = arith.constant 0 : i32
    return %c0_i32, %c0_i32_0 : i32, i32
  }
  func.func @transform_10(%arg0: i32) -> (i32, i32) {
    %c0_i32 = arith.constant 0 : i32
    %c0_i32_0 = arith.constant 0 : i32
    %c0_i32_1 = arith.constant 0 : i32
    return %c0_i32, %c0_i32_0 : i32, i32
  }
  func.func @transform_11(%arg0: i32) -> (i32, i32) {
    %c0_i32 = arith.constant 0 : i32
    %c0_i32_0 = arith.constant 0 : i32
    %c0_i32_1 = arith.constant 0 : i32
    return %c0_i32, %c0_i32_0 : i32, i32
  }
  func.func @transform_12(%arg0: i32) -> (i32, i32) {
    %c0_i32 = arith.constant 0 : i32
    %c0_i32_0 = arith.constant 0 : i32
    %c0_i32_1 = arith.constant 0 : i32
    return %c0_i32, %c0_i32_0 : i32, i32
  }
  func.func @transform_13(%arg0: i32) -> (i32, i32) {
    %c0_i32 = arith.constant 0 : i32
    %c0_i32_0 = arith.constant 0 : i32
    %c0_i32_1 = arith.constant 0 : i32
    return %c0_i32, %c0_i32_0 : i32, i32
  }
  func.func @transform_14(%arg0: i32) -> (i32, i32) {
    %c0_i32 = arith.constant 0 : i32
    %c0_i32_0 = arith.constant 0 : i32
    %c0_i32_1 = arith.constant 0 : i32
    return %c0_i32, %c0_i32_0 : i32, i32
  }
  func.func @transform_15(%arg0: i32) -> (i32, i32) {
    %c0_i32 = arith.constant 0 : i32
    %c0_i32_0 = arith.constant 0 : i32
    %c0_i32_1 = arith.constant 0 : i32
    return %c0_i32, %c0_i32_0 : i32, i32
  }
  func.func @transform_16(%arg0: i32) -> (i32, i32, i32) {
    %c0_i32 = arith.constant 0 : i32
    %c0_i32_0 = arith.constant 0 : i32
    %c0_i32_1 = arith.constant 0 : i32
    return %arg0, %c0_i32, %c0_i32_0 : i32, i32, i32
  }
}

module attributes {stable_mosaic.version = 11 : i64} {
  func.func @_enc_norm_vis_proj_kernel(%arg0: i32, %arg1: memref<1x16x32xf32, #tpu.memory_space<vmem>>, %arg2: memref<1x32xf32, #tpu.memory_space<vmem>>, %arg3: memref<1x32xf32, #tpu.memory_space<vmem>>, %arg4: memref<32x64xbf16, #tpu.memory_space<vmem>>, %arg5: memref<1x64xf32, #tpu.memory_space<vmem>>, %arg6: memref<1x16x32xf32, #tpu.memory_space<vmem>>, %arg7: memref<1x16x64xf32, #tpu.memory_space<vmem>>) attributes {dimension_semantics = [#tpu.dimension_semantics<parallel>], iteration_bounds = array<i64: 2>, scalar_prefetch = 0 : i64, scratch_operands = 0 : i64, tpu.core_type = #tpu.core_type<tc>, window_params = [{transform_indices = @transform_0, window_bounds = array<i64: 1, 16, 32>}, {pipeline_mode = #tpu.pipeline_mode<synchronous>, transform_indices = @transform_1, window_bounds = array<i64: 1, 32>}, {pipeline_mode = #tpu.pipeline_mode<synchronous>, transform_indices = @transform_2, window_bounds = array<i64: 1, 32>}, {pipeline_mode = #tpu.pipeline_mode<synchronous>, transform_indices = @transform_3, window_bounds = array<i64: 32, 64>}, {pipeline_mode = #tpu.pipeline_mode<synchronous>, transform_indices = @transform_4, window_bounds = array<i64: 1, 64>}, {transform_indices = @transform_5, window_bounds = array<i64: 1, 16, 32>}, {transform_indices = @transform_6, window_bounds = array<i64: 1, 16, 64>}]} {
    %c0 = arith.constant 0 : index
    %c0_0 = arith.constant 0 : index
    %c0_1 = arith.constant 0 : index
    %0 = vector.load %arg1[%c0, %c0_0, %c0_1] : memref<1x16x32xf32, #tpu.memory_space<vmem>>, vector<1x16x32xf32>
    %1 = vector.shape_cast %0 : vector<1x16x32xf32> to vector<16x32xf32>
    %c0_2 = arith.constant 0 : index
    %c0_3 = arith.constant 0 : index
    %2 = vector.load %arg2[%c0_2, %c0_3] : memref<1x32xf32, #tpu.memory_space<vmem>>, vector<1x32xf32>
    %c0_4 = arith.constant 0 : index
    %c0_5 = arith.constant 0 : index
    %3 = vector.load %arg3[%c0_4, %c0_5] : memref<1x32xf32, #tpu.memory_space<vmem>>, vector<1x32xf32>
    %cst = arith.constant dense<0.000000e+00> : vector<16xf32>
    %4 = vector.multi_reduction <add>, %1, %cst [1] : vector<16x32xf32> to vector<16xf32>
    %5 = vector.shape_cast %4 : vector<16xf32> to vector<16x1xf32>
    %cst_6 = arith.constant 3.200000e+01 : f32
    %6 = vector.broadcast %cst_6 : f32 to vector<16x1xf32>
    %7 = arith.divf %5, %6 : vector<16x1xf32>
    %8 = vector.broadcast %7 : vector<16x1xf32> to vector<16x32xf32>
    %9 = arith.subf %1, %8 : vector<16x32xf32>
    %10 = arith.mulf %9, %9 : vector<16x32xf32>
    %cst_7 = arith.constant dense<0.000000e+00> : vector<16xf32>
    %11 = vector.multi_reduction <add>, %10, %cst_7 [1] : vector<16x32xf32> to vector<16xf32>
    %12 = vector.shape_cast %11 : vector<16xf32> to vector<16x1xf32>
    %cst_8 = arith.constant 3.200000e+01 : f32
    %13 = vector.broadcast %cst_8 : f32 to vector<16x1xf32>
    %14 = arith.divf %12, %13 : vector<16x1xf32>
    %cst_9 = arith.constant 9.99999974E-6 : f32
    %15 = vector.broadcast %cst_9 : f32 to vector<16x1xf32>
    %16 = arith.addf %14, %15 : vector<16x1xf32>
    %17 = math.rsqrt %16 : vector<16x1xf32>
    %18 = vector.broadcast %17 : vector<16x1xf32> to vector<16x32xf32>
    %19 = arith.mulf %9, %18 : vector<16x32xf32>
    %20 = vector.broadcast %2 : vector<1x32xf32> to vector<16x32xf32>
    %21 = arith.mulf %19, %20 : vector<16x32xf32>
    %22 = vector.broadcast %3 : vector<1x32xf32> to vector<16x32xf32>
    %23 = arith.addf %21, %22 : vector<16x32xf32>
    %c0_10 = arith.constant 0 : index
    %c0_11 = arith.constant 0 : index
    %c0_12 = arith.constant 0 : index
    %24 = vector.load %arg6[%c0_10, %c0_11, %c0_12] : memref<1x16x32xf32, #tpu.memory_space<vmem>>, vector<1x16x32xf32>
    %25 = vector.shape_cast %24 : vector<1x16x32xf32> to vector<16x32xf32>
    %26 = vector.shape_cast %23 : vector<16x32xf32> to vector<1x16x32xf32>
    tpu.vector_store %arg6[%c0_10, %c0_11, %c0_12], %26 {strides = array<i32>} : memref<1x16x32xf32, #tpu.memory_space<vmem>>, vector<1x16x32xf32>,
    %27 = arith.truncf %23 : vector<16x32xf32> to vector<16x32xbf16>
    %c0_13 = arith.constant 0 : index
    %c0_14 = arith.constant 0 : index
    %28 = vector.load %arg4[%c0_13, %c0_14] : memref<32x64xbf16, #tpu.memory_space<vmem>>, vector<32x64xbf16>
    %cst_15 = arith.constant dense<0.000000e+00> : vector<16x64xf32>
    %29 = tpu.matmul %27, %28, %cst_15 {dimension_numbers = #tpu.dot_dimension_numbers<[1], [0], [0], [1], [0, 0, 1, 1], [], []>} : vector<16x32xbf16>, vector<32x64xbf16>, vector<16x64xf32> -> vector<16x64xf32>
    %c0_16 = arith.constant 0 : index
    %c0_17 = arith.constant 0 : index
    %30 = vector.load %arg5[%c0_16, %c0_17] : memref<1x64xf32, #tpu.memory_space<vmem>>, vector<1x64xf32>
    %31 = vector.broadcast %30 : vector<1x64xf32> to vector<16x64xf32>
    %32 = arith.addf %29, %31 : vector<16x64xf32>
    %c0_18 = arith.constant 0 : index
    %c0_19 = arith.constant 0 : index
    %c0_20 = arith.constant 0 : index
    %33 = vector.load %arg7[%c0_18, %c0_19, %c0_20] : memref<1x16x64xf32, #tpu.memory_space<vmem>>, vector<1x16x64xf32>
    %34 = vector.shape_cast %33 : vector<1x16x64xf32> to vector<16x64xf32>
    %35 = vector.shape_cast %32 : vector<16x64xf32> to vector<1x16x64xf32>
    tpu.vector_store %arg7[%c0_18, %c0_19, %c0_20], %35 {strides = array<i32>} : memref<1x16x64xf32, #tpu.memory_space<vmem>>, vector<1x16x64xf32>,
    return
  }
  func.func @transform_0(%arg0: i32) -> (i32, i32, i32) {
    %c0_i32 = arith.constant 0 : i32
    %c0_i32_0 = arith.constant 0 : i32
    %c0_i32_1 = arith.constant 0 : i32
    return %arg0, %c0_i32, %c0_i32_0 : i32, i32, i32
  }
  func.func @transform_1(%arg0: i32) -> (i32, i32) {
    %c0_i32 = arith.constant 0 : i32
    %c0_i32_0 = arith.constant 0 : i32
    %c0_i32_1 = arith.constant 0 : i32
    return %c0_i32, %c0_i32_0 : i32, i32
  }
  func.func @transform_2(%arg0: i32) -> (i32, i32) {
    %c0_i32 = arith.constant 0 : i32
    %c0_i32_0 = arith.constant 0 : i32
    %c0_i32_1 = arith.constant 0 : i32
    return %c0_i32, %c0_i32_0 : i32, i32
  }
  func.func @transform_3(%arg0: i32) -> (i32, i32) {
    %c0_i32 = arith.constant 0 : i32
    %c0_i32_0 = arith.constant 0 : i32
    %c0_i32_1 = arith.constant 0 : i32
    return %c0_i32, %c0_i32_0 : i32, i32
  }
  func.func @transform_4(%arg0: i32) -> (i32, i32) {
    %c0_i32 = arith.constant 0 : i32
    %c0_i32_0 = arith.constant 0 : i32
    %c0_i32_1 = arith.constant 0 : i32
    return %c0_i32, %c0_i32_0 : i32, i32
  }
  func.func @transform_5(%arg0: i32) -> (i32, i32, i32) {
    %c0_i32 = arith.constant 0 : i32
    %c0_i32_0 = arith.constant 0 : i32
    %c0_i32_1 = arith.constant 0 : i32
    return %arg0, %c0_i32, %c0_i32_0 : i32, i32, i32
  }
  func.func @transform_6(%arg0: i32) -> (i32, i32, i32) {
    %c0_i32 = arith.constant 0 : i32
    %c0_i32_0 = arith.constant 0 : i32
    %c0_i32_1 = arith.constant 0 : i32
    return %arg0, %c0_i32, %c0_i32_0 : i32, i32, i32
  }
}

module attributes {stable_mosaic.version = 11 : i64} {
  func.func @_encoder_layer_kernel(%arg0: i32, %arg1: memref<1x16x32xf32, #tpu.memory_space<vmem>>, %arg2: memref<1x16x32xf32, #tpu.memory_space<vmem>>, %arg3: memref<32x64xbf16, #tpu.memory_space<vmem>>, %arg4: memref<1x64xf32, #tpu.memory_space<vmem>>, %arg5: memref<32x32xbf16, #tpu.memory_space<vmem>>, %arg6: memref<1x32xf32, #tpu.memory_space<vmem>>, %arg7: memref<32x32xbf16, #tpu.memory_space<vmem>>, %arg8: memref<1x32xf32, #tpu.memory_space<vmem>>, %arg9: memref<1x32xf32, #tpu.memory_space<vmem>>, %arg10: memref<1x32xf32, #tpu.memory_space<vmem>>, %arg11: memref<32x32xbf16, #tpu.memory_space<vmem>>, %arg12: memref<1x32xf32, #tpu.memory_space<vmem>>, %arg13: memref<32x32xbf16, #tpu.memory_space<vmem>>, %arg14: memref<1x32xf32, #tpu.memory_space<vmem>>, %arg15: memref<1x32xf32, #tpu.memory_space<vmem>>, %arg16: memref<1x32xf32, #tpu.memory_space<vmem>>, %arg17: memref<1x16x32xf32, #tpu.memory_space<vmem>>) attributes {dimension_semantics = [#tpu.dimension_semantics<parallel>], iteration_bounds = array<i64: 2>, scalar_prefetch = 0 : i64, scratch_operands = 0 : i64, tpu.core_type = #tpu.core_type<tc>, window_params = [{transform_indices = @transform_0, window_bounds = array<i64: 1, 16, 32>}, {pipeline_mode = #tpu.pipeline_mode<synchronous>, transform_indices = @transform_1, window_bounds = array<i64: 1, 16, 32>}, {pipeline_mode = #tpu.pipeline_mode<synchronous>, transform_indices = @transform_2, window_bounds = array<i64: 32, 64>}, {pipeline_mode = #tpu.pipeline_mode<synchronous>, transform_indices = @transform_3, window_bounds = array<i64: 1, 64>}, {pipeline_mode = #tpu.pipeline_mode<synchronous>, transform_indices = @transform_4, window_bounds = array<i64: 32, 32>}, {pipeline_mode = #tpu.pipeline_mode<synchronous>, transform_indices = @transform_5, window_bounds = array<i64: 1, 32>}, {pipeline_mode = #tpu.pipeline_mode<synchronous>, transform_indices = @transform_6, window_bounds = array<i64: 32, 32>}, {pipeline_mode = #tpu.pipeline_mode<synchronous>, transform_indices = @transform_7, window_bounds = array<i64: 1, 32>}, {pipeline_mode = #tpu.pipeline_mode<synchronous>, transform_indices = @transform_8, window_bounds = array<i64: 1, 32>}, {pipeline_mode = #tpu.pipeline_mode<synchronous>, transform_indices = @transform_9, window_bounds = array<i64: 1, 32>}, {pipeline_mode = #tpu.pipeline_mode<synchronous>, transform_indices = @transform_10, window_bounds = array<i64: 32, 32>}, {pipeline_mode = #tpu.pipeline_mode<synchronous>, transform_indices = @transform_11, window_bounds = array<i64: 1, 32>}, {pipeline_mode = #tpu.pipeline_mode<synchronous>, transform_indices = @transform_12, window_bounds = array<i64: 32, 32>}, {pipeline_mode = #tpu.pipeline_mode<synchronous>, transform_indices = @transform_13, window_bounds = array<i64: 1, 32>}, {pipeline_mode = #tpu.pipeline_mode<synchronous>, transform_indices = @transform_14, window_bounds = array<i64: 1, 32>}, {pipeline_mode = #tpu.pipeline_mode<synchronous>, transform_indices = @transform_15, window_bounds = array<i64: 1, 32>}, {transform_indices = @transform_16, window_bounds = array<i64: 1, 16, 32>}]} {
    %c0 = arith.constant 0 : index
    %c0_0 = arith.constant 0 : index
    %c0_1 = arith.constant 0 : index
    %0 = vector.load %arg1[%c0, %c0_0, %c0_1] : memref<1x16x32xf32, #tpu.memory_space<vmem>>, vector<1x16x32xf32>
    %1 = vector.shape_cast %0 : vector<1x16x32xf32> to vector<16x32xf32>
    %c0_2 = arith.constant 0 : index
    %c0_3 = arith.constant 0 : index
    %c0_4 = arith.constant 0 : index
    %2 = vector.load %arg2[%c0_2, %c0_3, %c0_4] : memref<1x16x32xf32, #tpu.memory_space<vmem>>, vector<1x16x32xf32>
    %3 = vector.shape_cast %2 : vector<1x16x32xf32> to vector<16x32xf32>
    %4 = arith.addf %1, %3 : vector<16x32xf32>
    %5 = arith.truncf %4 : vector<16x32xf32> to vector<16x32xbf16>
    %c0_5 = arith.constant 0 : index
    %c0_6 = arith.constant 0 : index
    %6 = vector.load %arg3[%c0_5, %c0_6] : memref<32x64xbf16, #tpu.memory_space<vmem>>, vector<32x64xbf16>
    %cst = arith.constant dense<0.000000e+00> : vector<16x64xf32>
    %7 = tpu.matmul %5, %6, %cst {dimension_numbers = #tpu.dot_dimension_numbers<[1], [0], [0], [1], [0, 0, 1, 1], [], []>} : vector<16x32xbf16>, vector<32x64xbf16>, vector<16x64xf32> -> vector<16x64xf32>
    %c0_7 = arith.constant 0 : index
    %c0_8 = arith.constant 0 : index
    %8 = vector.load %arg4[%c0_7, %c0_8] : memref<1x64xf32, #tpu.memory_space<vmem>>, vector<1x64xf32>
    %9 = vector.broadcast %8 : vector<1x64xf32> to vector<16x64xf32>
    %10 = arith.addf %7, %9 : vector<16x64xf32>
    %11 = vector.extract_strided_slice %10 {offsets = [0, 0], sizes = [16, 32], strides = [1, 1]} : vector<16x64xf32> to vector<16x32xf32>
    %12 = vector.extract_strided_slice %10 {offsets = [0, 32], sizes = [16, 32], strides = [1, 1]} : vector<16x64xf32> to vector<16x32xf32>
    %13 = arith.truncf %1 : vector<16x32xf32> to vector<16x32xbf16>
    %c0_9 = arith.constant 0 : index
    %c0_10 = arith.constant 0 : index
    %14 = vector.load %arg5[%c0_9, %c0_10] : memref<32x32xbf16, #tpu.memory_space<vmem>>, vector<32x32xbf16>
    %cst_11 = arith.constant dense<0.000000e+00> : vector<16x32xf32>
    %15 = tpu.matmul %13, %14, %cst_11 {dimension_numbers = #tpu.dot_dimension_numbers<[1], [0], [0], [1], [0, 0, 1, 1], [], []>} : vector<16x32xbf16>, vector<32x32xbf16>, vector<16x32xf32> -> vector<16x32xf32>
    %c0_12 = arith.constant 0 : index
    %c0_13 = arith.constant 0 : index
    %16 = vector.load %arg6[%c0_12, %c0_13] : memref<1x32xf32, #tpu.memory_space<vmem>>, vector<1x32xf32>
    %17 = vector.broadcast %16 : vector<1x32xf32> to vector<16x32xf32>
    %18 = arith.addf %15, %17 : vector<16x32xf32>
    %19 = vector.extract_strided_slice %11 {offsets = [0, 0], sizes = [16, 4], strides = [1, 1]} : vector<16x32xf32> to vector<16x4xf32>
    %20 = vector.extract_strided_slice %12 {offsets = [0, 0], sizes = [16, 4], strides = [1, 1]} : vector<16x32xf32> to vector<16x4xf32>
    %21 = vector.extract_strided_slice %18 {offsets = [0, 0], sizes = [16, 4], strides = [1, 1]} : vector<16x32xf32> to vector<16x4xf32>
    %cst_14 = arith.constant dense<0.000000e+00> : vector<16x16xf32>
    %22 = tpu.matmul %19, %20, %cst_14 {dimension_numbers = #tpu.dot_dimension_numbers<[1], [1], [0], [0], [0, 0, 1, 0], [], []>} : vector<16x4xf32>, vector<16x4xf32>, vector<16x16xf32> -> vector<16x16xf32>
    %cst_15 = arith.constant 5.000000e-01 : f32
    %23 = vector.broadcast %cst_15 : f32 to vector<16x16xf32>
    %24 = arith.mulf %22, %23 : vector<16x16xf32>
    %cst_16 = arith.constant dense<0xFF800000> : vector<16xf32>
    %25 = vector.multi_reduction <maximumf>, %24, %cst_16 [1] : vector<16x16xf32> to vector<16xf32>
    %26 = vector.shape_cast %25 : vector<16xf32> to vector<16x1xf32>
    %27 = vector.broadcast %26 : vector<16x1xf32> to vector<16x16xf32>
    %28 = arith.subf %24, %27 : vector<16x16xf32>
    %29 = math.exp %28 : vector<16x16xf32>
    %cst_17 = arith.constant dense<0.000000e+00> : vector<16xf32>
    %30 = vector.multi_reduction <add>, %29, %cst_17 [1] : vector<16x16xf32> to vector<16xf32>
    %31 = vector.shape_cast %30 : vector<16xf32> to vector<16x1xf32>
    %32 = tpu.reciprocal %31 {approx = true} : vector<16x1xf32> -> vector<16x1xf32>
    %33 = vector.broadcast %32 : vector<16x1xf32> to vector<16x16xf32>
    %34 = arith.mulf %29, %33 : vector<16x16xf32>
    %cst_18 = arith.constant dense<0.000000e+00> : vector<16x4xf32>
    %35 = tpu.matmul %34, %21, %cst_18 {dimension_numbers = #tpu.dot_dimension_numbers<[1], [0], [0], [1], [0, 0, 1, 1], [], []>} : vector<16x16xf32>, vector<16x4xf32>, vector<16x4xf32> -> vector<16x4xf32>
    %36 = vector.extract_strided_slice %11 {offsets = [0, 4], sizes = [16, 4], strides = [1, 1]} : vector<16x32xf32> to vector<16x4xf32>
    %37 = vector.extract_strided_slice %12 {offsets = [0, 4], sizes = [16, 4], strides = [1, 1]} : vector<16x32xf32> to vector<16x4xf32>
    %38 = vector.extract_strided_slice %18 {offsets = [0, 4], sizes = [16, 4], strides = [1, 1]} : vector<16x32xf32> to vector<16x4xf32>
    %cst_19 = arith.constant dense<0.000000e+00> : vector<16x16xf32>
    %39 = tpu.matmul %36, %37, %cst_19 {dimension_numbers = #tpu.dot_dimension_numbers<[1], [1], [0], [0], [0, 0, 1, 0], [], []>} : vector<16x4xf32>, vector<16x4xf32>, vector<16x16xf32> -> vector<16x16xf32>
    %cst_20 = arith.constant 5.000000e-01 : f32
    %40 = vector.broadcast %cst_20 : f32 to vector<16x16xf32>
    %41 = arith.mulf %39, %40 : vector<16x16xf32>
    %cst_21 = arith.constant dense<0xFF800000> : vector<16xf32>
    %42 = vector.multi_reduction <maximumf>, %41, %cst_21 [1] : vector<16x16xf32> to vector<16xf32>
    %43 = vector.shape_cast %42 : vector<16xf32> to vector<16x1xf32>
    %44 = vector.broadcast %43 : vector<16x1xf32> to vector<16x16xf32>
    %45 = arith.subf %41, %44 : vector<16x16xf32>
    %46 = math.exp %45 : vector<16x16xf32>
    %cst_22 = arith.constant dense<0.000000e+00> : vector<16xf32>
    %47 = vector.multi_reduction <add>, %46, %cst_22 [1] : vector<16x16xf32> to vector<16xf32>
    %48 = vector.shape_cast %47 : vector<16xf32> to vector<16x1xf32>
    %49 = tpu.reciprocal %48 {approx = true} : vector<16x1xf32> -> vector<16x1xf32>
    %50 = vector.broadcast %49 : vector<16x1xf32> to vector<16x16xf32>
    %51 = arith.mulf %46, %50 : vector<16x16xf32>
    %cst_23 = arith.constant dense<0.000000e+00> : vector<16x4xf32>
    %52 = tpu.matmul %51, %38, %cst_23 {dimension_numbers = #tpu.dot_dimension_numbers<[1], [0], [0], [1], [0, 0, 1, 1], [], []>} : vector<16x16xf32>, vector<16x4xf32>, vector<16x4xf32> -> vector<16x4xf32>
    %53 = vector.extract_strided_slice %11 {offsets = [0, 8], sizes = [16, 4], strides = [1, 1]} : vector<16x32xf32> to vector<16x4xf32>
    %54 = vector.extract_strided_slice %12 {offsets = [0, 8], sizes = [16, 4], strides = [1, 1]} : vector<16x32xf32> to vector<16x4xf32>
    %55 = vector.extract_strided_slice %18 {offsets = [0, 8], sizes = [16, 4], strides = [1, 1]} : vector<16x32xf32> to vector<16x4xf32>
    %cst_24 = arith.constant dense<0.000000e+00> : vector<16x16xf32>
    %56 = tpu.matmul %53, %54, %cst_24 {dimension_numbers = #tpu.dot_dimension_numbers<[1], [1], [0], [0], [0, 0, 1, 0], [], []>} : vector<16x4xf32>, vector<16x4xf32>, vector<16x16xf32> -> vector<16x16xf32>
    %cst_25 = arith.constant 5.000000e-01 : f32
    %57 = vector.broadcast %cst_25 : f32 to vector<16x16xf32>
    %58 = arith.mulf %56, %57 : vector<16x16xf32>
    %cst_26 = arith.constant dense<0xFF800000> : vector<16xf32>
    %59 = vector.multi_reduction <maximumf>, %58, %cst_26 [1] : vector<16x16xf32> to vector<16xf32>
    %60 = vector.shape_cast %59 : vector<16xf32> to vector<16x1xf32>
    %61 = vector.broadcast %60 : vector<16x1xf32> to vector<16x16xf32>
    %62 = arith.subf %58, %61 : vector<16x16xf32>
    %63 = math.exp %62 : vector<16x16xf32>
    %cst_27 = arith.constant dense<0.000000e+00> : vector<16xf32>
    %64 = vector.multi_reduction <add>, %63, %cst_27 [1] : vector<16x16xf32> to vector<16xf32>
    %65 = vector.shape_cast %64 : vector<16xf32> to vector<16x1xf32>
    %66 = tpu.reciprocal %65 {approx = true} : vector<16x1xf32> -> vector<16x1xf32>
    %67 = vector.broadcast %66 : vector<16x1xf32> to vector<16x16xf32>
    %68 = arith.mulf %63, %67 : vector<16x16xf32>
    %cst_28 = arith.constant dense<0.000000e+00> : vector<16x4xf32>
    %69 = tpu.matmul %68, %55, %cst_28 {dimension_numbers = #tpu.dot_dimension_numbers<[1], [0], [0], [1], [0, 0, 1, 1], [], []>} : vector<16x16xf32>, vector<16x4xf32>, vector<16x4xf32> -> vector<16x4xf32>
    %70 = vector.extract_strided_slice %11 {offsets = [0, 12], sizes = [16, 4], strides = [1, 1]} : vector<16x32xf32> to vector<16x4xf32>
    %71 = vector.extract_strided_slice %12 {offsets = [0, 12], sizes = [16, 4], strides = [1, 1]} : vector<16x32xf32> to vector<16x4xf32>
    %72 = vector.extract_strided_slice %18 {offsets = [0, 12], sizes = [16, 4], strides = [1, 1]} : vector<16x32xf32> to vector<16x4xf32>
    %cst_29 = arith.constant dense<0.000000e+00> : vector<16x16xf32>
    %73 = tpu.matmul %70, %71, %cst_29 {dimension_numbers = #tpu.dot_dimension_numbers<[1], [1], [0], [0], [0, 0, 1, 0], [], []>} : vector<16x4xf32>, vector<16x4xf32>, vector<16x16xf32> -> vector<16x16xf32>
    %cst_30 = arith.constant 5.000000e-01 : f32
    %74 = vector.broadcast %cst_30 : f32 to vector<16x16xf32>
    %75 = arith.mulf %73, %74 : vector<16x16xf32>
    %cst_31 = arith.constant dense<0xFF800000> : vector<16xf32>
    %76 = vector.multi_reduction <maximumf>, %75, %cst_31 [1] : vector<16x16xf32> to vector<16xf32>
    %77 = vector.shape_cast %76 : vector<16xf32> to vector<16x1xf32>
    %78 = vector.broadcast %77 : vector<16x1xf32> to vector<16x16xf32>
    %79 = arith.subf %75, %78 : vector<16x16xf32>
    %80 = math.exp %79 : vector<16x16xf32>
    %cst_32 = arith.constant dense<0.000000e+00> : vector<16xf32>
    %81 = vector.multi_reduction <add>, %80, %cst_32 [1] : vector<16x16xf32> to vector<16xf32>
    %82 = vector.shape_cast %81 : vector<16xf32> to vector<16x1xf32>
    %83 = tpu.reciprocal %82 {approx = true} : vector<16x1xf32> -> vector<16x1xf32>
    %84 = vector.broadcast %83 : vector<16x1xf32> to vector<16x16xf32>
    %85 = arith.mulf %80, %84 : vector<16x16xf32>
    %cst_33 = arith.constant dense<0.000000e+00> : vector<16x4xf32>
    %86 = tpu.matmul %85, %72, %cst_33 {dimension_numbers = #tpu.dot_dimension_numbers<[1], [0], [0], [1], [0, 0, 1, 1], [], []>} : vector<16x16xf32>, vector<16x4xf32>, vector<16x4xf32> -> vector<16x4xf32>
    %87 = vector.extract_strided_slice %11 {offsets = [0, 16], sizes = [16, 4], strides = [1, 1]} : vector<16x32xf32> to vector<16x4xf32>
    %88 = vector.extract_strided_slice %12 {offsets = [0, 16], sizes = [16, 4], strides = [1, 1]} : vector<16x32xf32> to vector<16x4xf32>
    %89 = vector.extract_strided_slice %18 {offsets = [0, 16], sizes = [16, 4], strides = [1, 1]} : vector<16x32xf32> to vector<16x4xf32>
    %cst_34 = arith.constant dense<0.000000e+00> : vector<16x16xf32>
    %90 = tpu.matmul %87, %88, %cst_34 {dimension_numbers = #tpu.dot_dimension_numbers<[1], [1], [0], [0], [0, 0, 1, 0], [], []>} : vector<16x4xf32>, vector<16x4xf32>, vector<16x16xf32> -> vector<16x16xf32>
    %cst_35 = arith.constant 5.000000e-01 : f32
    %91 = vector.broadcast %cst_35 : f32 to vector<16x16xf32>
    %92 = arith.mulf %90, %91 : vector<16x16xf32>
    %cst_36 = arith.constant dense<0xFF800000> : vector<16xf32>
    %93 = vector.multi_reduction <maximumf>, %92, %cst_36 [1] : vector<16x16xf32> to vector<16xf32>
    %94 = vector.shape_cast %93 : vector<16xf32> to vector<16x1xf32>
    %95 = vector.broadcast %94 : vector<16x1xf32> to vector<16x16xf32>
    %96 = arith.subf %92, %95 : vector<16x16xf32>
    %97 = math.exp %96 : vector<16x16xf32>
    %cst_37 = arith.constant dense<0.000000e+00> : vector<16xf32>
    %98 = vector.multi_reduction <add>, %97, %cst_37 [1] : vector<16x16xf32> to vector<16xf32>
    %99 = vector.shape_cast %98 : vector<16xf32> to vector<16x1xf32>
    %100 = tpu.reciprocal %99 {approx = true} : vector<16x1xf32> -> vector<16x1xf32>
    %101 = vector.broadcast %100 : vector<16x1xf32> to vector<16x16xf32>
    %102 = arith.mulf %97, %101 : vector<16x16xf32>
    %cst_38 = arith.constant dense<0.000000e+00> : vector<16x4xf32>
    %103 = tpu.matmul %102, %89, %cst_38 {dimension_numbers = #tpu.dot_dimension_numbers<[1], [0], [0], [1], [0, 0, 1, 1], [], []>} : vector<16x16xf32>, vector<16x4xf32>, vector<16x4xf32> -> vector<16x4xf32>
    %104 = vector.extract_strided_slice %11 {offsets = [0, 20], sizes = [16, 4], strides = [1, 1]} : vector<16x32xf32> to vector<16x4xf32>
    %105 = vector.extract_strided_slice %12 {offsets = [0, 20], sizes = [16, 4], strides = [1, 1]} : vector<16x32xf32> to vector<16x4xf32>
    %106 = vector.extract_strided_slice %18 {offsets = [0, 20], sizes = [16, 4], strides = [1, 1]} : vector<16x32xf32> to vector<16x4xf32>
    %cst_39 = arith.constant dense<0.000000e+00> : vector<16x16xf32>
    %107 = tpu.matmul %104, %105, %cst_39 {dimension_numbers = #tpu.dot_dimension_numbers<[1], [1], [0], [0], [0, 0, 1, 0], [], []>} : vector<16x4xf32>, vector<16x4xf32>, vector<16x16xf32> -> vector<16x16xf32>
    %cst_40 = arith.constant 5.000000e-01 : f32
    %108 = vector.broadcast %cst_40 : f32 to vector<16x16xf32>
    %109 = arith.mulf %107, %108 : vector<16x16xf32>
    %cst_41 = arith.constant dense<0xFF800000> : vector<16xf32>
    %110 = vector.multi_reduction <maximumf>, %109, %cst_41 [1] : vector<16x16xf32> to vector<16xf32>
    %111 = vector.shape_cast %110 : vector<16xf32> to vector<16x1xf32>
    %112 = vector.broadcast %111 : vector<16x1xf32> to vector<16x16xf32>
    %113 = arith.subf %109, %112 : vector<16x16xf32>
    %114 = math.exp %113 : vector<16x16xf32>
    %cst_42 = arith.constant dense<0.000000e+00> : vector<16xf32>
    %115 = vector.multi_reduction <add>, %114, %cst_42 [1] : vector<16x16xf32> to vector<16xf32>
    %116 = vector.shape_cast %115 : vector<16xf32> to vector<16x1xf32>
    %117 = tpu.reciprocal %116 {approx = true} : vector<16x1xf32> -> vector<16x1xf32>
    %118 = vector.broadcast %117 : vector<16x1xf32> to vector<16x16xf32>
    %119 = arith.mulf %114, %118 : vector<16x16xf32>
    %cst_43 = arith.constant dense<0.000000e+00> : vector<16x4xf32>
    %120 = tpu.matmul %119, %106, %cst_43 {dimension_numbers = #tpu.dot_dimension_numbers<[1], [0], [0], [1], [0, 0, 1, 1], [], []>} : vector<16x16xf32>, vector<16x4xf32>, vector<16x4xf32> -> vector<16x4xf32>
    %121 = vector.extract_strided_slice %11 {offsets = [0, 24], sizes = [16, 4], strides = [1, 1]} : vector<16x32xf32> to vector<16x4xf32>
    %122 = vector.extract_strided_slice %12 {offsets = [0, 24], sizes = [16, 4], strides = [1, 1]} : vector<16x32xf32> to vector<16x4xf32>
    %123 = vector.extract_strided_slice %18 {offsets = [0, 24], sizes = [16, 4], strides = [1, 1]} : vector<16x32xf32> to vector<16x4xf32>
    %cst_44 = arith.constant dense<0.000000e+00> : vector<16x16xf32>
    %124 = tpu.matmul %121, %122, %cst_44 {dimension_numbers = #tpu.dot_dimension_numbers<[1], [1], [0], [0], [0, 0, 1, 0], [], []>} : vector<16x4xf32>, vector<16x4xf32>, vector<16x16xf32> -> vector<16x16xf32>
    %cst_45 = arith.constant 5.000000e-01 : f32
    %125 = vector.broadcast %cst_45 : f32 to vector<16x16xf32>
    %126 = arith.mulf %124, %125 : vector<16x16xf32>
    %cst_46 = arith.constant dense<0xFF800000> : vector<16xf32>
    %127 = vector.multi_reduction <maximumf>, %126, %cst_46 [1] : vector<16x16xf32> to vector<16xf32>
    %128 = vector.shape_cast %127 : vector<16xf32> to vector<16x1xf32>
    %129 = vector.broadcast %128 : vector<16x1xf32> to vector<16x16xf32>
    %130 = arith.subf %126, %129 : vector<16x16xf32>
    %131 = math.exp %130 : vector<16x16xf32>
    %cst_47 = arith.constant dense<0.000000e+00> : vector<16xf32>
    %132 = vector.multi_reduction <add>, %131, %cst_47 [1] : vector<16x16xf32> to vector<16xf32>
    %133 = vector.shape_cast %132 : vector<16xf32> to vector<16x1xf32>
    %134 = tpu.reciprocal %133 {approx = true} : vector<16x1xf32> -> vector<16x1xf32>
    %135 = vector.broadcast %134 : vector<16x1xf32> to vector<16x16xf32>
    %136 = arith.mulf %131, %135 : vector<16x16xf32>
    %cst_48 = arith.constant dense<0.000000e+00> : vector<16x4xf32>
    %137 = tpu.matmul %136, %123, %cst_48 {dimension_numbers = #tpu.dot_dimension_numbers<[1], [0], [0], [1], [0, 0, 1, 1], [], []>} : vector<16x16xf32>, vector<16x4xf32>, vector<16x4xf32> -> vector<16x4xf32>
    %138 = vector.extract_strided_slice %11 {offsets = [0, 28], sizes = [16, 4], strides = [1, 1]} : vector<16x32xf32> to vector<16x4xf32>
    %139 = vector.extract_strided_slice %12 {offsets = [0, 28], sizes = [16, 4], strides = [1, 1]} : vector<16x32xf32> to vector<16x4xf32>
    %140 = vector.extract_strided_slice %18 {offsets = [0, 28], sizes = [16, 4], strides = [1, 1]} : vector<16x32xf32> to vector<16x4xf32>
    %cst_49 = arith.constant dense<0.000000e+00> : vector<16x16xf32>
    %141 = tpu.matmul %138, %139, %cst_49 {dimension_numbers = #tpu.dot_dimension_numbers<[1], [1], [0], [0], [0, 0, 1, 0], [], []>} : vector<16x4xf32>, vector<16x4xf32>, vector<16x16xf32> -> vector<16x16xf32>
    %cst_50 = arith.constant 5.000000e-01 : f32
    %142 = vector.broadcast %cst_50 : f32 to vector<16x16xf32>
    %143 = arith.mulf %141, %142 : vector<16x16xf32>
    %cst_51 = arith.constant dense<0xFF800000> : vector<16xf32>
    %144 = vector.multi_reduction <maximumf>, %143, %cst_51 [1] : vector<16x16xf32> to vector<16xf32>
    %145 = vector.shape_cast %144 : vector<16xf32> to vector<16x1xf32>
    %146 = vector.broadcast %145 : vector<16x1xf32> to vector<16x16xf32>
    %147 = arith.subf %143, %146 : vector<16x16xf32>
    %148 = math.exp %147 : vector<16x16xf32>
    %cst_52 = arith.constant dense<0.000000e+00> : vector<16xf32>
    %149 = vector.multi_reduction <add>, %148, %cst_52 [1] : vector<16x16xf32> to vector<16xf32>
    %150 = vector.shape_cast %149 : vector<16xf32> to vector<16x1xf32>
    %151 = tpu.reciprocal %150 {approx = true} : vector<16x1xf32> -> vector<16x1xf32>
    %152 = vector.broadcast %151 : vector<16x1xf32> to vector<16x16xf32>
    %153 = arith.mulf %148, %152 : vector<16x16xf32>
    %cst_53 = arith.constant dense<0.000000e+00> : vector<16x4xf32>
    %154 = tpu.matmul %153, %140, %cst_53 {dimension_numbers = #tpu.dot_dimension_numbers<[1], [0], [0], [1], [0, 0, 1, 1], [], []>} : vector<16x16xf32>, vector<16x4xf32>, vector<16x4xf32> -> vector<16x4xf32>
    %155 = tpu.concatenate %35, %52, %69, %86, %103, %120, %137, %154 in 1 : vector<16x4xf32>, vector<16x4xf32>, vector<16x4xf32>, vector<16x4xf32>, vector<16x4xf32>, vector<16x4xf32>, vector<16x4xf32>, vector<16x4xf32> -> vector<16x32xf32>
    %156 = arith.truncf %155 : vector<16x32xf32> to vector<16x32xbf16>
    %c0_54 = arith.constant 0 : index
    %c0_55 = arith.constant 0 : index
    %157 = vector.load %arg7[%c0_54, %c0_55] : memref<32x32xbf16, #tpu.memory_space<vmem>>, vector<32x32xbf16>
    %cst_56 = arith.constant dense<0.000000e+00> : vector<16x32xf32>
    %158 = tpu.matmul %156, %157, %cst_56 {dimension_numbers = #tpu.dot_dimension_numbers<[1], [0], [0], [1], [0, 0, 1, 1], [], []>} : vector<16x32xbf16>, vector<32x32xbf16>, vector<16x32xf32> -> vector<16x32xf32>
    %c0_57 = arith.constant 0 : index
    %c0_58 = arith.constant 0 : index
    %159 = vector.load %arg8[%c0_57, %c0_58] : memref<1x32xf32, #tpu.memory_space<vmem>>, vector<1x32xf32>
    %160 = vector.broadcast %159 : vector<1x32xf32> to vector<16x32xf32>
    %161 = arith.addf %158, %160 : vector<16x32xf32>
    %162 = arith.addf %1, %161 : vector<16x32xf32>
    %c0_59 = arith.constant 0 : index
    %c0_60 = arith.constant 0 : index
    %163 = vector.load %arg9[%c0_59, %c0_60] : memref<1x32xf32, #tpu.memory_space<vmem>>, vector<1x32xf32>
    %c0_61 = arith.constant 0 : index
    %c0_62 = arith.constant 0 : index
    %164 = vector.load %arg10[%c0_61, %c0_62] : memref<1x32xf32, #tpu.memory_space<vmem>>, vector<1x32xf32>
    %cst_63 = arith.constant dense<0.000000e+00> : vector<16xf32>
    %165 = vector.multi_reduction <add>, %162, %cst_63 [1] : vector<16x32xf32> to vector<16xf32>
    %166 = vector.shape_cast %165 : vector<16xf32> to vector<16x1xf32>
    %cst_64 = arith.constant 3.200000e+01 : f32
    %167 = vector.broadcast %cst_64 : f32 to vector<16x1xf32>
    %168 = arith.divf %166, %167 : vector<16x1xf32>
    %169 = vector.broadcast %168 : vector<16x1xf32> to vector<16x32xf32>
    %170 = arith.subf %162, %169 : vector<16x32xf32>
    %171 = arith.mulf %170, %170 : vector<16x32xf32>
    %cst_65 = arith.constant dense<0.000000e+00> : vector<16xf32>
    %172 = vector.multi_reduction <add>, %171, %cst_65 [1] : vector<16x32xf32> to vector<16xf32>
    %173 = vector.shape_cast %172 : vector<16xf32> to vector<16x1xf32>
    %cst_66 = arith.constant 3.200000e+01 : f32
    %174 = vector.broadcast %cst_66 : f32 to vector<16x1xf32>
    %175 = arith.divf %173, %174 : vector<16x1xf32>
    %cst_67 = arith.constant 9.99999974E-6 : f32
    %176 = vector.broadcast %cst_67 : f32 to vector<16x1xf32>
    %177 = arith.addf %175, %176 : vector<16x1xf32>
    %178 = math.rsqrt %177 : vector<16x1xf32>
    %179 = vector.broadcast %178 : vector<16x1xf32> to vector<16x32xf32>
    %180 = arith.mulf %170, %179 : vector<16x32xf32>
    %181 = vector.broadcast %163 : vector<1x32xf32> to vector<16x32xf32>
    %182 = arith.mulf %180, %181 : vector<16x32xf32>
    %183 = vector.broadcast %164 : vector<1x32xf32> to vector<16x32xf32>
    %184 = arith.addf %182, %183 : vector<16x32xf32>
    %185 = arith.truncf %184 : vector<16x32xf32> to vector<16x32xbf16>
    %c0_68 = arith.constant 0 : index
    %c0_69 = arith.constant 0 : index
    %186 = vector.load %arg11[%c0_68, %c0_69] : memref<32x32xbf16, #tpu.memory_space<vmem>>, vector<32x32xbf16>
    %cst_70 = arith.constant dense<0.000000e+00> : vector<16x32xf32>
    %187 = tpu.matmul %185, %186, %cst_70 {dimension_numbers = #tpu.dot_dimension_numbers<[1], [0], [0], [1], [0, 0, 1, 1], [], []>} : vector<16x32xbf16>, vector<32x32xbf16>, vector<16x32xf32> -> vector<16x32xf32>
    %c0_71 = arith.constant 0 : index
    %c0_72 = arith.constant 0 : index
    %188 = vector.load %arg12[%c0_71, %c0_72] : memref<1x32xf32, #tpu.memory_space<vmem>>, vector<1x32xf32>
    %189 = vector.broadcast %188 : vector<1x32xf32> to vector<16x32xf32>
    %190 = arith.addf %187, %189 : vector<16x32xf32>
    %cst_73 = arith.constant 0.000000e+00 : f32
    %191 = vector.broadcast %cst_73 : f32 to vector<16x32xf32>
    %192 = arith.maximumf %190, %191 : vector<16x32xf32>
    %193 = arith.truncf %192 : vector<16x32xf32> to vector<16x32xbf16>
    %c0_74 = arith.constant 0 : index
    %c0_75 = arith.constant 0 : index
    %194 = vector.load %arg13[%c0_74, %c0_75] : memref<32x32xbf16, #tpu.memory_space<vmem>>, vector<32x32xbf16>
    %cst_76 = arith.constant dense<0.000000e+00> : vector<16x32xf32>
    %195 = tpu.matmul %193, %194, %cst_76 {dimension_numbers = #tpu.dot_dimension_numbers<[1], [0], [0], [1], [0, 0, 1, 1], [], []>} : vector<16x32xbf16>, vector<32x32xbf16>, vector<16x32xf32> -> vector<16x32xf32>
    %c0_77 = arith.constant 0 : index
    %c0_78 = arith.constant 0 : index
    %196 = vector.load %arg14[%c0_77, %c0_78] : memref<1x32xf32, #tpu.memory_space<vmem>>, vector<1x32xf32>
    %197 = vector.broadcast %196 : vector<1x32xf32> to vector<16x32xf32>
    %198 = arith.addf %195, %197 : vector<16x32xf32>
    %199 = arith.addf %184, %198 : vector<16x32xf32>
    %c0_79 = arith.constant 0 : index
    %c0_80 = arith.constant 0 : index
    %200 = vector.load %arg15[%c0_79, %c0_80] : memref<1x32xf32, #tpu.memory_space<vmem>>, vector<1x32xf32>
    %c0_81 = arith.constant 0 : index
    %c0_82 = arith.constant 0 : index
    %201 = vector.load %arg16[%c0_81, %c0_82] : memref<1x32xf32, #tpu.memory_space<vmem>>, vector<1x32xf32>
    %cst_83 = arith.constant dense<0.000000e+00> : vector<16xf32>
    %202 = vector.multi_reduction <add>, %199, %cst_83 [1] : vector<16x32xf32> to vector<16xf32>
    %203 = vector.shape_cast %202 : vector<16xf32> to vector<16x1xf32>
    %cst_84 = arith.constant 3.200000e+01 : f32
    %204 = vector.broadcast %cst_84 : f32 to vector<16x1xf32>
    %205 = arith.divf %203, %204 : vector<16x1xf32>
    %206 = vector.broadcast %205 : vector<16x1xf32> to vector<16x32xf32>
    %207 = arith.subf %199, %206 : vector<16x32xf32>
    %208 = arith.mulf %207, %207 : vector<16x32xf32>
    %cst_85 = arith.constant dense<0.000000e+00> : vector<16xf32>
    %209 = vector.multi_reduction <add>, %208, %cst_85 [1] : vector<16x32xf32> to vector<16xf32>
    %210 = vector.shape_cast %209 : vector<16xf32> to vector<16x1xf32>
    %cst_86 = arith.constant 3.200000e+01 : f32
    %211 = vector.broadcast %cst_86 : f32 to vector<16x1xf32>
    %212 = arith.divf %210, %211 : vector<16x1xf32>
    %cst_87 = arith.constant 9.99999974E-6 : f32
    %213 = vector.broadcast %cst_87 : f32 to vector<16x1xf32>
    %214 = arith.addf %212, %213 : vector<16x1xf32>
    %215 = math.rsqrt %214 : vector<16x1xf32>
    %216 = vector.broadcast %215 : vector<16x1xf32> to vector<16x32xf32>
    %217 = arith.mulf %207, %216 : vector<16x32xf32>
    %218 = vector.broadcast %200 : vector<1x32xf32> to vector<16x32xf32>
    %219 = arith.mulf %217, %218 : vector<16x32xf32>
    %220 = vector.broadcast %201 : vector<1x32xf32> to vector<16x32xf32>
    %221 = arith.addf %219, %220 : vector<16x32xf32>
    %c0_88 = arith.constant 0 : index
    %c0_89 = arith.constant 0 : index
    %c0_90 = arith.constant 0 : index
    %222 = vector.load %arg17[%c0_88, %c0_89, %c0_90] : memref<1x16x32xf32, #tpu.memory_space<vmem>>, vector<1x16x32xf32>
    %223 = vector.shape_cast %222 : vector<1x16x32xf32> to vector<16x32xf32>
    %224 = vector.shape_cast %221 : vector<16x32xf32> to vector<1x16x32xf32>
    tpu.vector_store %arg17[%c0_88, %c0_89, %c0_90], %224 {strides = array<i32>} : memref<1x16x32xf32, #tpu.memory_space<vmem>>, vector<1x16x32xf32>,
    return
  }
  func.func @transform_0(%arg0: i32) -> (i32, i32, i32) {
    %c0_i32 = arith.constant 0 : i32
    %c0_i32_0 = arith.constant 0 : i32
    %c0_i32_1 = arith.constant 0 : i32
    return %arg0, %c0_i32, %c0_i32_0 : i32, i32, i32
  }
  func.func @transform_1(%arg0: i32) -> (i32, i32, i32) {
    %c0_i32 = arith.constant 0 : i32
    %c0_i32_0 = arith.constant 0 : i32
    %c0_i32_1 = arith.constant 0 : i32
    %c0_i32_2 = arith.constant 0 : i32
    return %c0_i32, %c0_i32_0, %c0_i32_1 : i32, i32, i32
  }
  func.func @transform_2(%arg0: i32) -> (i32, i32) {
    %c0_i32 = arith.constant 0 : i32
    %c0_i32_0 = arith.constant 0 : i32
    %c0_i32_1 = arith.constant 0 : i32
    return %c0_i32, %c0_i32_0 : i32, i32
  }
  func.func @transform_3(%arg0: i32) -> (i32, i32) {
    %c0_i32 = arith.constant 0 : i32
    %c0_i32_0 = arith.constant 0 : i32
    %c0_i32_1 = arith.constant 0 : i32
    return %c0_i32, %c0_i32_0 : i32, i32
  }
  func.func @transform_4(%arg0: i32) -> (i32, i32) {
    %c0_i32 = arith.constant 0 : i32
    %c0_i32_0 = arith.constant 0 : i32
    %c0_i32_1 = arith.constant 0 : i32
    return %c0_i32, %c0_i32_0 : i32, i32
  }
  func.func @transform_5(%arg0: i32) -> (i32, i32) {
    %c0_i32 = arith.constant 0 : i32
    %c0_i32_0 = arith.constant 0 : i32
    %c0_i32_1 = arith.constant 0 : i32
    return %c0_i32, %c0_i32_0 : i32, i32
  }
  func.func @transform_6(%arg0: i32) -> (i32, i32) {
    %c0_i32 = arith.constant 0 : i32
    %c0_i32_0 = arith.constant 0 : i32
    %c0_i32_1 = arith.constant 0 : i32
    return %c0_i32, %c0_i32_0 : i32, i32
  }
  func.func @transform_7(%arg0: i32) -> (i32, i32) {
    %c0_i32 = arith.constant 0 : i32
    %c0_i32_0 = arith.constant 0 : i32
    %c0_i32_1 = arith.constant 0 : i32
    return %c0_i32, %c0_i32_0 : i32, i32
  }
  func.func @transform_8(%arg0: i32) -> (i32, i32) {
    %c0_i32 = arith.constant 0 : i32
    %c0_i32_0 = arith.constant 0 : i32
    %c0_i32_1 = arith.constant 0 : i32
    return %c0_i32, %c0_i32_0 : i32, i32
  }
  func.func @transform_9(%arg0: i32) -> (i32, i32) {
    %c0_i32 = arith.constant 0 : i32
    %c0_i32_0 = arith.constant 0 : i32
    %c0_i32_1 = arith.constant 0 : i32
    return %c0_i32, %c0_i32_0 : i32, i32
  }
  func.func @transform_10(%arg0: i32) -> (i32, i32) {
    %c0_i32 = arith.constant 0 : i32
    %c0_i32_0 = arith.constant 0 : i32
    %c0_i32_1 = arith.constant 0 : i32
    return %c0_i32, %c0_i32_0 : i32, i32
  }
  func.func @transform_11(%arg0: i32) -> (i32, i32) {
    %c0_i32 = arith.constant 0 : i32
    %c0_i32_0 = arith.constant 0 : i32
    %c0_i32_1 = arith.constant 0 : i32
    return %c0_i32, %c0_i32_0 : i32, i32
  }
  func.func @transform_12(%arg0: i32) -> (i32, i32) {
    %c0_i32 = arith.constant 0 : i32
    %c0_i32_0 = arith.constant 0 : i32
    %c0_i32_1 = arith.constant 0 : i32
    return %c0_i32, %c0_i32_0 : i32, i32
  }
  func.func @transform_13(%arg0: i32) -> (i32, i32) {
    %c0_i32 = arith.constant 0 : i32
    %c0_i32_0 = arith.constant 0 : i32
    %c0_i32_1 = arith.constant 0 : i32
    return %c0_i32, %c0_i32_0 : i32, i32
  }
  func.func @transform_14(%arg0: i32) -> (i32, i32) {
    %c0_i32 = arith.constant 0 : i32
    %c0_i32_0 = arith.constant 0 : i32
    %c0_i32_1 = arith.constant 0 : i32
    return %c0_i32, %c0_i32_0 : i32, i32
  }
  func.func @transform_15(%arg0: i32) -> (i32, i32) {
    %c0_i32 = arith.constant 0 : i32
    %c0_i32_0 = arith.constant 0 : i32
    %c0_i32_1 = arith.constant 0 : i32
    return %c0_i32, %c0_i32_0 : i32, i32
  }
  func.func @transform_16(%arg0: i32) -> (i32, i32, i32) {
    %c0_i32 = arith.constant 0 : i32
    %c0_i32_0 = arith.constant 0 : i32
    %c0_i32_1 = arith.constant 0 : i32
    return %arg0, %c0_i32, %c0_i32_0 : i32, i32, i32
  }
}

module attributes {stable_mosaic.version = 11 : i64} {
  func.func @_klm_gate_kernel(%arg0: i32, %arg1: i32, %arg2: memref<1x4x64xf32, #tpu.memory_space<vmem>>, %arg3: memref<1x8x64xf32, #tpu.memory_space<vmem>>, %arg4: memref<1x32xf32, #tpu.memory_space<vmem>>, %arg5: memref<1x32xf32, #tpu.memory_space<vmem>>, %arg6: memref<1x32xf32, #tpu.memory_space<vmem>>, %arg7: memref<1x32xf32, #tpu.memory_space<vmem>>, %arg8: memref<32x64xbf16, #tpu.memory_space<vmem>>, %arg9: memref<1x64xf32, #tpu.memory_space<vmem>>, %arg10: memref<1x32xf32, #tpu.memory_space<vmem>>, %arg11: memref<1x32xf32, #tpu.memory_space<vmem>>, %arg12: memref<1x32xf32, #tpu.memory_space<vmem>>, %arg13: memref<1x32xf32, #tpu.memory_space<vmem>>, %arg14: memref<32x32xbf16, #tpu.memory_space<vmem>>, %arg15: memref<1x32xf32, #tpu.memory_space<vmem>>, %arg16: memref<1x32xf32, #tpu.memory_space<vmem>>, %arg17: memref<1x32xf32, #tpu.memory_space<vmem>>, %arg18: memref<1x4x32xf32, #tpu.memory_space<vmem>>, %arg19: memref<4x32xf32, #tpu.memory_space<vmem>>, %arg20: memref<4x32xf32, #tpu.memory_space<vmem>>) attributes {dimension_semantics = [#tpu.dimension_semantics<parallel>, #tpu.dimension_semantics<arbitrary>], iteration_bounds = array<i64: 2, 2>, scalar_prefetch = 0 : i64, scratch_operands = 2 : i64, tpu.core_type = #tpu.core_type<tc>, window_params = [{transform_indices = @transform_0, window_bounds = array<i64: 1, 4, 64>}, {transform_indices = @transform_1, window_bounds = array<i64: 1, 8, 64>}, {pipeline_mode = #tpu.pipeline_mode<synchronous>, transform_indices = @transform_2, window_bounds = array<i64: 1, 32>}, {pipeline_mode = #tpu.pipeline_mode<synchronous>, transform_indices = @transform_3, window_bounds = array<i64: 1, 32>}, {pipeline_mode = #tpu.pipeline_mode<synchronous>, transform_indices = @transform_4, window_bounds = array<i64: 1, 32>}, {pipeline_mode = #tpu.pipeline_mode<synchronous>, transform_indices = @transform_5, window_bounds = array<i64: 1, 32>}, {pipeline_mode = #tpu.pipeline_mode<synchronous>, transform_indices = @transform_6, window_bounds = array<i64: 32, 64>}, {pipeline_mode = #tpu.pipeline_mode<synchronous>, transform_indices = @transform_7, window_bounds = array<i64: 1, 64>}, {pipeline_mode = #tpu.pipeline_mode<synchronous>, transform_indices = @transform_8, window_bounds = array<i64: 1, 32>}, {pipeline_mode = #tpu.pipeline_mode<synchronous>, transform_indices = @transform_9, window_bounds = array<i64: 1, 32>}, {pipeline_mode = #tpu.pipeline_mode<synchronous>, transform_indices = @transform_10, window_bounds = array<i64: 1, 32>}, {pipeline_mode = #tpu.pipeline_mode<synchronous>, transform_indices = @transform_11, window_bounds = array<i64: 1, 32>}, {pipeline_mode = #tpu.pipeline_mode<synchronous>, transform_indices = @transform_12, window_bounds = array<i64: 32, 32>}, {pipeline_mode = #tpu.pipeline_mode<synchronous>, transform_indices = @transform_13, window_bounds = array<i64: 1, 32>}, {pipeline_mode = #tpu.pipeline_mode<synchronous>, transform_indices = @transform_14, window_bounds = array<i64: 1, 32>}, {pipeline_mode = #tpu.pipeline_mode<synchronous>, transform_indices = @transform_15, window_bounds = array<i64: 1, 32>}, {transform_indices = @transform_16, window_bounds = array<i64: 1, 4, 32>}]} {
    %c0_i32 = arith.constant 0 : i32
    %0 = arith.cmpi eq, %arg1, %c0_i32 : i32
    %1 = arith.extui %0 : i1 to i32
    %c0_i32_0 = arith.constant 0 : i32
    %2 = arith.cmpi ne, %1, %c0_i32_0 : i32
    scf.if %2 {
      %cst_59 = arith.constant 0.000000e+00 : f32
      %135 = vector.broadcast %cst_59 : f32 to vector<4x32xf32>
      %c0_60 = arith.constant 0 : index
      %c0_61 = arith.constant 0 : index
      %136 = vector.load %arg19[%c0_60, %c0_61] : memref<4x32xf32, #tpu.memory_space<vmem>>, vector<4x32xf32>
      tpu.vector_store %arg19[%c0_60, %c0_61], %135 {strides = array<i32>} : memref<4x32xf32, #tpu.memory_space<vmem>>, vector<4x32xf32>,
      %cst_62 = arith.constant 0.000000e+00 : f32
      %137 = vector.broadcast %cst_62 : f32 to vector<4x32xf32>
      %c0_63 = arith.constant 0 : index
      %c0_64 = arith.constant 0 : index
      %138 = vector.load %arg20[%c0_63, %c0_64] : memref<4x32xf32, #tpu.memory_space<vmem>>, vector<4x32xf32>
      tpu.vector_store %arg20[%c0_63, %c0_64], %137 {strides = array<i32>} : memref<4x32xf32, #tpu.memory_space<vmem>>, vector<4x32xf32>,
    } else {
    }
    %c0 = arith.constant 0 : index
    %c0_1 = arith.constant 0 : index
    %c0_2 = arith.constant 0 : index
    %3 = vector.load %arg2[%c0, %c0_1, %c0_2] : memref<1x4x64xf32, #tpu.memory_space<vmem>>, vector<1x4x64xf32>
    %4 = vector.shape_cast %3 : vector<1x4x64xf32> to vector<4x64xf32>
    %c0_3 = arith.constant 0 : index
    %c0_4 = arith.constant 0 : index
    %c0_5 = arith.constant 0 : index
    %5 = vector.load %arg3[%c0_3, %c0_4, %c0_5] : memref<1x8x64xf32, #tpu.memory_space<vmem>>, vector<1x8x64xf32>
    %6 = vector.shape_cast %5 : vector<1x8x64xf32> to vector<8x64xf32>
    %7 = vector.extract_strided_slice %4 {offsets = [0, 0], sizes = [4, 32], strides = [1, 1]} : vector<4x64xf32> to vector<4x32xf32>
    %8 = vector.extract_strided_slice %6 {offsets = [0, 0], sizes = [8, 32], strides = [1, 1]} : vector<8x64xf32> to vector<8x32xf32>
    %9 = vector.extract_strided_slice %6 {offsets = [0, 32], sizes = [8, 32], strides = [1, 1]} : vector<8x64xf32> to vector<8x32xf32>
    %c0_6 = arith.constant 0 : index
    %c0_7 = arith.constant 0 : index
    %10 = vector.load %arg4[%c0_6, %c0_7] : memref<1x32xf32, #tpu.memory_space<vmem>>, vector<1x32xf32>
    %c0_8 = arith.constant 0 : index
    %c0_9 = arith.constant 0 : index
    %11 = vector.load %arg5[%c0_8, %c0_9] : memref<1x32xf32, #tpu.memory_space<vmem>>, vector<1x32xf32>
    %cst = arith.constant dense<0.000000e+00> : vector<4xf32>
    %12 = vector.multi_reduction <add>, %7, %cst [1] : vector<4x32xf32> to vector<4xf32>
    %13 = vector.shape_cast %12 : vector<4xf32> to vector<4x1xf32>
    %cst_10 = arith.constant 3.200000e+01 : f32
    %14 = vector.broadcast %cst_10 : f32 to vector<4x1xf32>
    %15 = arith.divf %13, %14 : vector<4x1xf32>
    %16 = vector.broadcast %15 : vector<4x1xf32> to vector<4x32xf32>
    %17 = arith.subf %7, %16 : vector<4x32xf32>
    %18 = arith.mulf %17, %17 : vector<4x32xf32>
    %cst_11 = arith.constant dense<0.000000e+00> : vector<4xf32>
    %19 = vector.multi_reduction <add>, %18, %cst_11 [1] : vector<4x32xf32> to vector<4xf32>
    %20 = vector.shape_cast %19 : vector<4xf32> to vector<4x1xf32>
    %cst_12 = arith.constant 3.200000e+01 : f32
    %21 = vector.broadcast %cst_12 : f32 to vector<4x1xf32>
    %22 = arith.divf %20, %21 : vector<4x1xf32>
    %cst_13 = arith.constant 9.99999974E-6 : f32
    %23 = vector.broadcast %cst_13 : f32 to vector<4x1xf32>
    %24 = arith.addf %22, %23 : vector<4x1xf32>
    %25 = math.rsqrt %24 : vector<4x1xf32>
    %26 = vector.broadcast %25 : vector<4x1xf32> to vector<4x32xf32>
    %27 = arith.mulf %17, %26 : vector<4x32xf32>
    %28 = vector.broadcast %10 : vector<1x32xf32> to vector<4x32xf32>
    %29 = arith.mulf %27, %28 : vector<4x32xf32>
    %30 = vector.broadcast %11 : vector<1x32xf32> to vector<4x32xf32>
    %31 = arith.addf %29, %30 : vector<4x32xf32>
    %c0_14 = arith.constant 0 : index
    %c0_15 = arith.constant 0 : index
    %32 = vector.load %arg6[%c0_14, %c0_15] : memref<1x32xf32, #tpu.memory_space<vmem>>, vector<1x32xf32>
    %c0_16 = arith.constant 0 : index
    %c0_17 = arith.constant 0 : index
    %33 = vector.load %arg7[%c0_16, %c0_17] : memref<1x32xf32, #tpu.memory_space<vmem>>, vector<1x32xf32>
    %cst_18 = arith.constant dense<0.000000e+00> : vector<8xf32>
    %34 = vector.multi_reduction <add>, %8, %cst_18 [1] : vector<8x32xf32> to vector<8xf32>
    %35 = vector.shape_cast %34 : vector<8xf32> to vector<8x1xf32>
    %cst_19 = arith.constant 3.200000e+01 : f32
    %36 = vector.broadcast %cst_19 : f32 to vector<8x1xf32>
    %37 = arith.divf %35, %36 : vector<8x1xf32>
    %38 = vector.broadcast %37 : vector<8x1xf32> to vector<8x32xf32>
    %39 = arith.subf %8, %38 : vector<8x32xf32>
    %40 = arith.mulf %39, %39 : vector<8x32xf32>
    %cst_20 = arith.constant dense<0.000000e+00> : vector<8xf32>
    %41 = vector.multi_reduction <add>, %40, %cst_20 [1] : vector<8x32xf32> to vector<8xf32>
    %42 = vector.shape_cast %41 : vector<8xf32> to vector<8x1xf32>
    %cst_21 = arith.constant 3.200000e+01 : f32
    %43 = vector.broadcast %cst_21 : f32 to vector<8x1xf32>
    %44 = arith.divf %42, %43 : vector<8x1xf32>
    %cst_22 = arith.constant 9.99999974E-6 : f32
    %45 = vector.broadcast %cst_22 : f32 to vector<8x1xf32>
    %46 = arith.addf %44, %45 : vector<8x1xf32>
    %47 = math.rsqrt %46 : vector<8x1xf32>
    %48 = vector.broadcast %47 : vector<8x1xf32> to vector<8x32xf32>
    %49 = arith.mulf %39, %48 : vector<8x32xf32>
    %50 = vector.broadcast %32 : vector<1x32xf32> to vector<8x32xf32>
    %51 = arith.mulf %49, %50 : vector<8x32xf32>
    %52 = vector.broadcast %33 : vector<1x32xf32> to vector<8x32xf32>
    %53 = arith.addf %51, %52 : vector<8x32xf32>
    %54 = vector.shape_cast %31 : vector<4x32xf32> to vector<4x1x32xf32>
    %55 = vector.shape_cast %53 : vector<8x32xf32> to vector<1x8x32xf32>
    %56 = vector.broadcast %54 : vector<4x1x32xf32> to vector<4x8x32xf32>
    %57 = vector.broadcast %55 : vector<1x8x32xf32> to vector<4x8x32xf32>
    %58 = arith.mulf %56, %57 : vector<4x8x32xf32>
    %59 = vector.shape_cast %58 : vector<4x8x32xf32> to vector<32x32xf32>
    %60 = arith.truncf %59 : vector<32x32xf32> to vector<32x32xbf16>
    %c0_23 = arith.constant 0 : index
    %c0_24 = arith.constant 0 : index
    %61 = vector.load %arg8[%c0_23, %c0_24] : memref<32x64xbf16, #tpu.memory_space<vmem>>, vector<32x64xbf16>
    %cst_25 = arith.constant dense<0.000000e+00> : vector<32x64xf32>
    %62 = tpu.matmul %60, %61, %cst_25 {dimension_numbers = #tpu.dot_dimension_numbers<[1], [0], [0], [1], [0, 0, 1, 1], [], []>} : vector<32x32xbf16>, vector<32x64xbf16>, vector<32x64xf32> -> vector<32x64xf32>
    %c0_26 = arith.constant 0 : index
    %c0_27 = arith.constant 0 : index
    %63 = vector.load %arg9[%c0_26, %c0_27] : memref<1x64xf32, #tpu.memory_space<vmem>>, vector<1x64xf32>
    %64 = vector.broadcast %63 : vector<1x64xf32> to vector<32x64xf32>
    %65 = arith.addf %62, %64 : vector<32x64xf32>
    %66 = vector.extract_strided_slice %65 {offsets = [0, 0], sizes = [32, 32], strides = [1, 1]} : vector<32x64xf32> to vector<32x32xf32>
    %c0_28 = arith.constant 0 : index
    %c0_29 = arith.constant 0 : index
    %67 = vector.load %arg10[%c0_28, %c0_29] : memref<1x32xf32, #tpu.memory_space<vmem>>, vector<1x32xf32>
    %c0_30 = arith.constant 0 : index
    %c0_31 = arith.constant 0 : index
    %68 = vector.load %arg11[%c0_30, %c0_31] : memref<1x32xf32, #tpu.memory_space<vmem>>, vector<1x32xf32>
    %cst_32 = arith.constant dense<0.000000e+00> : vector<32xf32>
    %69 = vector.multi_reduction <add>, %66, %cst_32 [1] : vector<32x32xf32> to vector<32xf32>
    %70 = vector.shape_cast %69 : vector<32xf32> to vector<32x1xf32>
    %cst_33 = arith.constant 3.200000e+01 : f32
    %71 = vector.broadcast %cst_33 : f32 to vector<32x1xf32>
    %72 = arith.divf %70, %71 : vector<32x1xf32>
    %73 = vector.broadcast %72 : vector<32x1xf32> to vector<32x32xf32>
    %74 = arith.subf %66, %73 : vector<32x32xf32>
    %75 = arith.mulf %74, %74 : vector<32x32xf32>
    %cst_34 = arith.constant dense<0.000000e+00> : vector<32xf32>
    %76 = vector.multi_reduction <add>, %75, %cst_34 [1] : vector<32x32xf32> to vector<32xf32>
    %77 = vector.shape_cast %76 : vector<32xf32> to vector<32x1xf32>
    %cst_35 = arith.constant 3.200000e+01 : f32
    %78 = vector.broadcast %cst_35 : f32 to vector<32x1xf32>
    %79 = arith.divf %77, %78 : vector<32x1xf32>
    %cst_36 = arith.constant 9.99999974E-6 : f32
    %80 = vector.broadcast %cst_36 : f32 to vector<32x1xf32>
    %81 = arith.addf %79, %80 : vector<32x1xf32>
    %82 = math.rsqrt %81 : vector<32x1xf32>
    %83 = vector.broadcast %82 : vector<32x1xf32> to vector<32x32xf32>
    %84 = arith.mulf %74, %83 : vector<32x32xf32>
    %85 = vector.broadcast %67 : vector<1x32xf32> to vector<32x32xf32>
    %86 = arith.mulf %84, %85 : vector<32x32xf32>
    %87 = vector.broadcast %68 : vector<1x32xf32> to vector<32x32xf32>
    %88 = arith.addf %86, %87 : vector<32x32xf32>
    %89 = vector.shape_cast %88 : vector<32x32xf32> to vector<4x8x32xf32>
    %90 = vector.extract_strided_slice %65 {offsets = [0, 32], sizes = [32, 32], strides = [1, 1]} : vector<32x64xf32> to vector<32x32xf32>
    %c0_37 = arith.constant 0 : index
    %c0_38 = arith.constant 0 : index
    %91 = vector.load %arg12[%c0_37, %c0_38] : memref<1x32xf32, #tpu.memory_space<vmem>>, vector<1x32xf32>
    %c0_39 = arith.constant 0 : index
    %c0_40 = arith.constant 0 : index
    %92 = vector.load %arg13[%c0_39, %c0_40] : memref<1x32xf32, #tpu.memory_space<vmem>>, vector<1x32xf32>
    %cst_41 = arith.constant dense<0.000000e+00> : vector<32xf32>
    %93 = vector.multi_reduction <add>, %90, %cst_41 [1] : vector<32x32xf32> to vector<32xf32>
    %94 = vector.shape_cast %93 : vector<32xf32> to vector<32x1xf32>
    %cst_42 = arith.constant 3.200000e+01 : f32
    %95 = vector.broadcast %cst_42 : f32 to vector<32x1xf32>
    %96 = arith.divf %94, %95 : vector<32x1xf32>
    %97 = vector.broadcast %96 : vector<32x1xf32> to vector<32x32xf32>
    %98 = arith.subf %90, %97 : vector<32x32xf32>
    %99 = arith.mulf %98, %98 : vector<32x32xf32>
    %cst_43 = arith.constant dense<0.000000e+00> : vector<32xf32>
    %100 = vector.multi_reduction <add>, %99, %cst_43 [1] : vector<32x32xf32> to vector<32xf32>
    %101 = vector.shape_cast %100 : vector<32xf32> to vector<32x1xf32>
    %cst_44 = arith.constant 3.200000e+01 : f32
    %102 = vector.broadcast %cst_44 : f32 to vector<32x1xf32>
    %103 = arith.divf %101, %102 : vector<32x1xf32>
    %cst_45 = arith.constant 9.99999974E-6 : f32
    %104 = vector.broadcast %cst_45 : f32 to vector<32x1xf32>
    %105 = arith.addf %103, %104 : vector<32x1xf32>
    %106 = math.rsqrt %105 : vector<32x1xf32>
    %107 = vector.broadcast %106 : vector<32x1xf32> to vector<32x32xf32>
    %108 = arith.mulf %98, %107 : vector<32x32xf32>
    %109 = vector.broadcast %91 : vector<1x32xf32> to vector<32x32xf32>
    %110 = arith.mulf %108, %109 : vector<32x32xf32>
    %111 = vector.broadcast %92 : vector<1x32xf32> to vector<32x32xf32>
    %112 = arith.addf %110, %111 : vector<32x32xf32>
    %113 = arith.negf %112 : vector<32x32xf32>
    %114 = math.exp %113 : vector<32x32xf32>
    %cst_46 = arith.constant 1.000000e+00 : f32
    %115 = vector.broadcast %cst_46 : f32 to vector<32x32xf32>
    %116 = arith.addf %115, %114 : vector<32x32xf32>
    %117 = arith.divf %115, %116 : vector<32x32xf32>
    %118 = vector.shape_cast %117 : vector<32x32xf32> to vector<4x8x32xf32>
    %c0_47 = arith.constant 0 : index
    %c0_48 = arith.constant 0 : index
    %119 = vector.load %arg19[%c0_47, %c0_48] : memref<4x32xf32, #tpu.memory_space<vmem>>, vector<4x32xf32>
    %cst_49 = arith.constant dense<0.000000e+00> : vector<4x32xf32>
    %120 = vector.multi_reduction <add>, %89, %cst_49 [1] : vector<4x8x32xf32> to vector<4x32xf32>
    %121 = arith.addf %119, %120 : vector<4x32xf32>
    %c0_50 = arith.constant 0 : index
    %c0_51 = arith.constant 0 : index
    %122 = vector.load %arg19[%c0_50, %c0_51] : memref<4x32xf32, #tpu.memory_space<vmem>>, vector<4x32xf32>
    tpu.vector_store %arg19[%c0_50, %c0_51], %121 {strides = array<i32>} : memref<4x32xf32, #tpu.memory_space<vmem>>, vector<4x32xf32>,
    %c0_52 = arith.constant 0 : index
    %c0_53 = arith.constant 0 : index
    %123 = vector.load %arg20[%c0_52, %c0_53] : memref<4x32xf32, #tpu.memory_space<vmem>>, vector<4x32xf32>
    %cst_54 = arith.constant 1.000000e+00 : f32
    %124 = vector.broadcast %cst_54 : f32 to vector<4x8x32xf32>
    %125 = arith.addf %124, %118 : vector<4x8x32xf32>
    %126 = vector.shape_cast %9 : vector<8x32xf32> to vector<1x8x32xf32>
    %127 = vector.broadcast %126 : vector<1x8x32xf32> to vector<4x8x32xf32>
    %128 = arith.mulf %125, %127 : vector<4x8x32xf32>
    %cst_55 = arith.constant dense<0.000000e+00> : vector<4x32xf32>
    %129 = vector.multi_reduction <add>, %128, %cst_55 [1] : vector<4x8x32xf32> to vector<4x32xf32>
    %130 = arith.addf %123, %129 : vector<4x32xf32>
    %c0_56 = arith.constant 0 : index
    %c0_57 = arith.constant 0 : index
    %131 = vector.load %arg20[%c0_56, %c0_57] : memref<4x32xf32, #tpu.memory_space<vmem>>, vector<4x32xf32>
    tpu.vector_store %arg20[%c0_56, %c0_57], %130 {strides = array<i32>} : memref<4x32xf32, #tpu.memory_space<vmem>>, vector<4x32xf32>,
    %c1_i32 = arith.constant 1 : i32
    %132 = arith.cmpi eq, %arg1, %c1_i32 : i32
    %133 = arith.extui %132 : i1 to i32
    %c0_i32_58 = arith.constant 0 : i32
    %134 = arith.cmpi ne, %133, %c0_i32_58 : i32
    scf.if %134 {
      %135 = vector.extract_strided_slice %4 {offsets = [0, 32], sizes = [4, 32], strides = [1, 1]} : vector<4x64xf32> to vector<4x32xf32>
      %c0_59 = arith.constant 0 : index
      %c0_60 = arith.constant 0 : index
      %136 = vector.load %arg19[%c0_59, %c0_60] : memref<4x32xf32, #tpu.memory_space<vmem>>, vector<4x32xf32>
      %cst_61 = arith.constant 6.250000e-02 : f32
      %137 = vector.broadcast %cst_61 : f32 to vector<4x32xf32>
      %138 = arith.mulf %136, %137 : vector<4x32xf32>
      %139 = arith.negf %138 : vector<4x32xf32>
      %140 = math.exp %139 : vector<4x32xf32>
      %cst_62 = arith.constant 1.000000e+00 : f32
      %141 = vector.broadcast %cst_62 : f32 to vector<4x32xf32>
      %142 = arith.addf %141, %140 : vector<4x32xf32>
      %143 = arith.divf %141, %142 : vector<4x32xf32>
      %cst_63 = arith.constant 1.000000e+00 : f32
      %144 = vector.broadcast %cst_63 : f32 to vector<4x32xf32>
      %145 = arith.addf %144, %143 : vector<4x32xf32>
      %146 = arith.mulf %145, %135 : vector<4x32xf32>
      %c0_64 = arith.constant 0 : index
      %c0_65 = arith.constant 0 : index
      %147 = vector.load %arg20[%c0_64, %c0_65] : memref<4x32xf32, #tpu.memory_space<vmem>>, vector<4x32xf32>
      %cst_66 = arith.constant 6.250000e-02 : f32
      %148 = vector.broadcast %cst_66 : f32 to vector<4x32xf32>
      %149 = arith.mulf %147, %148 : vector<4x32xf32>
      %150 = arith.addf %146, %149 : vector<4x32xf32>
      %cst_67 = arith.constant 5.000000e-01 : f32
      %151 = vector.broadcast %cst_67 : f32 to vector<4x32xf32>
      %152 = arith.mulf %150, %151 : vector<4x32xf32>
      %153 = arith.truncf %152 : vector<4x32xf32> to vector<4x32xbf16>
      %c0_68 = arith.constant 0 : index
      %c0_69 = arith.constant 0 : index
      %154 = vector.load %arg14[%c0_68, %c0_69] : memref<32x32xbf16, #tpu.memory_space<vmem>>, vector<32x32xbf16>
      %cst_70 = arith.constant dense<0.000000e+00> : vector<4x32xf32>
      %155 = tpu.matmul %153, %154, %cst_70 {dimension_numbers = #tpu.dot_dimension_numbers<[1], [0], [0], [1], [0, 0, 1, 1], [], []>} : vector<4x32xbf16>, vector<32x32xbf16>, vector<4x32xf32> -> vector<4x32xf32>
      %c0_71 = arith.constant 0 : index
      %c0_72 = arith.constant 0 : index
      %156 = vector.load %arg15[%c0_71, %c0_72] : memref<1x32xf32, #tpu.memory_space<vmem>>, vector<1x32xf32>
      %157 = vector.broadcast %156 : vector<1x32xf32> to vector<4x32xf32>
      %158 = arith.addf %155, %157 : vector<4x32xf32>
      %c0_73 = arith.constant 0 : index
      %c0_74 = arith.constant 0 : index
      %159 = vector.load %arg16[%c0_73, %c0_74] : memref<1x32xf32, #tpu.memory_space<vmem>>, vector<1x32xf32>
      %c0_75 = arith.constant 0 : index
      %c0_76 = arith.constant 0 : index
      %160 = vector.load %arg17[%c0_75, %c0_76] : memref<1x32xf32, #tpu.memory_space<vmem>>, vector<1x32xf32>
      %cst_77 = arith.constant dense<0.000000e+00> : vector<4xf32>
      %161 = vector.multi_reduction <add>, %158, %cst_77 [1] : vector<4x32xf32> to vector<4xf32>
      %162 = vector.shape_cast %161 : vector<4xf32> to vector<4x1xf32>
      %cst_78 = arith.constant 3.200000e+01 : f32
      %163 = vector.broadcast %cst_78 : f32 to vector<4x1xf32>
      %164 = arith.divf %162, %163 : vector<4x1xf32>
      %165 = vector.broadcast %164 : vector<4x1xf32> to vector<4x32xf32>
      %166 = arith.subf %158, %165 : vector<4x32xf32>
      %167 = arith.mulf %166, %166 : vector<4x32xf32>
      %cst_79 = arith.constant dense<0.000000e+00> : vector<4xf32>
      %168 = vector.multi_reduction <add>, %167, %cst_79 [1] : vector<4x32xf32> to vector<4xf32>
      %169 = vector.shape_cast %168 : vector<4xf32> to vector<4x1xf32>
      %cst_80 = arith.constant 3.200000e+01 : f32
      %170 = vector.broadcast %cst_80 : f32 to vector<4x1xf32>
      %171 = arith.divf %169, %170 : vector<4x1xf32>
      %cst_81 = arith.constant 9.99999974E-6 : f32
      %172 = vector.broadcast %cst_81 : f32 to vector<4x1xf32>
      %173 = arith.addf %171, %172 : vector<4x1xf32>
      %174 = math.rsqrt %173 : vector<4x1xf32>
      %175 = vector.broadcast %174 : vector<4x1xf32> to vector<4x32xf32>
      %176 = arith.mulf %166, %175 : vector<4x32xf32>
      %177 = vector.broadcast %159 : vector<1x32xf32> to vector<4x32xf32>
      %178 = arith.mulf %176, %177 : vector<4x32xf32>
      %179 = vector.broadcast %160 : vector<1x32xf32> to vector<4x32xf32>
      %180 = arith.addf %178, %179 : vector<4x32xf32>
      %cst_82 = arith.constant 0.000000e+00 : f32
      %181 = vector.broadcast %cst_82 : f32 to vector<4x32xf32>
      %182 = arith.maximumf %180, %181 : vector<4x32xf32>
      %c0_83 = arith.constant 0 : index
      %c0_84 = arith.constant 0 : index
      %c0_85 = arith.constant 0 : index
      %183 = vector.load %arg18[%c0_83, %c0_84, %c0_85] : memref<1x4x32xf32, #tpu.memory_space<vmem>>, vector<1x4x32xf32>
      %184 = vector.shape_cast %183 : vector<1x4x32xf32> to vector<4x32xf32>
      %185 = vector.shape_cast %182 : vector<4x32xf32> to vector<1x4x32xf32>
      tpu.vector_store %arg18[%c0_83, %c0_84, %c0_85], %185 {strides = array<i32>} : memref<1x4x32xf32, #tpu.memory_space<vmem>>, vector<1x4x32xf32>,
    } else {
    }
    return
  }
  func.func @transform_0(%arg0: i32, %arg1: i32) -> (i32, i32, i32) {
    %c0_i32 = arith.constant 0 : i32
    %c0_i32_0 = arith.constant 0 : i32
    %c0_i32_1 = arith.constant 0 : i32
    return %arg0, %c0_i32, %c0_i32_0 : i32, i32, i32
  }
  func.func @transform_1(%arg0: i32, %arg1: i32) -> (i32, i32, i32) {
    %c0_i32 = arith.constant 0 : i32
    %c0_i32_0 = arith.constant 0 : i32
    return %arg0, %arg1, %c0_i32 : i32, i32, i32
  }
  func.func @transform_2(%arg0: i32, %arg1: i32) -> (i32, i32) {
    %c0_i32 = arith.constant 0 : i32
    %c0_i32_0 = arith.constant 0 : i32
    %c0_i32_1 = arith.constant 0 : i32
    return %c0_i32, %c0_i32_0 : i32, i32
  }
  func.func @transform_3(%arg0: i32, %arg1: i32) -> (i32, i32) {
    %c0_i32 = arith.constant 0 : i32
    %c0_i32_0 = arith.constant 0 : i32
    %c0_i32_1 = arith.constant 0 : i32
    return %c0_i32, %c0_i32_0 : i32, i32
  }
  func.func @transform_4(%arg0: i32, %arg1: i32) -> (i32, i32) {
    %c0_i32 = arith.constant 0 : i32
    %c0_i32_0 = arith.constant 0 : i32
    %c0_i32_1 = arith.constant 0 : i32
    return %c0_i32, %c0_i32_0 : i32, i32
  }
  func.func @transform_5(%arg0: i32, %arg1: i32) -> (i32, i32) {
    %c0_i32 = arith.constant 0 : i32
    %c0_i32_0 = arith.constant 0 : i32
    %c0_i32_1 = arith.constant 0 : i32
    return %c0_i32, %c0_i32_0 : i32, i32
  }
  func.func @transform_6(%arg0: i32, %arg1: i32) -> (i32, i32) {
    %c0_i32 = arith.constant 0 : i32
    %c0_i32_0 = arith.constant 0 : i32
    %c0_i32_1 = arith.constant 0 : i32
    return %c0_i32, %c0_i32_0 : i32, i32
  }
  func.func @transform_7(%arg0: i32, %arg1: i32) -> (i32, i32) {
    %c0_i32 = arith.constant 0 : i32
    %c0_i32_0 = arith.constant 0 : i32
    %c0_i32_1 = arith.constant 0 : i32
    return %c0_i32, %c0_i32_0 : i32, i32
  }
  func.func @transform_8(%arg0: i32, %arg1: i32) -> (i32, i32) {
    %c0_i32 = arith.constant 0 : i32
    %c0_i32_0 = arith.constant 0 : i32
    %c0_i32_1 = arith.constant 0 : i32
    return %c0_i32, %c0_i32_0 : i32, i32
  }
  func.func @transform_9(%arg0: i32, %arg1: i32) -> (i32, i32) {
    %c0_i32 = arith.constant 0 : i32
    %c0_i32_0 = arith.constant 0 : i32
    %c0_i32_1 = arith.constant 0 : i32
    return %c0_i32, %c0_i32_0 : i32, i32
  }
  func.func @transform_10(%arg0: i32, %arg1: i32) -> (i32, i32) {
    %c0_i32 = arith.constant 0 : i32
    %c0_i32_0 = arith.constant 0 : i32
    %c0_i32_1 = arith.constant 0 : i32
    return %c0_i32, %c0_i32_0 : i32, i32
  }
  func.func @transform_11(%arg0: i32, %arg1: i32) -> (i32, i32) {
    %c0_i32 = arith.constant 0 : i32
    %c0_i32_0 = arith.constant 0 : i32
    %c0_i32_1 = arith.constant 0 : i32
    return %c0_i32, %c0_i32_0 : i32, i32
  }
  func.func @transform_12(%arg0: i32, %arg1: i32) -> (i32, i32) {
    %c0_i32 = arith.constant 0 : i32
    %c0_i32_0 = arith.constant 0 : i32
    %c0_i32_1 = arith.constant 0 : i32
    return %c0_i32, %c0_i32_0 : i32, i32
  }
  func.func @transform_13(%arg0: i32, %arg1: i32) -> (i32, i32) {
    %c0_i32 = arith.constant 0 : i32
    %c0_i32_0 = arith.constant 0 : i32
    %c0_i32_1 = arith.constant 0 : i32
    return %c0_i32, %c0_i32_0 : i32, i32
  }
  func.func @transform_14(%arg0: i32, %arg1: i32) -> (i32, i32) {
    %c0_i32 = arith.constant 0 : i32
    %c0_i32_0 = arith.constant 0 : i32
    %c0_i32_1 = arith.constant 0 : i32
    return %c0_i32, %c0_i32_0 : i32, i32
  }
  func.func @transform_15(%arg0: i32, %arg1: i32) -> (i32, i32) {
    %c0_i32 = arith.constant 0 : i32
    %c0_i32_0 = arith.constant 0 : i32
    %c0_i32_1 = arith.constant 0 : i32
    return %c0_i32, %c0_i32_0 : i32, i32
  }
  func.func @transform_16(%arg0: i32, %arg1: i32) -> (i32, i32, i32) {
    %c0_i32 = arith.constant 0 : i32
    %c0_i32_0 = arith.constant 0 : i32
    %c0_i32_1 = arith.constant 0 : i32
    return %arg0, %c0_i32, %c0_i32_0 : i32, i32, i32
  }
}

</mosaic_0001>

<bundles_post_ra>
// kernel: klm_forward.8
= control target key start
LH: loop header
LB: loop body
LE: loop exit
PB: predicated region body
PF: predicated region fallthrough
CT: control target
= control target key end

     0   :  { %12 = vsyncpa [#allocation3], 0  ;;  %s1031_s0 = inlined_call_operand.vmem [shape: f32[2,16,32], index: 0, kind: input, shape index: {}]   ;;  %s1032_s1 = inlined_call_operand.vmem [shape: f32[1,32], index: 1, kind: input, shape index: {}]   ;;  %s1033_s2 = inlined_call_operand.hbm [shape: f32[1,32], index: 2, kind: input, shape index: {}]   ;;  %s1034_s3 = inlined_call_operand.hbm [shape: bf16[32,64], index: 3, kind: input, shape index: {}]   ;;  %s1035_s4 = inlined_call_operand.hbm [shape: f32[1,64], index: 4, kind: input, shape index: {}]   ;;  %s1036_s5 = inlined_call_operand.hbm [shape: f32[2,16,32], index: 5, kind: output, shape index: {0}]   ;;  %s1037_s6 = inlined_call_operand.vmem [shape: f32[2,16,64], index: 6, kind: output, shape index: {1}]  }
   0x1   :  { %13 = vsyncpa [#allocation6], 0 }
   0x2   :  { %14 = vsyncpa [#allocation4], 0 }
   0x3   :  { %16 = vsyncpa [#allocation4 + $0x1], 0  ;;  %s884_s21 = smov 0   ;;  %s886_s22 = smov 0  }
   0x4   :  { %s888_s23 = smov 0   ;;  %s890_s24 = smov 0  }
   0x5 LB: > { %s905_s25 = sadd.s32 4294967295, %s839_s24   ;;  %s561_s26 = sadd.s32 4294967294, %s839_s24   ;;  %s839_s24 = sphi %s890_s24, %s1047_s24   ;;  %s835_s23 = sphi %s888_s23, %s1046_s23   ;;  %s831_s22 = sphi %s886_s22, %s1045_s22   ;;  %s827_s21 = sphi %s884_s21, %s1044_s21  }
   0x6   : > { %s909_s27 = sadd.s32 1, %s839_s24   ;;  %s139_s28 = sadd.s32 1, %s835_s23 }
   0x7   : > { %s136_s29 = ssub.s32 %s839_s24, %s909_s27  ;;  %p149_p0 = scmp.ne.s32.totalorder %s835_s23, %s831_s22 }
   0x8   : > { %p137_p1 = scmp.eq.s32.totalorder %s136_s29, 0  ;;  %p150_p2 = scmp.eq.s32.totalorder %s905_s25, 1 }
   0x9   : > { %p155_p3 = scmp.ne.s32.totalorder %s831_s22, %s827_s21  ;;  %p156_p4 = scmp.eq.s32.totalorder %s561_s26, 1 }
   0xa   : > { %s920_s30 = scalar_select %p137_p1, %s835_s23, %s139_s28  }
   0xb   : > { %p922_p5 = por %p150_p2, %p149_p0  ;;  %p926_p6 = por %p156_p4, %p155_p3 }
   0xc   : > { %p562_p7 = scmp.ge.s32.totalorder %s839_s24, 1  ;;  %p189_p8 = scmp.lt.s32.totalorder %s839_s24, 3 }
   0xd   : > { %p623_p9 = scmp.eq.s32.totalorder %s905_s25, 0  ;;  %s215_s12 = sshll.u32 %s1034_s3, 4  ;;  %s216_s12 = int_to_ptr.hbm [resolvable:$true] %s215_s12 }
   0xe   : > { %p933_p10 = pnand %p562_p7, %p189_p8  ;;  %s841_s13 = smov [#allocation5]  }
   0xf   : > { %s217_s14 = sshll.u32 %s841_s13, 4  ;;  %s204_s18 = sshll.u32 %s1033_s2, 4  ;;  %s218_s14 = int_to_ptr.vmem [resolvable:$true] %s217_s14  ;;  %s205_s18 = int_to_ptr.hbm [resolvable:$true] %s204_s18 }
  0x10   : > { %p609_p11 = pneg %p933_p10  ;;  %s842_s19 = smov 64  }
  0x11   : > { %s843_s20 = smov 4   ;;  %s844_s26 = smov [#allocation2]  }
  0x12   : > { %p944_p12 = pnand %p623_p9, %p609_p11  ;;  %s206_s28 = sshll.u32 %s844_s26, 4  ;;  %s207_s28 = int_to_ptr.vmem [resolvable:$true] %s206_s28 }
  0x13   : > { %s230_s11 = sshll.u32 %s1035_s4, 4  ;;  %s845_s13 = smov [#allocation7]   ;;  %s231_s11 = int_to_ptr.hbm [resolvable:$true] %s230_s11 }
  0x14   : > { %615 = dma.hbm_to_vmem [thread:$0]  (!%p944_p12), %s216_s12, 256, %s218_s14, [#allocation6], %s842_s19, %s842_s19, %s843_s20  }
  0x15   : > { %612 = dma.hbm_to_vmem [thread:$0]  (!%p944_p12), %s205_s18, 16, %s207_s28, [#allocation3]  }
  0x16   : > { %s232_s16 = sshll.u32 %s845_s13, 4  ;;  %253 = sbr.rel (%p933_p10) target bundleno = 452 (0x1c4), region = 40  ;;  %s233_s16 = int_to_ptr.vmem [resolvable:$true] %s232_s16 }
  0x17   : > { %618 = dma.hbm_to_vmem [thread:$0]  (!%p944_p12), %s231_s11, 16, %s233_s16, [#allocation6]  }
  0x1b   : > { %814 = dma.done.wait (%p623_p9), [#allocation3], 16  }
  0x1c   : > { %816 = vsyncadd (%p623_p9), [#allocation3], 4294967280 }
  0x1d   : > { %818 = dma.done.wait (%p623_p9), [#allocation6], 272  }
  0x1e   : > { %820 = vsyncadd (%p623_p9), [#allocation6], 4294967024  ;;  %p299_p13 = scmp.lt.s32.totalorder %s905_s25, 1  ;;  %vm314_vm0 = vcmask 261120   ;;  %v846_v4 = vmov 32.0   ;;  %v593_v21 = vld [vmem:[#allocation5 + $0x8] sm:$0xff] }
  0x1f   : > { %673 = vrcp.f32 %v846_v4  ;;  %408 = vmatpush.bf16.msra.mxu0 %v593_v21  ;;  %v592_v23 = vld [vmem:[#allocation5] sm:$0xff]  ;;  %s289_s18 = sand.u32 1, %s831_s22   ;;  %v670_v37 = vld [vmem:[%s1032_s1] ss:$0 sm:$0xff]  ;;  %s594_s29 = sshll.u32 %s905_s25, 4 }
  0x20   : > { %s972_s12 = scalar_select %p299_p13, %s905_s25, 1  ;;  %v671_v41 = vld [vmem:[#allocation2] ss:$0 sm:$0xff] }
  0x21   : > { %s571_s26 = sshll.u32 %s289_s18, 4  ;;  %s436_s13 = scalar_lea.hbm %s1036_s5, %s594_s29 }
  0x22   : > { %s1038_s9 = sshll.u32 %s972_s12, 4  ;;  %s291_s28 = scalar_lea.vmem [#allocation8], %s571_s26 }
  0x23   : > { %s303_s17 = scalar_lea.vmem %s1031_s0, %s1038_s9  ;;  %409 = vmatpush.bf16.msra.mxu0 %v592_v23  ;;  %s437_s16 = sshll.u32 %s291_s28, 4  ;;  %s438_s16 = int_to_ptr.vmem [resolvable:$true] %s437_s16 }
  0x24   : > { %v310_v0 = vld [vmem:[%s303_s17] sm:$0xff]  ;;  %v311_v2 = vld [vmem:[%s303_s17 + $0x8] sm:$0xff]  ;;  %s439_s14 = sshll.u32 %s436_s13, 4  ;;  %s420_s15 = scalar_lea.sflag [#allocation4], %s289_s18  ;;  %s440_s14 = int_to_ptr.hbm [resolvable:$true] %s439_s14 }
  0x25   : > { %v315_v1 = vsel %vm314_vm0, %v310_v0, 0.0  ;;  %v318_v3 = vsel %vm314_vm0, %v311_v2, 0.0  ;;  %v674_v5 = vpop.eup %673  ;;  %s783_s17 = sshra.s32 %s440_s14, 4  ;;  %s789_s25 = scalar_lea.hbm %s1036_s5, 32  ;;  %s784_s17 = int_to_ptr.hbm [resolvable:$true] %s783_s17 }
  0x26   : > { %316 = vadd.xlane.f32.xlu0 %v315_v1  ;;  %v322_v6 = vmul.f32 32.0, %v674_v5  ;;  %vm326_vm1 = vweird.f32 %v674_v5  ;;  %s785_s19 = scalar_lea.hbm %s784_s17, 16  ;;  %p790_p3 = scmp.lt.s32.totalorder %s784_s17, %s1036_s5 }
  0x27   : > { %p786_p0 = scmp.ne.s32.totalorder %s784_s17, %s785_s19  ;;  %p791_p4 = scmp.lt.s32.totalorder %s789_s25, %s785_s19 }
  0x28   : > { %v323_v7 = vsub.f32 1.0, %v322_v6 }
  0x29   : > { %p787_p1 = pnand %p786_p0, %p922_p5  ;;  %p792_p7 = por %p791_p4, %p790_p3 }
  0x2a   : > { %v324_v8 = vmul.f32 %v674_v5, %v323_v7 }
  0x2b   : > { %p788_p2 = pneg %p787_p1 }
  0x2c   : > { %v325_v9 = vadd.f32 %v674_v5, %v324_v8 }
  0x2d   : > { %p793_p8 = pnand %p792_p7, %p788_p2 }
  0x2e   : > { %319 = vadd.xlane.f32.xlu0 %v318_v3  ;;  %v327_v10 = vsel %vm326_vm1, %v674_v5, %v325_v9 }
  0x99   : > { %v317_v11 = vpop.xlane.xlu0 %316 }
  0x9a   : > { %v328_v12 = vmul.f32 %v327_v10, %v317_v11 }
  0x9c   : > { %v330_v13 = vsub.f32 %v310_v0, %v328_v12 }
  0x9e   : > { %v332_v14 = vmul.f32 %v330_v13, %v330_v13 }
  0xa0   : > { %v334_v15 = vsel %vm314_vm0, %v332_v14, 0.0 }
  0xa1   : > { %335 = vadd.xlane.f32.xlu1 %v334_v15  ;;  %v320_v16 = vpop.xlane.xlu0 %319 }
  0xa2   : > { %v329_v17 = vmul.f32 %v327_v10, %v320_v16 }
  0xa4   : > { %v331_v18 = vsub.f32 %v311_v2, %v329_v17 }
  0xa6   : > { %v333_v19 = vmul.f32 %v331_v18, %v331_v18 }
  0xa8   : > { %v337_v20 = vsel %vm314_vm0, %v333_v19, 0.0 }
  0xa9   : > { %338 = vadd.xlane.f32.xlu1 %v337_v20 }
 0x114   : > { %v336_v22 = vpop.xlane.xlu1 %335 }
 0x115   : > { %v340_v24 = vmul.f32 %v336_v22, %v327_v10 }
 0x117   : > { %v342_v25 = vadd.f32 1e-05, %v340_v24 }
 0x119   : > { %675 = vrsqrt.f32 %v342_v25  ;;  %vm350_vm3 = vweird.f32 %v342_v25 }
 0x11c   : > { %v339_v26 = vpop.xlane.xlu1 %338 }
 0x11d   : > { %v341_v27 = vmul.f32 %v339_v26, %v327_v10 }
 0x11f   : > { %v676_v28 = vpop.eup %675  ;;  %v343_v29 = vadd.f32 1e-05, %v341_v27 }
 0x120   : > { %v345_v30 = vmul.f32 %v676_v28, %v342_v25  ;;  %vm351_vm2 = vweird.f32 %v676_v28 }
 0x121   : > { %677 = vrsqrt.f32 %v343_v29  ;;  %vm352_vm4 = vmor %vm350_vm3, %vm351_vm2  ;;  %vm360_vm6 = vweird.f32 %v343_v29 }
 0x122   : > { %v346_v31 = vmul.f32 %v676_v28, %v345_v30 }
 0x124   : > { %v347_v32 = vmul.f32 0.5, %v346_v31 }
 0x126   : > { %v348_v33 = vsub.f32 1.5, %v347_v32 }
 0x127   : > { %v678_v34 = vpop.eup %677 }
 0x128   : > { %v349_v35 = vmul.f32 %v676_v28, %v348_v33  ;;  %v355_v36 = vmul.f32 %v678_v34, %v343_v29  ;;  %vm361_vm5 = vweird.f32 %v678_v34 }
 0x129   : > { %vm362_vm7 = vmor %vm360_vm6, %vm361_vm5 }
 0x12a   : > { %v353_v38 = vsel %vm352_vm4, %v676_v28, %v349_v35  ;;  %v356_v39 = vmul.f32 %v678_v34, %v355_v36 }
 0x12b   : > { %v364_v40 = vmul.f32 %v353_v38, %v330_v13 }
 0x12c   : > { %v357_v42 = vmul.f32 0.5, %v356_v39 }
 0x12d   : > { %v369_v43 = vmul.f32 %v670_v37, %v364_v40 }
 0x12e   : > { %v358_v44 = vsub.f32 1.5, %v357_v42 }
 0x12f   : > { %v374_v45 = vadd.f32 %v671_v41, %v369_v43 }
 0x130   : > { %v359_v46 = vmul.f32 %v678_v34, %v358_v44 }
 0x131   : > { %376 = vst.msk [vmem:[%s291_s28] sm:$0xff] %vm314_vm0, %v374_v45 }
 0x132   : > { %v363_v47 = vsel %vm362_vm7, %v678_v34, %v359_v46 }
 0x133   : > { %v365_v48 = vmul.f32 %v363_v47, %v331_v18 }
 0x135   : > { %v370_v49 = vmul.f32 %v670_v37, %v365_v48 }
 0x137   : > { %v375_v50 = vadd.f32 %v671_v41, %v370_v49 }
 0x139   : > { %377 = vst.msk [vmem:[%s291_s28 + $0x8] sm:$0xff] %vm314_vm0, %v375_v50  ;;  %v378_v51 = vpack.c.bf16 %v375_v50, %v374_v45 }
 0x13b   : > { %584 = vmatmul.msk.bf16.vlgmr.msra.gmra.mxu0 %vm314_vm0, %v378_v51 }
 0x13c   : > { %796 = shalt.err (!%p793_p8)
}
 0x13d   : > { %s847_s18 = smov 128   ;;  %s848_s28 = smov 8   ;;  %v672_v52 = vld [vmem:[#allocation7] ss:$0 sm:$0xff]  ;;  %vm416_vm8 = vcmask 523264  }
 0x13e   : > { %607 = dma.vmem_to_hbm [thread:$0]  (%p922_p5), %s438_s16, 256, %s440_s14, %s420_s15, %s847_s18, %s847_s18, %s848_s28  }
 0x13f   : > { %s1043_s29 = sshll.u32 %s972_s12, 4 }
 0x140   : > { %s308_s20 = scalar_lea.vmem %s1037_s6, %s1043_s29 }
 0x1b8   : > { %v411_v53 = vpop.f32.mrf.mxu0 }
 0x1b9   : > { %v412_v54 = vadd.f32 %v672_v52, %v411_v53 }
 0x1bb   : > { %417 = vst.msk [vmem:[%s308_s20] sm:$0xff] %vm416_vm8, %v412_v54 }
 0x1c0   : > { %v413_v55 = vpop.f32.mrf.mxu0 }
 0x1c1   : > { %v414_v56 = vadd.f32 %v672_v52, %v413_v55 }
 0x1c3   : > { %418 = vst.msk [vmem:[%s308_s20 + $0x8] sm:$0xff] %vm416_vm8, %v414_v56 }
 0x1c4 PF: > { %p629_p9 = scmp.ge.s32.totalorder %s839_s24, 2  ;;  %s457_s7 = sand.u32 1, %s827_s21  }
 0x1c5   : > { %s458_s12 = scalar_lea.sflag [#allocation4], %s457_s7 }
 0x1c6   : > { %p620_p5 = pnand %p629_p9, %p926_p6 }
 0x1c8   : > { %p621_p10 = pneg %p620_p5 }
 0x1ca   : > { %822 = dma.done.wait (%p621_p10), %s458_s12, 256  }
 0x1cb   : > { %824 = vsyncadd (%p621_p10), %s458_s12, 4294967040  ;;  %p19_p11 = scmp.ge.s32.totalorder %s909_s27, 4   ;;  %s1044_s21 = smov %s831_s22 }
 0x1cc   : > { %s1045_s22 = smov %s835_s23  ;;  %s1046_s23 = smov %s920_s30 }
 0x1cd   : > { %s1047_s24 = smov %s909_s27  ;;  %21 = sbr.rel (!%p19_p11) target bundleno = 5 (0x5), region = 100 }
 0x1d2   :  { %472 = vsyncpa [#allocation3], 1 }
 0x1d3   :  { %474 = vsyncpa [#allocation3 + $0x1], 1 }
 0x1d4   :  { %475 = vsyncpa [#allocation6], 1 }
 0x1d5   :  { %476 = vsyncpa [#allocation4], 1 }
 0x1d6   :  { %478 = vsyncpa [#allocation4 + $0x1], 1 }

// kernel: klm_forward.5
= control target key start
LH: loop header
LB: loop body
LE: loop exit
PB: predicated region body
PF: predicated region fallthrough
CT: control target
= control target key end

     0   :  { %s2445_s0 = inlined_call_operand.vmem [shape: f32[2,4,32], index: 0, kind: input, shape index: {}]   ;;  %s2446_s1 = inlined_call_operand.hbm [shape: f32[2,8,32], index: 1, kind: input, shape index: {}]   ;;  %s2447_s2 = inlined_call_operand.hbm [shape: bf16[32,32], index: 2, kind: input, shape index: {}]   ;;  %s2448_s3 = inlined_call_operand.vmem [shape: f32[1,32], index: 3, kind: input, shape index: {}]   ;;  %s2449_s4 = inlined_call_operand.hbm [shape: bf16[32,64], index: 4, kind: input, shape index: {}]   ;;  %s2450_s5 = inlined_call_operand.vmem [shape: f32[1,64], index: 5, kind: input, shape index: {}]   ;;  %s2451_s6 = inlined_call_operand.hbm [shape: bf16[32,32], index: 6, kind: input, shape index: {}]   ;;  %s2452_s7 = inlined_call_operand.hbm [shape: f32[1,32], index: 7, kind: input, shape index: {}]   ;;  %s2453_s8 = inlined_call_operand.hbm [shape: f32[1,32], index: 8, kind: input, shape index: {}]   ;;  %s2454_s9 = inlined_call_operand.hbm [shape: f32[1,32], index: 9, kind: input, shape index: {}]   ;;  %s2455_s10 = inlined_call_operand.hbm [shape: bf16[32,64], index: 10, kind: input, shape index: {}]   ;;  %s2456_s11 = inlined_call_operand.hbm [shape: f32[1,64], index: 11, kind: input, shape index: {}]   ;;  %s2457_s12 = inlined_call_operand.vmem [shape: f32[2,4,64], index: 12, kind: output, shape index: {}]  }
   0x1   :  { %2458 = sst [smem:[#allocation21_spill]] %s2447_s2 }
   0x2   :  { %2459 = sst [smem:[#allocation22_spill]] %s2448_s3 }
   0x3   :  { %2460 = sst [smem:[#allocation23_spill]] %s2451_s6 }
   0x4   :  { %2461 = sst [smem:[#allocation24_spill]] %s2453_s8 }
   0x5   :  { %2462 = sst [smem:[#allocation25_spill]] %s2457_s12 }
   0x6   :  { %17 = vsyncpa [#allocation3], 0 }
   0x7   :  { %19 = vsyncpa [#allocation3 + $0x1], 0 }
   0x8   :  { %20 = vsyncpa [#allocation5], 0 }
   0x9   :  { %21 = vsyncpa [#allocation8], 0 }
   0xa   :  { %22 = vsyncpa [#allocation11], 0 }
   0xb   :  { %23 = vsyncpa [#allocation14], 0  ;;  %s2191_s21 = smov 0   ;;  %s2193_s22 = smov 0  }
   0xc   :  { %s2195_s23 = smov 0   ;;  %s2197_s24 = smov 0  }
   0xd LB: > { %s2463_s2 = sld [smem:[#allocation21_spill]]  ;;  %s2215_s28 = sadd.s32 4294967295, %s2091_s24   ;;  %s2091_s24 = sphi %s2197_s24, %s2475_s24   ;;  %s2087_s23 = sphi %s2195_s23, %s2474_s23   ;;  %s2083_s22 = sphi %s2193_s22, %s2473_s22   ;;  %s2079_s21 = sphi %s2191_s21, %s2472_s21  }
   0xe   : > { %p1490_p0 = scmp.ge.s32.totalorder %s2091_s24, 1  ;;  %p76_p1 = scmp.eq.s32.totalorder %s2215_s28, 0 }
   0xf   : > { %p322_p2 = scmp.lt.s32.totalorder %s2091_s24, 3  ;;  %s2093_s30 = smov [#allocation4]  }
  0x10   : > { %s335_s13 = sshll.u32 %s2093_s30, 4  ;;  %s2465_s6 = sld [smem:[#allocation23_spill]]  ;;  %s336_s13 = int_to_ptr.vmem [resolvable:$true] %s335_s13 }
  0x11   : > { %p2220_p3 = pnand %p1490_p0, %p322_p2  ;;  %s2467_s8 = sld [smem:[#allocation24_spill]] }
  0x12   : > { %s2094_s25 = smov [#allocation7]   ;;  %s2095_s30 = smov 64  }
  0x13   : > { %s333_s27 = sshll.u32 %s2463_s2, 4  ;;  %p1618_p4 = pneg %p2220_p3  ;;  %s334_s27 = int_to_ptr.hbm [resolvable:$true] %s333_s27 }
  0x14   : > { %s369_s26 = sshll.u32 %s2094_s25, 4  ;;  %s2096_s2 = smov 4   ;;  %s370_s26 = int_to_ptr.vmem [resolvable:$true] %s369_s26 }
  0x15   : > { %p2231_p5 = pnand %p1618_p4, %p76_p1  ;;  %s2097_s12 = smov [#allocation10]  }
  0x16   : > { %s367_s16 = sshll.u32 %s2465_s6, 4  ;;  %s417_s6 = sshll.u32 %s2455_s10, 4  ;;  %s368_s16 = int_to_ptr.hbm [resolvable:$true] %s367_s16  ;;  %s418_s6 = int_to_ptr.hbm [resolvable:$true] %s417_s6 }
  0x17   : > { %s394_s20 = sshll.u32 %s2467_s8, 4  ;;  %s396_s3 = sshll.u32 %s2097_s12, 4  ;;  %s395_s20 = int_to_ptr.hbm [resolvable:$true] %s394_s20  ;;  %s397_s3 = int_to_ptr.vmem [resolvable:$true] %s396_s3 }
  0x18   : > { %1621 = dma.hbm_to_vmem [thread:$0]  (!%p2231_p5), %s334_s27, 256, %s336_s13, [#allocation5], %s2095_s30, %s2095_s30, %s2096_s2  }
  0x19   : > { %1627 = dma.hbm_to_vmem [thread:$0]  (!%p2231_p5), %s368_s16, 256, %s370_s26, [#allocation8], %s2095_s30, %s2095_s30, %s2096_s2  }
  0x1a   : > { %1633 = dma.hbm_to_vmem [thread:$0]  (!%p2231_p5), %s395_s20, 16, %s397_s3, [#allocation11]  }
  0x1b   : > { %s2098_s18 = smov [#allocation13]   ;;  %s350_s27 = sshll.u32 %s2449_s4, 4  ;;  %s351_s27 = int_to_ptr.hbm [resolvable:$true] %s350_s27 }
  0x1c   : > { %s419_s19 = sshll.u32 %s2098_s18, 4  ;;  %s382_s26 = sshll.u32 %s2452_s7, 4  ;;  %s420_s19 = int_to_ptr.vmem [resolvable:$true] %s419_s19  ;;  %s383_s26 = int_to_ptr.hbm [resolvable:$true] %s382_s26 }
  0x1d   : > { %1639 = dma.hbm_to_vmem [thread:$0]  (!%p2231_p5), %s418_s6, 256, %s420_s19, [#allocation14], %s2095_s30, %s2095_s30, %s2096_s2  }
  0x1e   : > { %s2099_s12 = smov [#allocation6]   ;;  %s2100_s3 = smov [#allocation9]  }
  0x1f   : > { %s352_s14 = sshll.u32 %s2099_s12, 4  ;;  %s384_s8 = sshll.u32 %s2100_s3, 4  ;;  %s353_s14 = int_to_ptr.vmem [resolvable:$true] %s352_s14  ;;  %s385_s8 = int_to_ptr.vmem [resolvable:$true] %s384_s8 }
  0x20   : > { %1624 = dma.hbm_to_vmem [thread:$0]  (!%p2231_p5), %s351_s27, 256, %s353_s14, [#allocation5], %s2095_s30, %s2095_s30, %s2096_s2  }
  0x21   : > { %s406_s6 = sshll.u32 %s2454_s9, 4  ;;  %s432_s2 = sshll.u32 %s2456_s11, 4  ;;  %s407_s6 = int_to_ptr.hbm [resolvable:$true] %s406_s6  ;;  %s433_s2 = int_to_ptr.hbm [resolvable:$true] %s432_s2 }
  0x22   : > { %1630 = dma.hbm_to_vmem [thread:$0]  (!%p2231_p5), %s383_s26, 16, %s385_s8, [#allocation8]  }
  0x23   : > { %s2101_s30 = smov [#allocation12]   ;;  %s2102_s27 = smov [#allocation15]  }
  0x24   : > { %s408_s25 = sshll.u32 %s2101_s30, 4  ;;  %s434_s13 = sshll.u32 %s2102_s27, 4  ;;  %s409_s25 = int_to_ptr.vmem [resolvable:$true] %s408_s25  ;;  %s435_s13 = int_to_ptr.vmem [resolvable:$true] %s434_s13 }
  0x25   : > { %1636 = dma.hbm_to_vmem [thread:$0]  (!%p2231_p5), %s407_s6, 16, %s409_s25, [#allocation11]  }
  0x26   : > { %1642 = dma.hbm_to_vmem [thread:$0]  (!%p2231_p5), %s433_s2, 16, %s435_s13, [#allocation14]  }
  0x27   : > { %s2270_s16 = sadd.s32 1, %s2091_s24   ;;  %s62_s12 = sadd.s32 1, %s2087_s23 }
  0x28   : > { %s59_s26 = ssub.s32 %s2091_s24, %s2270_s16  ;;  %p69_p7 = scmp.ne.s32.totalorder %s2087_s23, %s2083_s22 }
  0x29   : > { %p60_p6 = scmp.eq.s32.totalorder %s59_s26, 0  ;;  %p70_p8 = scmp.eq.s32.totalorder %s2091_s24, 0 }
  0x2a   : > { %p75_p9 = scmp.ne.s32.totalorder %s2083_s22, %s2079_s21  ;;  %p1655_p11 = scmp.lt.s32.totalorder %s2091_s24, 2 }
  0x2b   : > { %s2281_s14 = scalar_select %p60_p6, %s2087_s23, %s62_s12  }
  0x2c   : > { %p2285_p10 = por %p76_p1, %p75_p9  ;;  %s452_s8 = sand.u32 1, %s2087_s23  }
  0x2d   : > { %s1501_s17 = sshll.u32 %s2091_s24, 3  ;;  %p71_p12 = por %p70_p8, %p69_p7 }
  0x2e   : > { %s1500_s20 = sshll.u32 %s452_s8, 3  ;;  %s460_s18 = scalar_lea.hbm %s2446_s1, %s1501_s17 }
  0x2f   : > { %s462_s19 = sshll.u32 %s460_s18, 4  ;;  %s456_s2 = scalar_lea.vmem [#allocation2], %s1500_s20  ;;  %s463_s19 = int_to_ptr.hbm [resolvable:$true] %s462_s19 }
  0x30   : > { %s464_s30 = sshll.u32 %s456_s2, 4  ;;  %p2295_p13 = pnand %p1655_p11, %p71_p12  ;;  %s465_s30 = int_to_ptr.vmem [resolvable:$true] %s464_s30 }
  0x31   : > { %s453_s25 = scalar_lea.sflag [#allocation3], %s452_s8  ;;  %s2011_s27 = sshra.s32 %s463_s19, 4  ;;  %s2012_s27 = int_to_ptr.hbm [resolvable:$true] %s2011_s27 }
  0x32   : > { %s2013_s24 = scalar_lea.hbm %s2012_s27, 8  ;;  %p2015_p2 = pneg %p2295_p13 }
  0x33   : > { %p2014_p0 = scmp.ne.s32.totalorder %s2012_s27, %s2013_s24  ;;  %s2018_s12 = scalar_lea.hbm %s2446_s1, 16 }
  0x34   : > { %p2019_p6 = scmp.lt.s32.totalorder %s2012_s27, %s2446_s1  ;;  %p2020_p7 = scmp.lt.s32.totalorder %s2018_s12, %s2013_s24 }
  0x35   : > { %p2016_p4 = pnand %p2015_p2, %p2014_p0 }
  0x36   : > { %p2021_p8 = por %p2020_p7, %p2019_p6 }
  0x37   : > { %p2017_p5 = pneg %p2016_p4 }
  0x39   : > { %p2022_p9 = pnand %p2021_p8, %p2017_p5 }
  0x3b   : > { %2025 = shalt.err (!%p2022_p9)
}
  0x3c   : > { %1646 = dma.hbm_to_vmem [thread:$0]  (!%p2295_p13), %s463_s19, 128, %s465_s30, %s453_s25  }
  0x3d   : > { %473 = sbr.rel (%p2220_p3) target bundleno = 1666 (0x682), region = 68  ;;  %s475_s8 = sand.u32 (!%p2220_p3), 1, %s2083_s22  }
  0x3e   : > { %s1503_s15 = sshll.u32 (!%p2220_p3), %s475_s8, 3  ;;  %s476_s6 = scalar_lea.sflag (!%p2220_p3), [#allocation3], %s475_s8 }
  0x3f   : > { %s479_s18 = scalar_lea.vmem (!%p2220_p3), [#allocation2], %s1503_s15 }
  0x42   : > { %2058 = dma.done.wait (%p2285_p10), %s476_s6, 128  }
  0x43   : > { %2060 = vsyncadd (%p2285_p10), %s476_s6, 4294967168 }
  0x44   : > { %2062 = dma.done.wait (%p76_p1), [#allocation5], 512  }
  0x45   : > { %2064 = vsyncadd (%p76_p1), [#allocation5], 4294966784 }
  0x46   : > { %2066 = dma.done.wait (%p76_p1), [#allocation8], 272  }
  0x47   : > { %2068 = vsyncadd (%p76_p1), [#allocation8], 4294967024 }
  0x48   : > { %2070 = dma.done.wait (%p76_p1), [#allocation11], 32  }
  0x49   : > { %2072 = vsyncadd (%p76_p1), [#allocation11], 4294967264 }
  0x4a   : > { %2074 = dma.done.wait (%p76_p1), [#allocation14], 272  }
  0x4b   : > { %2076 = vsyncadd (%p76_p1), [#allocation14], 4294967024  ;;  %p564_p3 = scmp.lt.s32.totalorder %s2215_s28, 1  ;;  %v1577_v0 = vld [vmem:[#allocation4 + $0x8] sm:$0xff]  ;;  %v1579_v1 = vld [vmem:[#allocation6 + $0x8] sm:$0xff]  ;;  %vm596_vm0 = vcmask 261120  }
  0x4c   : > { %v1576_v2 = vld [vmem:[#allocation4] sm:$0xff]  ;;  %v1578_v3 = vld [vmem:[#allocation6] sm:$0xff]  ;;  %606 = vmatpush.bf16.msra.mxu0 %v1577_v0  ;;  %643 = vmatpush.bf16.msra.mxu1 %v1579_v1  ;;  %s2470_s24 = sld [smem:[#allocation22_spill]]  ;;  %vm650_vm1 = vcmask 31744   ;;  %s2103_s13 = smov 112   ;;  %vm678_vm2 = vcmask 60416  }
  0x4d   : > { %s2477_s28 = smov (!%p564_p3, %s2215_s28), 1  ;;  %v574_v5 = vld [vmem:[%s479_s18] sm:$0xff]  ;;  %s2104_s26 = smov 120   ;;  %vm693_vm3 = vcmask 64512   ;;  %vm1209_vm4 = vcmask 97280   ;;  %vm1211_vm5 = vcmask 130048  }
  0x4e   : > { %s1512_s29 = sshll.u32 %s2477_s28, 2  ;;  %v613_v7 = vpack.c.bf16 %v574_v5, %v574_v5  ;;  %v1730_v8 = vld [vmem:[%s2450_s5] ss:$0 sm:$0xff]  ;;  %s2105_s12 = smov 124   ;;  %vm1213_vm6 = vcmask 162816   ;;  %vm1215_vm7 = vcmask 195584  }
  0x4f   : > { %s567_s2 = scalar_lea.vmem %s2445_s0, %s1512_s29  ;;  %s2106_s17 = smov 104   ;;  %vm1217_vm8 = vcmask 228352   ;;  %vm1259_vm9 = vcmask 257024   ;;  %vm1334_vm14 = vcmask 519168  }
  0x50   : > { %v2342_v4 = vld [vmem:[%s567_s2] sm:$0xf]  ;;  %607 = vmatpush.bf16.msra.mxu0 %v1576_v2  ;;  %644 = vmatpush.bf16.msra.mxu1 %v1578_v3  ;;  %s2107_s20 = smov 116   ;;  %s2108_s8 = smov 108  }
  0x51   : > { %v575_v6 = vpack.c.bf16 %v2342_v4, %v2342_v4  ;;  %s2109_s15 = smov 100   ;;  %s2110_s6 = smov 88  }
  0x52   : > { %v1729_v9 = vld [vmem:[%s2470_s24] ss:$0 sm:$0xff]  ;;  %s2111_s18 = smov 92   ;;  %s2112_s3 = smov 96  }
  0x53   : > { %1522 = vmatmul.msk.bf16.vlgmr.msra.gmra.mxu0 %vm596_vm0, %v575_v6  ;;  %1531 = vmatmul.msk.bf16.vlgmr.msra.gmra.mxu1 %vm596_vm0, %v613_v7  ;;  %s2113_s19 = smov 84   ;;  %s2114_s2 = smov 76  }
  0x54   : > { %s2115_s30 = smov 68   ;;  %s2116_s21 = smov 72  }
  0x55   : > { %s2117_s25 = smov 80   ;;  %s2118_s27 = smov 4  }
  0x56   : > { %s2119_s24 = smov 12  }
  0xd0   : > { %v609_v10 = vpop.f32.mrf.mxu0  ;;  %v646_v11 = vpop.f32.mrf.mxu1 }
  0xd1   : > { %v2354_v12 = vadd.f32 %v1730_v8, %v646_v11  ;;  %v610_v13 = vadd.f32 %v1729_v9, %v609_v10 }
  0xd3   : > { %917 = vrot.lane.b32.xlu2 %v2354_v12, %s2103_s13  ;;  %785 = vrot.lane.b32.xlu1 %v2354_v12, %s2104_s26 }
  0xd4   : > { %719 = vrot.lane.b32.xlu0 %v2354_v12, %s2105_s12  ;;  %1532 = vmatpush.xpose.msk.msrb.mxu0 %vm650_vm1, %v2354_v12 }
  0xd7   : > { %1533 = vmatmul.msk.f32.vlgmr.msrb.gmra.mxu0 %vm650_vm1, %v610_v13 }
  0xd8   : > { %v611_v14 = vpop.f32.mrf.mxu0  ;;  %v648_v15 = vpop.f32.mrf.mxu1 }
  0xdb   : > { %915 = vrot.lane.b32.xlu2 %v610_v13, %s2103_s13  ;;  %783 = vrot.lane.b32.xlu1 %v610_v13, %s2104_s26  ;;  %s2120_s13 = smov 8   ;;  %s2121_s26 = smov 20  }
  0xdc   : > { %717 = vrot.lane.b32.xlu0 %v610_v13, %s2105_s12  ;;  %s2122_s12 = smov 16  }
  0xe3   : > { %1049 = vrot.lane.b32.xlu2 %v2354_v12, %s2106_s17  ;;  %849 = vrot.lane.b32.xlu1 %v610_v13, %s2107_s20 }
  0xe4   : > { %851 = vrot.lane.b32.xlu0 %v2354_v12, %s2107_s20  ;;  %s2124_s20 = smov 28  }
  0xeb   : > { %981 = vrot.lane.b32.xlu2 %v610_v13, %s2108_s8  ;;  %983 = vrot.lane.b32.xlu1 %v2354_v12, %s2108_s8 }
  0xec   : > { %1047 = vrot.lane.b32.xlu0 %v610_v13, %s2106_s17  ;;  %s2123_s17 = smov 24  }
  0xf3   : > { %1113 = vrot.lane.b32.xlu1 %v610_v13, %s2109_s15 }
  0xf4   : > { %1115 = vrot.lane.b32.xlu0 %v2354_v12, %s2109_s15 }
  0xfb   : > { %823 = vrot.lane.b32.xlu1 %v2354_v12, %s2110_s6  ;;  %s2471_s6 = sld [smem:[#allocation25_spill]] }
 0x12d   : > { %v918_v16 = vpop.permute.xlu2 %917 }
 0x135   : > { %v916_v19 = vpop.permute.xlu2 %915 }
 0x13d   : > { %v1050_v26 = vpop.permute.xlu2 %1049 }
 0x145   : > { %v786_v17 = vpop.permute.xlu1 %785  ;;  %v982_v30 = vpop.permute.xlu2 %981 }
 0x146   : > { %v720_v18 = vpop.permute.xlu0 %719 }
 0x147   : > { %1535 = vmatpush.xpose.msk.msra.mxu3 %vm650_vm1, %v720_v18 }
 0x14b   : > { %1538 = vmatpush.xpose.msk.msrb.mxu3 %vm650_vm1, %v786_v17 }
 0x14d   : > { %v784_v20 = vpop.permute.xlu1 %783 }
 0x14e   : > { %v718_v21 = vpop.permute.xlu0 %717 }
 0x14f   : > { %1536 = vmatmul.msk.f32.vlgmr.msra.gmra.mxu3 %vm650_vm1, %v718_v21 }
 0x150   : > { %1544 = vmatpush.xpose.msk.msra.mxu3 %vm650_vm1, %v918_v16 }
 0x154   : > { %v674_v22 = vpop.f32.mrf.mxu0 }
 0x155   : > { %v677_v23 = vmul.f32 0.5, %v674_v22  ;;  %v850_v24 = vpop.permute.xlu1 %849 }
 0x156   : > { %v852_v25 = vpop.permute.xlu0 %851 }
 0x157   : > { %1539 = vmatmul.msk.f32.vlgmr.msrb.gmra.mxu3 %vm650_vm1, %v784_v20  ;;  %1541 = vmatpush.xpose.msk.msra.mxu0 %vm650_vm1, %v852_v25  ;;  %v679_v27 = vsel %vm678_vm2, %v677_v23, -inf }
 0x158   : > { %1550 = vmatpush.xpose.msk.msrb.mxu3 %vm650_vm1, %v1050_v26  ;;  %680 = vmax.xlane.f32.xlu0 %v679_v27 }
 0x15a   : > { %1542 = vmatmul.msk.f32.vlgmr.msra.gmra.mxu0 %vm650_vm1, %v850_v24 }
 0x15d   : > { %v984_v28 = vpop.permute.xlu1 %983 }
 0x15e   : > { %v1048_v29 = vpop.permute.xlu0 %1047  ;;  %1547 = vmatpush.xpose.msk.msrb.mxu0 %vm650_vm1, %v984_v28 }
 0x15f   : > { %1545 = vmatmul.msk.f32.vlgmr.msra.gmra.mxu3 %vm650_vm1, %v916_v19 }
 0x162   : > { %1548 = vmatmul.msk.f32.vlgmr.msrb.gmra.mxu0 %vm650_vm1, %v982_v30 }
 0x165   : > { %v1114_v32 = vpop.permute.xlu1 %1113 }
 0x166   : > { %v1116_v31 = vpop.permute.xlu0 %1115 }
 0x167   : > { %1551 = vmatmul.msk.f32.vlgmr.msrb.gmra.mxu3 %vm650_vm1, %v1048_v29  ;;  %1553 = vmatpush.xpose.msk.msra.mxu0 %vm650_vm1, %v1116_v31 }
 0x16a   : > { %1554 = vmatmul.msk.f32.vlgmr.msra.gmra.mxu0 %vm650_vm1, %v1114_v32 }
 0x16d   : > { %v824_v59 = vpop.permute.xlu1 %823 }
 0x1cb   : > { %v681_v33 = vpop.xlane.xlu0 %680 }
 0x1cc   : > { %v682_v34 = vsub.f32 %v677_v23, %v681_v33 }
 0x1ce   : > { %v683_v35 = vmul.f32 1.442695, %v682_v34 }
 0x1d0   : > { %1735 = vpow2.f32 %v683_v35 }
 0x1d2   : > { %v742_v36 = vpop.f32.mrf.mxu3 }
 0x1d3   : > { %v745_v44 = vmul.f32 0.5, %v742_v36 }
 0x1d5   : > { %v746_v49 = vsel %vm678_vm2, %v745_v44, -inf }
 0x1d6   : > { %v1736_v37 = vpop.eup %1735 }
 0x1d7   : > { %v874_v38 = vpop.f32.mrf.mxu0  ;;  %v685_v39 = vsel %vm678_vm2, %v1736_v37, 0.0 }
 0x1d8   : > { %v877_v40 = vmul.f32 0.5, %v874_v38  ;;  %686 = vadd.xlane.f32.xlu1 %v685_v39 }
 0x1da   : > { %v808_v41 = vpop.f32.mrf.mxu3  ;;  %v878_v42 = vsel %vm678_vm2, %v877_v40, -inf }
 0x1db   : > { %v811_v43 = vmul.f32 0.5, %v808_v41  ;;  %879 = vmax.xlane.f32.xlu2 %v878_v42 }
 0x1dd   : > { %v812_v46 = vsel %vm678_vm2, %v811_v43, -inf }
 0x1df   : > { %v1006_v45 = vpop.f32.mrf.mxu0 }
 0x1e0   : > { %v1009_v47 = vmul.f32 0.5, %v1006_v45  ;;  %813 = vmax.xlane.f32.xlu1 %v812_v46 }
 0x1e2   : > { %v940_v48 = vpop.f32.mrf.mxu3  ;;  %v1010_v50 = vsel %vm678_vm2, %v1009_v47, -inf }
 0x1e3   : > { %747 = vmax.xlane.f32.xlu2 %v746_v49  ;;  %1011 = vmax.xlane.f32.xlu0 %v1010_v50  ;;  %v943_v57 = vmul.f32 0.5, %v940_v48 }
 0x1e5   : > { %v944_v58 = vsel %vm678_vm2, %v943_v57, -inf }
 0x1e7   : > { %v1138_v54 = vpop.f32.mrf.mxu0 }
 0x1e8   : > { %v2390_v55 = vmul.f32 0.5, %v1138_v54 }
 0x1ea   : > { %v1072_v51 = vpop.f32.mrf.mxu3  ;;  %v1142_v56 = vsel %vm678_vm2, %v2390_v55, -inf }
 0x1eb   : > { %v1075_v52 = vmul.f32 0.5, %v1072_v51 }
 0x1ed   : > { %v1076_v53 = vsel %vm678_vm2, %v1075_v52, -inf }
 0x1ee   : > { %1077 = vmax.xlane.f32.xlu1 %v1076_v53 }
 0x1f7   : > { %757 = vrot.lane.b32.xlu0 %v2354_v12, %s2111_s18  ;;  %s571_s18 = scalar_lea.vmem %s2471_s6, %s1512_s29 }
 0x1fb   : > { %690 = vrot.lane.b32.xlu2 %v2354_v12, %s2112_s3 }
 0x224   : > { %1143 = vmax.xlane.f32.xlu2 %v1142_v56 }
 0x22c   : > { %945 = vmax.xlane.f32.xlu2 %v944_v58 }
 0x244   : > { %889 = vrot.lane.b32.xlu2 %v2354_v12, %s2113_s19 }
 0x24b   : > { %v687_v60 = vpop.xlane.xlu1 %686 }
 0x24e   : > { %v880_v61 = vpop.xlane.xlu2 %879 }
 0x24f   : > { %v881_v62 = vsub.f32 %v877_v40, %v880_v61 }
 0x251   : > { %v882_v63 = vmul.f32 1.442695, %v881_v62 }
 0x253   : > { %1737 = vpow2.f32 %v882_v63  ;;  %v814_v3 = vpop.xlane.xlu1 %813 }
 0x254   : > { %1739 = vrcp.f32 %v687_v60  ;;  %v815_v10 = vsub.f32 %v811_v43, %v814_v3 }
 0x256   : > { %v748_v0 = vpop.xlane.xlu2 %747  ;;  %v1012_v1 = vpop.xlane.xlu0 %1011  ;;  %v816_v15 = vmul.f32 1.442695, %v815_v10 }
 0x257   : > { %v749_v2 = vsub.f32 %v745_v44, %v748_v0  ;;  %v1013_v7 = vsub.f32 %v1009_v47, %v1012_v1 }
 0x259   : > { %v1738_v5 = vpop.eup %1737  ;;  %v750_v6 = vmul.f32 1.442695, %v749_v2  ;;  %v1014_v11 = vmul.f32 1.442695, %v1013_v7 }
 0x25a   : > { %v884_v8 = vsel %vm678_vm2, %v1738_v5, 0.0  ;;  %v1740_v9 = vpop.eup %1739 }
 0x25b   : > { %1741 = vpow2.f32 %v750_v6  ;;  %885 = vadd.xlane.f32.xlu1 %v884_v8  ;;  %v689_v14 = vmul.f32 %v1740_v9, %v1736_v37  ;;  %v1581_v8 = vld [vmem:[#allocation7 + $0x8] sm:$0xff]  ;;  %v1580_v9 = vld [vmem:[#allocation7] sm:$0xff] }
 0x25c   : > { %1743 = vpow2.f32 %v1014_v11  ;;  %1249 = vmatpush.bf16.msra.mxu3 %v1581_v8 }
 0x25d   : > { %1745 = vpow2.f32 %v816_v15 }
 0x25e   : > { %v691_v13 = vpop.permute.xlu2 %690 }
 0x25f   : > { %712 = vmatpush.msrb.mxu1 %v691_v13 }
 0x260   : > { %1534 = vmatmul.msk.f32.vlgmr.msrb.gmra.mxu1 %vm693_vm3, %v689_v14  ;;  %1250 = vmatpush.bf16.msra.mxu3 %v1580_v9 }
 0x261   : > { %v1742_v16 = vpop.eup %1741  ;;  %v1078_v17 = vpop.xlane.xlu1 %1077 }
 0x262   : > { %v752_v18 = vsel %vm678_vm2, %v1742_v16, 0.0  ;;  %v1079_v19 = vsub.f32 %v1075_v52, %v1078_v17  ;;  %v1744_v20 = vpop.eup %1743 }
 0x263   : > { %753 = vadd.xlane.f32.xlu0 %v752_v18  ;;  %v1746_v22 = vpop.eup %1745  ;;  %v1016_v24 = vsel %vm678_vm2, %v1744_v20, 0.0 }
 0x264   : > { %v1080_v21 = vmul.f32 1.442695, %v1079_v19  ;;  %v818_v25 = vsel %vm678_vm2, %v1746_v22, 0.0 }
 0x266   : > { %1747 = vpow2.f32 %v1080_v21 }
 0x269   : > { %v758_v23 = vpop.permute.xlu0 %757 }
 0x26a   : > { %778 = vmatpush.msra.mxu2 %v758_v23 }
 0x26b   : > { %1017 = vadd.xlane.f32.xlu0 %v1016_v24 }
 0x26c   : > { %844 = vmatpush.msrb.mxu2 %v824_v59  ;;  %v2401_v26 = vpop.eup %1747 }
 0x26d   : > { %819 = vadd.xlane.f32.xlu2 %v818_v25  ;;  %v1082_v27 = vsel %vm678_vm2, %v2401_v26, 0.0 }
 0x275   : > { %1083 = vadd.xlane.f32.xlu2 %v1082_v27 }
 0x27f   : > { %1021 = vrot.lane.b32.xlu0 %v2354_v12, %s2114_s2 }
 0x287   : > { %1153 = vrot.lane.b32.xlu0 %v2354_v12, %s2115_s30 }
 0x28d   : > { %1087 = vrot.lane.b32.xlu2 %v2354_v12, %s2116_s21 }
 0x297   : > { %v1144_v28 = vpop.xlane.xlu2 %1143 }
 0x298   : > { %v1145_v40 = vsub.f32 %v2390_v55, %v1144_v28 }
 0x29a   : > { %v1146_v43 = vmul.f32 1.442695, %v1145_v40 }
 0x29f   : > { %v946_v29 = vpop.xlane.xlu2 %945 }
 0x2a0   : > { %v947_v30 = vsub.f32 %v943_v57, %v946_v29 }
 0x2a2   : > { %v948_v31 = vmul.f32 1.442695, %v947_v30 }
 0x2a4   : > { %1749 = vpow2.f32 %v948_v31 }
 0x2a7   : > { %v890_v32 = vpop.permute.xlu2 %889 }
 0x2a8   : > { %910 = vmatpush.msra.mxu1 %v890_v32  ;;  %v2125_v32 = vmov 32.0  }
 0x2aa   : > { %v1750_v33 = vpop.eup %1749 }
 0x2ab   : > { %v950_v34 = vsel %vm678_vm2, %v1750_v33, 0.0 }
 0x2ac   : > { %951 = vadd.xlane.f32.xlu1 %v950_v34 }
 0x2c5   : > { %955 = vrot.lane.b32.xlu1 %v2354_v12, %s2117_s25 }
 0x2ce   : > { %v886_v35 = vpop.xlane.xlu1 %885 }
 0x2cf   : > { %1751 = vrcp.f32 %v886_v35 }
 0x2d5   : > { %v1752_v36 = vpop.eup %1751 }
 0x2d6   : > { %v888_v37 = vmul.f32 %v1752_v36, %v1738_v5  ;;  %v754_v38 = vpop.xlane.xlu0 %753 }
 0x2d7   : > { %1753 = vrcp.f32 %v754_v38 }
 0x2d8   : > { %1543 = vmatmul.msk.f32.vlgmr.msra.gmra.mxu1 %vm693_vm3, %v888_v37 }
 0x2dd   : > { %v1754_v39 = vpop.eup %1753  ;;  %v714_v61 = vpop.f32.mrf.mxu1 }
 0x2de   : > { %v756_v41 = vmul.f32 %v1754_v39, %v1742_v16  ;;  %v1018_v44 = vpop.xlane.xlu0 %1017 }
 0x2e0   : > { %v820_v42 = vpop.xlane.xlu2 %819  ;;  %1537 = vmatmul.msk.f32.vlgmr.msra.gmra.mxu2 %vm693_vm3, %v756_v41 }
 0x2e1   : > { %1755 = vrcp.f32 %v820_v42 }
 0x2e2   : > { %1757 = vpow2.f32 %v1146_v43 }
 0x2e3   : > { %1759 = vrcp.f32 %v1018_v44  ;;  %v1582_v44 = vld [vmem:[#allocation13] sm:$0xff] }
 0x2e7   : > { %v1756_v12 = vpop.eup %1755 }
 0x2e8   : > { %v822_v45 = vmul.f32 %v1756_v12, %v1746_v22  ;;  %v1758_v46 = vpop.eup %1757  ;;  %v1084_v53 = vpop.xlane.xlu2 %1083 }
 0x2e9   : > { %v1760_v47 = vpop.eup %1759  ;;  %v1148_v48 = vsel %vm678_vm2, %v1758_v46, 0.0 }
 0x2ea   : > { %1540 = vmatmul.msk.f32.vlgmr.msrb.gmra.mxu2 %vm693_vm3, %v822_v45  ;;  %v1020_v49 = vmul.f32 %v1760_v47, %v1744_v20 }
 0x2ef   : > { %1149 = vadd.xlane.f32.xlu1 %v1148_v48 }
 0x2f0   : > { %v1088_v57 = vpop.permute.xlu2 %1087 }
 0x2f1   : > { %v1022_v50 = vpop.permute.xlu0 %1021 }
 0x2f2   : > { %1042 = vmatpush.msrb.mxu1 %v1022_v50 }
 0x2f3   : > { %1549 = vmatmul.msk.f32.vlgmr.msrb.gmra.mxu1 %vm693_vm3, %v1020_v49 }
 0x2f9   : > { %v1154_v51 = vpop.permute.xlu0 %1153 }
 0x2fa   : > { %1174 = vmatpush.msra.mxu1 %v1154_v51 }
 0x31f   : > { %v952_v52 = vpop.xlane.xlu1 %951 }
 0x320   : > { %1761 = vrcp.f32 %v952_v52 }
 0x321   : > { %1763 = vrcp.f32 %v1084_v53  ;;  %v1732_v53 = vld [vmem:[#allocation10] ss:$0 sm:$0xff] }
 0x326   : > { %v1762_v54 = vpop.eup %1761 }
 0x327   : > { %v954_v55 = vmul.f32 %v1762_v54, %v1750_v33  ;;  %v1764_v58 = vpop.eup %1763 }
 0x328   : > { %v1086_v59 = vmul.f32 %v1764_v58, %v2401_v26  ;;  %v1731_v26 = vld [vmem:[#allocation9] ss:$0 sm:$0xff] }
 0x337   : > { %v956_v56 = vpop.permute.xlu1 %955 }
 0x338   : > { %976 = vmatpush.msra.mxu2 %v956_v56  ;;  %v1733_v56 = vld [vmem:[#allocation12] ss:$0 sm:$0xff] }
 0x339   : > { %1546 = vmatmul.msk.f32.vlgmr.msra.gmra.mxu2 %vm693_vm3, %v954_v55 }
 0x33a   : > { %1108 = vmatpush.msrb.mxu2 %v1088_v57 }
 0x341   : > { %1552 = vmatmul.msk.f32.vlgmr.msrb.gmra.mxu2 %vm693_vm3, %v1086_v59 }
 0x355   : > { %v912_v1 = vpop.f32.mrf.mxu1 }
 0x362   : > { %v1150_v60 = vpop.xlane.xlu1 %1149 }
 0x363   : > { %1765 = vrcp.f32 %v1150_v60  ;;  %v780_v62 = vpop.f32.mrf.mxu2  ;;  %v1734_v60 = vld [vmem:[#allocation15] ss:$0 sm:$0xff] }
 0x364   : > { %1180 = vrot.lane.b32.xlu0 %v780_v62, %s2118_s27  ;;  %1767 = vrcp.f32 %v2125_v32 }
 0x369   : > { %v1766_v63 = vpop.eup %1765 }
 0x36a   : > { %v1152_v0 = vmul.f32 %v1766_v63, %v1758_v46  ;;  %v1768_v33 = vpop.eup %1767 }
 0x36b   : > { %v1264_v34 = vmul.f32 32.0, %v1768_v33  ;;  %vm1268_vm10 = vweird.f32 %v1768_v33 }
 0x36c   : > { %1188 = vrot.lane.b32.xlu0 %v912_v1, %s2119_s24  ;;  %1555 = vmatmul.msk.f32.vlgmr.msra.gmra.mxu1 %vm693_vm3, %v1152_v0 }
 0x36d   : > { %v846_v2 = vpop.f32.mrf.mxu2  ;;  %v1265_v35 = vsub.f32 1.0, %v1264_v34 }
 0x36e   : > { %1184 = vrot.lane.b32.xlu1 %v846_v2, %s2120_s13 }
 0x36f   : > { %v1266_v36 = vmul.f32 %v1768_v33, %v1265_v35 }
 0x370   : > { %v1044_v3 = vpop.f32.mrf.mxu1 }
 0x371   : > { %v1267_v37 = vadd.f32 %v1768_v33, %v1266_v36 }
 0x373   : > { %v1269_v38 = vsel %vm1268_vm10, %v1768_v33, %v1267_v37 }
 0x374   : > { %1196 = vrot.lane.b32.xlu0 %v1044_v3, %s2121_s26 }
 0x3bc   : > { %v978_v5 = vpop.f32.mrf.mxu2 }
 0x3bd   : > { %1192 = vrot.lane.b32.xlu2 %v978_v5, %s2122_s12 }
 0x3c4   : > { %v1110_v6 = vpop.f32.mrf.mxu2 }
 0x3c5   : > { %1200 = vrot.lane.b32.xlu2 %v1110_v6, %s2123_s17 }
 0x3d6   : > { %v1181_v10 = vpop.permute.xlu0 %1180 }
 0x3d7   : > { %v1207_v15 = vsel %vm650_vm1, %v714_v61, %v1181_v10 }
 0x3de   : > { %v1189_v11 = vpop.permute.xlu0 %1188 }
 0x3e0   : > { %v1185_v14 = vpop.permute.xlu1 %1184 }
 0x3e1   : > { %v1208_v16 = vsel %vm693_vm3, %v1207_v15, %v1185_v14 }
 0x3e2   : > { %v1210_v18 = vsel %vm1209_vm4, %v1208_v16, %v1189_v11 }
 0x3e6   : > { %v1197_v17 = vpop.permute.xlu0 %1196 }
 0x3e9   : > { %v1176_v7 = vpop.f32.mrf.mxu1 }
 0x3ea   : > { %1204 = vrot.lane.b32.xlu0 %v1176_v7, %s2124_s20 }
 0x417   : > { %v1193_v13 = vpop.permute.xlu2 %1192 }
 0x418   : > { %v1212_v19 = vsel %vm1211_vm5, %v1210_v18, %v1193_v13 }
 0x419   : > { %v1214_v21 = vsel %vm1213_vm6, %v1212_v19, %v1197_v17 }
 0x41f   : > { %v1201_v20 = vpop.permute.xlu2 %1200 }
 0x420   : > { %v1216_v22 = vsel %vm1215_vm7, %v1214_v21, %v1201_v20 }
 0x45c   : > { %v1205_v23 = vpop.permute.xlu0 %1204 }
 0x45d   : > { %v1218_v24 = vsel %vm1217_vm8, %v1216_v22, %v1205_v23 }
 0x45e   : > { %v1219_v25 = vpack.c.bf16 %v1218_v24, %v1218_v24 }
 0x460   : > { %1564 = vmatmul.msk.bf16.vlgmr.msra.gmra.mxu3 %vm596_vm0, %v1219_v25 }
 0x4e3   : > { %v1252_v27 = vpop.f32.mrf.mxu3 }
 0x4e4   : > { %v1253_v28 = vadd.f32 %v1731_v26, %v1252_v27 }
 0x4e6   : > { %v1256_v29 = vadd.f32 %v1253_v28, %v2342_v4  ;;  %v1583_v4 = vld [vmem:[#allocation13 + $0x8] sm:$0xff] }
 0x4e7   : > { %1327 = vmatpush.bf16.msra.mxu2 %v1583_v4 }
 0x4e8   : > { %v1260_v30 = vsel %vm1259_vm9, %v1256_v29, 0.0 }
 0x4e9   : > { %1261 = vadd.xlane.f32.xlu1 %v1260_v30 }
 0x4eb   : > { %v1254_v31 = vpop.f32.mrf.mxu3  ;;  %1328 = vmatpush.bf16.msra.mxu2 %v1582_v44 }
 0x55c   : > { %v1262_v39 = vpop.xlane.xlu1 %1261 }
 0x55d   : > { %v1270_v40 = vmul.f32 %v1269_v38, %v1262_v39 }
 0x55f   : > { %v1271_v41 = vsub.f32 %v1256_v29, %v1270_v40 }
 0x561   : > { %v1272_v42 = vmul.f32 %v1271_v41, %v1271_v41 }
 0x563   : > { %v1273_v43 = vsel %vm1259_vm9, %v1272_v42, 0.0 }
 0x564   : > { %1274 = vadd.xlane.f32.xlu2 %v1273_v43 }
 0x5d7   : > { %v1275_v12 = vpop.xlane.xlu2 %1274 }
 0x5d8   : > { %v1276_v45 = vmul.f32 %v1275_v12, %v1269_v38 }
 0x5da   : > { %v1277_v46 = vadd.f32 1e-05, %v1276_v45 }
 0x5dc   : > { %1769 = vrsqrt.f32 %v1277_v46  ;;  %vm1284_vm12 = vweird.f32 %v1277_v46 }
 0x5e2   : > { %v1770_v47 = vpop.eup %1769 }
 0x5e3   : > { %v1279_v48 = vmul.f32 %v1770_v47, %v1277_v46  ;;  %vm1285_vm11 = vweird.f32 %v1770_v47 }
 0x5e4   : > { %vm1286_vm13 = vmor %vm1284_vm12, %vm1285_vm11 }
 0x5e5   : > { %v1280_v49 = vmul.f32 %v1770_v47, %v1279_v48 }
 0x5e7   : > { %v1281_v50 = vmul.f32 0.5, %v1280_v49 }
 0x5e9   : > { %v1282_v51 = vsub.f32 1.5, %v1281_v50 }
 0x5eb   : > { %v1283_v52 = vmul.f32 %v1770_v47, %v1282_v51 }
 0x5ed   : > { %v1287_v54 = vsel %vm1286_vm13, %v1770_v47, %v1283_v52 }
 0x5ee   : > { %v1288_v55 = vmul.f32 %v1287_v54, %v1271_v41 }
 0x5f0   : > { %v1292_v57 = vmul.f32 %v1732_v53, %v1288_v55 }
 0x5f2   : > { %v1296_v58 = vadd.f32 %v1733_v56, %v1292_v57 }
 0x5f4   : > { %v1297_v59 = vpack.c.bf16 %v1296_v58, %v1296_v58 }
 0x5f6   : > { %1573 = vmatmul.msk.bf16.vlgmr.msra.gmra.mxu2 %vm596_vm0, %v1297_v59 }
 0x679   : > { %v1330_v61 = vpop.f32.mrf.mxu2 }
 0x67a   : > { %v1331_v62 = vadd.f32 %v1734_v60, %v1330_v61 }
 0x67c   : > { %1335 = vst.msk [vmem:[%s571_s18] sm:$0xf] %vm1334_vm14, %v1331_v62 }
 0x681   : > { %v1332_v63 = vpop.f32.mrf.mxu2 }
 0x682 PF: > { %p26_p1 = scmp.ge.s32.totalorder %s2270_s16, 4   ;;  %s2472_s21 = smov %s2083_s22 }
 0x683   : > { %s2473_s22 = smov %s2087_s23  ;;  %s2474_s23 = smov %s2281_s14 }
 0x684   : > { %s2475_s24 = smov %s2270_s16  ;;  %28 = sbr.rel (!%p26_p1) target bundleno = 13 (0xd), region = 143 }
 0x689   :  { %1355 = vsyncpa [#allocation3], 1 }
 0x68a   :  { %1357 = vsyncpa [#allocation3 + $0x1], 1 }
 0x68b   :  { %1358 = vsyncpa [#allocation5], 1 }
 0x68c   :  { %1359 = vsyncpa [#allocation8], 1 }
 0x68d   :  { %1360 = vsyncpa [#allocation11], 1 }
 0x68e   :  { %1361 = vsyncpa [#allocation14], 1 }

// kernel: klm_forward.6
= control target key start
LH: loop header
LB: loop body
LE: loop exit
PB: predicated region body
PF: predicated region fallthrough
CT: control target
= control target key end

     0   :  { %s3561_s0 = inlined_call_operand.vmem [shape: f32[2,16,32], index: 0, kind: input, shape index: {}]   ;;  %s3562_s1 = inlined_call_operand.hbm [shape: f32[1,16,32], index: 1, kind: input, shape index: {}]   ;;  %s3563_s2 = inlined_call_operand.vmem [shape: bf16[32,64], index: 2, kind: input, shape index: {}]   ;;  %s3564_s3 = inlined_call_operand.vmem [shape: f32[1,64], index: 3, kind: input, shape index: {}]   ;;  %s3565_s4 = inlined_call_operand.hbm [shape: bf16[32,32], index: 4, kind: input, shape index: {}]   ;;  %s3566_s5 = inlined_call_operand.hbm [shape: f32[1,32], index: 5, kind: input, shape index: {}]   ;;  %s3567_s6 = inlined_call_operand.hbm [shape: bf16[32,32], index: 6, kind: input, shape index: {}]   ;;  %s3568_s7 = inlined_call_operand.hbm [shape: f32[1,32], index: 7, kind: input, shape index: {}]   ;;  %s3569_s8 = inlined_call_operand.hbm [shape: f32[1,32], index: 8, kind: input, shape index: {}]   ;;  %s3570_s9 = inlined_call_operand.hbm [shape: f32[1,32], index: 9, kind: input, shape index: {}]   ;;  %s3571_s10 = inlined_call_operand.hbm [shape: bf16[32,32], index: 10, kind: input, shape index: {}]   ;;  %s3572_s11 = inlined_call_operand.hbm [shape: f32[1,32], index: 11, kind: input, shape index: {}]   ;;  %s3573_s12 = inlined_call_operand.hbm [shape: bf16[32,32], index: 12, kind: input, shape index: {}]   ;;  %s3574_s13 = inlined_call_operand.hbm [shape: f32[1,32], index: 13, kind: input, shape index: {}]   ;;  %s3575_s14 = inlined_call_operand.hbm [shape: f32[1,32], index: 14, kind: input, shape index: {}]   ;;  %s3576_s15 = inlined_call_operand.hbm [shape: f32[1,32], index: 15, kind: input, shape index: {}]   ;;  %s3577_s16 = inlined_call_operand.vmem [shape: f32[2,16,32], index: 16, kind: output, shape index: {}]  }
   0x1   :  { %3579 = sst [smem:[#allocation30_spill]] %s3561_s0 }
   0x2   :  { %3580 = sst [smem:[#allocation31_spill]] %s3565_s4 }
   0x3   :  { %3581 = sst [smem:[#allocation32_spill]] %s3567_s6 }
   0x4   :  { %3582 = sst [smem:[#allocation33_spill]] %s3569_s8 }
   0x5   :  { %3583 = sst [smem:[#allocation34_spill]] %s3577_s16 }
   0x6   :  { %21 = vsyncpa [#allocation3], 0 }
   0x7   :  { %22 = vsyncpa [#allocation5], 0 }
   0x8   :  { %23 = vsyncpa [#allocation8], 0 }
   0x9   :  { %24 = vsyncpa [#allocation11], 0 }
   0xa   :  { %25 = vsyncpa [#allocation14], 0 }
   0xb   :  { %26 = vsyncpa [#allocation17], 0 }
   0xc   :  { %27 = vsyncpa [#allocation20], 0  ;;  %s3098_s21 = smov 0  }
   0xd LB: > { %3584 = sst [smem:[#allocation29_spill]] %s2971_s21  ;;  %s3107_s25 = sadd.s32 4294967295, %s2971_s21   ;;  %s2971_s21 = sphi %s3098_s21, %s33_s21  }
   0xe   : > { %s3585_s4 = sld [smem:[#allocation31_spill]]  ;;  %p2084_p0 = scmp.ge.s32.totalorder %s2971_s21, 1 }
   0xf   : > { %p405_p1 = scmp.lt.s32.totalorder %s2971_s21, 3  ;;  %p2318_p2 = scmp.eq.s32.totalorder %s3107_s25, 0 }
  0x10   : > { %s2973_s27 = smov [#allocation4]   ;;  %s3587_s6 = sld [smem:[#allocation32_spill]] }
  0x11   : > { %p3112_p3 = pnand %p2084_p0, %p405_p1  ;;  %s438_s28 = sshll.u32 %s2973_s27, 4  ;;  %s439_s28 = int_to_ptr.vmem [resolvable:$true] %s438_s28 }
  0x12   : > { %s2974_s18 = smov [#allocation7]   ;;  %s3589_s8 = sld [smem:[#allocation33_spill]] }
  0x13   : > { %p2278_p4 = pneg %p3112_p3  ;;  %s464_s19 = sshll.u32 %s2974_s18, 4  ;;  %s465_s19 = int_to_ptr.vmem [resolvable:$true] %s464_s19 }
  0x14   : > { %s436_s24 = sshll.u32 %s3585_s4, 4  ;;  %s2975_s27 = smov 64   ;;  %s437_s24 = int_to_ptr.hbm [resolvable:$true] %s436_s24 }
  0x15   : > { %p3123_p5 = pnand %p2318_p2, %p2278_p4  ;;  %s2976_s29 = smov 4  }
  0x16   : > { %s462_s0 = sshll.u32 %s3587_s6, 4  ;;  %s2977_s30 = smov [#allocation10]   ;;  %s463_s0 = int_to_ptr.hbm [resolvable:$true] %s462_s0 }
  0x17   : > { %2284 = dma.hbm_to_vmem [thread:$0]  (!%p3123_p5), %s437_s24, 256, %s439_s28, [#allocation5], %s2975_s27, %s2975_s27, %s2976_s29  }
  0x18   : > { %s489_s23 = sshll.u32 %s3589_s8, 4  ;;  %s491_s4 = sshll.u32 %s2977_s30, 4  ;;  %s490_s23 = int_to_ptr.hbm [resolvable:$true] %s489_s23  ;;  %s492_s4 = int_to_ptr.vmem [resolvable:$true] %s491_s4 }
  0x19   : > { %2290 = dma.hbm_to_vmem [thread:$0]  (!%p3123_p5), %s463_s0, 256, %s465_s19, [#allocation8], %s2975_s27, %s2975_s27, %s2976_s29  }
  0x1a   : > { %s512_s18 = sshll.u32 %s3571_s10, 4  ;;  %s538_s8 = sshll.u32 %s3573_s12, 4  ;;  %s513_s18 = int_to_ptr.hbm [resolvable:$true] %s512_s18  ;;  %s539_s8 = int_to_ptr.hbm [resolvable:$true] %s538_s8 }
  0x1b   : > { %2296 = dma.hbm_to_vmem [thread:$0]  (!%p3123_p5), %s490_s23, 16, %s492_s4, [#allocation11]  }
  0x1c   : > { %s2978_s16 = smov [#allocation13]   ;;  %s2979_s28 = smov [#allocation16]  }
  0x1d   : > { %s514_s24 = sshll.u32 %s2978_s16, 4  ;;  %s540_s0 = sshll.u32 %s2979_s28, 4  ;;  %s515_s24 = int_to_ptr.vmem [resolvable:$true] %s514_s24  ;;  %s541_s0 = int_to_ptr.vmem [resolvable:$true] %s540_s0 }
  0x1e   : > { %2302 = dma.hbm_to_vmem [thread:$0]  (!%p3123_p5), %s513_s18, 256, %s515_s24, [#allocation14], %s2975_s27, %s2975_s27, %s2976_s29  }
  0x1f   : > { %s565_s19 = sshll.u32 %s3575_s14, 4  ;;  %s416_s30 = sshll.u32 %s3562_s1, 4  ;;  %s566_s19 = int_to_ptr.hbm [resolvable:$true] %s565_s19  ;;  %s417_s30 = int_to_ptr.hbm [resolvable:$true] %s416_s30 }
  0x20   : > { %2308 = dma.hbm_to_vmem [thread:$0]  (!%p3123_p5), %s539_s8, 256, %s541_s0, [#allocation17], %s2975_s27, %s2975_s27, %s2976_s29  }
  0x21   : > { %s2980_s16 = smov [#allocation19]   ;;  %s2981_s18 = smov [#allocation2]  }
  0x22   : > { %s567_s20 = sshll.u32 %s2980_s16, 4  ;;  %s418_s22 = sshll.u32 %s2981_s18, 4  ;;  %s568_s20 = int_to_ptr.vmem [resolvable:$true] %s567_s20  ;;  %s419_s22 = int_to_ptr.vmem [resolvable:$true] %s418_s22 }
  0x23   : > { %2314 = dma.hbm_to_vmem [thread:$0]  (!%p3123_p5), %s566_s19, 16, %s568_s20, [#allocation20]  }
  0x24   : > { %s2982_s24 = smov 128   ;;  %s2983_s28 = smov 8  }
  0x25   : > { %2281 = dma.hbm_to_vmem [thread:$0]  (!%p3123_p5), %s417_s30, 256, %s419_s22, [#allocation3], %s2982_s24, %s2982_s24, %s2983_s28  }
  0x26   : > { %s451_s29 = sshll.u32 %s3566_s5, 4  ;;  %s2984_s0 = smov [#allocation6]   ;;  %s452_s29 = int_to_ptr.hbm [resolvable:$true] %s451_s29 }
  0x27   : > { %s453_s6 = sshll.u32 %s2984_s0, 4  ;;  %s477_s19 = sshll.u32 %s3568_s7, 4  ;;  %s454_s6 = int_to_ptr.vmem [resolvable:$true] %s453_s6  ;;  %s478_s19 = int_to_ptr.hbm [resolvable:$true] %s477_s19 }
  0x28   : > { %2287 = dma.hbm_to_vmem [thread:$0]  (!%p3123_p5), %s452_s29, 16, %s454_s6, [#allocation5]  }
  0x29   : > { %s2985_s23 = smov [#allocation9]   ;;  %s501_s18 = sshll.u32 %s3570_s9, 4  ;;  %s502_s18 = int_to_ptr.hbm [resolvable:$true] %s501_s18 }
  0x2a   : > { %s479_s16 = sshll.u32 %s2985_s23, 4  ;;  %s527_s28 = sshll.u32 %s3572_s11, 4  ;;  %s480_s16 = int_to_ptr.vmem [resolvable:$true] %s479_s16  ;;  %s528_s28 = int_to_ptr.hbm [resolvable:$true] %s527_s28 }
  0x2b   : > { %2293 = dma.hbm_to_vmem [thread:$0]  (!%p3123_p5), %s478_s19, 16, %s480_s16, [#allocation8]  }
  0x2c   : > { %s2986_s8 = smov [#allocation12]   ;;  %s2987_s29 = smov [#allocation15]  }
  0x2d   : > { %s503_s27 = sshll.u32 %s2986_s8, 4  ;;  %s529_s0 = sshll.u32 %s2987_s29, 4  ;;  %s504_s27 = int_to_ptr.vmem [resolvable:$true] %s503_s27  ;;  %s530_s0 = int_to_ptr.vmem [resolvable:$true] %s529_s0 }
  0x2e   : > { %2299 = dma.hbm_to_vmem [thread:$0]  (!%p3123_p5), %s502_s18, 16, %s504_s27, [#allocation11]  }
  0x2f   : > { %s553_s4 = sshll.u32 %s3574_s13, 4  ;;  %s577_s16 = sshll.u32 %s3576_s15, 4  ;;  %s554_s4 = int_to_ptr.hbm [resolvable:$true] %s553_s4  ;;  %s578_s16 = int_to_ptr.hbm [resolvable:$true] %s577_s16 }
  0x30   : > { %2305 = dma.hbm_to_vmem [thread:$0]  (!%p3123_p5), %s528_s28, 16, %s530_s0, [#allocation14]  }
  0x31   : > { %s2988_s20 = smov [#allocation18]   ;;  %s2989_s18 = smov [#allocation21]  }
  0x32   : > { %s555_s30 = sshll.u32 %s2988_s20, 4  ;;  %s579_s22 = sshll.u32 %s2989_s18, 4  ;;  %s556_s30 = int_to_ptr.vmem [resolvable:$true] %s555_s30  ;;  %s580_s22 = int_to_ptr.vmem [resolvable:$true] %s579_s22 }
  0x33   : > { %2311 = dma.hbm_to_vmem [thread:$0]  (!%p3123_p5), %s554_s4, 16, %s556_s30, [#allocation17]  }
  0x34   : > { %2317 = dma.hbm_to_vmem [thread:$0]  (!%p3123_p5), %s578_s16, 16, %s580_s22, [#allocation20]  }
  0x35   : > { %600 = sbr.rel (%p3112_p3) target bundleno = 2524 (0x9dc), region = 84 }
  0x3a   : > { %2942 = dma.done.wait (%p2318_p2), [#allocation3], 256  }
  0x3b   : > { %2944 = vsyncadd (%p2318_p2), [#allocation3], 4294967040 }
  0x3c   : > { %2946 = dma.done.wait (%p2318_p2), [#allocation5], 272  }
  0x3d   : > { %2948 = vsyncadd (%p2318_p2), [#allocation5], 4294967024 }
  0x3e   : > { %2950 = dma.done.wait (%p2318_p2), [#allocation8], 272  }
  0x3f   : > { %2952 = vsyncadd (%p2318_p2), [#allocation8], 4294967024 }
  0x40   : > { %2954 = dma.done.wait (%p2318_p2), [#allocation11], 32  }
  0x41   : > { %2956 = vsyncadd (%p2318_p2), [#allocation11], 4294967264 }
  0x42   : > { %2958 = dma.done.wait (%p2318_p2), [#allocation14], 272  }
  0x43   : > { %2960 = vsyncadd (%p2318_p2), [#allocation14], 4294967024 }
  0x44   : > { %2962 = dma.done.wait (%p2318_p2), [#allocation17], 272  }
  0x45   : > { %2964 = vsyncadd (%p2318_p2), [#allocation17], 4294967024 }
  0x46   : > { %2966 = dma.done.wait (%p2318_p2), [#allocation20], 32  }
  0x47   : > { %2968 = vsyncadd (%p2318_p2), [#allocation20], 4294967264  ;;  %p711_p6 = scmp.lt.s32.totalorder %s3107_s25, 1  ;;  %s3590_s28 = sld [smem:[#allocation30_spill]]  ;;  %v2215_v0 = vld [vmem:[%s3563_s2 + $0x8] sm:$0xff]  ;;  %v724_v3 = vld [vmem:[#allocation2] sm:$0xff] }
  0x48   : > { %v725_v4 = vld [vmem:[#allocation2 + $0x8] sm:$0xff]  ;;  %759 = vmatpush.bf16.msra.mxu0 %v2215_v0  ;;  %v2214_v5 = vld [vmem:[%s3563_s2] sm:$0xff]  ;;  %v2217_v8 = vld [vmem:[#allocation4 + $0x8] sm:$0xff]  ;;  %vm749_vm0 = vcmask 261120   ;;  %s2990_s19 = smov 92   ;;  %s2991_s23 = smov 124  }
  0x49   : > { %s3594_s25 = smov (!%p711_p6, %s3107_s25), 1  ;;  %v2216_v9 = vld [vmem:[#allocation4] sm:$0xff]  ;;  %797 = vmatpush.bf16.msra.mxu1 %v2217_v8  ;;  %v2462_v12 = vld [vmem:[%s3564_s3] ss:$0 sm:$0xff]  ;;  %s2992_s16 = smov 96   ;;  %vm811_vm1 = vcmask 31744  }
  0x4a   : > { %s2212_s26 = sshll.u32 %s3594_s25, 4  ;;  %s2993_s20 = smov 88   ;;  %v2463_v18 = vld [vmem:[#allocation6] ss:$0 sm:$0xff]  ;;  %vm845_vm2 = vcmask 130048   ;;  %vm1643_vm3 = vcmask 64512  }
  0x4b   : > { %s2994_s30 = smov 120   ;;  %s2995_s18 = smov 84   ;;  %vm1646_vm4 = vcmask 97280   ;;  %vm1651_vm5 = vcmask 162816   ;;  %vm1654_vm6 = vcmask 195584   ;;  %vm1657_vm7 = vcmask 228352  }
  0x4c   : > { %760 = vmatpush.bf16.msra.mxu0 %v2214_v5  ;;  %s2996_s22 = smov 116   ;;  %s2997_s17 = smov 76  }
  0x4d   : > { %s3226_s8 = scalar_lea.vmem %s3590_s28, %s2212_s26  ;;  %798 = vmatpush.bf16.msra.mxu1 %v2216_v9  ;;  %s2998_s24 = smov 80  }
  0x4e   : > { %v722_v1 = vld [vmem:[%s3226_s8] sm:$0xff]  ;;  %v723_v2 = vld [vmem:[%s3226_s8 + $0x8] sm:$0xff]  ;;  %s2999_s28 = smov 112   ;;  %s3000_s27 = smov 108  }
  0x4f   : > { %v726_v6 = vadd.f32 %v724_v3, %v722_v1  ;;  %v727_v7 = vadd.f32 %v725_v4, %v723_v2  ;;  %v767_v11 = vpack.c.bf16 %v723_v2, %v722_v1  ;;  %s3001_s29 = smov 72   ;;  %s3002_s0 = smov 68  }
  0x50   : > { %s3003_s6 = smov 100   ;;  %s3004_s21 = smov 104  }
  0x51   : > { %v728_v10 = vpack.c.bf16 %v727_v7, %v726_v6  ;;  %2134 = vmatmul.msk.bf16.vlgmr.msra.gmra.mxu1 %vm749_vm0, %v767_v11  ;;  %s3005_s4 = smov 8  }
  0x53   : > { %2125 = vmatmul.msk.bf16.vlgmr.msra.gmra.mxu0 %vm749_vm0, %v728_v10 }
  0xce   : > { %v800_v17 = vpop.f32.mrf.mxu1 }
  0xcf   : > { %v3275_v20 = vadd.f32 %v2463_v18, %v800_v17 }
  0xd0   : > { %v762_v13 = vpop.f32.mrf.mxu0 }
  0xd1   : > { %v3241_v14 = vadd.f32 %v2462_v12, %v762_v13 }
  0xd3   : > { %901 = vrot.lane.b32.xlu2 %v3241_v14, %s2990_s19 }
  0xd6   : > { %v802_v19 = vpop.f32.mrf.mxu1 }
  0xd7   : > { %v3277_v21 = vadd.f32 %v2463_v18, %v802_v19 }
  0xd8   : > { %v764_v15 = vpop.f32.mrf.mxu0 }
  0xd9   : > { %v3244_v16 = vadd.f32 %v2462_v12, %v764_v15  ;;  %2224 = vmatpush.msra.mxu3 %v3277_v21  ;;  %888 = vmatpush.msrb.mxu0 %v3277_v21 }
  0xdb   : > { %899 = vrot.lane.b32.xlu1 %v3244_v16, %s2991_s23  ;;  %809 = vrot.lane.b32.xlu0 %v3244_v16, %s2992_s16 }
  0xdc   : > { %1001 = vrot.lane.b32.xlu2 %v3241_v14, %s2993_s20  ;;  %2225 = vmatpush.msra.mxu3 %v3275_v20 }
  0xdd   : > { %889 = vmatpush.msrb.mxu0 %v3275_v20 }
  0xe3   : > { %807 = vrot.lane.b32.xlu0 %v3241_v14, %s2992_s16  ;;  %s3008_s16 = smov 24  }
  0xe4   : > { %997 = vrot.lane.b32.xlu2 %v3241_v14, %s2994_s30 }
  0xeb   : > { %897 = vrot.lane.b32.xlu0 %v3241_v14, %s2991_s23 }
  0xec   : > { %903 = vrot.lane.b32.xlu2 %v3244_v16, %s2990_s19  ;;  %s3006_s19 = smov 16  }
  0xf3   : > { %1099 = vrot.lane.b32.xlu0 %v3241_v14, %s2995_s18 }
  0xf4   : > { %1003 = vrot.lane.b32.xlu2 %v3244_v16, %s2993_s20  ;;  %s3009_s20 = smov 12  }
  0xfb   : > { %1095 = vrot.lane.b32.xlu0 %v3241_v14, %s2996_s22 }
  0xfc   : > { %999 = vrot.lane.b32.xlu2 %v3244_v16, %s2994_s30 }
 0x103   : > { %1101 = vrot.lane.b32.xlu0 %v3244_v16, %s2995_s18  ;;  %s3011_s18 = smov 28  }
 0x104   : > { %1297 = vrot.lane.b32.xlu2 %v3244_v16, %s2997_s17 }
 0x10b   : > { %1199 = vrot.lane.b32.xlu0 %v3244_v16, %s2998_s24 }
 0x10c   : > { %1193 = vrot.lane.b32.xlu2 %v3241_v14, %s2999_s28 }
 0x113   : > { %1295 = vrot.lane.b32.xlu0 %v3241_v14, %s2997_s17  ;;  %s3591_s17 = sld [smem:[#allocation34_spill]] }
 0x114   : > { %1293 = vrot.lane.b32.xlu2 %v3244_v16, %s3000_s27 }
 0x11b   : > { %1195 = vrot.lane.b32.xlu0 %v3244_v16, %s2999_s28 }
 0x11c   : > { %1393 = vrot.lane.b32.xlu2 %v3241_v14, %s3001_s29 }
 0x123   : > { %1493 = vrot.lane.b32.xlu0 %v3244_v16, %s3002_s0 }
 0x124   : > { %1487 = vrot.lane.b32.xlu2 %v3241_v14, %s3003_s6 }
 0x12b   : > { %1389 = vrot.lane.b32.xlu0 %v3241_v14, %s3004_s21 }
 0x12d   : > { %v902_v22 = vpop.permute.xlu2 %901 }
 0x133   : > { %1489 = vrot.lane.b32.xlu0 %v3244_v16, %s3003_s6 }
 0x136   : > { %v1002_v23 = vpop.permute.xlu2 %1001 }
 0x13e   : > { %v998_v24 = vpop.permute.xlu2 %997 }
 0x146   : > { %v904_v25 = vpop.permute.xlu2 %903 }
 0x147   : > { %2141 = vmatpush.xpose.msk.msrb.mxu3 %vm811_vm1, %v904_v25 }
 0x14b   : > { %2142 = vmatpush.xpose.msk.msrb.mxu3 %vm811_vm1, %v902_v22 }
 0x14d   : > { %v810_v26 = vpop.permute.xlu0 %809  ;;  %v900_v47 = vpop.permute.xlu1 %899 }
 0x14e   : > { %v1004_v27 = vpop.permute.xlu2 %1003  ;;  %2135 = vmatpush.xpose.msk.msra.mxu2 %vm811_vm1, %v810_v26 }
 0x14f   : > { %2147 = vmatpush.xpose.msk.msrb.mxu1 %vm811_vm1, %v1004_v27 }
 0x153   : > { %2148 = vmatpush.xpose.msk.msrb.mxu1 %vm811_vm1, %v1002_v23 }
 0x155   : > { %v808_v28 = vpop.permute.xlu0 %807 }
 0x156   : > { %2149 = vmatmul.msk.f32.vlgmr.msrb.gmra.mxu1 %vm811_vm1, %v998_v24  ;;  %2136 = vmatpush.xpose.msk.msra.mxu2 %vm811_vm1, %v808_v28  ;;  %v1000_v29 = vpop.permute.xlu2 %999 }
 0x159   : > { %2137 = vmatmul.msk.f32.vlgmr.msra.gmra.mxu2 %vm811_vm1, %v3241_v14 }
 0x15d   : > { %v898_v30 = vpop.permute.xlu0 %897 }
 0x15e   : > { %2150 = vmatmul.msk.f32.gmra.mxu1 %vm811_vm1, %v1000_v29  ;;  %v1298_v57 = vpop.permute.xlu2 %1297 }
 0x161   : > { %2138 = vmatmul.msk.f32.gmra.mxu2 %vm811_vm1, %v3244_v16 }
 0x165   : > { %v1100_v31 = vpop.permute.xlu0 %1099 }
 0x166   : > { %v1194_v59 = vpop.permute.xlu2 %1193 }
 0x16d   : > { %v1096_v32 = vpop.permute.xlu0 %1095 }
 0x16e   : > { %v1294_v63 = vpop.permute.xlu2 %1293 }
 0x175   : > { %v1102_v33 = vpop.permute.xlu0 %1101 }
 0x176   : > { %v1394_v2 = vpop.permute.xlu2 %1393 }
 0x17d   : > { %v1200_v34 = vpop.permute.xlu0 %1199 }
 0x17e   : > { %2159 = vmatpush.xpose.msk.msra.mxu1 %vm811_vm1, %v1200_v34  ;;  %v1488_v6 = vpop.permute.xlu2 %1487 }
 0x185   : > { %v1296_v58 = vpop.permute.xlu0 %1295 }
 0x18d   : > { %v1196_v60 = vpop.permute.xlu0 %1195 }
 0x195   : > { %v1494_v0 = vpop.permute.xlu0 %1493 }
 0x19d   : > { %v1390_v3 = vpop.permute.xlu0 %1389 }
 0x1a5   : > { %v1490_v7 = vpop.permute.xlu0 %1489 }
 0x1d3   : > { %v1030_v37 = vpop.f32.mrf.mxu1 }
 0x1d4   : > { %v3308_v39 = vmul.f32 0.5, %v1030_v37 }
 0x1d6   : > { %v1038_v42 = vsel %vm845_vm2, %v3308_v39, -inf }
 0x1db   : > { %v1033_v44 = vpop.f32.mrf.mxu1 }
 0x1dc   : > { %v837_v35 = vpop.f32.mrf.mxu2  ;;  %v3313_v45 = vmul.f32 0.5, %v1033_v44 }
 0x1dd   : > { %v3304_v36 = vmul.f32 0.5, %v837_v35 }
 0x1de   : > { %v1041_v46 = vsel %vm845_vm2, %v3313_v45, -inf }
 0x1df   : > { %v846_v38 = vsel %vm845_vm2, %v3304_v36, -inf }
 0x1e0   : > { %847 = vmax.xlane.f32.xlu2 %v846_v38 }
 0x1e4   : > { %v840_v40 = vpop.f32.mrf.mxu2 }
 0x1e5   : > { %v844_v41 = vmul.f32 0.5, %v840_v40 }
 0x1e7   : > { %v849_v43 = vsel %vm845_vm2, %v844_v41, -inf }
 0x1e8   : > { %1039 = vmax.xlane.f32.xlu2 %v1038_v42  ;;  %850 = vmax.xlane.f32.xlu1 %v849_v43 }
 0x1f0   : > { %1042 = vmax.xlane.f32.xlu2 %v1041_v46 }
 0x201   : > { %1097 = vrot.lane.b32.xlu1 %v3244_v16, %s2996_s22 }
 0x253   : > { %v848_v8 = vpop.xlane.xlu2 %847 }
 0x25b   : > { %v851_v48 = vpop.xlane.xlu1 %850  ;;  %v1040_v10 = vpop.xlane.xlu2 %1039 }
 0x25c   : > { %v853_v49 = vsub.f32 %v844_v41, %v851_v48  ;;  %v1044_v11 = vsub.f32 %v3308_v39, %v1040_v10  ;;  %v3389_v48 = vpack.i.bf16 %v3275_v20, %v3277_v21 }
 0x25e   : > { %v856_v50 = vmul.f32 1.442695, %v853_v49  ;;  %v1046_v13 = vmul.f32 1.442695, %v1044_v11 }
 0x260   : > { %2471 = vpow2.f32 %v856_v50 }
 0x266   : > { %v2472_v51 = vpop.eup %2471 }
 0x267   : > { %v861_v52 = vsel %vm845_vm2, %v2472_v51, 0.0 }
 0x268   : > { %862 = vadd.xlane.f32.xlu1 %v861_v52 }
 0x273   : > { %v1098_v53 = vpop.permute.xlu1 %1097 }
 0x281   : > { %1197 = vrot.lane.b32.xlu1 %v3241_v14, %s2998_s24  ;;  %s720_s24 = scalar_lea.vmem %s3591_s17, %s2212_s26 }
 0x289   : > { %1291 = vrot.lane.b32.xlu1 %v3241_v14, %s3000_s27 }
 0x291   : > { %1395 = vrot.lane.b32.xlu1 %v3244_v16, %s3001_s29 }
 0x299   : > { %1491 = vrot.lane.b32.xlu1 %v3241_v14, %s3002_s0  ;;  %v1043_v14 = vpop.xlane.xlu2 %1042 }
 0x29a   : > { %v1045_v18 = vsub.f32 %v3313_v45, %v1043_v14 }
 0x29c   : > { %v1048_v24 = vmul.f32 1.442695, %v1045_v18 }
 0x2a1   : > { %1391 = vrot.lane.b32.xlu1 %v3244_v16, %s3004_s21  ;;  %v852_v16 = vsub.f32 %v3304_v36, %v848_v8 }
 0x2a3   : > { %v854_v23 = vmul.f32 1.442695, %v852_v16 }
 0x2db   : > { %v863_v54 = vpop.xlane.xlu1 %862 }
 0x2dc   : > { %2473 = vrcp.f32 %v863_v54 }
 0x2dd   : > { %2475 = vpow2.f32 %v1046_v13 }
 0x2de   : > { %2477 = vpow2.f32 %v854_v23 }
 0x2df   : > { %2479 = vpow2.f32 %v1048_v24 }
 0x2e2   : > { %v2474_v55 = vpop.eup %2473 }
 0x2e3   : > { %v867_v56 = vmul.f32 %v2474_v55, %v2472_v51  ;;  %v3361_v25 = vpop.eup %2475 }
 0x2e4   : > { %v1050_v28 = vsel %vm845_vm2, %v3361_v25, 0.0 }
 0x2e5   : > { %2140 = vmatmul.msk.f32.vlgmr.msra.gmra.mxu3 %vm845_vm2, %v867_v56 }
 0x2e6   : > { %2153 = vmatpush.xpose.msk.msra.mxu3 %vm811_vm1, %v1102_v33 }
 0x2ea   : > { %2154 = vmatpush.xpose.msk.msra.mxu3 %vm811_vm1, %v1100_v31  ;;  %v3369_v31 = vpop.eup %2477 }
 0x2eb   : > { %v858_v34 = vsel %vm845_vm2, %v3369_v31, 0.0 }
 0x2ed   : > { %2143 = vmatmul.msk.f32.vlgmr.msrb.gmra.mxu3 %vm811_vm1, %v898_v30 }
 0x2ee   : > { %2165 = vmatpush.xpose.msk.msrb.mxu3 %vm811_vm1, %v1298_v57 }
 0x2f2   : > { %2166 = vmatpush.xpose.msk.msrb.mxu3 %vm811_vm1, %v1296_v58 }
 0x2f3   : > { %v1198_v61 = vpop.permute.xlu1 %1197 }
 0x2f4   : > { %2160 = vmatpush.xpose.msk.msra.mxu1 %vm811_vm1, %v1198_v61 }
 0x2f5   : > { %2144 = vmatmul.msk.f32.gmra.mxu3 %vm811_vm1, %v900_v47 }
 0x2f7   : > { %2161 = vmatmul.msk.f32.vlgmr.msra.gmra.mxu1 %vm811_vm1, %v1194_v59 }
 0x2fb   : > { %v1292_v62 = vpop.permute.xlu1 %1291 }
 0x2fd   : > { %2155 = vmatmul.msk.f32.vlgmr.msra.gmra.mxu3 %vm811_vm1, %v1096_v32  ;;  %v3371_v32 = vpop.eup %2479 }
 0x2fe   : > { %2177 = vmatpush.xpose.msk.msra.mxu3 %vm811_vm1, %v1494_v0  ;;  %v1053_v33 = vsel %vm845_vm2, %v3371_v32, 0.0 }
 0x2ff   : > { %2162 = vmatmul.msk.f32.gmra.mxu1 %vm811_vm1, %v1196_v60 }
 0x303   : > { %v1396_v1 = vpop.permute.xlu1 %1395 }
 0x304   : > { %2171 = vmatpush.xpose.msk.msrb.mxu1 %vm811_vm1, %v1396_v1 }
 0x305   : > { %2156 = vmatmul.msk.f32.gmra.mxu3 %vm811_vm1, %v1098_v53 }
 0x308   : > { %2172 = vmatpush.xpose.msk.msrb.mxu1 %vm811_vm1, %v1394_v2 }
 0x30b   : > { %v1492_v4 = vpop.permute.xlu1 %1491  ;;  %2173 = vmatmul.msk.f32.vlgmr.msrb.gmra.mxu1 %vm811_vm1, %v1390_v3 }
 0x30c   : > { %2178 = vmatpush.xpose.msk.msra.mxu3 %vm811_vm1, %v1492_v4 }
 0x30d   : > { %2167 = vmatmul.msk.f32.vlgmr.msrb.gmra.mxu3 %vm811_vm1, %v1292_v62 }
 0x313   : > { %v1392_v5 = vpop.permute.xlu1 %1391 }
 0x314   : > { %2174 = vmatmul.msk.f32.gmra.mxu1 %vm811_vm1, %v1392_v5 }
 0x315   : > { %2168 = vmatmul.msk.f32.gmra.mxu3 %vm811_vm1, %v1294_v63 }
 0x31d   : > { %2179 = vmatmul.msk.f32.vlgmr.msra.gmra.mxu3 %vm811_vm1, %v1488_v6 }
 0x325   : > { %2180 = vmatmul.msk.f32.gmra.mxu3 %vm811_vm1, %v1490_v7 }
 0x368   : > { %v3352_v9 = vpop.f32.mrf.mxu3 }
 0x370   : > { %v930_v12 = vpop.f32.mrf.mxu3 }
 0x371   : > { %v936_v38 = vmul.f32 0.5, %v930_v12 }
 0x373   : > { %v938_v40 = vsel %vm845_vm2, %v936_v38, -inf }
 0x374   : > { %v1226_v15 = vpop.f32.mrf.mxu1 }
 0x375   : > { %v3356_v17 = vmul.f32 0.5, %v1226_v15 }
 0x377   : > { %v1234_v19 = vsel %vm845_vm2, %v3356_v17, -inf }
 0x378   : > { %v933_v22 = vpop.f32.mrf.mxu3  ;;  %1235 = vmax.xlane.f32.xlu1 %v1234_v19 }
 0x379   : > { %v3409_v21 = vmul.f32 0.5, %v933_v22 }
 0x37b   : > { %v941_v56 = vsel %vm845_vm2, %v3409_v21, -inf }
 0x37c   : > { %v1229_v26 = vpop.f32.mrf.mxu1 }
 0x37d   : > { %v3363_v27 = vmul.f32 0.5, %v1229_v26 }
 0x37f   : > { %v1237_v29 = vsel %vm845_vm2, %v3363_v27, -inf }
 0x380   : > { %v1128_v30 = vpop.f32.mrf.mxu3  ;;  %1051 = vadd.xlane.f32.xlu1 %v1050_v28  ;;  %1238 = vmax.xlane.f32.xlu0 %v1237_v29 }
 0x381   : > { %v1134_v44 = vmul.f32 0.5, %v1128_v30 }
 0x383   : > { %v1136_v46 = vsel %vm845_vm2, %v1134_v44, -inf }
 0x388   : > { %v1131_v35 = vpop.f32.mrf.mxu3  ;;  %1054 = vadd.xlane.f32.xlu1 %v1053_v33  ;;  %859 = vadd.xlane.f32.xlu0 %v858_v34  ;;  %v1422_v36 = vpop.f32.mrf.mxu1 }
 0x389   : > { %v3377_v37 = vmul.f32 0.5, %v1422_v36  ;;  %v3426_v2 = vmul.f32 0.5, %v1131_v35 }
 0x38b   : > { %v1430_v39 = vsel %vm845_vm2, %v3377_v37, -inf  ;;  %v1139_v6 = vsel %vm845_vm2, %v3426_v2, -inf }
 0x38c   : > { %1431 = vmax.xlane.f32.xlu2 %v1430_v39 }
 0x390   : > { %939 = vmax.xlane.f32.xlu1 %v938_v40  ;;  %v1324_v41 = vpop.f32.mrf.mxu3 }
 0x391   : > { %v1425_v42 = vpop.f32.mrf.mxu1  ;;  %v3415_v57 = vmul.f32 0.5, %v1324_v41 }
 0x392   : > { %v3382_v43 = vmul.f32 0.5, %v1425_v42 }
 0x393   : > { %v1332_v58 = vsel %vm845_vm2, %v3415_v57, -inf }
 0x394   : > { %v1433_v45 = vsel %vm845_vm2, %v3382_v43, -inf }
 0x395   : > { %1434 = vmax.xlane.f32.xlu2 %v1433_v45 }
 0x398   : > { %1137 = vmax.xlane.f32.xlu1 %v1136_v46  ;;  %v1327_v47 = vpop.f32.mrf.mxu3 }
 0x399   : > { %v3391_v49 = vmul.f32 0.5, %v1327_v47 }
 0x39b   : > { %v1335_v50 = vsel %vm845_vm2, %v3391_v49, -inf }
 0x39c   : > { %2398 = vrot.lane.b32.xlu0 %v3389_v48, %s2994_s30  ;;  %s3010_s30 = smov 20  }
 0x3a0   : > { %1336 = vmax.xlane.f32.xlu1 %v1335_v50  ;;  %v1520_v51 = vpop.f32.mrf.mxu3 }
 0x3a1   : > { %v3397_v52 = vmul.f32 0.5, %v1520_v51 }
 0x3a3   : > { %v1528_v53 = vsel %vm845_vm2, %v3397_v52, -inf }
 0x3a8   : > { %1529 = vmax.xlane.f32.xlu1 %v1528_v53  ;;  %v1523_v54 = vpop.f32.mrf.mxu3 }
 0x3a9   : > { %v3401_v55 = vmul.f32 0.5, %v1523_v54 }
 0x3ab   : > { %v1531_v20 = vsel %vm845_vm2, %v3401_v55, -inf }
 0x3ad   : > { %2393 = vrot.lane.b32.xlu2 %v3389_v48, %s2991_s23  ;;  %s3007_s23 = smov 4  }
 0x3b0   : > { %1532 = vmax.xlane.f32.xlu1 %v1531_v20 }
 0x3b5   : > { %2403 = vrot.lane.b32.xlu2 %v3389_v48, %s2996_s22 }
 0x3c6   : > { %942 = vmax.xlane.f32.xlu0 %v941_v56 }
 0x3c9   : > { %2413 = vrot.lane.b32.xlu1 %v3389_v48, %s3000_s27 }
 0x3de   : > { %1333 = vmax.xlane.f32.xlu2 %v1332_v58 }
 0x3eb   : > { %v1236_v59 = vpop.xlane.xlu1 %1235 }
 0x3ec   : > { %v1240_v60 = vsub.f32 %v3356_v17, %v1236_v59 }
 0x3ee   : > { %v1242_v61 = vmul.f32 1.442695, %v1240_v60 }
 0x3f0   : > { %2481 = vpow2.f32 %v1242_v61 }
 0x3f3   : > { %v1052_v62 = vpop.xlane.xlu1 %1051  ;;  %v1239_v63 = vpop.xlane.xlu0 %1238 }
 0x3f4   : > { %v1241_v16 = vsub.f32 %v3363_v27, %v1239_v63 }
 0x3f6   : > { %v3420_v0 = vpop.eup %2481  ;;  %2408 = vrot.lane.b32.xlu2 %v3389_v48, %s2999_s28  ;;  %v1244_v28 = vmul.f32 1.442695, %v1241_v16 }
 0x3f7   : > { %v1246_v1 = vsel %vm845_vm2, %v3420_v0, 0.0 }
 0x3f8   : > { %1247 = vadd.xlane.f32.xlu0 %v1246_v1 }
 0x3fb   : > { %v1055_v3 = vpop.xlane.xlu1 %1054  ;;  %v860_v4 = vpop.xlane.xlu0 %859 }
 0x3fc   : > { %2483 = vrcp.f32 %v860_v4 }
 0x3ff   : > { %v3428_v5 = vpop.xlane.xlu2 %1431 }
 0x400   : > { %1140 = vmax.xlane.f32.xlu0 %v1139_v6  ;;  %v1436_v20 = vsub.f32 %v3377_v37, %v3428_v5 }
 0x402   : > { %v2484_v7 = vpop.eup %2483  ;;  %v1438_v58 = vmul.f32 1.442695, %v1436_v20 }
 0x403   : > { %v940_v8 = vpop.xlane.xlu1 %939  ;;  %v866_v11 = vmul.f32 %v2484_v7, %v3369_v31 }
 0x404   : > { %v944_v10 = vsub.f32 %v936_v38, %v940_v8 }
 0x405   : > { %2139 = vmatmul.msk.f32.vlgmr.msrb.gmra.mxu0 %vm845_vm2, %v866_v11 }
 0x406   : > { %v946_v12 = vmul.f32 1.442695, %v944_v10 }
 0x408   : > { %2485 = vpow2.f32 %v946_v12  ;;  %v1435_v13 = vpop.xlane.xlu2 %1434 }
 0x409   : > { %2487 = vrcp.f32 %v1052_v62  ;;  %v1437_v34 = vsub.f32 %v3382_v43, %v1435_v13 }
 0x40b   : > { %v1138_v14 = vpop.xlane.xlu1 %1137 }
 0x40c   : > { %v1142_v15 = vsub.f32 %v1134_v44, %v1138_v14 }
 0x40e   : > { %v3435_v17 = vpop.eup %2485  ;;  %v1144_v18 = vmul.f32 1.442695, %v1142_v15  ;;  %v2399_v19 = vpop.permute.xlu0 %2398 }
 0x40f   : > { %v2488_v22 = vpop.eup %2487  ;;  %v950_v23 = vsel %vm845_vm2, %v3435_v17, 0.0  ;;  %v2400_v24 = vunpack.i.l.bf16 %v2399_v19  ;;  %v2401_v30 = vunpack.i.h.bf16 %v2399_v19 }
 0x410   : > { %2489 = vpow2.f32 %v1144_v18  ;;  %951 = vadd.xlane.f32.xlu0 %v950_v23  ;;  %v2394_v26 = vpop.permute.xlu2 %2393  ;;  %v1058_v31 = vmul.f32 %v2488_v22, %v3361_v25  ;;  %v1440_v25 = vmul.f32 1.442695, %v1437_v34 }
 0x411   : > { %2491 = vrcp.f32 %v1055_v3  ;;  %v2395_v29 = vunpack.i.l.bf16 %v2394_v26  ;;  %1086 = vmatpush.msrb.mxu2 %v2400_v24  ;;  %v2396_v27 = vunpack.i.h.bf16 %v2394_v26 }
 0x412   : > { %2493 = vpow2.f32 %v1244_v28 }
 0x413   : > { %v3440_v33 = vpop.xlane.xlu1 %1336  ;;  %988 = vmatpush.msra.mxu0 %v2395_v29  ;;  %1087 = vmatpush.msrb.mxu2 %v2401_v30  ;;  %2495 = vpow2.f32 %v1440_v25 }
 0x414   : > { %2151 = vmatmul.msk.f32.vlgmr.msrb.gmra.mxu2 %vm845_vm2, %v1058_v31 }
 0x415   : > { %989 = vmatpush.msra.mxu0 %v2396_v27 }
 0x416   : > { %v3444_v35 = vpop.eup %2489 }
 0x417   : > { %v2492_v36 = vpop.eup %2491  ;;  %v1148_v38 = vsel %vm845_vm2, %v3444_v35, 0.0 }
 0x418   : > { %v2404_v39 = vpop.permute.xlu2 %2403  ;;  %1149 = vadd.xlane.f32.xlu1 %v1148_v38  ;;  %v1059_v41 = vmul.f32 %v2492_v36, %v3371_v32  ;;  %v3449_v42 = vpop.eup %2493 }
 0x419   : > { %v2405_v40 = vunpack.i.l.bf16 %v2404_v39  ;;  %v2406_v44 = vunpack.i.h.bf16 %v2404_v39  ;;  %v1249_v46 = vsel %vm845_vm2, %v3449_v42, 0.0  ;;  %v3455_v50 = vpop.eup %2495 }
 0x41a   : > { %v1445_v32 = vsel %vm845_vm2, %v3455_v50, 0.0 }
 0x41b   : > { %v1530_v45 = vpop.xlane.xlu1 %1529  ;;  %1184 = vmatpush.msrb.mxu0 %v2405_v40 }
 0x41c   : > { %2152 = vmatmul.msk.f32.gmra.mxu2 %vm845_vm2, %v1059_v41  ;;  %v1534_v43 = vsub.f32 %v3397_v52, %v1530_v45 }
 0x41d   : > { %1185 = vmatpush.msrb.mxu0 %v2406_v44 }
 0x41e   : > { %v1536_v47 = vmul.f32 1.442695, %v1534_v43 }
 0x41f   : > { %1250 = vadd.xlane.f32.xlu2 %v1249_v46 }
 0x420   : > { %2497 = vpow2.f32 %v1536_v47 }
 0x423   : > { %v1533_v11 = vpop.xlane.xlu1 %1532 }
 0x424   : > { %v1535_v12 = vsub.f32 %v3401_v55, %v1533_v11 }
 0x426   : > { %v3459_v51 = vpop.eup %2497  ;;  %v1538_v15 = vmul.f32 1.442695, %v1535_v12 }
 0x427   : > { %1446 = vadd.xlane.f32.xlu2 %v1445_v32  ;;  %v1540_v53 = vsel %vm845_vm2, %v3459_v51, 0.0 }
 0x42f   : > { %1541 = vadd.xlane.f32.xlu2 %v1540_v53 }
 0x439   : > { %v943_v52 = vpop.xlane.xlu0 %942 }
 0x43a   : > { %v945_v54 = vsub.f32 %v3409_v21, %v943_v52 }
 0x43c   : > { %v948_v56 = vmul.f32 1.442695, %v945_v54 }
 0x43e   : > { %2499 = vpow2.f32 %v948_v56 }
 0x43f   : > { %2501 = vpow2.f32 %v1438_v58 }
 0x444   : > { %v3466_v59 = vpop.eup %2499 }
 0x445   : > { %v953_v60 = vsel %vm845_vm2, %v3466_v59, 0.0  ;;  %v3472_v61 = vpop.eup %2501 }
 0x446   : > { %954 = vadd.xlane.f32.xlu0 %v953_v60  ;;  %v1442_v21 = vsel %vm845_vm2, %v3472_v61, 0.0 }
 0x447   : > { %2423 = vrot.lane.b32.xlu2 %v3389_v48, %s3003_s6 }
 0x44e   : > { %1443 = vadd.xlane.f32.xlu0 %v1442_v21 }
 0x451   : > { %v1334_v37 = vpop.xlane.xlu2 %1333 }
 0x452   : > { %v1338_v8 = vsub.f32 %v3415_v57, %v1334_v37 }
 0x454   : > { %v1340_v13 = vmul.f32 1.442695, %v1338_v8 }
 0x459   : > { %v2409_v62 = vpop.permute.xlu2 %2408 }
 0x45a   : > { %v2410_v63 = vunpack.i.l.bf16 %v2409_v62  ;;  %v2411_v1 = vunpack.i.h.bf16 %v2409_v62 }
 0x45c   : > { %1282 = vmatpush.msra.mxu2 %v2410_v63 }
 0x45e   : > { %1283 = vmatpush.msra.mxu2 %v2411_v1 }
 0x462   : > { %2418 = vrot.lane.b32.xlu0 %v3389_v48, %s3004_s21  ;;  %v1339_v48 = vsub.f32 %v3391_v49, %v3440_v33  ;;  %v2414_v49 = vpop.permute.xlu1 %2413 }
 0x463   : > { %v2415_v26 = vunpack.i.l.bf16 %v2414_v49  ;;  %v2416_v28 = vunpack.i.h.bf16 %v2414_v49 }
 0x46b   : > { %v1248_v3 = vpop.xlane.xlu0 %1247 }
 0x46c   : > { %2503 = vrcp.f32 %v1248_v3 }
 0x472   : > { %v2504_v4 = vpop.eup %2503 }
 0x473   : > { %v1254_v5 = vmul.f32 %v2504_v4, %v3420_v0  ;;  %v1141_v6 = vpop.xlane.xlu0 %1140 }
 0x474   : > { %v1143_v7 = vsub.f32 %v3426_v2, %v1141_v6  ;;  %v1342_v2 = vmul.f32 1.442695, %v1339_v48 }
 0x475   : > { %2163 = vmatmul.msk.f32.vlgmr.msra.gmra.mxu2 %vm845_vm2, %v1254_v5 }
 0x476   : > { %v1146_v10 = vmul.f32 1.442695, %v1143_v7 }
 0x478   : > { %2505 = vpow2.f32 %v1146_v10 }
 0x479   : > { %2507 = vpow2.f32 %v1340_v13 }
 0x47a   : > { %2509 = vpow2.f32 %v1538_v15 }
 0x47e   : > { %v3483_v14 = vpop.eup %2505 }
 0x47f   : > { %v1151_v0 = vsel %vm845_vm2, %v3483_v14, 0.0  ;;  %v3489_v16 = vpop.eup %2507 }
 0x480   : > { %1152 = vadd.xlane.f32.xlu1 %v1151_v0  ;;  %v1344_v55 = vsel %vm845_vm2, %v3489_v16, 0.0  ;;  %v3493_v18 = vpop.eup %2509 }
 0x481   : > { %v1543_v23 = vsel %vm845_vm2, %v3493_v18, 0.0 }
 0x482   : > { %v891_v11 = vpop.f32.mrf.mxu0 }
 0x483   : > { %v952_v57 = vpop.xlane.xlu0 %951 }
 0x484   : > { %2511 = vrcp.f32 %v952_v57 }
 0x485   : > { %2513 = vpow2.f32 %v1342_v2 }
 0x488   : > { %1345 = vadd.xlane.f32.xlu1 %v1344_v55 }
 0x48a   : > { %v2512_v19 = vpop.eup %2511 }
 0x48b   : > { %v958_v22 = vmul.f32 %v2512_v19, %v3435_v17  ;;  %v3498_v24 = vpop.eup %2513  ;;  %v1150_v39 = vpop.xlane.xlu1 %1149 }
 0x48c   : > { %1544 = vadd.xlane.f32.xlu0 %v1543_v23  ;;  %v1347_v29 = vsel %vm845_vm2, %v3498_v24, 0.0  ;;  %v2219_v23 = vld [vmem:[#allocation7 + $0x8] sm:$0xff] }
 0x48d   : > { %2145 = vmatmul.msk.f32.vlgmr.msra.gmra.mxu0 %vm845_vm2, %v958_v22  ;;  %1690 = vmatpush.bf16.msra.mxu1 %v2219_v23 }
 0x48e   : > { %1380 = vmatpush.msra.mxu0 %v2415_v26 }
 0x490   : > { %1381 = vmatpush.msra.mxu0 %v2416_v28  ;;  %1348 = vadd.xlane.f32.xlu1 %v1347_v29 }
 0x492   : > { %v1251_v30 = vpop.xlane.xlu2 %1250 }
 0x493   : > { %2515 = vrcp.f32 %v1251_v30 }
 0x497   : > { %v1089_v31 = vpop.f32.mrf.mxu2 }
 0x499   : > { %v2516_v17 = vpop.eup %2515 }
 0x49a   : > { %v1255_v27 = vmul.f32 %v2516_v17, %v3449_v42  ;;  %v1447_v36 = vpop.xlane.xlu2 %1446 }
 0x49c   : > { %2164 = vmatmul.msk.f32.gmra.mxu2 %vm845_vm2, %v1255_v27 }
 0x49f   : > { %v1092_v33 = vpop.f32.mrf.mxu2 }
 0x4a0   : > { %v2427_v34 = vpack.i.bf16 %v1092_v33, %v1089_v31 }
 0x4a2   : > { %2428 = vrot.lane.b32.xlu2 %v2427_v34, %s3005_s4  ;;  %v1542_v25 = vpop.xlane.xlu2 %1541 }
 0x4aa   : > { %v2424_v45 = vpop.permute.xlu2 %2423 }
 0x4ab   : > { %v2425_v43 = vunpack.i.l.bf16 %v2424_v45  ;;  %v2426_v46 = vunpack.i.h.bf16 %v2424_v45 }
 0x4b9   : > { %v955_v38 = vpop.xlane.xlu0 %954 }
 0x4ba   : > { %2517 = vrcp.f32 %v955_v38 }
 0x4bb   : > { %2519 = vrcp.f32 %v1150_v39 }
 0x4c0   : > { %v2518_v40 = vpop.eup %2517 }
 0x4c1   : > { %v959_v41 = vmul.f32 %v2518_v40, %v3466_v59  ;;  %v2520_v44 = vpop.eup %2519  ;;  %v1444_v47 = vpop.xlane.xlu0 %1443 }
 0x4c2   : > { %v1156_v42 = vmul.f32 %v2520_v44, %v3444_v35  ;;  %2521 = vrcp.f32 %v1444_v47 }
 0x4c3   : > { %2146 = vmatmul.msk.f32.gmra.mxu0 %vm845_vm2, %v959_v41  ;;  %2523 = vrcp.f32 %v1447_v36 }
 0x4c8   : > { %v2522_v53 = vpop.eup %2521 }
 0x4c9   : > { %v1450_v20 = vmul.f32 %v2522_v53, %v3472_v61  ;;  %v2524_v35 = vpop.eup %2523 }
 0x4ca   : > { %v1451_v56 = vmul.f32 %v2524_v35, %v3455_v50 }
 0x4cb   : > { %2157 = vmatmul.msk.f32.vlgmr.msrb.gmra.mxu0 %vm845_vm2, %v1156_v42 }
 0x4cc   : > { %1576 = vmatpush.msrb.mxu0 %v2425_v43 }
 0x4ce   : > { %1577 = vmatpush.msrb.mxu0 %v2426_v46 }
 0x4d4   : > { %v2419_v32 = vpop.permute.xlu0 %2418 }
 0x4d5   : > { %v2420_v52 = vunpack.i.l.bf16 %v2419_v32  ;;  %v2421_v54 = vunpack.i.h.bf16 %v2419_v32 }
 0x4d7   : > { %1478 = vmatpush.msrb.mxu2 %v2420_v52 }
 0x4d9   : > { %1479 = vmatpush.msrb.mxu2 %v2421_v54 }
 0x4da   : > { %2175 = vmatmul.msk.f32.vlgmr.msrb.gmra.mxu2 %vm845_vm2, %v1450_v20 }
 0x4e2   : > { %2176 = vmatmul.msk.f32.gmra.mxu2 %vm845_vm2, %v1451_v56 }
 0x4f3   : > { %v1153_v58 = vpop.xlane.xlu1 %1152 }
 0x4f4   : > { %2525 = vrcp.f32 %v1153_v58 }
 0x4f8   : > { %v1285_v5 = vpop.f32.mrf.mxu2 }
 0x4fa   : > { %v2526_v59 = vpop.eup %2525 }
 0x4fb   : > { %v1346_v60 = vpop.xlane.xlu1 %1345  ;;  %v1157_v21 = vmul.f32 %v2526_v59, %v3483_v14 }
 0x4fc   : > { %2527 = vrcp.f32 %v1346_v60  ;;  %v2429_v26 = vpop.permute.xlu2 %2428 }
 0x4fd   : > { %2158 = vmatmul.msk.f32.gmra.mxu0 %vm845_vm2, %v1157_v21  ;;  %v2431_v38 = vunpack.i.h.bf16 %v2429_v26  ;;  %v2430_v39 = vunpack.i.l.bf16 %v2429_v26  ;;  %v2221_v26 = vld [vmem:[#allocation13 + $0x8] sm:$0xff] }
 0x4fe   : > { %1793 = vmatpush.bf16.msra.mxu2 %v2221_v26 }
 0x4ff   : > { %v1545_v1 = vpop.xlane.xlu0 %1544 }
 0x502   : > { %v2528_v37 = vpop.eup %2527 }
 0x503   : > { %v1352_v61 = vmul.f32 %v2528_v37, %v3489_v16  ;;  %v1349_v62 = vpop.xlane.xlu1 %1348 }
 0x504   : > { %2529 = vrcp.f32 %v1349_v62 }
 0x505   : > { %2169 = vmatmul.msk.f32.vlgmr.msra.gmra.mxu0 %vm845_vm2, %v1352_v61  ;;  %2531 = vrcp.f32 %v1542_v25 }
 0x506   : > { %2533 = vrcp.f32 %v1545_v1 }
 0x50a   : > { %v2530_v63 = vpop.eup %2529  ;;  %v991_v12 = vpop.f32.mrf.mxu0 }
 0x50b   : > { %v1353_v50 = vmul.f32 %v2530_v63, %v3498_v24  ;;  %v2532_v3 = vpop.eup %2531  ;;  %v2218_v24 = vld [vmem:[#allocation7] sm:$0xff]  ;;  %v2464_v63 = vld [vmem:[#allocation9] ss:$0 sm:$0xff] }
 0x50c   : > { %v1548_v4 = vmul.f32 %v2532_v3, %v3459_v51  ;;  %v2534_v6 = vpop.eup %2533  ;;  %1691 = vmatpush.bf16.msra.mxu1 %v2218_v24  ;;  %v2545_v3 = vld [vmem:[%s3226_s8] sm:$0xff] }
 0x50d   : > { %2170 = vmatmul.msk.f32.gmra.mxu0 %vm845_vm2, %v1353_v50  ;;  %v1549_v7 = vmul.f32 %v2534_v6, %v3493_v18 }
 0x515   : > { %2181 = vmatmul.msk.f32.vlgmr.msrb.gmra.mxu0 %vm845_vm2, %v1548_v4 }
 0x51d   : > { %2182 = vmatmul.msk.f32.gmra.mxu0 %vm845_vm2, %v1549_v7 }
 0x51f   : > { %v1288_v8 = vpop.f32.mrf.mxu2 }
 0x520   : > { %v2432_v10 = vpack.i.bf16 %v1288_v8, %v1285_v5  ;;  %v2546_v8 = vld [vmem:[%s3226_s8 + $0x8] sm:$0xff] }
 0x522   : > { %2433 = vrot.lane.b32.xlu1 %v2432_v10, %s3006_s19 }
 0x540   : > { %v994_v13 = vpop.f32.mrf.mxu0 }
 0x541   : > { %v2437_v14 = vpack.i.bf16 %v994_v13, %v991_v12  ;;  %v3012_v12 = vmov 32.0  }
 0x542   : > { %2535 = vrcp.f32 %v3012_v12 }
 0x543   : > { %2438 = vrot.lane.b32.xlu1 %v2437_v14, %s3007_s23 }
 0x548   : > { %v1187_v0 = vpop.f32.mrf.mxu0  ;;  %v2536_v13 = vpop.eup %2535 }
 0x549   : > { %v1709_v14 = vmul.f32 32.0, %v2536_v13  ;;  %vm1713_vm8 = vweird.f32 %v2536_v13 }
 0x55d   : > { %v1481_v48 = vpop.f32.mrf.mxu2 }
 0x565   : > { %v1484_v51 = vpop.f32.mrf.mxu2 }
 0x566   : > { %v2452_v15 = vpack.i.bf16 %v1484_v51, %v1481_v48  ;;  %v1710_v48 = vsub.f32 1.0, %v1709_v14 }
 0x568   : > { %2453 = vrot.lane.b32.xlu0 %v2452_v15, %s3008_s16  ;;  %v1711_v51 = vmul.f32 %v2536_v13, %v1710_v48 }
 0x56a   : > { %v1712_v15 = vadd.f32 %v2536_v13, %v1711_v51 }
 0x57a   : > { %v1190_v2 = vpop.f32.mrf.mxu0 }
 0x57b   : > { %v2442_v57 = vpack.i.bf16 %v1190_v2, %v1187_v0  ;;  %v3533_v0 = vsel %vm1713_vm8, %v2536_v13, %v1712_v15 }
 0x57d   : > { %2443 = vrot.lane.b32.xlu2 %v2442_v57, %s3009_s20 }
 0x582   : > { %v1383_v16 = vpop.f32.mrf.mxu0 }
 0x58a   : > { %v1386_v55 = vpop.f32.mrf.mxu0 }
 0x58b   : > { %v2447_v18 = vpack.i.bf16 %v1386_v55, %v1383_v16 }
 0x58d   : > { %2448 = vrot.lane.b32.xlu2 %v2447_v18, %s3010_s30 }
 0x592   : > { %v1579_v49 = vpop.f32.mrf.mxu0 }
 0x594   : > { %v2434_v28 = vpop.permute.xlu1 %2433 }
 0x595   : > { %v2436_v46 = vunpack.i.h.bf16 %v2434_v28  ;;  %v2435_v47 = vunpack.i.l.bf16 %v2434_v28 }
 0x59a   : > { %v1582_v19 = vpop.f32.mrf.mxu0 }
 0x59b   : > { %v2457_v22 = vpack.i.bf16 %v1582_v19, %v1579_v49 }
 0x59d   : > { %2458 = vrot.lane.b32.xlu1 %v2457_v22, %s3011_s18 }
 0x5b5   : > { %v2439_v29 = vpop.permute.xlu1 %2438 }
 0x5b6   : > { %v2441_v31 = vunpack.i.h.bf16 %v2439_v29  ;;  %v2440_v17 = vunpack.i.l.bf16 %v2439_v29 }
 0x5b8   : > { %v1642_v27 = vsel %vm811_vm1, %v3352_v9, %v2441_v31  ;;  %v1641_v33 = vsel %vm811_vm1, %v891_v11, %v2440_v17  ;;  %v2220_v31 = vld [vmem:[#allocation13] sm:$0xff] }
 0x5b9   : > { %v1644_v40 = vsel %vm1643_vm3, %v1641_v33, %v2430_v39  ;;  %v1645_v41 = vsel %vm1643_vm3, %v1642_v27, %v2431_v38  ;;  %1794 = vmatpush.bf16.msra.mxu2 %v2220_v31 }
 0x5d7   : > { %v2444_v30 = vpop.permute.xlu2 %2443 }
 0x5d8   : > { %v2446_v34 = vunpack.i.h.bf16 %v2444_v30  ;;  %v2445_v36 = vunpack.i.l.bf16 %v2444_v30 }
 0x5da   : > { %v1647_v44 = vsel %vm1646_vm4, %v1644_v40, %v2445_v36  ;;  %v1648_v45 = vsel %vm1646_vm4, %v1645_v41, %v2446_v34  ;;  %v2454_v32 = vpop.permute.xlu0 %2453 }
 0x5db   : > { %v1649_v9 = vsel %vm845_vm2, %v1647_v44, %v2435_v47  ;;  %v1650_v53 = vsel %vm845_vm2, %v1648_v45, %v2436_v46  ;;  %v2456_v20 = vunpack.i.h.bf16 %v2454_v32  ;;  %v2455_v35 = vunpack.i.l.bf16 %v2454_v32  ;;  %v2465_v47 = vld [vmem:[#allocation10] ss:$0 sm:$0xff] }
 0x5e7   : > { %v2449_v25 = vpop.permute.xlu2 %2448 }
 0x5e8   : > { %v2451_v42 = vunpack.i.h.bf16 %v2449_v25  ;;  %v2450_v43 = vunpack.i.l.bf16 %v2449_v25 }
 0x5ea   : > { %v1652_v52 = vsel %vm1651_vm5, %v1649_v9, %v2450_v43  ;;  %v1653_v54 = vsel %vm1651_vm5, %v1650_v53, %v2451_v42 }
 0x5eb   : > { %v1655_v60 = vsel %vm1654_vm6, %v1652_v52, %v2455_v35  ;;  %v1656_v21 = vsel %vm1654_vm6, %v1653_v54, %v2456_v20  ;;  %v2466_v52 = vld [vmem:[#allocation12] ss:$0 sm:$0xff] }
 0x60f   : > { %v2459_v56 = vpop.permute.xlu1 %2458 }
 0x610   : > { %v2461_v58 = vunpack.i.h.bf16 %v2459_v56  ;;  %v2460_v59 = vunpack.i.l.bf16 %v2459_v56 }
 0x612   : > { %v1658_v37 = vsel %vm1657_vm7, %v1655_v60, %v2460_v59  ;;  %v1659_v61 = vsel %vm1657_vm7, %v1656_v21, %v2461_v58  ;;  %v2223_v60 = vld [vmem:[#allocation16 + $0x8] sm:$0xff]  ;;  %v2222_v21 = vld [vmem:[#allocation16] sm:$0xff] }
 0x613   : > { %v1660_v62 = vpack.c.bf16 %v1659_v61, %v1658_v37  ;;  %1833 = vmatpush.bf16.msrb.mxu3 %v2223_v60  ;;  %v2467_v61 = vld [vmem:[#allocation15] ss:$0 sm:$0xff] }
 0x615   : > { %2191 = vmatmul.msk.bf16.vlgmr.msra.gmra.mxu1 %vm749_vm0, %v1660_v62 }
 0x617   : > { %1834 = vmatpush.bf16.msrb.mxu3 %v2222_v21 }
 0x692   : > { %v1693_v50 = vpop.f32.mrf.mxu1 }
 0x693   : > { %v1694_v1 = vadd.f32 %v2464_v63, %v1693_v50 }
 0x695   : > { %v1698_v4 = vadd.f32 %v2545_v3, %v1694_v1 }
 0x697   : > { %v1702_v5 = vsel %vm749_vm0, %v1698_v4, 0.0 }
 0x698   : > { %1703 = vadd.xlane.f32.xlu2 %v1702_v5  ;;  %v2468_v5 = vld [vmem:[#allocation18] ss:$0 sm:$0xff] }
 0x69a   : > { %v1695_v6 = vpop.f32.mrf.mxu1 }
 0x69b   : > { %v1696_v7 = vadd.f32 %v2464_v63, %v1695_v6 }
 0x69d   : > { %v1699_v10 = vadd.f32 %v2546_v8, %v1696_v7 }
 0x69f   : > { %v1705_v11 = vsel %vm749_vm0, %v1699_v10, 0.0 }
 0x6a0   : > { %1706 = vadd.xlane.f32.xlu1 %v1705_v11 }
 0x70b   : > { %v1704_v2 = vpop.xlane.xlu2 %1703 }
 0x70c   : > { %v1715_v57 = vmul.f32 %v3533_v0, %v1704_v2 }
 0x70e   : > { %v1717_v16 = vsub.f32 %v1698_v4, %v1715_v57 }
 0x710   : > { %v1719_v55 = vmul.f32 %v1717_v16, %v1717_v16 }
 0x712   : > { %v1721_v18 = vsel %vm749_vm0, %v1719_v55, 0.0 }
 0x713   : > { %v1707_v49 = vpop.xlane.xlu1 %1706  ;;  %1722 = vadd.xlane.f32.xlu0 %v1721_v18 }
 0x714   : > { %v1716_v19 = vmul.f32 %v3533_v0, %v1707_v49 }
 0x716   : > { %v1718_v22 = vsub.f32 %v1699_v10, %v1716_v19 }
 0x718   : > { %v1720_v23 = vmul.f32 %v1718_v22, %v1718_v22 }
 0x71a   : > { %v1724_v24 = vsel %vm749_vm0, %v1720_v23, 0.0 }
 0x71b   : > { %1725 = vadd.xlane.f32.xlu2 %v1724_v24 }
 0x786   : > { %v1723_v28 = vpop.xlane.xlu0 %1722 }
 0x787   : > { %v1727_v29 = vmul.f32 %v1723_v28, %v3533_v0 }
 0x789   : > { %v1729_v30 = vadd.f32 1e-05, %v1727_v29 }
 0x78b   : > { %2537 = vrsqrt.f32 %v1729_v30  ;;  %vm1737_vm10 = vweird.f32 %v1729_v30 }
 0x78e   : > { %v1726_v17 = vpop.xlane.xlu2 %1725 }
 0x78f   : > { %v1728_v27 = vmul.f32 %v1726_v17, %v3533_v0 }
 0x791   : > { %v2538_v33 = vpop.eup %2537  ;;  %v1730_v34 = vadd.f32 1e-05, %v1728_v27 }
 0x792   : > { %v1732_v36 = vmul.f32 %v2538_v33, %v1729_v30  ;;  %vm1738_vm9 = vweird.f32 %v2538_v33 }
 0x793   : > { %2539 = vrsqrt.f32 %v1730_v34  ;;  %vm1739_vm11 = vmor %vm1737_vm10, %vm1738_vm9  ;;  %vm1747_vm13 = vweird.f32 %v1730_v34 }
 0x794   : > { %v1733_v38 = vmul.f32 %v2538_v33, %v1732_v36 }
 0x796   : > { %v1734_v39 = vmul.f32 0.5, %v1733_v38 }
 0x798   : > { %v1735_v25 = vsub.f32 1.5, %v1734_v39  ;;  %v2469_v39 = vld [vmem:[#allocation19] ss:$0 sm:$0xff] }
 0x799   : > { %v2540_v40 = vpop.eup %2539 }
 0x79a   : > { %v1736_v41 = vmul.f32 %v2538_v33, %v1735_v25  ;;  %v1742_v44 = vmul.f32 %v2540_v40, %v1730_v34  ;;  %vm1748_vm12 = vweird.f32 %v2540_v40 }
 0x79b   : > { %vm1749_vm14 = vmor %vm1747_vm13, %vm1748_vm12 }
 0x79c   : > { %v1743_v45 = vmul.f32 %v2540_v40, %v1742_v44  ;;  %v1740_v42 = vsel %vm1739_vm11, %v2538_v33, %v1736_v41  ;;  %v2470_v41 = vld [vmem:[#allocation21] ss:$0 sm:$0xff] }
 0x79d   : > { %v1751_v32 = vmul.f32 %v1740_v42, %v1717_v16 }
 0x79e   : > { %v1744_v43 = vmul.f32 0.5, %v1743_v45 }
 0x79f   : > { %v1756_v54 = vmul.f32 %v2465_v47, %v1751_v32 }
 0x7a0   : > { %v1745_v46 = vsub.f32 1.5, %v1744_v43 }
 0x7a1   : > { %v1761_v56 = vadd.f32 %v2466_v52, %v1756_v54 }
 0x7a2   : > { %v1746_v9 = vmul.f32 %v2540_v40, %v1745_v46 }
 0x7a4   : > { %v1750_v53 = vsel %vm1749_vm14, %v2540_v40, %v1746_v9 }
 0x7a5   : > { %v1752_v20 = vmul.f32 %v1750_v53, %v1718_v22 }
 0x7a7   : > { %v1757_v35 = vmul.f32 %v2465_v47, %v1752_v20 }
 0x7a9   : > { %v1762_v58 = vadd.f32 %v2466_v52, %v1757_v35 }
 0x7ab   : > { %v1763_v59 = vpack.c.bf16 %v1762_v58, %v1761_v56 }
 0x7ad   : > { %2200 = vmatmul.msk.bf16.vlgmr.msra.gmra.mxu2 %vm749_vm0, %v1763_v59 }
 0x830   : > { %v1796_v37 = vpop.f32.mrf.mxu2 }
 0x831   : > { %v1797_v62 = vadd.f32 %v2467_v61, %v1796_v37 }
 0x833   : > { %v1801_v1 = vmax.f32 %v1797_v62, 0.0 }
 0x838   : > { %v1798_v63 = vpop.f32.mrf.mxu2 }
 0x839   : > { %v1799_v50 = vadd.f32 %v2467_v61, %v1798_v63 }
 0x83b   : > { %v1802_v3 = vmax.f32 %v1799_v50, 0.0 }
 0x83d   : > { %v1803_v4 = vpack.c.bf16 %v1802_v3, %v1801_v1 }
 0x83f   : > { %2209 = vmatmul.msk.bf16.vlgmr.msrb.gmra.mxu3 %vm749_vm0, %v1803_v4 }
 0x8c2   : > { %v1836_v6 = vpop.f32.mrf.mxu3 }
 0x8c3   : > { %v1837_v7 = vadd.f32 %v2468_v5, %v1836_v6 }
 0x8c5   : > { %v1841_v8 = vadd.f32 %v1837_v7, %v1761_v56 }
 0x8c7   : > { %v1845_v10 = vsel %vm749_vm0, %v1841_v8, 0.0 }
 0x8c8   : > { %1846 = vadd.xlane.f32.xlu1 %v1845_v10 }
 0x8ca   : > { %v1838_v11 = vpop.f32.mrf.mxu3 }
 0x8cb   : > { %v1839_v12 = vadd.f32 %v2468_v5, %v1838_v11 }
 0x8cd   : > { %v1842_v13 = vadd.f32 %v1839_v12, %v1762_v58 }
 0x8cf   : > { %v1848_v14 = vsel %vm749_vm0, %v1842_v13, 0.0 }
 0x8d0   : > { %1849 = vadd.xlane.f32.xlu2 %v1848_v14 }
 0x93b   : > { %v1847_v48 = vpop.xlane.xlu1 %1846 }
 0x93c   : > { %v1851_v51 = vmul.f32 %v1847_v48, %v3533_v0 }
 0x93e   : > { %v1853_v15 = vsub.f32 %v1841_v8, %v1851_v51 }
 0x940   : > { %v1855_v2 = vmul.f32 %v1853_v15, %v1853_v15 }
 0x942   : > { %v1857_v57 = vsel %vm749_vm0, %v1855_v2, 0.0 }
 0x943   : > { %v1850_v16 = vpop.xlane.xlu2 %1849  ;;  %1858 = vadd.xlane.f32.xlu1 %v1857_v57 }
 0x944   : > { %v1852_v55 = vmul.f32 %v1850_v16, %v3533_v0 }
 0x946   : > { %v1854_v18 = vsub.f32 %v1842_v13, %v1852_v55 }
 0x948   : > { %v1856_v49 = vmul.f32 %v1854_v18, %v1854_v18 }
 0x94a   : > { %v1860_v19 = vsel %vm749_vm0, %v1856_v49, 0.0 }
 0x94b   : > { %1861 = vadd.xlane.f32.xlu2 %v1860_v19 }
 0x9b6   : > { %v1859_v22 = vpop.xlane.xlu1 %1858 }
 0x9b7   : > { %v1863_v23 = vmul.f32 %v1859_v22, %v3533_v0 }
 0x9b9   : > { %v1865_v24 = vadd.f32 1e-05, %v1863_v23 }
 0x9bb   : > { %2541 = vrsqrt.f32 %v1865_v24  ;;  %vm1873_vm1 = vweird.f32 %v1865_v24 }
 0x9be   : > { %v1862_v26 = vpop.xlane.xlu2 %1861 }
 0x9bf   : > { %v1864_v28 = vmul.f32 %v1862_v26, %v3533_v0 }
 0x9c1   : > { %v2542_v29 = vpop.eup %2541  ;;  %v1866_v30 = vadd.f32 1e-05, %v1864_v28 }
 0x9c2   : > { %v1868_v31 = vmul.f32 %v2542_v29, %v1865_v24  ;;  %vm1874_vm15 = vweird.f32 %v2542_v29 }
 0x9c3   : > { %2543 = vrsqrt.f32 %v1866_v30  ;;  %vm1875_vm2 = vmor %vm1873_vm1, %vm1874_vm15  ;;  %vm1883_vm4 = vweird.f32 %v1866_v30 }
 0x9c4   : > { %v1869_v17 = vmul.f32 %v2542_v29, %v1868_v31 }
 0x9c6   : > { %v1870_v27 = vmul.f32 0.5, %v1869_v17 }
 0x9c8   : > { %v1871_v33 = vsub.f32 1.5, %v1870_v27 }
 0x9c9   : > { %v2544_v34 = vpop.eup %2543 }
 0x9ca   : > { %v1872_v36 = vmul.f32 %v2542_v29, %v1871_v33  ;;  %v1878_v38 = vmul.f32 %v2544_v34, %v1866_v30  ;;  %vm1884_vm3 = vweird.f32 %v2544_v34 }
 0x9cb   : > { %vm1885_vm5 = vmor %vm1883_vm4, %vm1884_vm3 }
 0x9cc   : > { %v1876_v25 = vsel %vm1875_vm2, %v2542_v29, %v1872_v36  ;;  %v1879_v40 = vmul.f32 %v2544_v34, %v1878_v38 }
 0x9cd   : > { %v1887_v44 = vmul.f32 %v1876_v25, %v1853_v15 }
 0x9ce   : > { %v1880_v0 = vmul.f32 0.5, %v1879_v40 }
 0x9cf   : > { %v1892_v45 = vmul.f32 %v2469_v39, %v1887_v44 }
 0x9d0   : > { %v1881_v42 = vsub.f32 1.5, %v1880_v0 }
 0x9d1   : > { %v1897_v43 = vadd.f32 %v2470_v41, %v1892_v45 }
 0x9d2   : > { %v1882_v46 = vmul.f32 %v2544_v34, %v1881_v42 }
 0x9d3   : > { %1899 = vst.msk [vmem:[%s720_s24] sm:$0xff] %vm749_vm0, %v1897_v43 }
 0x9d4   : > { %v1886_v47 = vsel %vm1885_vm5, %v2544_v34, %v1882_v46 }
 0x9d5   : > { %v1888_v32 = vmul.f32 %v1886_v47, %v1854_v18 }
 0x9d7   : > { %v1893_v9 = vmul.f32 %v2469_v39, %v1888_v32 }
 0x9d9   : > { %v1898_v53 = vadd.f32 %v2470_v41, %v1893_v9 }
 0x9db   : > { %1900 = vst.msk [vmem:[%s720_s24 + $0x8] sm:$0xff] %vm749_vm0, %v1898_v53 }
 0x9dc PF: > { %s3592_s25 = sld [smem:[#allocation29_spill]] }
 0x9e2   : > { %s33_s21 = sadd.s32 1, %s3592_s25  }
 0x9e3   : > { %p30_p7 = scmp.ge.s32.totalorder %s33_s21, 4  }
 0x9e5   :  { %32 = sbr.rel (!%p30_p7) target bundleno = 13 (0xd), region = 167 }
 0x9ea   :  { %1922 = vsyncpa [#allocation3], 1 }
 0x9eb   :  { %1924 = vsyncpa [#allocation3 + $0x1], 1 }
 0x9ec   :  { %1925 = vsyncpa [#allocation5], 1 }
 0x9ed   :  { %1926 = vsyncpa [#allocation8], 1 }
 0x9ee   :  { %1927 = vsyncpa [#allocation11], 1 }
 0x9ef   :  { %1928 = vsyncpa [#allocation14], 1 }
 0x9f0   :  { %1929 = vsyncpa [#allocation17], 1 }
 0x9f1   :  { %1930 = vsyncpa [#allocation20], 1 }

// kernel: klm_forward.7
= control target key start
LH: loop header
LB: loop body
LE: loop exit
PB: predicated region body
PF: predicated region fallthrough
CT: control target
= control target key end

     0   :  { %s3653_s0 = inlined_call_operand.vmem [shape: f32[2,16,32], index: 0, kind: input, shape index: {}]   ;;  %s3654_s1 = inlined_call_operand.hbm [shape: f32[1,16,32], index: 1, kind: input, shape index: {}]   ;;  %s3655_s2 = inlined_call_operand.hbm [shape: bf16[32,64], index: 2, kind: input, shape index: {}]   ;;  %s3656_s3 = inlined_call_operand.vmem [shape: f32[1,64], index: 3, kind: input, shape index: {}]   ;;  %s3657_s4 = inlined_call_operand.hbm [shape: bf16[32,32], index: 4, kind: input, shape index: {}]   ;;  %s3658_s5 = inlined_call_operand.hbm [shape: f32[1,32], index: 5, kind: input, shape index: {}]   ;;  %s3659_s6 = inlined_call_operand.hbm [shape: bf16[32,32], index: 6, kind: input, shape index: {}]   ;;  %s3660_s7 = inlined_call_operand.hbm [shape: f32[1,32], index: 7, kind: input, shape index: {}]   ;;  %s3661_s8 = inlined_call_operand.hbm [shape: f32[1,32], index: 8, kind: input, shape index: {}]   ;;  %s3662_s9 = inlined_call_operand.hbm [shape: f32[1,32], index: 9, kind: input, shape index: {}]   ;;  %s3663_s10 = inlined_call_operand.hbm [shape: bf16[32,32], index: 10, kind: input, shape index: {}]   ;;  %s3664_s11 = inlined_call_operand.hbm [shape: f32[1,32], index: 11, kind: input, shape index: {}]   ;;  %s3665_s12 = inlined_call_operand.hbm [shape: bf16[32,32], index: 12, kind: input, shape index: {}]   ;;  %s3666_s13 = inlined_call_operand.hbm [shape: f32[1,32], index: 13, kind: input, shape index: {}]   ;;  %s3667_s14 = inlined_call_operand.hbm [shape: f32[1,32], index: 14, kind: input, shape index: {}]   ;;  %s3668_s15 = inlined_call_operand.hbm [shape: f32[1,32], index: 15, kind: input, shape index: {}]   ;;  %s3669_s16 = inlined_call_operand.vmem [shape: f32[2,16,32], index: 16, kind: output, shape index: {}]  }
   0x1   :  { %3671 = sst [smem:[#allocation33_spill]] %s3653_s0 }
   0x2   :  { %3672 = sst [smem:[#allocation34_spill]] %s3655_s2 }
   0x3   :  { %3673 = sst [smem:[#allocation35_spill]] %s3658_s5 }
   0x4   :  { %3674 = sst [smem:[#allocation36_spill]] %s3660_s7 }
   0x5   :  { %3675 = sst [smem:[#allocation37_spill]] %s3669_s16 }
   0x6   :  { %21 = vsyncpa [#allocation3], 0 }
   0x7   :  { %22 = vsyncpa [#allocation5], 0 }
   0x8   :  { %23 = vsyncpa [#allocation8], 0 }
   0x9   :  { %24 = vsyncpa [#allocation11], 0 }
   0xa   :  { %25 = vsyncpa [#allocation14], 0 }
   0xb   :  { %26 = vsyncpa [#allocation17], 0 }
   0xc   :  { %27 = vsyncpa [#allocation20], 0 }
   0xd   :  { %28 = vsyncpa [#allocation23], 0  ;;  %s3172_s21 = smov 0  }
   0xe LB: > { %3676 = sst [smem:[#allocation32_spill]] %s3044_s21  ;;  %s3181_s25 = sadd.s32 4294967295, %s3044_s21   ;;  %s3044_s21 = sphi %s3172_s21, %s34_s21  }
   0xf   : > { %s3677_s2 = sld [smem:[#allocation34_spill]]  ;;  %p2111_p0 = scmp.ge.s32.totalorder %s3044_s21, 1 }
  0x10   : > { %p406_p1 = scmp.lt.s32.totalorder %s3044_s21, 3  ;;  %p2354_p2 = scmp.eq.s32.totalorder %s3181_s25, 0 }
  0x11   : > { %s3046_s27 = smov [#allocation4]   ;;  %s3679_s5 = sld [smem:[#allocation35_spill]] }
  0x12   : > { %p3186_p3 = pnand %p2111_p0, %p406_p1  ;;  %s433_s28 = sshll.u32 %s3046_s27, 4  ;;  %s434_s28 = int_to_ptr.vmem [resolvable:$true] %s433_s28 }
  0x13   : > { %s3047_s18 = smov [#allocation7]   ;;  %s3681_s7 = sld [smem:[#allocation36_spill]] }
  0x14   : > { %p2311_p4 = pneg %p3186_p3  ;;  %s465_s19 = sshll.u32 %s3047_s18, 4  ;;  %s466_s19 = int_to_ptr.vmem [resolvable:$true] %s465_s19 }
  0x15   : > { %s431_s24 = sshll.u32 %s3677_s2, 4  ;;  %s3048_s27 = smov 64   ;;  %s432_s24 = int_to_ptr.hbm [resolvable:$true] %s431_s24 }
  0x16   : > { %p3197_p5 = pnand %p2354_p2, %p2311_p4  ;;  %s3049_s29 = smov 4  }
  0x17   : > { %s463_s0 = sshll.u32 %s3679_s5, 4  ;;  %s3050_s30 = smov [#allocation10]   ;;  %s464_s0 = int_to_ptr.hbm [resolvable:$true] %s463_s0 }
  0x18   : > { %2317 = dma.hbm_to_vmem [thread:$0]  (!%p3197_p5), %s432_s24, 256, %s434_s28, [#allocation5], %s3048_s27, %s3048_s27, %s3049_s29  }
  0x19   : > { %s489_s23 = sshll.u32 %s3681_s7, 4  ;;  %s491_s2 = sshll.u32 %s3050_s30, 4  ;;  %s490_s23 = int_to_ptr.hbm [resolvable:$true] %s489_s23  ;;  %s492_s2 = int_to_ptr.vmem [resolvable:$true] %s491_s2 }
  0x1a   : > { %2323 = dma.hbm_to_vmem [thread:$0]  (!%p3197_p5), %s464_s0, 16, %s466_s19, [#allocation8]  }
  0x1b   : > { %s513_s20 = sshll.u32 %s3662_s9, 4  ;;  %s539_s21 = sshll.u32 %s3664_s11, 4  ;;  %s514_s20 = int_to_ptr.hbm [resolvable:$true] %s513_s20  ;;  %s540_s21 = int_to_ptr.hbm [resolvable:$true] %s539_s21 }
  0x1c   : > { %2329 = dma.hbm_to_vmem [thread:$0]  (!%p3197_p5), %s490_s23, 16, %s492_s2, [#allocation11]  }
  0x1d   : > { %s3051_s16 = smov [#allocation13]   ;;  %s3052_s28 = smov [#allocation16]  }
  0x1e   : > { %s515_s24 = sshll.u32 %s3051_s16, 4  ;;  %s541_s0 = sshll.u32 %s3052_s28, 4  ;;  %s516_s24 = int_to_ptr.vmem [resolvable:$true] %s515_s24  ;;  %s542_s0 = int_to_ptr.vmem [resolvable:$true] %s541_s0 }
  0x1f   : > { %2335 = dma.hbm_to_vmem [thread:$0]  (!%p3197_p5), %s514_s20, 16, %s516_s24, [#allocation14]  }
  0x20   : > { %s565_s30 = sshll.u32 %s3666_s13, 4  ;;  %s417_s23 = sshll.u32 %s3654_s1, 4  ;;  %s566_s30 = int_to_ptr.hbm [resolvable:$true] %s565_s30  ;;  %s418_s23 = int_to_ptr.hbm [resolvable:$true] %s417_s23 }
  0x21   : > { %2341 = dma.hbm_to_vmem [thread:$0]  (!%p3197_p5), %s540_s21, 16, %s542_s0, [#allocation17]  }
  0x22   : > { %s3053_s16 = smov [#allocation19]   ;;  %s3054_s20 = smov [#allocation2]  }
  0x23   : > { %s567_s18 = sshll.u32 %s3053_s16, 4  ;;  %s419_s22 = sshll.u32 %s3054_s20, 4  ;;  %s568_s18 = int_to_ptr.vmem [resolvable:$true] %s567_s18  ;;  %s420_s22 = int_to_ptr.vmem [resolvable:$true] %s419_s22 }
  0x24   : > { %2347 = dma.hbm_to_vmem [thread:$0]  (!%p3197_p5), %s566_s30, 16, %s568_s18, [#allocation20]  }
  0x25   : > { %s3055_s24 = smov 128   ;;  %s3056_s28 = smov 8  }
  0x26   : > { %2314 = dma.hbm_to_vmem [thread:$0]  (!%p3197_p5), %s418_s23, 256, %s420_s22, [#allocation3], %s3055_s24, %s3055_s24, %s3056_s28  }
  0x27   : > { %s448_s5 = sshll.u32 %s3657_s4, 4  ;;  %s3057_s19 = smov [#allocation6]   ;;  %s449_s5 = int_to_ptr.hbm [resolvable:$true] %s448_s5 }
  0x28   : > { %s450_s2 = sshll.u32 %s3057_s19, 4  ;;  %s474_s30 = sshll.u32 %s3659_s6, 4  ;;  %s451_s2 = int_to_ptr.vmem [resolvable:$true] %s450_s2  ;;  %s475_s30 = int_to_ptr.hbm [resolvable:$true] %s474_s30 }
  0x29   : > { %2320 = dma.hbm_to_vmem [thread:$0]  (!%p3197_p5), %s449_s5, 256, %s451_s2, [#allocation5], %s3048_s27, %s3048_s27, %s3049_s29  }
  0x2a   : > { %s3058_s23 = smov [#allocation9]   ;;  %s501_s24 = sshll.u32 %s3661_s8, 4  ;;  %s502_s24 = int_to_ptr.hbm [resolvable:$true] %s501_s24 }
  0x2b   : > { %s476_s18 = sshll.u32 %s3058_s23, 4  ;;  %s524_s0 = sshll.u32 %s3663_s10, 4  ;;  %s477_s18 = int_to_ptr.vmem [resolvable:$true] %s476_s18  ;;  %s525_s0 = int_to_ptr.hbm [resolvable:$true] %s524_s0 }
  0x2c   : > { %2326 = dma.hbm_to_vmem [thread:$0]  (!%p3197_p5), %s475_s30, 256, %s477_s18, [#allocation8], %s3048_s27, %s3048_s27, %s3049_s29  }
  0x2d   : > { %s3059_s5 = smov [#allocation12]   ;;  %s3060_s2 = smov [#allocation15]  }
  0x2e   : > { %s503_s19 = sshll.u32 %s3059_s5, 4  ;;  %s526_s7 = sshll.u32 %s3060_s2, 4  ;;  %s504_s19 = int_to_ptr.vmem [resolvable:$true] %s503_s19  ;;  %s527_s7 = int_to_ptr.vmem [resolvable:$true] %s526_s7 }
  0x2f   : > { %2332 = dma.hbm_to_vmem [thread:$0]  (!%p3197_p5), %s502_s24, 16, %s504_s19, [#allocation11]  }
  0x30   : > { %s550_s20 = sshll.u32 %s3665_s12, 4  ;;  %s577_s22 = sshll.u32 %s3667_s14, 4  ;;  %s551_s20 = int_to_ptr.hbm [resolvable:$true] %s550_s20  ;;  %s578_s22 = int_to_ptr.hbm [resolvable:$true] %s577_s22 }
  0x31   : > { %2338 = dma.hbm_to_vmem [thread:$0]  (!%p3197_p5), %s525_s0, 256, %s527_s7, [#allocation14], %s3048_s27, %s3048_s27, %s3049_s29  }
  0x32   : > { %s3061_s24 = smov [#allocation18]   ;;  %s3062_s21 = smov [#allocation21]  }
  0x33   : > { %s552_s28 = sshll.u32 %s3061_s24, 4  ;;  %s579_s5 = sshll.u32 %s3062_s21, 4  ;;  %s553_s28 = int_to_ptr.vmem [resolvable:$true] %s552_s28  ;;  %s580_s5 = int_to_ptr.vmem [resolvable:$true] %s579_s5 }
  0x34   : > { %2344 = dma.hbm_to_vmem [thread:$0]  (!%p3197_p5), %s551_s20, 256, %s553_s28, [#allocation17], %s3048_s27, %s3048_s27, %s3049_s29  }
  0x35   : > { %s589_s0 = sshll.u32 %s3668_s15, 4  ;;  %s3063_s7 = smov [#allocation22]   ;;  %s590_s0 = int_to_ptr.hbm [resolvable:$true] %s589_s0 }
  0x36   : > { %2350 = dma.hbm_to_vmem [thread:$0]  (!%p3197_p5), %s578_s22, 16, %s580_s5, [#allocation20]  }
  0x37   : > { %s591_s16 = sshll.u32 %s3063_s7, 4  ;;  %612 = sbr.rel (%p3186_p3) target bundleno = 2528 (0x9e0), region = 84  ;;  %s592_s16 = int_to_ptr.vmem [resolvable:$true] %s591_s16 }
  0x38   : > { %2353 = dma.hbm_to_vmem [thread:$0]  (!%p3197_p5), %s590_s0, 16, %s592_s16, [#allocation23]  }
  0x3c   : > { %3011 = dma.done.wait (%p2354_p2), [#allocation3], 256  }
  0x3d   : > { %3013 = vsyncadd (%p2354_p2), [#allocation3], 4294967040 }
  0x3e   : > { %3015 = dma.done.wait (%p2354_p2), [#allocation5], 512  }
  0x3f   : > { %3017 = vsyncadd (%p2354_p2), [#allocation5], 4294966784 }
  0x40   : > { %3019 = dma.done.wait (%p2354_p2), [#allocation8], 272  }
  0x41   : > { %3021 = vsyncadd (%p2354_p2), [#allocation8], 4294967024 }
  0x42   : > { %3023 = dma.done.wait (%p2354_p2), [#allocation11], 32  }
  0x43   : > { %3025 = vsyncadd (%p2354_p2), [#allocation11], 4294967264 }
  0x44   : > { %3027 = dma.done.wait (%p2354_p2), [#allocation14], 272  }
  0x45   : > { %3029 = vsyncadd (%p2354_p2), [#allocation14], 4294967024 }
  0x46   : > { %3031 = dma.done.wait (%p2354_p2), [#allocation17], 272  }
  0x47   : > { %3033 = vsyncadd (%p2354_p2), [#allocation17], 4294967024 }
  0x48   : > { %3035 = dma.done.wait (%p2354_p2), [#allocation20], 32  }
  0x49   : > { %3037 = vsyncadd (%p2354_p2), [#allocation20], 4294967264 }
  0x4a   : > { %3039 = dma.done.wait (%p2354_p2), [#allocation23], 16  }
  0x4b   : > { %3041 = vsyncadd (%p2354_p2), [#allocation23], 4294967280  ;;  %p728_p6 = scmp.lt.s32.totalorder %s3181_s25, 1  ;;  %s3682_s29 = sld [smem:[#allocation33_spill]]  ;;  %v2244_v0 = vld [vmem:[#allocation4 + $0x8] sm:$0xff]  ;;  %v741_v3 = vld [vmem:[#allocation2] sm:$0xff] }
  0x4c   : > { %v742_v4 = vld [vmem:[#allocation2 + $0x8] sm:$0xff]  ;;  %776 = vmatpush.bf16.msra.mxu0 %v2244_v0  ;;  %v2243_v5 = vld [vmem:[#allocation4] sm:$0xff]  ;;  %v2245_v9 = vld [vmem:[#allocation6] sm:$0xff]  ;;  %vm766_vm0 = vcmask 261120   ;;  %s3064_s18 = smov 92   ;;  %s3065_s22 = smov 124  }
  0x4d   : > { %s3686_s25 = smov (!%p728_p6, %s3181_s25), 1  ;;  %v2246_v8 = vld [vmem:[#allocation6 + $0x8] sm:$0xff]  ;;  %v2501_v12 = vld [vmem:[%s3656_s3] ss:$0 sm:$0xff]  ;;  %s3066_s24 = smov 96   ;;  %vm828_vm1 = vcmask 31744  }
  0x4e   : > { %s2241_s26 = sshll.u32 %s3686_s25, 4  ;;  %814 = vmatpush.bf16.msra.mxu1 %v2246_v8  ;;  %s3067_s28 = smov 88   ;;  %v2502_v18 = vld [vmem:[#allocation7] ss:$0 sm:$0xff]  ;;  %vm862_vm2 = vcmask 130048   ;;  %vm1660_vm3 = vcmask 64512  }
  0x4f   : > { %s3068_s21 = smov 120   ;;  %s3069_s5 = smov 84   ;;  %vm1663_vm4 = vcmask 97280   ;;  %vm1668_vm5 = vcmask 162816   ;;  %vm1671_vm6 = vcmask 195584   ;;  %vm1674_vm7 = vcmask 228352  }
  0x50   : > { %777 = vmatpush.bf16.msra.mxu0 %v2243_v5  ;;  %s3070_s19 = smov 116   ;;  %s3071_s2 = smov 76  }
  0x51   : > { %s3324_s23 = scalar_lea.vmem %s3682_s29, %s2241_s26  ;;  %s3072_s0 = smov 80  }
  0x52   : > { %v739_v1 = vld [vmem:[%s3324_s23] sm:$0xff]  ;;  %v740_v2 = vld [vmem:[%s3324_s23 + $0x8] sm:$0xff]  ;;  %815 = vmatpush.bf16.msra.mxu1 %v2245_v9  ;;  %s3073_s7 = smov 112   ;;  %s3074_s16 = smov 108  }
  0x53   : > { %v743_v6 = vadd.f32 %v741_v3, %v739_v1  ;;  %v744_v7 = vadd.f32 %v742_v4, %v740_v2  ;;  %v784_v11 = vpack.c.bf16 %v740_v2, %v739_v1  ;;  %s3075_s17 = smov 72   ;;  %s3076_s27 = smov 68  }
  0x54   : > { %s3077_s29 = smov 100   ;;  %s3078_s20 = smov 104  }
  0x55   : > { %v745_v10 = vpack.c.bf16 %v744_v7, %v743_v6  ;;  %2163 = vmatmul.msk.bf16.vlgmr.msra.gmra.mxu1 %vm766_vm0, %v784_v11  ;;  %s3079_s30 = smov 8  }
  0x57   : > { %2154 = vmatmul.msk.bf16.vlgmr.msra.gmra.mxu0 %vm766_vm0, %v745_v10 }
  0xd2   : > { %v817_v17 = vpop.f32.mrf.mxu1 }
  0xd3   : > { %v3367_v20 = vadd.f32 %v2502_v18, %v817_v17 }
  0xd4   : > { %v779_v13 = vpop.f32.mrf.mxu0 }
  0xd5   : > { %v3333_v14 = vadd.f32 %v2501_v12, %v779_v13 }
  0xd7   : > { %918 = vrot.lane.b32.xlu2 %v3333_v14, %s3064_s18 }
  0xda   : > { %v819_v19 = vpop.f32.mrf.mxu1 }
  0xdb   : > { %v3369_v21 = vadd.f32 %v2502_v18, %v819_v19 }
  0xdc   : > { %v781_v15 = vpop.f32.mrf.mxu0 }
  0xdd   : > { %v3336_v16 = vadd.f32 %v2501_v12, %v781_v15  ;;  %2253 = vmatpush.msra.mxu3 %v3369_v21  ;;  %905 = vmatpush.msrb.mxu0 %v3369_v21 }
  0xdf   : > { %916 = vrot.lane.b32.xlu1 %v3336_v16, %s3065_s22  ;;  %826 = vrot.lane.b32.xlu0 %v3336_v16, %s3066_s24 }
  0xe0   : > { %1018 = vrot.lane.b32.xlu2 %v3333_v14, %s3067_s28  ;;  %2254 = vmatpush.msra.mxu3 %v3367_v20 }
  0xe1   : > { %906 = vmatpush.msrb.mxu0 %v3367_v20 }
  0xe7   : > { %824 = vrot.lane.b32.xlu0 %v3333_v14, %s3066_s24  ;;  %s3082_s24 = smov 24  }
  0xe8   : > { %1014 = vrot.lane.b32.xlu2 %v3333_v14, %s3068_s21 }
  0xef   : > { %914 = vrot.lane.b32.xlu0 %v3333_v14, %s3065_s22 }
  0xf0   : > { %920 = vrot.lane.b32.xlu2 %v3336_v16, %s3064_s18  ;;  %s3080_s18 = smov 16  }
  0xf7   : > { %1116 = vrot.lane.b32.xlu0 %v3333_v14, %s3069_s5 }
  0xf8   : > { %1020 = vrot.lane.b32.xlu2 %v3336_v16, %s3067_s28  ;;  %s3083_s28 = smov 12  }
  0xff   : > { %1112 = vrot.lane.b32.xlu0 %v3333_v14, %s3070_s19 }
 0x100   : > { %1016 = vrot.lane.b32.xlu2 %v3336_v16, %s3068_s21 }
 0x107   : > { %1118 = vrot.lane.b32.xlu0 %v3336_v16, %s3069_s5  ;;  %s3085_s5 = smov 28  }
 0x108   : > { %1314 = vrot.lane.b32.xlu2 %v3336_v16, %s3071_s2 }
 0x10f   : > { %1216 = vrot.lane.b32.xlu0 %v3336_v16, %s3072_s0 }
 0x110   : > { %1210 = vrot.lane.b32.xlu2 %v3333_v14, %s3073_s7 }
 0x117   : > { %1312 = vrot.lane.b32.xlu0 %v3333_v14, %s3071_s2  ;;  %s3683_s2 = sld [smem:[#allocation37_spill]] }
 0x118   : > { %1310 = vrot.lane.b32.xlu2 %v3336_v16, %s3074_s16 }
 0x11f   : > { %1212 = vrot.lane.b32.xlu0 %v3336_v16, %s3073_s7 }
 0x120   : > { %1410 = vrot.lane.b32.xlu2 %v3333_v14, %s3075_s17 }
 0x127   : > { %1510 = vrot.lane.b32.xlu0 %v3336_v16, %s3076_s27 }
 0x128   : > { %1504 = vrot.lane.b32.xlu2 %v3333_v14, %s3077_s29 }
 0x12f   : > { %1406 = vrot.lane.b32.xlu0 %v3333_v14, %s3078_s20 }
 0x131   : > { %v919_v22 = vpop.permute.xlu2 %918 }
 0x137   : > { %1506 = vrot.lane.b32.xlu0 %v3336_v16, %s3077_s29 }
 0x13a   : > { %v1019_v23 = vpop.permute.xlu2 %1018 }
 0x142   : > { %v1015_v24 = vpop.permute.xlu2 %1014 }
 0x14a   : > { %v921_v25 = vpop.permute.xlu2 %920 }
 0x14b   : > { %2170 = vmatpush.xpose.msk.msrb.mxu3 %vm828_vm1, %v921_v25 }
 0x14f   : > { %2171 = vmatpush.xpose.msk.msrb.mxu3 %vm828_vm1, %v919_v22 }
 0x151   : > { %v827_v26 = vpop.permute.xlu0 %826  ;;  %v917_v47 = vpop.permute.xlu1 %916 }
 0x152   : > { %v1021_v27 = vpop.permute.xlu2 %1020  ;;  %2164 = vmatpush.xpose.msk.msra.mxu2 %vm828_vm1, %v827_v26 }
 0x153   : > { %2176 = vmatpush.xpose.msk.msrb.mxu1 %vm828_vm1, %v1021_v27 }
 0x157   : > { %2177 = vmatpush.xpose.msk.msrb.mxu1 %vm828_vm1, %v1019_v23 }
 0x159   : > { %v825_v28 = vpop.permute.xlu0 %824 }
 0x15a   : > { %2178 = vmatmul.msk.f32.vlgmr.msrb.gmra.mxu1 %vm828_vm1, %v1015_v24  ;;  %2165 = vmatpush.xpose.msk.msra.mxu2 %vm828_vm1, %v825_v28  ;;  %v1017_v29 = vpop.permute.xlu2 %1016 }
 0x15d   : > { %2166 = vmatmul.msk.f32.vlgmr.msra.gmra.mxu2 %vm828_vm1, %v3333_v14 }
 0x161   : > { %v915_v30 = vpop.permute.xlu0 %914 }
 0x162   : > { %2179 = vmatmul.msk.f32.gmra.mxu1 %vm828_vm1, %v1017_v29  ;;  %v1315_v57 = vpop.permute.xlu2 %1314 }
 0x165   : > { %2167 = vmatmul.msk.f32.gmra.mxu2 %vm828_vm1, %v3336_v16 }
 0x169   : > { %v1117_v31 = vpop.permute.xlu0 %1116 }
 0x16a   : > { %v1211_v59 = vpop.permute.xlu2 %1210 }
 0x171   : > { %v1113_v32 = vpop.permute.xlu0 %1112 }
 0x172   : > { %v1311_v63 = vpop.permute.xlu2 %1310 }
 0x179   : > { %v1119_v33 = vpop.permute.xlu0 %1118 }
 0x17a   : > { %v1411_v2 = vpop.permute.xlu2 %1410 }
 0x181   : > { %v1217_v34 = vpop.permute.xlu0 %1216 }
 0x182   : > { %2188 = vmatpush.xpose.msk.msra.mxu1 %vm828_vm1, %v1217_v34  ;;  %v1505_v6 = vpop.permute.xlu2 %1504 }
 0x189   : > { %v1313_v58 = vpop.permute.xlu0 %1312 }
 0x191   : > { %v1213_v60 = vpop.permute.xlu0 %1212 }
 0x199   : > { %v1511_v0 = vpop.permute.xlu0 %1510 }
 0x1a1   : > { %v1407_v3 = vpop.permute.xlu0 %1406 }
 0x1a9   : > { %v1507_v7 = vpop.permute.xlu0 %1506 }
 0x1d7   : > { %v1047_v37 = vpop.f32.mrf.mxu1 }
 0x1d8   : > { %v3400_v39 = vmul.f32 0.5, %v1047_v37 }
 0x1da   : > { %v1055_v42 = vsel %vm862_vm2, %v3400_v39, -inf }
 0x1df   : > { %v1050_v44 = vpop.f32.mrf.mxu1 }
 0x1e0   : > { %v854_v35 = vpop.f32.mrf.mxu2  ;;  %v3405_v45 = vmul.f32 0.5, %v1050_v44 }
 0x1e1   : > { %v3396_v36 = vmul.f32 0.5, %v854_v35 }
 0x1e2   : > { %v1058_v46 = vsel %vm862_vm2, %v3405_v45, -inf }
 0x1e3   : > { %v863_v38 = vsel %vm862_vm2, %v3396_v36, -inf }
 0x1e4   : > { %864 = vmax.xlane.f32.xlu2 %v863_v38 }
 0x1e8   : > { %v857_v40 = vpop.f32.mrf.mxu2 }
 0x1e9   : > { %v861_v41 = vmul.f32 0.5, %v857_v40 }
 0x1eb   : > { %v866_v43 = vsel %vm862_vm2, %v861_v41, -inf }
 0x1ec   : > { %1056 = vmax.xlane.f32.xlu2 %v1055_v42  ;;  %867 = vmax.xlane.f32.xlu1 %v866_v43 }
 0x1f4   : > { %1059 = vmax.xlane.f32.xlu2 %v1058_v46 }
 0x205   : > { %1114 = vrot.lane.b32.xlu1 %v3336_v16, %s3070_s19 }
 0x257   : > { %v865_v8 = vpop.xlane.xlu2 %864 }
 0x25f   : > { %v868_v48 = vpop.xlane.xlu1 %867  ;;  %v1057_v10 = vpop.xlane.xlu2 %1056 }
 0x260   : > { %v870_v49 = vsub.f32 %v861_v41, %v868_v48  ;;  %v1061_v11 = vsub.f32 %v3400_v39, %v1057_v10  ;;  %v3481_v48 = vpack.i.bf16 %v3367_v20, %v3369_v21 }
 0x262   : > { %v873_v50 = vmul.f32 1.442695, %v870_v49  ;;  %v1063_v13 = vmul.f32 1.442695, %v1061_v11 }
 0x264   : > { %2510 = vpow2.f32 %v873_v50 }
 0x26a   : > { %v2511_v51 = vpop.eup %2510 }
 0x26b   : > { %v878_v52 = vsel %vm862_vm2, %v2511_v51, 0.0 }
 0x26c   : > { %879 = vadd.xlane.f32.xlu1 %v878_v52 }
 0x277   : > { %v1115_v53 = vpop.permute.xlu1 %1114 }
 0x285   : > { %1214 = vrot.lane.b32.xlu1 %v3333_v14, %s3072_s0  ;;  %s737_s0 = scalar_lea.vmem %s3683_s2, %s2241_s26 }
 0x28d   : > { %1308 = vrot.lane.b32.xlu1 %v3333_v14, %s3074_s16 }
 0x295   : > { %1412 = vrot.lane.b32.xlu1 %v3336_v16, %s3075_s17 }
 0x29d   : > { %1508 = vrot.lane.b32.xlu1 %v3333_v14, %s3076_s27  ;;  %v1060_v14 = vpop.xlane.xlu2 %1059 }
 0x29e   : > { %v1062_v18 = vsub.f32 %v3405_v45, %v1060_v14 }
 0x2a0   : > { %v1065_v24 = vmul.f32 1.442695, %v1062_v18 }
 0x2a5   : > { %1408 = vrot.lane.b32.xlu1 %v3336_v16, %s3078_s20  ;;  %v869_v16 = vsub.f32 %v3396_v36, %v865_v8 }
 0x2a7   : > { %v871_v23 = vmul.f32 1.442695, %v869_v16 }
 0x2df   : > { %v880_v54 = vpop.xlane.xlu1 %879 }
 0x2e0   : > { %2512 = vrcp.f32 %v880_v54 }
 0x2e1   : > { %2514 = vpow2.f32 %v1063_v13 }
 0x2e2   : > { %2516 = vpow2.f32 %v871_v23 }
 0x2e3   : > { %2518 = vpow2.f32 %v1065_v24 }
 0x2e6   : > { %v2513_v55 = vpop.eup %2512 }
 0x2e7   : > { %v884_v56 = vmul.f32 %v2513_v55, %v2511_v51  ;;  %v3453_v25 = vpop.eup %2514 }
 0x2e8   : > { %v1067_v28 = vsel %vm862_vm2, %v3453_v25, 0.0 }
 0x2e9   : > { %2169 = vmatmul.msk.f32.vlgmr.msra.gmra.mxu3 %vm862_vm2, %v884_v56 }
 0x2ea   : > { %2182 = vmatpush.xpose.msk.msra.mxu3 %vm828_vm1, %v1119_v33 }
 0x2ee   : > { %2183 = vmatpush.xpose.msk.msra.mxu3 %vm828_vm1, %v1117_v31  ;;  %v3461_v31 = vpop.eup %2516 }
 0x2ef   : > { %v875_v34 = vsel %vm862_vm2, %v3461_v31, 0.0 }
 0x2f1   : > { %2172 = vmatmul.msk.f32.vlgmr.msrb.gmra.mxu3 %vm828_vm1, %v915_v30 }
 0x2f2   : > { %2194 = vmatpush.xpose.msk.msrb.mxu3 %vm828_vm1, %v1315_v57 }
 0x2f6   : > { %2195 = vmatpush.xpose.msk.msrb.mxu3 %vm828_vm1, %v1313_v58 }
 0x2f7   : > { %v1215_v61 = vpop.permute.xlu1 %1214 }
 0x2f8   : > { %2189 = vmatpush.xpose.msk.msra.mxu1 %vm828_vm1, %v1215_v61 }
 0x2f9   : > { %2173 = vmatmul.msk.f32.gmra.mxu3 %vm828_vm1, %v917_v47 }
 0x2fb   : > { %2190 = vmatmul.msk.f32.vlgmr.msra.gmra.mxu1 %vm828_vm1, %v1211_v59 }
 0x2ff   : > { %v1309_v62 = vpop.permute.xlu1 %1308 }
 0x301   : > { %2184 = vmatmul.msk.f32.vlgmr.msra.gmra.mxu3 %vm828_vm1, %v1113_v32  ;;  %v3463_v32 = vpop.eup %2518 }
 0x302   : > { %2206 = vmatpush.xpose.msk.msra.mxu3 %vm828_vm1, %v1511_v0  ;;  %v1070_v33 = vsel %vm862_vm2, %v3463_v32, 0.0 }
 0x303   : > { %2191 = vmatmul.msk.f32.gmra.mxu1 %vm828_vm1, %v1213_v60 }
 0x307   : > { %v1413_v1 = vpop.permute.xlu1 %1412 }
 0x308   : > { %2200 = vmatpush.xpose.msk.msrb.mxu1 %vm828_vm1, %v1413_v1 }
 0x309   : > { %2185 = vmatmul.msk.f32.gmra.mxu3 %vm828_vm1, %v1115_v53 }
 0x30c   : > { %2201 = vmatpush.xpose.msk.msrb.mxu1 %vm828_vm1, %v1411_v2 }
 0x30f   : > { %v1509_v4 = vpop.permute.xlu1 %1508  ;;  %2202 = vmatmul.msk.f32.vlgmr.msrb.gmra.mxu1 %vm828_vm1, %v1407_v3 }
 0x310   : > { %2207 = vmatpush.xpose.msk.msra.mxu3 %vm828_vm1, %v1509_v4 }
 0x311   : > { %2196 = vmatmul.msk.f32.vlgmr.msrb.gmra.mxu3 %vm828_vm1, %v1309_v62 }
 0x317   : > { %v1409_v5 = vpop.permute.xlu1 %1408 }
 0x318   : > { %2203 = vmatmul.msk.f32.gmra.mxu1 %vm828_vm1, %v1409_v5 }
 0x319   : > { %2197 = vmatmul.msk.f32.gmra.mxu3 %vm828_vm1, %v1311_v63 }
 0x321   : > { %2208 = vmatmul.msk.f32.vlgmr.msra.gmra.mxu3 %vm828_vm1, %v1505_v6 }
 0x329   : > { %2209 = vmatmul.msk.f32.gmra.mxu3 %vm828_vm1, %v1507_v7 }
 0x36c   : > { %v3444_v9 = vpop.f32.mrf.mxu3 }
 0x374   : > { %v947_v12 = vpop.f32.mrf.mxu3 }
 0x375   : > { %v953_v38 = vmul.f32 0.5, %v947_v12 }
 0x377   : > { %v955_v40 = vsel %vm862_vm2, %v953_v38, -inf }
 0x378   : > { %v1243_v15 = vpop.f32.mrf.mxu1 }
 0x379   : > { %v3448_v17 = vmul.f32 0.5, %v1243_v15 }
 0x37b   : > { %v1251_v19 = vsel %vm862_vm2, %v3448_v17, -inf }
 0x37c   : > { %v950_v22 = vpop.f32.mrf.mxu3  ;;  %1252 = vmax.xlane.f32.xlu1 %v1251_v19 }
 0x37d   : > { %v3501_v21 = vmul.f32 0.5, %v950_v22 }
 0x37f   : > { %v958_v56 = vsel %vm862_vm2, %v3501_v21, -inf }
 0x380   : > { %v1246_v26 = vpop.f32.mrf.mxu1 }
 0x381   : > { %v3455_v27 = vmul.f32 0.5, %v1246_v26 }
 0x383   : > { %v1254_v29 = vsel %vm862_vm2, %v3455_v27, -inf }
 0x384   : > { %v1145_v30 = vpop.f32.mrf.mxu3  ;;  %1068 = vadd.xlane.f32.xlu1 %v1067_v28  ;;  %1255 = vmax.xlane.f32.xlu0 %v1254_v29 }
 0x385   : > { %v1151_v44 = vmul.f32 0.5, %v1145_v30 }
 0x387   : > { %v1153_v46 = vsel %vm862_vm2, %v1151_v44, -inf }
 0x38c   : > { %v1148_v35 = vpop.f32.mrf.mxu3  ;;  %1071 = vadd.xlane.f32.xlu1 %v1070_v33  ;;  %876 = vadd.xlane.f32.xlu0 %v875_v34  ;;  %v1439_v36 = vpop.f32.mrf.mxu1 }
 0x38d   : > { %v3469_v37 = vmul.f32 0.5, %v1439_v36  ;;  %v3518_v2 = vmul.f32 0.5, %v1148_v35 }
 0x38f   : > { %v1447_v39 = vsel %vm862_vm2, %v3469_v37, -inf  ;;  %v1156_v6 = vsel %vm862_vm2, %v3518_v2, -inf }
 0x390   : > { %1448 = vmax.xlane.f32.xlu2 %v1447_v39 }
 0x394   : > { %956 = vmax.xlane.f32.xlu1 %v955_v40  ;;  %v1341_v41 = vpop.f32.mrf.mxu3 }
 0x395   : > { %v1442_v42 = vpop.f32.mrf.mxu1  ;;  %v3507_v57 = vmul.f32 0.5, %v1341_v41 }
 0x396   : > { %v3474_v43 = vmul.f32 0.5, %v1442_v42 }
 0x397   : > { %v1349_v58 = vsel %vm862_vm2, %v3507_v57, -inf }
 0x398   : > { %v1450_v45 = vsel %vm862_vm2, %v3474_v43, -inf }
 0x399   : > { %1451 = vmax.xlane.f32.xlu2 %v1450_v45 }
 0x39c   : > { %1154 = vmax.xlane.f32.xlu1 %v1153_v46  ;;  %v1344_v47 = vpop.f32.mrf.mxu3 }
 0x39d   : > { %v3483_v49 = vmul.f32 0.5, %v1344_v47 }
 0x39f   : > { %v1352_v50 = vsel %vm862_vm2, %v3483_v49, -inf }
 0x3a0   : > { %2437 = vrot.lane.b32.xlu0 %v3481_v48, %s3068_s21  ;;  %s3084_s21 = smov 20  }
 0x3a4   : > { %1353 = vmax.xlane.f32.xlu1 %v1352_v50  ;;  %v1537_v51 = vpop.f32.mrf.mxu3 }
 0x3a5   : > { %v3489_v52 = vmul.f32 0.5, %v1537_v51 }
 0x3a7   : > { %v1545_v53 = vsel %vm862_vm2, %v3489_v52, -inf }
 0x3ac   : > { %1546 = vmax.xlane.f32.xlu1 %v1545_v53  ;;  %v1540_v54 = vpop.f32.mrf.mxu3 }
 0x3ad   : > { %v3493_v55 = vmul.f32 0.5, %v1540_v54 }
 0x3af   : > { %v1548_v20 = vsel %vm862_vm2, %v3493_v55, -inf }
 0x3b1   : > { %2432 = vrot.lane.b32.xlu2 %v3481_v48, %s3065_s22  ;;  %s3081_s22 = smov 4  }
 0x3b4   : > { %1549 = vmax.xlane.f32.xlu1 %v1548_v20 }
 0x3b9   : > { %2442 = vrot.lane.b32.xlu2 %v3481_v48, %s3070_s19 }
 0x3ca   : > { %959 = vmax.xlane.f32.xlu0 %v958_v56 }
 0x3cd   : > { %2452 = vrot.lane.b32.xlu1 %v3481_v48, %s3074_s16 }
 0x3e2   : > { %1350 = vmax.xlane.f32.xlu2 %v1349_v58 }
 0x3ef   : > { %v1253_v59 = vpop.xlane.xlu1 %1252 }
 0x3f0   : > { %v1257_v60 = vsub.f32 %v3448_v17, %v1253_v59 }
 0x3f2   : > { %v1259_v61 = vmul.f32 1.442695, %v1257_v60 }
 0x3f4   : > { %2520 = vpow2.f32 %v1259_v61 }
 0x3f7   : > { %v1069_v62 = vpop.xlane.xlu1 %1068  ;;  %v1256_v63 = vpop.xlane.xlu0 %1255 }
 0x3f8   : > { %v1258_v16 = vsub.f32 %v3455_v27, %v1256_v63 }
 0x3fa   : > { %v3512_v0 = vpop.eup %2520  ;;  %2447 = vrot.lane.b32.xlu2 %v3481_v48, %s3073_s7  ;;  %v1261_v28 = vmul.f32 1.442695, %v1258_v16 }
 0x3fb   : > { %v1263_v1 = vsel %vm862_vm2, %v3512_v0, 0.0 }
 0x3fc   : > { %1264 = vadd.xlane.f32.xlu0 %v1263_v1 }
 0x3ff   : > { %v1072_v3 = vpop.xlane.xlu1 %1071  ;;  %v877_v4 = vpop.xlane.xlu0 %876 }
 0x400   : > { %2522 = vrcp.f32 %v877_v4 }
 0x403   : > { %v3520_v5 = vpop.xlane.xlu2 %1448 }
 0x404   : > { %1157 = vmax.xlane.f32.xlu0 %v1156_v6  ;;  %v1453_v20 = vsub.f32 %v3469_v37, %v3520_v5 }
 0x406   : > { %v2523_v7 = vpop.eup %2522  ;;  %v1455_v58 = vmul.f32 1.442695, %v1453_v20 }
 0x407   : > { %v957_v8 = vpop.xlane.xlu1 %956  ;;  %v883_v11 = vmul.f32 %v2523_v7, %v3461_v31 }
 0x408   : > { %v961_v10 = vsub.f32 %v953_v38, %v957_v8 }
 0x409   : > { %2168 = vmatmul.msk.f32.vlgmr.msrb.gmra.mxu0 %vm862_vm2, %v883_v11 }
 0x40a   : > { %v963_v12 = vmul.f32 1.442695, %v961_v10 }
 0x40c   : > { %2524 = vpow2.f32 %v963_v12  ;;  %v1452_v13 = vpop.xlane.xlu2 %1451 }
 0x40d   : > { %2526 = vrcp.f32 %v1069_v62  ;;  %v1454_v34 = vsub.f32 %v3474_v43, %v1452_v13 }
 0x40f   : > { %v1155_v14 = vpop.xlane.xlu1 %1154 }
 0x410   : > { %v1159_v15 = vsub.f32 %v1151_v44, %v1155_v14 }
 0x412   : > { %v3527_v17 = vpop.eup %2524  ;;  %v1161_v18 = vmul.f32 1.442695, %v1159_v15  ;;  %v2438_v19 = vpop.permute.xlu0 %2437 }
 0x413   : > { %v2527_v22 = vpop.eup %2526  ;;  %v967_v23 = vsel %vm862_vm2, %v3527_v17, 0.0  ;;  %v2439_v24 = vunpack.i.l.bf16 %v2438_v19  ;;  %v2440_v30 = vunpack.i.h.bf16 %v2438_v19 }
 0x414   : > { %2528 = vpow2.f32 %v1161_v18  ;;  %968 = vadd.xlane.f32.xlu0 %v967_v23  ;;  %v2433_v26 = vpop.permute.xlu2 %2432  ;;  %v1075_v31 = vmul.f32 %v2527_v22, %v3453_v25  ;;  %v1457_v25 = vmul.f32 1.442695, %v1454_v34 }
 0x415   : > { %2530 = vrcp.f32 %v1072_v3  ;;  %v2434_v29 = vunpack.i.l.bf16 %v2433_v26  ;;  %1103 = vmatpush.msrb.mxu2 %v2439_v24  ;;  %v2435_v27 = vunpack.i.h.bf16 %v2433_v26 }
 0x416   : > { %2532 = vpow2.f32 %v1261_v28 }
 0x417   : > { %v3532_v33 = vpop.xlane.xlu1 %1353  ;;  %1005 = vmatpush.msra.mxu0 %v2434_v29  ;;  %1104 = vmatpush.msrb.mxu2 %v2440_v30  ;;  %2534 = vpow2.f32 %v1457_v25 }
 0x418   : > { %2180 = vmatmul.msk.f32.vlgmr.msrb.gmra.mxu2 %vm862_vm2, %v1075_v31 }
 0x419   : > { %1006 = vmatpush.msra.mxu0 %v2435_v27 }
 0x41a   : > { %v3536_v35 = vpop.eup %2528 }
 0x41b   : > { %v2531_v36 = vpop.eup %2530  ;;  %v1165_v38 = vsel %vm862_vm2, %v3536_v35, 0.0 }
 0x41c   : > { %v2443_v39 = vpop.permute.xlu2 %2442  ;;  %1166 = vadd.xlane.f32.xlu1 %v1165_v38  ;;  %v1076_v41 = vmul.f32 %v2531_v36, %v3463_v32  ;;  %v3541_v42 = vpop.eup %2532 }
 0x41d   : > { %v2444_v40 = vunpack.i.l.bf16 %v2443_v39  ;;  %v2445_v44 = vunpack.i.h.bf16 %v2443_v39  ;;  %v1266_v46 = vsel %vm862_vm2, %v3541_v42, 0.0  ;;  %v3547_v50 = vpop.eup %2534 }
 0x41e   : > { %v1462_v32 = vsel %vm862_vm2, %v3547_v50, 0.0 }
 0x41f   : > { %v1547_v45 = vpop.xlane.xlu1 %1546  ;;  %1201 = vmatpush.msrb.mxu0 %v2444_v40 }
 0x420   : > { %2181 = vmatmul.msk.f32.gmra.mxu2 %vm862_vm2, %v1076_v41  ;;  %v1551_v43 = vsub.f32 %v3489_v52, %v1547_v45 }
 0x421   : > { %1202 = vmatpush.msrb.mxu0 %v2445_v44 }
 0x422   : > { %v1553_v47 = vmul.f32 1.442695, %v1551_v43 }
 0x423   : > { %1267 = vadd.xlane.f32.xlu2 %v1266_v46 }
 0x424   : > { %2536 = vpow2.f32 %v1553_v47 }
 0x427   : > { %v1550_v11 = vpop.xlane.xlu1 %1549 }
 0x428   : > { %v1552_v12 = vsub.f32 %v3493_v55, %v1550_v11 }
 0x42a   : > { %v3551_v51 = vpop.eup %2536  ;;  %v1555_v15 = vmul.f32 1.442695, %v1552_v12 }
 0x42b   : > { %1463 = vadd.xlane.f32.xlu2 %v1462_v32  ;;  %v1557_v53 = vsel %vm862_vm2, %v3551_v51, 0.0 }
 0x433   : > { %1558 = vadd.xlane.f32.xlu2 %v1557_v53 }
 0x43d   : > { %v960_v52 = vpop.xlane.xlu0 %959 }
 0x43e   : > { %v962_v54 = vsub.f32 %v3501_v21, %v960_v52 }
 0x440   : > { %v965_v56 = vmul.f32 1.442695, %v962_v54 }
 0x442   : > { %2538 = vpow2.f32 %v965_v56 }
 0x443   : > { %2540 = vpow2.f32 %v1455_v58 }
 0x448   : > { %v3558_v59 = vpop.eup %2538 }
 0x449   : > { %v970_v60 = vsel %vm862_vm2, %v3558_v59, 0.0  ;;  %v3564_v61 = vpop.eup %2540 }
 0x44a   : > { %971 = vadd.xlane.f32.xlu0 %v970_v60  ;;  %v1459_v21 = vsel %vm862_vm2, %v3564_v61, 0.0 }
 0x44b   : > { %2462 = vrot.lane.b32.xlu2 %v3481_v48, %s3077_s29 }
 0x452   : > { %1460 = vadd.xlane.f32.xlu0 %v1459_v21 }
 0x455   : > { %v1351_v37 = vpop.xlane.xlu2 %1350 }
 0x456   : > { %v1355_v8 = vsub.f32 %v3507_v57, %v1351_v37 }
 0x458   : > { %v1357_v13 = vmul.f32 1.442695, %v1355_v8 }
 0x45d   : > { %v2448_v62 = vpop.permute.xlu2 %2447 }
 0x45e   : > { %v2449_v63 = vunpack.i.l.bf16 %v2448_v62  ;;  %v2450_v1 = vunpack.i.h.bf16 %v2448_v62 }
 0x460   : > { %1299 = vmatpush.msra.mxu2 %v2449_v63 }
 0x462   : > { %1300 = vmatpush.msra.mxu2 %v2450_v1 }
 0x466   : > { %2457 = vrot.lane.b32.xlu0 %v3481_v48, %s3078_s20  ;;  %v1356_v48 = vsub.f32 %v3483_v49, %v3532_v33  ;;  %v2453_v49 = vpop.permute.xlu1 %2452 }
 0x467   : > { %v2454_v26 = vunpack.i.l.bf16 %v2453_v49  ;;  %v2455_v28 = vunpack.i.h.bf16 %v2453_v49 }
 0x46f   : > { %v1265_v3 = vpop.xlane.xlu0 %1264 }
 0x470   : > { %2542 = vrcp.f32 %v1265_v3 }
 0x476   : > { %v2543_v4 = vpop.eup %2542 }
 0x477   : > { %v1271_v5 = vmul.f32 %v2543_v4, %v3512_v0  ;;  %v1158_v6 = vpop.xlane.xlu0 %1157 }
 0x478   : > { %v1160_v7 = vsub.f32 %v3518_v2, %v1158_v6  ;;  %v1359_v2 = vmul.f32 1.442695, %v1356_v48 }
 0x479   : > { %2192 = vmatmul.msk.f32.vlgmr.msra.gmra.mxu2 %vm862_vm2, %v1271_v5 }
 0x47a   : > { %v1163_v10 = vmul.f32 1.442695, %v1160_v7 }
 0x47c   : > { %2544 = vpow2.f32 %v1163_v10 }
 0x47d   : > { %2546 = vpow2.f32 %v1357_v13 }
 0x47e   : > { %2548 = vpow2.f32 %v1555_v15 }
 0x482   : > { %v3575_v14 = vpop.eup %2544 }
 0x483   : > { %v1168_v0 = vsel %vm862_vm2, %v3575_v14, 0.0  ;;  %v3581_v16 = vpop.eup %2546 }
 0x484   : > { %1169 = vadd.xlane.f32.xlu1 %v1168_v0  ;;  %v1361_v55 = vsel %vm862_vm2, %v3581_v16, 0.0  ;;  %v3585_v18 = vpop.eup %2548 }
 0x485   : > { %v1560_v23 = vsel %vm862_vm2, %v3585_v18, 0.0 }
 0x486   : > { %v908_v11 = vpop.f32.mrf.mxu0 }
 0x487   : > { %v969_v57 = vpop.xlane.xlu0 %968 }
 0x488   : > { %2550 = vrcp.f32 %v969_v57 }
 0x489   : > { %2552 = vpow2.f32 %v1359_v2 }
 0x48c   : > { %1362 = vadd.xlane.f32.xlu1 %v1361_v55 }
 0x48e   : > { %v2551_v19 = vpop.eup %2550 }
 0x48f   : > { %v975_v22 = vmul.f32 %v2551_v19, %v3527_v17  ;;  %v3590_v24 = vpop.eup %2552  ;;  %v1167_v39 = vpop.xlane.xlu1 %1166 }
 0x490   : > { %1561 = vadd.xlane.f32.xlu0 %v1560_v23  ;;  %v1364_v29 = vsel %vm862_vm2, %v3590_v24, 0.0  ;;  %v2248_v23 = vld [vmem:[#allocation9 + $0x8] sm:$0xff] }
 0x491   : > { %2174 = vmatmul.msk.f32.vlgmr.msra.gmra.mxu0 %vm862_vm2, %v975_v22  ;;  %1707 = vmatpush.bf16.msra.mxu1 %v2248_v23 }
 0x492   : > { %1397 = vmatpush.msra.mxu0 %v2454_v26 }
 0x494   : > { %1398 = vmatpush.msra.mxu0 %v2455_v28  ;;  %1365 = vadd.xlane.f32.xlu1 %v1364_v29 }
 0x496   : > { %v1268_v30 = vpop.xlane.xlu2 %1267 }
 0x497   : > { %2554 = vrcp.f32 %v1268_v30 }
 0x49b   : > { %v1106_v31 = vpop.f32.mrf.mxu2 }
 0x49d   : > { %v2555_v17 = vpop.eup %2554 }
 0x49e   : > { %v1272_v27 = vmul.f32 %v2555_v17, %v3541_v42  ;;  %v1464_v36 = vpop.xlane.xlu2 %1463 }
 0x4a0   : > { %2193 = vmatmul.msk.f32.gmra.mxu2 %vm862_vm2, %v1272_v27 }
 0x4a3   : > { %v1109_v33 = vpop.f32.mrf.mxu2 }
 0x4a4   : > { %v2466_v34 = vpack.i.bf16 %v1109_v33, %v1106_v31 }
 0x4a6   : > { %2467 = vrot.lane.b32.xlu2 %v2466_v34, %s3079_s30  ;;  %v1559_v25 = vpop.xlane.xlu2 %1558 }
 0x4ae   : > { %v2463_v45 = vpop.permute.xlu2 %2462 }
 0x4af   : > { %v2464_v43 = vunpack.i.l.bf16 %v2463_v45  ;;  %v2465_v46 = vunpack.i.h.bf16 %v2463_v45 }
 0x4bd   : > { %v972_v38 = vpop.xlane.xlu0 %971 }
 0x4be   : > { %2556 = vrcp.f32 %v972_v38 }
 0x4bf   : > { %2558 = vrcp.f32 %v1167_v39 }
 0x4c4   : > { %v2557_v40 = vpop.eup %2556 }
 0x4c5   : > { %v976_v41 = vmul.f32 %v2557_v40, %v3558_v59  ;;  %v2559_v44 = vpop.eup %2558  ;;  %v1461_v47 = vpop.xlane.xlu0 %1460 }
 0x4c6   : > { %v1173_v42 = vmul.f32 %v2559_v44, %v3536_v35  ;;  %2560 = vrcp.f32 %v1461_v47 }
 0x4c7   : > { %2175 = vmatmul.msk.f32.gmra.mxu0 %vm862_vm2, %v976_v41  ;;  %2562 = vrcp.f32 %v1464_v36 }
 0x4cc   : > { %v2561_v53 = vpop.eup %2560 }
 0x4cd   : > { %v1467_v20 = vmul.f32 %v2561_v53, %v3564_v61  ;;  %v2563_v35 = vpop.eup %2562 }
 0x4ce   : > { %v1468_v56 = vmul.f32 %v2563_v35, %v3547_v50 }
 0x4cf   : > { %2186 = vmatmul.msk.f32.vlgmr.msrb.gmra.mxu0 %vm862_vm2, %v1173_v42 }
 0x4d0   : > { %1593 = vmatpush.msrb.mxu0 %v2464_v43 }
 0x4d2   : > { %1594 = vmatpush.msrb.mxu0 %v2465_v46 }
 0x4d8   : > { %v2458_v32 = vpop.permute.xlu0 %2457 }
 0x4d9   : > { %v2459_v52 = vunpack.i.l.bf16 %v2458_v32  ;;  %v2460_v54 = vunpack.i.h.bf16 %v2458_v32 }
 0x4db   : > { %1495 = vmatpush.msrb.mxu2 %v2459_v52 }
 0x4dd   : > { %1496 = vmatpush.msrb.mxu2 %v2460_v54 }
 0x4de   : > { %2204 = vmatmul.msk.f32.vlgmr.msrb.gmra.mxu2 %vm862_vm2, %v1467_v20 }
 0x4e6   : > { %2205 = vmatmul.msk.f32.gmra.mxu2 %vm862_vm2, %v1468_v56 }
 0x4f7   : > { %v1170_v58 = vpop.xlane.xlu1 %1169 }
 0x4f8   : > { %2564 = vrcp.f32 %v1170_v58 }
 0x4fc   : > { %v1302_v5 = vpop.f32.mrf.mxu2 }
 0x4fe   : > { %v2565_v59 = vpop.eup %2564 }
 0x4ff   : > { %v1363_v60 = vpop.xlane.xlu1 %1362  ;;  %v1174_v21 = vmul.f32 %v2565_v59, %v3575_v14 }
 0x500   : > { %2566 = vrcp.f32 %v1363_v60  ;;  %v2468_v26 = vpop.permute.xlu2 %2467 }
 0x501   : > { %2187 = vmatmul.msk.f32.gmra.mxu0 %vm862_vm2, %v1174_v21  ;;  %v2470_v38 = vunpack.i.h.bf16 %v2468_v26  ;;  %v2469_v39 = vunpack.i.l.bf16 %v2468_v26  ;;  %v2250_v26 = vld [vmem:[#allocation15 + $0x8] sm:$0xff] }
 0x502   : > { %1810 = vmatpush.bf16.msra.mxu2 %v2250_v26 }
 0x503   : > { %v1562_v1 = vpop.xlane.xlu0 %1561 }
 0x506   : > { %v2567_v37 = vpop.eup %2566 }
 0x507   : > { %v1369_v61 = vmul.f32 %v2567_v37, %v3581_v16  ;;  %v1366_v62 = vpop.xlane.xlu1 %1365 }
 0x508   : > { %2568 = vrcp.f32 %v1366_v62 }
 0x509   : > { %2198 = vmatmul.msk.f32.vlgmr.msra.gmra.mxu0 %vm862_vm2, %v1369_v61  ;;  %2570 = vrcp.f32 %v1559_v25 }
 0x50a   : > { %2572 = vrcp.f32 %v1562_v1 }
 0x50e   : > { %v2569_v63 = vpop.eup %2568  ;;  %v1008_v12 = vpop.f32.mrf.mxu0 }
 0x50f   : > { %v1370_v50 = vmul.f32 %v2569_v63, %v3590_v24  ;;  %v2571_v3 = vpop.eup %2570  ;;  %v2247_v24 = vld [vmem:[#allocation9] sm:$0xff]  ;;  %v2503_v63 = vld [vmem:[#allocation10] ss:$0 sm:$0xff] }
 0x510   : > { %v1565_v4 = vmul.f32 %v2571_v3, %v3551_v51  ;;  %v2573_v6 = vpop.eup %2572  ;;  %1708 = vmatpush.bf16.msra.mxu1 %v2247_v24  ;;  %v2584_v3 = vld [vmem:[%s3324_s23] sm:$0xff] }
 0x511   : > { %2199 = vmatmul.msk.f32.gmra.mxu0 %vm862_vm2, %v1370_v50  ;;  %v1566_v7 = vmul.f32 %v2573_v6, %v3585_v18 }
 0x519   : > { %2210 = vmatmul.msk.f32.vlgmr.msrb.gmra.mxu0 %vm862_vm2, %v1565_v4 }
 0x521   : > { %2211 = vmatmul.msk.f32.gmra.mxu0 %vm862_vm2, %v1566_v7 }
 0x523   : > { %v1305_v8 = vpop.f32.mrf.mxu2 }
 0x524   : > { %v2471_v10 = vpack.i.bf16 %v1305_v8, %v1302_v5  ;;  %v2585_v8 = vld [vmem:[%s3324_s23 + $0x8] sm:$0xff] }
 0x526   : > { %2472 = vrot.lane.b32.xlu1 %v2471_v10, %s3080_s18 }
 0x544   : > { %v1011_v13 = vpop.f32.mrf.mxu0 }
 0x545   : > { %v2476_v14 = vpack.i.bf16 %v1011_v13, %v1008_v12  ;;  %v3086_v12 = vmov 32.0  }
 0x546   : > { %2574 = vrcp.f32 %v3086_v12 }
 0x547   : > { %2477 = vrot.lane.b32.xlu1 %v2476_v14, %s3081_s22 }
 0x54c   : > { %v1204_v0 = vpop.f32.mrf.mxu0  ;;  %v2575_v13 = vpop.eup %2574 }
 0x54d   : > { %v1726_v14 = vmul.f32 32.0, %v2575_v13  ;;  %vm1730_vm8 = vweird.f32 %v2575_v13 }
 0x561   : > { %v1498_v48 = vpop.f32.mrf.mxu2 }
 0x569   : > { %v1501_v51 = vpop.f32.mrf.mxu2 }
 0x56a   : > { %v2491_v15 = vpack.i.bf16 %v1501_v51, %v1498_v48  ;;  %v1727_v48 = vsub.f32 1.0, %v1726_v14 }
 0x56c   : > { %2492 = vrot.lane.b32.xlu0 %v2491_v15, %s3082_s24  ;;  %v1728_v51 = vmul.f32 %v2575_v13, %v1727_v48 }
 0x56e   : > { %v1729_v15 = vadd.f32 %v2575_v13, %v1728_v51 }
 0x57e   : > { %v1207_v2 = vpop.f32.mrf.mxu0 }
 0x57f   : > { %v2481_v57 = vpack.i.bf16 %v1207_v2, %v1204_v0  ;;  %v3625_v0 = vsel %vm1730_vm8, %v2575_v13, %v1729_v15 }
 0x581   : > { %2482 = vrot.lane.b32.xlu2 %v2481_v57, %s3083_s28 }
 0x586   : > { %v1400_v16 = vpop.f32.mrf.mxu0 }
 0x58e   : > { %v1403_v55 = vpop.f32.mrf.mxu0 }
 0x58f   : > { %v2486_v18 = vpack.i.bf16 %v1403_v55, %v1400_v16 }
 0x591   : > { %2487 = vrot.lane.b32.xlu2 %v2486_v18, %s3084_s21 }
 0x596   : > { %v1596_v49 = vpop.f32.mrf.mxu0 }
 0x598   : > { %v2473_v28 = vpop.permute.xlu1 %2472 }
 0x599   : > { %v2475_v46 = vunpack.i.h.bf16 %v2473_v28  ;;  %v2474_v47 = vunpack.i.l.bf16 %v2473_v28 }
 0x59e   : > { %v1599_v19 = vpop.f32.mrf.mxu0 }
 0x59f   : > { %v2496_v22 = vpack.i.bf16 %v1599_v19, %v1596_v49 }
 0x5a1   : > { %2497 = vrot.lane.b32.xlu1 %v2496_v22, %s3085_s5 }
 0x5b9   : > { %v2478_v29 = vpop.permute.xlu1 %2477 }
 0x5ba   : > { %v2480_v31 = vunpack.i.h.bf16 %v2478_v29  ;;  %v2479_v17 = vunpack.i.l.bf16 %v2478_v29 }
 0x5bc   : > { %v1659_v27 = vsel %vm828_vm1, %v3444_v9, %v2480_v31  ;;  %v1658_v33 = vsel %vm828_vm1, %v908_v11, %v2479_v17  ;;  %v2249_v31 = vld [vmem:[#allocation15] sm:$0xff] }
 0x5bd   : > { %v1661_v40 = vsel %vm1660_vm3, %v1658_v33, %v2469_v39  ;;  %v1662_v41 = vsel %vm1660_vm3, %v1659_v27, %v2470_v38  ;;  %1811 = vmatpush.bf16.msra.mxu2 %v2249_v31 }
 0x5db   : > { %v2483_v30 = vpop.permute.xlu2 %2482 }
 0x5dc   : > { %v2485_v34 = vunpack.i.h.bf16 %v2483_v30  ;;  %v2484_v36 = vunpack.i.l.bf16 %v2483_v30 }
 0x5de   : > { %v1664_v44 = vsel %vm1663_vm4, %v1661_v40, %v2484_v36  ;;  %v1665_v45 = vsel %vm1663_vm4, %v1662_v41, %v2485_v34  ;;  %v2493_v32 = vpop.permute.xlu0 %2492 }
 0x5df   : > { %v1666_v9 = vsel %vm862_vm2, %v1664_v44, %v2474_v47  ;;  %v1667_v53 = vsel %vm862_vm2, %v1665_v45, %v2475_v46  ;;  %v2495_v20 = vunpack.i.h.bf16 %v2493_v32  ;;  %v2494_v35 = vunpack.i.l.bf16 %v2493_v32  ;;  %v2504_v47 = vld [vmem:[#allocation12] ss:$0 sm:$0xff] }
 0x5eb   : > { %v2488_v25 = vpop.permute.xlu2 %2487 }
 0x5ec   : > { %v2490_v42 = vunpack.i.h.bf16 %v2488_v25  ;;  %v2489_v43 = vunpack.i.l.bf16 %v2488_v25 }
 0x5ee   : > { %v1669_v52 = vsel %vm1668_vm5, %v1666_v9, %v2489_v43  ;;  %v1670_v54 = vsel %vm1668_vm5, %v1667_v53, %v2490_v42 }
 0x5ef   : > { %v1672_v60 = vsel %vm1671_vm6, %v1669_v52, %v2494_v35  ;;  %v1673_v21 = vsel %vm1671_vm6, %v1670_v54, %v2495_v20  ;;  %v2505_v52 = vld [vmem:[#allocation13] ss:$0 sm:$0xff] }
 0x613   : > { %v2498_v56 = vpop.permute.xlu1 %2497 }
 0x614   : > { %v2500_v58 = vunpack.i.h.bf16 %v2498_v56  ;;  %v2499_v59 = vunpack.i.l.bf16 %v2498_v56 }
 0x616   : > { %v1675_v37 = vsel %vm1674_vm7, %v1672_v60, %v2499_v59  ;;  %v1676_v61 = vsel %vm1674_vm7, %v1673_v21, %v2500_v58  ;;  %v2252_v60 = vld [vmem:[#allocation18 + $0x8] sm:$0xff]  ;;  %v2251_v21 = vld [vmem:[#allocation18] sm:$0xff] }
 0x617   : > { %v1677_v62 = vpack.c.bf16 %v1676_v61, %v1675_v37  ;;  %1850 = vmatpush.bf16.msrb.mxu3 %v2252_v60  ;;  %v2506_v61 = vld [vmem:[#allocation16] ss:$0 sm:$0xff] }
 0x619   : > { %2220 = vmatmul.msk.bf16.vlgmr.msra.gmra.mxu1 %vm766_vm0, %v1677_v62 }
 0x61b   : > { %1851 = vmatpush.bf16.msrb.mxu3 %v2251_v21 }
 0x696   : > { %v1710_v50 = vpop.f32.mrf.mxu1 }
 0x697   : > { %v1711_v1 = vadd.f32 %v2503_v63, %v1710_v50 }
 0x699   : > { %v1715_v4 = vadd.f32 %v2584_v3, %v1711_v1 }
 0x69b   : > { %v1719_v5 = vsel %vm766_vm0, %v1715_v4, 0.0 }
 0x69c   : > { %1720 = vadd.xlane.f32.xlu2 %v1719_v5  ;;  %v2507_v5 = vld [vmem:[#allocation19] ss:$0 sm:$0xff] }
 0x69e   : > { %v1712_v6 = vpop.f32.mrf.mxu1 }
 0x69f   : > { %v1713_v7 = vadd.f32 %v2503_v63, %v1712_v6 }
 0x6a1   : > { %v1716_v10 = vadd.f32 %v2585_v8, %v1713_v7 }
 0x6a3   : > { %v1722_v11 = vsel %vm766_vm0, %v1716_v10, 0.0 }
 0x6a4   : > { %1723 = vadd.xlane.f32.xlu1 %v1722_v11 }
 0x70f   : > { %v1721_v2 = vpop.xlane.xlu2 %1720 }
 0x710   : > { %v1732_v57 = vmul.f32 %v3625_v0, %v1721_v2 }
 0x712   : > { %v1734_v16 = vsub.f32 %v1715_v4, %v1732_v57 }
 0x714   : > { %v1736_v55 = vmul.f32 %v1734_v16, %v1734_v16 }
 0x716   : > { %v1738_v18 = vsel %vm766_vm0, %v1736_v55, 0.0 }
 0x717   : > { %v1724_v49 = vpop.xlane.xlu1 %1723  ;;  %1739 = vadd.xlane.f32.xlu0 %v1738_v18 }
 0x718   : > { %v1733_v19 = vmul.f32 %v3625_v0, %v1724_v49 }
 0x71a   : > { %v1735_v22 = vsub.f32 %v1716_v10, %v1733_v19 }
 0x71c   : > { %v1737_v23 = vmul.f32 %v1735_v22, %v1735_v22 }
 0x71e   : > { %v1741_v24 = vsel %vm766_vm0, %v1737_v23, 0.0 }
 0x71f   : > { %1742 = vadd.xlane.f32.xlu2 %v1741_v24 }
 0x78a   : > { %v1740_v28 = vpop.xlane.xlu0 %1739 }
 0x78b   : > { %v1744_v29 = vmul.f32 %v1740_v28, %v3625_v0 }
 0x78d   : > { %v1746_v30 = vadd.f32 1e-05, %v1744_v29 }
 0x78f   : > { %2576 = vrsqrt.f32 %v1746_v30  ;;  %vm1754_vm10 = vweird.f32 %v1746_v30 }
 0x792   : > { %v1743_v17 = vpop.xlane.xlu2 %1742 }
 0x793   : > { %v1745_v27 = vmul.f32 %v1743_v17, %v3625_v0 }
 0x795   : > { %v2577_v33 = vpop.eup %2576  ;;  %v1747_v34 = vadd.f32 1e-05, %v1745_v27 }
 0x796   : > { %v1749_v36 = vmul.f32 %v2577_v33, %v1746_v30  ;;  %vm1755_vm9 = vweird.f32 %v2577_v33 }
 0x797   : > { %2578 = vrsqrt.f32 %v1747_v34  ;;  %vm1756_vm11 = vmor %vm1754_vm10, %vm1755_vm9  ;;  %vm1764_vm13 = vweird.f32 %v1747_v34 }
 0x798   : > { %v1750_v38 = vmul.f32 %v2577_v33, %v1749_v36 }
 0x79a   : > { %v1751_v39 = vmul.f32 0.5, %v1750_v38 }
 0x79c   : > { %v1752_v25 = vsub.f32 1.5, %v1751_v39  ;;  %v2508_v39 = vld [vmem:[#allocation21] ss:$0 sm:$0xff] }
 0x79d   : > { %v2579_v40 = vpop.eup %2578 }
 0x79e   : > { %v1753_v41 = vmul.f32 %v2577_v33, %v1752_v25  ;;  %v1759_v44 = vmul.f32 %v2579_v40, %v1747_v34  ;;  %vm1765_vm12 = vweird.f32 %v2579_v40 }
 0x79f   : > { %vm1766_vm14 = vmor %vm1764_vm13, %vm1765_vm12 }
 0x7a0   : > { %v1760_v45 = vmul.f32 %v2579_v40, %v1759_v44  ;;  %v1757_v42 = vsel %vm1756_vm11, %v2577_v33, %v1753_v41  ;;  %v2509_v41 = vld [vmem:[#allocation22] ss:$0 sm:$0xff] }
 0x7a1   : > { %v1768_v32 = vmul.f32 %v1757_v42, %v1734_v16 }
 0x7a2   : > { %v1761_v43 = vmul.f32 0.5, %v1760_v45 }
 0x7a3   : > { %v1773_v54 = vmul.f32 %v2504_v47, %v1768_v32 }
 0x7a4   : > { %v1762_v46 = vsub.f32 1.5, %v1761_v43 }
 0x7a5   : > { %v1778_v56 = vadd.f32 %v2505_v52, %v1773_v54 }
 0x7a6   : > { %v1763_v9 = vmul.f32 %v2579_v40, %v1762_v46 }
 0x7a8   : > { %v1767_v53 = vsel %vm1766_vm14, %v2579_v40, %v1763_v9 }
 0x7a9   : > { %v1769_v20 = vmul.f32 %v1767_v53, %v1735_v22 }
 0x7ab   : > { %v1774_v35 = vmul.f32 %v2504_v47, %v1769_v20 }
 0x7ad   : > { %v1779_v58 = vadd.f32 %v2505_v52, %v1774_v35 }
 0x7af   : > { %v1780_v59 = vpack.c.bf16 %v1779_v58, %v1778_v56 }
 0x7b1   : > { %2229 = vmatmul.msk.bf16.vlgmr.msra.gmra.mxu2 %vm766_vm0, %v1780_v59 }
 0x834   : > { %v1813_v37 = vpop.f32.mrf.mxu2 }
 0x835   : > { %v1814_v62 = vadd.f32 %v2506_v61, %v1813_v37 }
 0x837   : > { %v1818_v1 = vmax.f32 %v1814_v62, 0.0 }
 0x83c   : > { %v1815_v63 = vpop.f32.mrf.mxu2 }
 0x83d   : > { %v1816_v50 = vadd.f32 %v2506_v61, %v1815_v63 }
 0x83f   : > { %v1819_v3 = vmax.f32 %v1816_v50, 0.0 }
 0x841   : > { %v1820_v4 = vpack.c.bf16 %v1819_v3, %v1818_v1 }
 0x843   : > { %2238 = vmatmul.msk.bf16.vlgmr.msrb.gmra.mxu3 %vm766_vm0, %v1820_v4 }
 0x8c6   : > { %v1853_v6 = vpop.f32.mrf.mxu3 }
 0x8c7   : > { %v1854_v7 = vadd.f32 %v2507_v5, %v1853_v6 }
 0x8c9   : > { %v1858_v8 = vadd.f32 %v1854_v7, %v1778_v56 }
 0x8cb   : > { %v1862_v10 = vsel %vm766_vm0, %v1858_v8, 0.0 }
 0x8cc   : > { %1863 = vadd.xlane.f32.xlu1 %v1862_v10 }
 0x8ce   : > { %v1855_v11 = vpop.f32.mrf.mxu3 }
 0x8cf   : > { %v1856_v12 = vadd.f32 %v2507_v5, %v1855_v11 }
 0x8d1   : > { %v1859_v13 = vadd.f32 %v1856_v12, %v1779_v58 }
 0x8d3   : > { %v1865_v14 = vsel %vm766_vm0, %v1859_v13, 0.0 }
 0x8d4   : > { %1866 = vadd.xlane.f32.xlu2 %v1865_v14 }
 0x93f   : > { %v1864_v48 = vpop.xlane.xlu1 %1863 }
 0x940   : > { %v1868_v51 = vmul.f32 %v1864_v48, %v3625_v0 }
 0x942   : > { %v1870_v15 = vsub.f32 %v1858_v8, %v1868_v51 }
 0x944   : > { %v1872_v2 = vmul.f32 %v1870_v15, %v1870_v15 }
 0x946   : > { %v1874_v57 = vsel %vm766_vm0, %v1872_v2, 0.0 }
 0x947   : > { %v1867_v16 = vpop.xlane.xlu2 %1866  ;;  %1875 = vadd.xlane.f32.xlu1 %v1874_v57 }
 0x948   : > { %v1869_v55 = vmul.f32 %v1867_v16, %v3625_v0 }
 0x94a   : > { %v1871_v18 = vsub.f32 %v1859_v13, %v1869_v55 }
 0x94c   : > { %v1873_v49 = vmul.f32 %v1871_v18, %v1871_v18 }
 0x94e   : > { %v1877_v19 = vsel %vm766_vm0, %v1873_v49, 0.0 }
 0x94f   : > { %1878 = vadd.xlane.f32.xlu2 %v1877_v19 }
 0x9ba   : > { %v1876_v22 = vpop.xlane.xlu1 %1875 }
 0x9bb   : > { %v1880_v23 = vmul.f32 %v1876_v22, %v3625_v0 }
 0x9bd   : > { %v1882_v24 = vadd.f32 1e-05, %v1880_v23 }
 0x9bf   : > { %2580 = vrsqrt.f32 %v1882_v24  ;;  %vm1890_vm1 = vweird.f32 %v1882_v24 }
 0x9c2   : > { %v1879_v26 = vpop.xlane.xlu2 %1878 }
 0x9c3   : > { %v1881_v28 = vmul.f32 %v1879_v26, %v3625_v0 }
 0x9c5   : > { %v2581_v29 = vpop.eup %2580  ;;  %v1883_v30 = vadd.f32 1e-05, %v1881_v28 }
 0x9c6   : > { %v1885_v31 = vmul.f32 %v2581_v29, %v1882_v24  ;;  %vm1891_vm15 = vweird.f32 %v2581_v29 }
 0x9c7   : > { %2582 = vrsqrt.f32 %v1883_v30  ;;  %vm1892_vm2 = vmor %vm1890_vm1, %vm1891_vm15  ;;  %vm1900_vm4 = vweird.f32 %v1883_v30 }
 0x9c8   : > { %v1886_v17 = vmul.f32 %v2581_v29, %v1885_v31 }
 0x9ca   : > { %v1887_v27 = vmul.f32 0.5, %v1886_v17 }
 0x9cc   : > { %v1888_v33 = vsub.f32 1.5, %v1887_v27 }
 0x9cd   : > { %v2583_v34 = vpop.eup %2582 }
 0x9ce   : > { %v1889_v36 = vmul.f32 %v2581_v29, %v1888_v33  ;;  %v1895_v38 = vmul.f32 %v2583_v34, %v1883_v30  ;;  %vm1901_vm3 = vweird.f32 %v2583_v34 }
 0x9cf   : > { %vm1902_vm5 = vmor %vm1900_vm4, %vm1901_vm3 }
 0x9d0   : > { %v1893_v25 = vsel %vm1892_vm2, %v2581_v29, %v1889_v36  ;;  %v1896_v40 = vmul.f32 %v2583_v34, %v1895_v38 }
 0x9d1   : > { %v1904_v44 = vmul.f32 %v1893_v25, %v1870_v15 }
 0x9d2   : > { %v1897_v0 = vmul.f32 0.5, %v1896_v40 }
 0x9d3   : > { %v1909_v45 = vmul.f32 %v2508_v39, %v1904_v44 }
 0x9d4   : > { %v1898_v42 = vsub.f32 1.5, %v1897_v0 }
 0x9d5   : > { %v1914_v43 = vadd.f32 %v2509_v41, %v1909_v45 }
 0x9d6   : > { %v1899_v46 = vmul.f32 %v2583_v34, %v1898_v42 }
 0x9d7   : > { %1916 = vst.msk [vmem:[%s737_s0] sm:$0xff] %vm766_vm0, %v1914_v43 }
 0x9d8   : > { %v1903_v47 = vsel %vm1902_vm5, %v2583_v34, %v1899_v46 }
 0x9d9   : > { %v1905_v32 = vmul.f32 %v1903_v47, %v1871_v18 }
 0x9db   : > { %v1910_v9 = vmul.f32 %v2508_v39, %v1905_v32 }
 0x9dd   : > { %v1915_v53 = vadd.f32 %v2509_v41, %v1910_v9 }
 0x9df   : > { %1917 = vst.msk [vmem:[%s737_s0 + $0x8] sm:$0xff] %vm766_vm0, %v1915_v53 }
 0x9e0 PF: > { %s3684_s25 = sld [smem:[#allocation32_spill]] }
 0x9e6   : > { %s34_s21 = sadd.s32 1, %s3684_s25  }
 0x9e7   : > { %p31_p7 = scmp.ge.s32.totalorder %s34_s21, 4  }
 0x9e9   :  { %33 = sbr.rel (!%p31_p7) target bundleno = 14 (0xe), region = 171 }
 0x9ee   :  { %1939 = vsyncpa [#allocation3], 1 }
 0x9ef   :  { %1941 = vsyncpa [#allocation3 + $0x1], 1 }
 0x9f0   :  { %1942 = vsyncpa [#allocation5], 1 }
 0x9f1   :  { %1943 = vsyncpa [#allocation8], 1 }
 0x9f2   :  { %1944 = vsyncpa [#allocation11], 1 }
 0x9f3   :  { %1945 = vsyncpa [#allocation14], 1 }
 0x9f4   :  { %1946 = vsyncpa [#allocation17], 1 }
 0x9f5   :  { %1947 = vsyncpa [#allocation20], 1 }
 0x9f6   :  { %1948 = vsyncpa [#allocation23], 1 }

// kernel: klm_forward.9
= control target key start
LH: loop header
LB: loop body
LE: loop exit
PB: predicated region body
PF: predicated region fallthrough
CT: control target
= control target key end

     0   :  { %s3044_s0 = inlined_call_operand.vmem [shape: f32[2,4,64], index: 0, kind: input, shape index: {}]   ;;  %s3045_s1 = inlined_call_operand.vmem [shape: f32[2,16,64], index: 1, kind: input, shape index: {}]   ;;  %s3046_s2 = inlined_call_operand.vmem [shape: f32[1,32], index: 2, kind: input, shape index: {}]   ;;  %s3047_s3 = inlined_call_operand.hbm [shape: f32[1,32], index: 3, kind: input, shape index: {}]   ;;  %s3048_s4 = inlined_call_operand.hbm [shape: f32[1,32], index: 4, kind: input, shape index: {}]   ;;  %s3049_s5 = inlined_call_operand.hbm [shape: f32[1,32], index: 5, kind: input, shape index: {}]   ;;  %s3050_s6 = inlined_call_operand.hbm [shape: bf16[32,64], index: 6, kind: input, shape index: {}]   ;;  %s3051_s7 = inlined_call_operand.hbm [shape: f32[1,64], index: 7, kind: input, shape index: {}]   ;;  %s3052_s8 = inlined_call_operand.hbm [shape: f32[1,32], index: 8, kind: input, shape index: {}]   ;;  %s3053_s9 = inlined_call_operand.hbm [shape: f32[1,32], index: 9, kind: input, shape index: {}]   ;;  %s3054_s10 = inlined_call_operand.hbm [shape: f32[1,32], index: 10, kind: input, shape index: {}]   ;;  %s3055_s11 = inlined_call_operand.hbm [shape: f32[1,32], index: 11, kind: input, shape index: {}]   ;;  %s3056_s12 = inlined_call_operand.hbm [shape: bf16[32,32], index: 12, kind: input, shape index: {}]   ;;  %s3057_s13 = inlined_call_operand.hbm [shape: f32[1,32], index: 13, kind: input, shape index: {}]   ;;  %s3058_s14 = inlined_call_operand.hbm [shape: f32[1,32], index: 14, kind: input, shape index: {}]   ;;  %s3059_s15 = inlined_call_operand.hbm [shape: f32[1,32], index: 15, kind: input, shape index: {}]   ;;  %s3060_s16 = inlined_call_operand.hbm [shape: f32[2,4,32], index: 16, kind: output, shape index: {}]  }
   0x1   :  { %3073 = sst [smem:[#allocation44_spill]] %s3044_s0 }
   0x2   :  { %3074 = sst [smem:[#allocation45_spill]] %s3045_s1 }
   0x3   :  { %3075 = sst [smem:[#allocation46_spill]] %s3046_s2 }
   0x4   :  { %3076 = sst [smem:[#allocation47_spill]] %s3048_s4 }
   0x5   :  { %3077 = sst [smem:[#allocation48_spill]] %s3050_s6 }
   0x6   :  { %3078 = sst [smem:[#allocation49_spill]] %s3052_s8 }
   0x7   :  { %3079 = sst [smem:[#allocation50_spill]] %s3060_s16 }
   0x8   :  { %21 = vsyncpa [#allocation5], 0 }
   0x9   :  { %22 = vsyncpa [#allocation8], 0 }
   0xa   :  { %23 = vsyncpa [#allocation11], 0 }
   0xb   :  { %24 = vsyncpa [#allocation14], 0 }
   0xc   :  { %25 = vsyncpa [#allocation17], 0 }
   0xd   :  { %26 = vsyncpa [#allocation20], 0 }
   0xe   :  { %27 = vsyncpa [#allocation23], 0 }
   0xf   :  { %28 = vsyncpa [#allocation6], 0 }
  0x10   :  { %30 = vsyncpa [#allocation6 + $0x1], 0  ;;  %s2602_s21 = smov 0   ;;  %s2604_s22 = smov 0  }
  0x11   :  { %s2606_s23 = smov 0   ;;  %s2608_s24 = smov 0  }
  0x12   :  { %s2610_s25 = smov 0   ;;  %s2612_s26 = smov 0  }
  0x13   :  { %s2614_s27 = smov 0   ;;  %s2616_s28 = smov 0  }
  0x14 LB: > { %3080 = sst [smem:[#allocation34_spill]] %s2467_s21  ;;  %s1647_s29 = sadd.s32 4294967295, %s2495_s28   ;;  %s2495_s28 = sphi %s2616_s28, %s36_s28   ;;  %s2491_s27 = sphi %s2614_s27, %s3120_s27   ;;  %s2487_s26 = sphi %s2612_s26, %s3119_s26   ;;  %s2483_s25 = sphi %s2610_s25, %s3118_s25   ;;  %s2479_s24 = sphi %s2608_s24, %s3117_s24   ;;  %s2475_s23 = sphi %s2606_s23, %s3116_s23   ;;  %s2471_s22 = sphi %s2604_s22, %s3122_s22   ;;  %s2467_s21 = sphi %s2602_s21, %s3121_s21  }
  0x15   : > { %3081 = sst [smem:[#allocation35_spill]] %s2475_s23  ;;  %s1648_s30 = sadd.s32 4294967294, %s2495_s28  }
  0x16   : > { %3082 = sst [smem:[#allocation36_spill]] %s2487_s26  ;;  %s45_s0 = sadd.s32 1, %s2487_s26 }
  0x17   : > { %3083 = sst [smem:[#allocation37_spill]] %s2491_s27  ;;  %s48_s17 = sadd.s32 1, %s2491_s27 }
  0x18   : > { %3084 = sst [smem:[#allocation38_spill]] %s2495_s28  ;;  %p46_p0 = scmp.ge.s32.totalorder %s45_s0, 2 }
  0x19   : > { %s403_s18 = sadd.s32 1, %s2475_s23  ;;  %p413_p1 = scmp.ne.s32.totalorder %s2475_s23, %s2471_s22 }
  0x1a   : > { %p414_p2 = scmp.eq.s32.totalorder %s1647_s29, 3  ;;  %s3124_s0 = smov (%p46_p0, %s45_s0), 0 }
  0x1b   : > { %3085 = sst [smem:[#allocation39_spill]] %s3124_s0  ;;  %s3126_s17 = smov (!%p46_p0, %s48_s17), %s2491_s27 }
  0x1c   : > { %p2652_p3 = por %p414_p2, %p413_p1  ;;  %p419_p4 = scmp.ne.s32.totalorder %s2471_s22, %s2467_s21 }
  0x1d   : > { %p50_p5 = scmp.ge.s32.totalorder %s3126_s17, 2  ;;  %p420_p6 = scmp.eq.s32.totalorder %s1648_s30, 3 }
  0x1e   : > { %s3086_s19 = scalar_select %p2652_p3, 1, 0 }
  0x1f   : > { %p1649_p7 = scmp.ge.s32.totalorder %s2495_s28, 1  ;;  %p427_p8 = scmp.lt.s32.totalorder %s2495_s28, 5 }
  0x20   : > { %3087 = sst [smem:[#allocation40_spill]] %s3086_s19  ;;  %s3128_s17 = smov (%p50_p5, %s3126_s17), 0 }
  0x21   : > { %3088 = sst [smem:[#allocation41_spill]] %s3128_s17  ;;  %p2662_p9 = por %p420_p6, %p419_p4 }
  0x22   : > { %p2666_p10 = pnand %p1649_p7, %p427_p8  ;;  %s400_s26 = ssub.s32 %s2491_s27, %s3128_s17 }
  0x23   : > { %s3089_s20 = scalar_select %p2662_p9, 1, 0 }
  0x24   : > { %p401_p11 = scmp.eq.s32.totalorder %s400_s26, 0  ;;  %p1772_p12 = pneg %p2666_p10 }
  0x25   : > { %3090 = sst [smem:[#allocation42_spill]] %s3089_s20  ;;  %p2674_p13 = scmp.eq.s32.totalorder %s1647_s29, 0 }
  0x26   : > { %s3093_s4 = sld [smem:[#allocation47_spill]]  ;;  %s2497_s27 = smov [#allocation7]  }
  0x27   : > { %s2682_s19 = scalar_select %p401_p11, %s2475_s23, %s403_s18  }
  0x28   : > { %p2686_p0 = pnand %p2674_p13, %p1772_p12  ;;  %s3096_s6 = sld [smem:[#allocation48_spill]] }
  0x29   : > { %3094 = sst [smem:[#allocation43_spill]] %s2682_s19  ;;  %s456_s2 = sshll.u32 %s2497_s27, 4  ;;  %s457_s2 = int_to_ptr.vmem [resolvable:$true] %s456_s2 }
  0x2a   : > { %s2498_s21 = smov [#allocation10]   ;;  %s3097_s8 = sld [smem:[#allocation49_spill]] }
  0x2b   : > { %s479_s28 = sshll.u32 %s2498_s21, 4  ;;  %s2499_s23 = smov 64   ;;  %s480_s28 = int_to_ptr.vmem [resolvable:$true] %s479_s28 }
  0x2c   : > { %s454_s16 = sshll.u32 %s3093_s4, 4  ;;  %s2500_s1 = smov 4   ;;  %s455_s16 = int_to_ptr.hbm [resolvable:$true] %s454_s16 }
  0x2d   : > { %1778 = dma.hbm_to_vmem [thread:$0]  (!%p2686_p0), %s455_s16, 16, %s457_s2, [#allocation8]  }
  0x2e   : > { %s477_s17 = sshll.u32 %s3096_s6, 4  ;;  %s2501_s26 = smov [#allocation13]   ;;  %s478_s17 = int_to_ptr.hbm [resolvable:$true] %s477_s17 }
  0x2f   : > { %1784 = dma.hbm_to_vmem [thread:$0]  (!%p2686_p0), %s478_s17, 256, %s480_s28, [#allocation11], %s2499_s23, %s2499_s23, %s2500_s1  }
  0x30   : > { %s504_s19 = sshll.u32 %s3097_s8, 4  ;;  %s506_s27 = sshll.u32 %s2501_s26, 4  ;;  %s505_s19 = int_to_ptr.hbm [resolvable:$true] %s504_s19  ;;  %s507_s27 = int_to_ptr.vmem [resolvable:$true] %s506_s27 }
  0x31   : > { %s528_s2 = sshll.u32 %s3054_s10, 4  ;;  %s551_s21 = sshll.u32 %s3056_s12, 4  ;;  %s529_s2 = int_to_ptr.hbm [resolvable:$true] %s528_s2  ;;  %s552_s21 = int_to_ptr.hbm [resolvable:$true] %s551_s21 }
  0x32   : > { %1790 = dma.hbm_to_vmem [thread:$0]  (!%p2686_p0), %s505_s19, 16, %s507_s27, [#allocation14]  }
  0x33   : > { %s2502_s18 = smov [#allocation16]   ;;  %s2503_s17 = smov [#allocation19]  }
  0x34   : > { %s530_s8 = sshll.u32 %s2502_s18, 4  ;;  %s553_s28 = sshll.u32 %s2503_s17, 4  ;;  %s531_s8 = int_to_ptr.vmem [resolvable:$true] %s530_s8  ;;  %s554_s28 = int_to_ptr.vmem [resolvable:$true] %s553_s28 }
  0x35   : > { %1796 = dma.hbm_to_vmem [thread:$0]  (!%p2686_p0), %s529_s2, 16, %s531_s8, [#allocation17]  }
  0x36   : > { %s578_s29 = sshll.u32 %s3058_s14, 4  ;;  %s2504_s19 = smov [#allocation22]   ;;  %s579_s29 = int_to_ptr.hbm [resolvable:$true] %s578_s29 }
  0x37   : > { %1802 = dma.hbm_to_vmem [thread:$0]  (!%p2686_p0), %s552_s21, 256, %s554_s28, [#allocation20], %s2499_s23, %s2499_s23, %s2500_s1  }
  0x38   : > { %s580_s27 = sshll.u32 %s2504_s19, 4  ;;  %s442_s8 = sshll.u32 %s3047_s3, 4  ;;  %s581_s27 = int_to_ptr.vmem [resolvable:$true] %s580_s27  ;;  %s443_s8 = int_to_ptr.hbm [resolvable:$true] %s442_s8 }
  0x39   : > { %1808 = dma.hbm_to_vmem [thread:$0]  (!%p2686_p0), %s579_s29, 16, %s581_s27, [#allocation23]  }
  0x3a   : > { %s2505_s2 = smov [#allocation4]   ;;  %s466_s26 = sshll.u32 %s3049_s5, 4  ;;  %s467_s26 = int_to_ptr.hbm [resolvable:$true] %s466_s26 }
  0x3b   : > { %s444_s18 = sshll.u32 %s2505_s2, 4  ;;  %s492_s21 = sshll.u32 %s3051_s7, 4  ;;  %s445_s18 = int_to_ptr.vmem [resolvable:$true] %s444_s18  ;;  %s493_s21 = int_to_ptr.hbm [resolvable:$true] %s492_s21 }
  0x3c   : > { %1775 = dma.hbm_to_vmem [thread:$0]  (!%p2686_p0), %s443_s8, 16, %s445_s18, [#allocation5]  }
  0x3d   : > { %s2506_s28 = smov [#allocation9]   ;;  %s2507_s19 = smov [#allocation12]  }
  0x3e   : > { %s468_s29 = sshll.u32 %s2506_s28, 4  ;;  %s494_s27 = sshll.u32 %s2507_s19, 4  ;;  %s469_s29 = int_to_ptr.vmem [resolvable:$true] %s468_s29  ;;  %s495_s27 = int_to_ptr.vmem [resolvable:$true] %s494_s27 }
  0x3f   : > { %1781 = dma.hbm_to_vmem [thread:$0]  (!%p2686_p0), %s467_s26, 16, %s469_s29, [#allocation8]  }
  0x40   : > { %s516_s2 = sshll.u32 %s3053_s9, 4  ;;  %s540_s17 = sshll.u32 %s3055_s11, 4  ;;  %s517_s2 = int_to_ptr.hbm [resolvable:$true] %s516_s2  ;;  %s541_s17 = int_to_ptr.hbm [resolvable:$true] %s540_s17 }
  0x41   : > { %1787 = dma.hbm_to_vmem [thread:$0]  (!%p2686_p0), %s493_s21, 16, %s495_s27, [#allocation11]  }
  0x42   : > { %s2508_s6 = smov [#allocation15]   ;;  %s2509_s26 = smov [#allocation18]  }
  0x43   : > { %s518_s1 = sshll.u32 %s2508_s6, 4  ;;  %s542_s23 = sshll.u32 %s2509_s26, 4  ;;  %s519_s1 = int_to_ptr.vmem [resolvable:$true] %s518_s1  ;;  %s543_s23 = int_to_ptr.vmem [resolvable:$true] %s542_s23 }
  0x44   : > { %1793 = dma.hbm_to_vmem [thread:$0]  (!%p2686_p0), %s517_s2, 16, %s519_s1, [#allocation14]  }
  0x45   : > { %s566_s19 = sshll.u32 %s3057_s13, 4  ;;  %s590_s16 = sshll.u32 %s3059_s15, 4  ;;  %s567_s19 = int_to_ptr.hbm [resolvable:$true] %s566_s19  ;;  %s591_s16 = int_to_ptr.hbm [resolvable:$true] %s590_s16 }
  0x46   : > { %1799 = dma.hbm_to_vmem [thread:$0]  (!%p2686_p0), %s541_s17, 16, %s543_s23, [#allocation17]  }
  0x47   : > { %s2510_s4 = smov [#allocation21]   ;;  %s2511_s2 = smov [#allocation24]  }
  0x48   : > { %s568_s8 = sshll.u32 %s2510_s4, 4  ;;  %s592_s18 = sshll.u32 %s2511_s2, 4  ;;  %s569_s8 = int_to_ptr.vmem [resolvable:$true] %s568_s8  ;;  %s593_s18 = int_to_ptr.vmem [resolvable:$true] %s592_s18 }
  0x49   : > { %1805 = dma.hbm_to_vmem [thread:$0]  (!%p2686_p0), %s567_s19, 16, %s569_s8, [#allocation20]  }
  0x4a   : > { %1811 = dma.hbm_to_vmem [thread:$0]  (!%p2686_p0), %s591_s16, 16, %s593_s18, [#allocation23]  }
  0x4b   : > { %623 = sbr.rel (%p2666_p10) target bundleno = 1702 (0x6a6), region = 84 }
  0x50   : > { %2434 = dma.done.wait (%p2674_p13), [#allocation5], 16  }
  0x51   : > { %2436 = vsyncadd (%p2674_p13), [#allocation5], 4294967280 }
  0x52   : > { %2438 = dma.done.wait (%p2674_p13), [#allocation8], 32  }
  0x53   : > { %2440 = vsyncadd (%p2674_p13), [#allocation8], 4294967264 }
  0x54   : > { %2442 = dma.done.wait (%p2674_p13), [#allocation11], 272  }
  0x55   : > { %2444 = vsyncadd (%p2674_p13), [#allocation11], 4294967024 }
  0x56   : > { %2446 = dma.done.wait (%p2674_p13), [#allocation14], 32  }
  0x57   : > { %2448 = vsyncadd (%p2674_p13), [#allocation14], 4294967264 }
  0x58   : > { %2450 = dma.done.wait (%p2674_p13), [#allocation17], 32  }
  0x59   : > { %2452 = vsyncadd (%p2674_p13), [#allocation17], 4294967264 }
  0x5a   : > { %2454 = dma.done.wait (%p2674_p13), [#allocation20], 272  }
  0x5b   : > { %2456 = vsyncadd (%p2674_p13), [#allocation20], 4294967024 }
  0x5c   : > { %2458 = dma.done.wait (%p2674_p13), [#allocation23], 32  }
  0x5d   : > { %2460 = vsyncadd (%p2674_p13), [#allocation23], 4294967264  ;;  %s738_s0 = sand.u32 1, %s2471_s22   ;;  %p741_p1 = scmp.lt.s32.totalorder %s2483_s25, 1 }
  0x5e   : > { %s2786_s20 = sshll.u32 %s738_s0, 2  ;;  %p747_p2 = scmp.lt.s32.totalorder %s2479_s24, 1 }
  0x5f   : > { %s742_s17 = scalar_select %p741_p1, %s2483_s25, 1 }
  0x60   : > { %s748_s6 = scalar_select %p747_p2, %s2479_s24, 1 }
  0x61   : > { %s1679_s1 = sshll.u32 %s742_s17, 2  ;;  %s1680_s26 = sshll.u32 %s742_s17, 1 }
  0x62   : > { %s3098_s28 = sld [smem:[#allocation44_spill]]  ;;  %s750_s19 = sadd.s32 %s1680_s26, %s748_s6 }
  0x63   : > { %s1681_s21 = sshll.u32 %s750_s19, 3  ;;  %s3099_s4 = sld [smem:[#allocation45_spill]] }
  0x64   : > { %s740_s2 = scalar_lea.vmem [#allocation25], %s2786_s20  ;;  %p1682_p4 = scmp.ne.s32.totalorder %s2479_s24, 0 }
  0x66   : > { %757 = sbr.rel (%p1682_p4) target bundleno = 110 (0x6e), region = 140 }
  0x68   : > { %s744_s29 = scalar_lea.vmem %s3098_s28, %s1679_s1 }
  0x69   : > { %s752_s8 = scalar_lea.vmem %s3099_s4, %s1681_s21 }
  0x6b   : > { %vm758_vm0 = vcmask 257024   ;;  %v2512_v0 = vmov 0.0  }
  0x6c   : > { %759 = vst.msk [vmem:[#allocation2] sm:$0xf] %vm758_vm0, %v2512_v0 }
  0x6d   : > { %760 = vst.msk [vmem:[#allocation3] sm:$0xf] %vm758_vm0, %v2512_v0 }
  0x6e PF: > { %v2799_v1 = vld [vmem:[%s744_s29] sm:$0xf]  ;;  %vm3072_vm1 = vcmask 257024   ;;  %vm805_vm2 = vcmask 261120   ;;  %v2513_v5 = vmov 32.0   ;;  %v1713_v23 = vld [vmem:[#allocation10 + $0x8] sm:$0xff] }
  0x6f   : > { %v766_v2 = vsel %vm3072_vm1, %v2799_v1, 0.0  ;;  %v2803_v3 = vld [vmem:[%s752_s8] sm:$0xff]  ;;  %1936 = vrcp.f32 %v2513_v5  ;;  %886 = vmatpush.bf16.msra.mxu0 %v1713_v23  ;;  %1716 = vmatpush.bf16.msra.mxu1 %v1713_v23  ;;  %v1712_v26 = vld [vmem:[#allocation10] sm:$0xff]  ;;  %s3100_s6 = sld [smem:[#allocation46_spill]]  ;;  %v1928_v41 = vld [vmem:[#allocation4] ss:$0 sm:$0xff] }
  0x70   : > { %767 = vadd.xlane.f32.xlu0 %v766_v2  ;;  %v806_v4 = vsel %vm805_vm2, %v2803_v3, 0.0  ;;  %v1929_v48 = vld [vmem:[#allocation7] ss:$0 sm:$0xff]  ;;  %v1930_v50 = vld [vmem:[#allocation9] ss:$0 sm:$0xff]  ;;  %s2514_s1 = smov 96  }
  0x71   : > { %v1931_v5 = vld [vmem:[#allocation12] ss:$0 sm:$0xff]  ;;  %s2515_s26 = smov 32   ;;  %p1697_p5 = scmp.ne.s32.totalorder %s2479_s24, 1 }
  0x72   : > { %s2516_s23 = smov (!%p1697_p5), 96  }
  0x73   : > { %887 = vmatpush.bf16.msra.mxu0 %v1712_v26  ;;  %1717 = vmatpush.bf16.msra.mxu1 %v1712_v26 }
  0x75   : > { %v1937_v6 = vpop.eup %1936  ;;  %v1927_v38 = vld [vmem:[%s3100_s6] ss:$0 sm:$0xff] }
  0x76   : > { %v770_v7 = vmul.f32 32.0, %v1937_v6  ;;  %vm774_vm3 = vweird.f32 %v1937_v6 }
  0x78   : > { %807 = vadd.xlane.f32.xlu0 %v806_v4  ;;  %v771_v8 = vsub.f32 1.0, %v770_v7 }
  0x7a   : > { %v772_v9 = vmul.f32 %v1937_v6, %v771_v8 }
  0x7c   : > { %v773_v10 = vadd.f32 %v1937_v6, %v772_v9 }
  0x7e   : > { %v2807_v11 = vsel %vm774_vm3, %v1937_v6, %v773_v10 }
  0xe3   : > { %v768_v12 = vpop.xlane.xlu0 %767 }
  0xe4   : > { %v776_v13 = vmul.f32 %v2807_v11, %v768_v12 }
  0xe6   : > { %v777_v14 = vsub.f32 %v2799_v1, %v776_v13 }
  0xe8   : > { %v778_v15 = vmul.f32 %v777_v14, %v777_v14 }
  0xea   : > { %v779_v16 = vsel %vm3072_vm1, %v778_v15, 0.0 }
  0xeb   : > { %780 = vadd.xlane.f32.xlu1 %v779_v16  ;;  %v808_v17 = vpop.xlane.xlu0 %807 }
  0xec   : > { %v809_v18 = vmul.f32 %v808_v17, %v2807_v11 }
  0xee   : > { %v810_v19 = vsub.f32 %v2803_v3, %v809_v18 }
  0xf0   : > { %v811_v20 = vmul.f32 %v810_v19, %v810_v19 }
  0xf2   : > { %v812_v21 = vsel %vm805_vm2, %v811_v20, 0.0 }
  0xf3   : > { %813 = vadd.xlane.f32.xlu1 %v812_v21 }
 0x15e   : > { %v781_v22 = vpop.xlane.xlu1 %780 }
 0x15f   : > { %v782_v24 = vmul.f32 %v781_v22, %v2807_v11 }
 0x161   : > { %v783_v25 = vadd.f32 1e-05, %v782_v24 }
 0x163   : > { %1938 = vrsqrt.f32 %v783_v25  ;;  %vm790_vm5 = vweird.f32 %v783_v25 }
 0x166   : > { %v814_v27 = vpop.xlane.xlu1 %813 }
 0x167   : > { %v815_v28 = vmul.f32 %v814_v27, %v2807_v11 }
 0x169   : > { %v1939_v29 = vpop.eup %1938  ;;  %v816_v30 = vadd.f32 1e-05, %v815_v28 }
 0x16a   : > { %v785_v31 = vmul.f32 %v1939_v29, %v783_v25  ;;  %vm791_vm4 = vweird.f32 %v1939_v29 }
 0x16b   : > { %1940 = vrsqrt.f32 %v816_v30  ;;  %vm792_vm6 = vmor %vm790_vm5, %vm791_vm4  ;;  %vm823_vm8 = vweird.f32 %v816_v30 }
 0x16c   : > { %v786_v32 = vmul.f32 %v1939_v29, %v785_v31 }
 0x16e   : > { %v787_v33 = vmul.f32 0.5, %v786_v32 }
 0x170   : > { %v788_v34 = vsub.f32 1.5, %v787_v33 }
 0x171   : > { %v1941_v35 = vpop.eup %1940 }
 0x172   : > { %v789_v36 = vmul.f32 %v1939_v29, %v788_v34  ;;  %v818_v37 = vmul.f32 %v1941_v35, %v816_v30  ;;  %vm824_vm7 = vweird.f32 %v1941_v35 }
 0x173   : > { %vm825_vm9 = vmor %vm823_vm8, %vm824_vm7 }
 0x174   : > { %v793_v39 = vsel %vm792_vm6, %v1939_v29, %v789_v36  ;;  %v819_v40 = vmul.f32 %v1941_v35, %v818_v37 }
 0x175   : > { %v794_v42 = vmul.f32 %v793_v39, %v777_v14 }
 0x176   : > { %v820_v43 = vmul.f32 0.5, %v819_v40 }
 0x177   : > { %v798_v44 = vmul.f32 %v1927_v38, %v794_v42 }
 0x178   : > { %v821_v45 = vsub.f32 1.5, %v820_v43 }
 0x179   : > { %v802_v46 = vadd.f32 %v1928_v41, %v798_v44 }
 0x17a   : > { %v822_v47 = vmul.f32 %v1941_v35, %v821_v45 }
 0x17b   : > { %v837_v52 = vrot.slane %v802_v46, 1  ;;  %v838_v53 = vrot.slane %v802_v46, 2  ;;  %v839_v54 = vrot.slane %v802_v46, 3  ;;  %v840_v56 = vperm.slane %v802_v46, 0 }
 0x17c   : > { %v826_v49 = vsel %vm825_vm9, %v1941_v35, %v822_v47 }
 0x17d   : > { %v827_v51 = vmul.f32 %v826_v49, %v810_v19  ;;  %v841_v58 = vperm.slane %v837_v52, 0  ;;  %v842_v59 = vperm.slane %v838_v53, 0  ;;  %v843_v60 = vperm.slane %v839_v54, 0  ;;  %v1932_v52 = vld [vmem:[#allocation16] ss:$0 sm:$0xff] }
 0x17f   : > { %v831_v55 = vmul.f32 %v1929_v48, %v827_v51  ;;  %v1933_v51 = vld [vmem:[#allocation18] ss:$0 sm:$0xff] }
 0x181   : > { %v835_v57 = vadd.f32 %v1930_v50, %v831_v55 }
 0x183   : > { %v848_v61 = vmul.f32 %v840_v56, %v835_v57  ;;  %v849_v62 = vmul.f32 %v841_v58, %v835_v57  ;;  %v850_v63 = vmul.f32 %v842_v59, %v835_v57  ;;  %v851_v0 = vmul.f32 %v843_v60, %v835_v57 }
 0x185   : > { %v852_v2 = vpack.c.bf16 %v849_v62, %v848_v61  ;;  %v853_v4 = vpack.c.bf16 %v851_v0, %v850_v63 }
 0x187   : > { %1691 = vmatmul.msk.bf16.vlgmr.msra.gmra.mxu0 %vm805_vm2, %v852_v2  ;;  %1692 = vmatmul.msk.bf16.vlgmr.msra.gmra.mxu1 %vm805_vm2, %v853_v4 }
 0x204   : > { %v889_v6 = vpop.f32.mrf.mxu0  ;;  %v894_v7 = vpop.f32.mrf.mxu1 }
 0x205   : > { %v2822_v8 = vadd.f32 %v1931_v5, %v889_v6  ;;  %v2824_v9 = vadd.f32 %v1931_v5, %v894_v7 }
 0x207   : > { %1013 = vrot.lane.b32.xlu0 %v2824_v9, %s2514_s1  ;;  %1009 = vrot.lane.b32.xlu2 %v2822_v8, %s2514_s1  ;;  %v901_v46 = vsel %vm805_vm2, %v2822_v8, 0.0  ;;  %v907_v50 = vsel %vm805_vm2, %v2824_v9, 0.0 }
 0x20c   : > { %v891_v10 = vpop.f32.mrf.mxu0  ;;  %v896_v12 = vpop.f32.mrf.mxu1 }
 0x20d   : > { %v2830_v13 = vadd.f32 %v1931_v5, %v891_v10  ;;  %v2832_v14 = vadd.f32 %v1931_v5, %v896_v12 }
 0x20f   : > { %1015 = vrot.lane.b32.xlu1 %v2832_v14, %s2514_s1  ;;  %1011 = vrot.lane.b32.xlu2 %v2830_v13, %s2514_s1  ;;  %v904_v45 = vsel %vm805_vm2, %v2830_v13, 0.0  ;;  %v910_v49 = vsel %vm805_vm2, %v2832_v14, 0.0 }
 0x261   : > { %v1010_v15 = vpop.permute.xlu2 %1009 }
 0x262   : > { %v1021_v16 = vsel %vm805_vm2, %v1010_v15, 0.0 }
 0x263   : > { %1022 = vadd.xlane.f32.xlu2 %v1021_v16 }
 0x269   : > { %v1012_v17 = vpop.permute.xlu2 %1011 }
 0x26a   : > { %v1024_v18 = vsel %vm805_vm2, %v1012_v17, 0.0 }
 0x26b   : > { %1025 = vadd.xlane.f32.xlu0 %v1024_v18 }
 0x279   : > { %v1014_v19 = vpop.permute.xlu0 %1013 }
 0x27a   : > { %v1027_v20 = vsel %vm805_vm2, %v1014_v19, 0.0 }
 0x27b   : > { %1028 = vadd.xlane.f32.xlu1 %v1027_v20 }
 0x281   : > { %v1016_v21 = vpop.permute.xlu1 %1015 }
 0x282   : > { %v1030_v22 = vsel %vm805_vm2, %v1016_v21, 0.0 }
 0x283   : > { %1031 = vadd.xlane.f32.xlu2 %v1030_v22 }
 0x2d6   : > { %v1023_v23 = vpop.xlane.xlu2 %1022 }
 0x2d7   : > { %v1033_v24 = vmul.f32 %v1023_v23, %v2807_v11 }
 0x2d9   : > { %v2844_v25 = vsub.f32 %v2822_v8, %v1033_v24 }
 0x2db   : > { %v1041_v26 = vmul.f32 %v2844_v25, %v2844_v25 }
 0x2dd   : > { %1049 = vrot.lane.b32.xlu2 %v1041_v26, %s2514_s1 }
 0x2de   : > { %v1026_v27 = vpop.xlane.xlu0 %1025 }
 0x2df   : > { %v1034_v28 = vmul.f32 %v1026_v27, %v2807_v11 }
 0x2e1   : > { %v2851_v29 = vsub.f32 %v2830_v13, %v1034_v28 }
 0x2e3   : > { %v1042_v30 = vmul.f32 %v2851_v29, %v2851_v29 }
 0x2e5   : > { %1051 = vrot.lane.b32.xlu0 %v1042_v30, %s2514_s1 }
 0x2ee   : > { %v1029_v31 = vpop.xlane.xlu1 %1028 }
 0x2ef   : > { %v1035_v32 = vmul.f32 %v1029_v31, %v2807_v11 }
 0x2f1   : > { %v2858_v33 = vsub.f32 %v2824_v9, %v1035_v32 }
 0x2f3   : > { %v1043_v34 = vmul.f32 %v2858_v33, %v2858_v33 }
 0x2f5   : > { %1053 = vrot.lane.b32.xlu1 %v1043_v34, %s2514_s1 }
 0x2f6   : > { %v1032_v35 = vpop.xlane.xlu2 %1031 }
 0x2f7   : > { %v1036_v36 = vmul.f32 %v1032_v35, %v2807_v11 }
 0x2f9   : > { %v2865_v37 = vsub.f32 %v2832_v14, %v1036_v36 }
 0x2fb   : > { %v1044_v38 = vmul.f32 %v2865_v37, %v2865_v37 }
 0x2fd   : > { %1055 = vrot.lane.b32.xlu2 %v1044_v38, %s2514_s1 }
 0x337   : > { %v1050_v39 = vpop.permute.xlu2 %1049 }
 0x338   : > { %v1061_v40 = vsel %vm805_vm2, %v1050_v39, 0.0 }
 0x339   : > { %1062 = vadd.xlane.f32.xlu2 %v1061_v40 }
 0x357   : > { %v1052_v41 = vpop.permute.xlu0 %1051  ;;  %v1056_v42 = vpop.permute.xlu2 %1055 }
 0x358   : > { %v1064_v43 = vsel %vm805_vm2, %v1052_v41, 0.0  ;;  %v1070_v44 = vsel %vm805_vm2, %v1056_v42, 0.0 }
 0x359   : > { %1065 = vadd.xlane.f32.xlu0 %v1064_v43  ;;  %1071 = vadd.xlane.f32.xlu2 %v1070_v44 }
 0x361   : > { %905 = vadd.xlane.f32.xlu2 %v904_v45  ;;  %902 = vadd.xlane.f32.xlu0 %v901_v46 }
 0x367   : > { %v1054_v47 = vpop.permute.xlu1 %1053 }
 0x368   : > { %v1067_v48 = vsel %vm805_vm2, %v1054_v47, 0.0 }
 0x369   : > { %1068 = vadd.xlane.f32.xlu1 %v1067_v48  ;;  %911 = vadd.xlane.f32.xlu2 %v910_v49 }
 0x36a   : > { %908 = vadd.xlane.f32.xlu0 %v907_v50 }
 0x37e   : > { %1136 = vrot.lane.b32.xlu0 %v1933_v51, %s2515_s26 }
 0x382   : > { %1127 = vrot.lane.b32.xlu1 %v1932_v52, %s2515_s26 }
 0x3ac   : > { %v1063_v53 = vpop.xlane.xlu2 %1062 }
 0x3ad   : > { %v1073_v54 = vmul.f32 %v1063_v53, %v2807_v11 }
 0x3af   : > { %v1077_v57 = vadd.f32 1e-05, %v1073_v54 }
 0x3b1   : > { %1942 = vrsqrt.f32 %v1077_v57  ;;  %vm1087_vm11 = vweird.f32 %v1077_v57 }
 0x3b7   : > { %v2889_v2 = vpop.eup %1942 }
 0x3b8   : > { %v1082_v12 = vmul.f32 %v2889_v2, %v1077_v57  ;;  %vm1088_vm10 = vweird.f32 %v2889_v2 }
 0x3b9   : > { %vm1089_vm14 = vmor %vm1087_vm11, %vm1088_vm10 }
 0x3cc   : > { %v1066_v55 = vpop.xlane.xlu0 %1065  ;;  %v1072_v56 = vpop.xlane.xlu2 %1071 }
 0x3cd   : > { %v1074_v58 = vmul.f32 %v1066_v55, %v2807_v11  ;;  %v1076_v59 = vmul.f32 %v1072_v56, %v2807_v11 }
 0x3cf   : > { %v1078_v60 = vadd.f32 1e-05, %v1074_v58  ;;  %v2885_v61 = vadd.f32 1e-05, %v1076_v59 }
 0x3d1   : > { %1944 = vrsqrt.f32 %v1078_v60  ;;  %vm1097_vm15 = vweird.f32 %v1078_v60  ;;  %vm1117_vm3 = vweird.f32 %v2885_v61 }
 0x3d2   : > { %1946 = vrsqrt.f32 %v2885_v61 }
 0x3d4   : > { %v906_v62 = vpop.xlane.xlu2 %905  ;;  %v903_v63 = vpop.xlane.xlu0 %902 }
 0x3d5   : > { %v913_v0 = vmul.f32 %v903_v63, %v2807_v11  ;;  %v914_v4 = vmul.f32 %v906_v62, %v2807_v11 }
 0x3d7   : > { %v2893_v5 = vsub.f32 %v2822_v8, %v913_v0  ;;  %v2895_v6 = vpop.eup %1944  ;;  %v2903_v15 = vsub.f32 %v2830_v13, %v914_v4  ;;  %v1083_v13 = vmul.f32 %v2889_v2, %v1082_v12 }
 0x3d8   : > { %v2897_v7 = vpop.eup %1946  ;;  %v1092_v17 = vmul.f32 %v2895_v6, %v1078_v60  ;;  %vm1098_vm12 = vweird.f32 %v2895_v6 }
 0x3d9   : > { %v921_v10 = vmul.f32 %v2893_v5, %v2893_v5  ;;  %v1112_v8 = vmul.f32 %v2897_v7, %v2885_v61  ;;  %v922_v27 = vmul.f32 %v2903_v15, %v2903_v15  ;;  %v1084_v35 = vmul.f32 0.5, %v1083_v13  ;;  %vm1099_vm0 = vmor %vm1097_vm15, %vm1098_vm12 }
 0x3da   : > { %v1093_v28 = vmul.f32 %v2895_v6, %v1092_v17  ;;  %vm1118_vm13 = vweird.f32 %v2897_v7 }
 0x3db   : > { %v925_v16 = vsel %vm805_vm2, %v921_v10, 0.0  ;;  %v1113_v30 = vmul.f32 %v2897_v7, %v1112_v8  ;;  %v928_v36 = vsel %vm805_vm2, %v922_v27, 0.0  ;;  %v1085_v41 = vsub.f32 1.5, %v1084_v35  ;;  %vm1119_vm5 = vmor %vm1117_vm3, %vm1118_vm13 }
 0x3dc   : > { %v1069_v18 = vpop.xlane.xlu1 %1068  ;;  %v912_v19 = vpop.xlane.xlu2 %911  ;;  %926 = vadd.xlane.f32.xlu2 %v925_v16  ;;  %v1094_v38 = vmul.f32 0.5, %v1093_v28  ;;  %vm1270_vm13 = vcmask 523520  }
 0x3dd   : > { %v1075_v20 = vmul.f32 %v1069_v18, %v2807_v11  ;;  %v916_v21 = vmul.f32 %v912_v19, %v2807_v11  ;;  %v909_v22 = vpop.xlane.xlu0 %908  ;;  %v1114_v39 = vmul.f32 0.5, %v1113_v30  ;;  %v1086_v46 = vmul.f32 %v2889_v2, %v1085_v41 }
 0x3de   : > { %v915_v23 = vmul.f32 %v909_v22, %v2807_v11  ;;  %v1095_v42 = vsub.f32 1.5, %v1094_v38 }
 0x3df   : > { %v1079_v24 = vadd.f32 1e-05, %v1075_v20  ;;  %v2914_v26 = vsub.f32 %v2832_v14, %v916_v21  ;;  %v1115_v43 = vsub.f32 1.5, %v1114_v39  ;;  %v1090_v51 = vsel %vm1089_vm14, %v2889_v2, %v1086_v46 }
 0x3e0   : > { %v2921_v31 = vsub.f32 %v2824_v9, %v915_v23  ;;  %v1096_v47 = vmul.f32 %v2895_v6, %v1095_v42  ;;  %v1121_v57 = vmul.f32 %v1090_v51, %v2844_v25 }
 0x3e1   : > { %1948 = vrsqrt.f32 %v1079_v24  ;;  %v924_v32 = vmul.f32 %v2914_v26, %v2914_v26  ;;  %v1116_v48 = vmul.f32 %v2897_v7, %v1115_v43  ;;  %vm1107_vm6 = vweird.f32 %v1079_v24 }
 0x3e2   : > { %v923_v34 = vmul.f32 %v2921_v31, %v2921_v31  ;;  %v1100_v53 = vsel %vm1099_vm0, %v2895_v6, %v1096_v47 }
 0x3e3   : > { %v934_v14 = vsel %vm805_vm2, %v924_v32, 0.0  ;;  %v1120_v54 = vsel %vm1119_vm5, %v2897_v7, %v1116_v48  ;;  %v1122_v58 = vmul.f32 %v1100_v53, %v2851_v29 }
 0x3e4   : > { %935 = vadd.xlane.f32.xlu0 %v934_v14  ;;  %929 = vadd.xlane.f32.xlu2 %v928_v36  ;;  %v931_v40 = vsel %vm805_vm2, %v923_v34, 0.0  ;;  %v1124_v59 = vmul.f32 %v1120_v54, %v2865_v37 }
 0x3e5   : > { %932 = vadd.xlane.f32.xlu1 %v931_v40 }
 0x3e7   : > { %v1949_v9 = vpop.eup %1948 }
 0x3e8   : > { %v1102_v44 = vmul.f32 %v1949_v9, %v1079_v24  ;;  %vm1108_vm4 = vweird.f32 %v1949_v9 }
 0x3e9   : > { %vm1109_vm7 = vmor %vm1107_vm6, %vm1108_vm4 }
 0x3ea   : > { %v1103_v45 = vmul.f32 %v1949_v9, %v1102_v44 }
 0x3ec   : > { %v1104_v49 = vmul.f32 0.5, %v1103_v45 }
 0x3ee   : > { %v1105_v50 = vsub.f32 1.5, %v1104_v49 }
 0x3f0   : > { %v1106_v52 = vmul.f32 %v1949_v9, %v1105_v50  ;;  %v1137_v61 = vpop.permute.xlu0 %1136 }
 0x3f2   : > { %v1110_v55 = vsel %vm1109_vm7, %v1949_v9, %v1106_v52 }
 0x3f3   : > { %v1123_v56 = vmul.f32 %v1110_v55, %v2858_v33 }
 0x3f4   : > { %v1128_v60 = vpop.permute.xlu1 %1127 }
 0x3f5   : > { %v1130_v62 = vmul.f32 %v1128_v60, %v1121_v57  ;;  %v1131_v63 = vmul.f32 %v1128_v60, %v1122_v58  ;;  %v1132_v0 = vmul.f32 %v1128_v60, %v1123_v56  ;;  %v1133_v2 = vmul.f32 %v1128_v60, %v1124_v59 }
 0x3f7   : > { %v1139_v4 = vadd.f32 %v1137_v61, %v1130_v62  ;;  %v1140_v6 = vadd.f32 %v1137_v61, %v1131_v63  ;;  %v1141_v10 = vadd.f32 %v1137_v61, %v1132_v0  ;;  %v1142_v7 = vadd.f32 %v1137_v61, %v1133_v2 }
 0x3f9   : > { %v1693_v12 = vmul.f32 -1.442695, %v1139_v4  ;;  %v1694_v16 = vmul.f32 -1.442695, %v1140_v6  ;;  %v1695_v17 = vmul.f32 -1.442695, %v1141_v10 }
 0x3fa   : > { %v1696_v33 = vmul.f32 -1.442695, %v1142_v7 }
 0x3fb   : > { %1950 = vpow2.f32 %v1693_v12 }
 0x3fc   : > { %1952 = vpow2.f32 %v1694_v16 }
 0x3fd   : > { %1954 = vpow2.f32 %v1695_v17 }
 0x3fe   : > { %1956 = vpow2.f32 %v1696_v33 }
 0x401   : > { %v1951_v25 = vpop.eup %1950 }
 0x402   : > { %v1953_v29 = vpop.eup %1952  ;;  %v1155_v37 = vadd.f32 1.0, %v1951_v25 }
 0x403   : > { %v1955_v8 = vpop.eup %1954  ;;  %v1156_v18 = vadd.f32 1.0, %v1953_v29 }
 0x404   : > { %v1957_v19 = vpop.eup %1956  ;;  %v1157_v20 = vadd.f32 1.0, %v1955_v8  ;;  %1958 = vrcp.f32 %v1155_v37  ;;  %v1168_v22 = vand.u32 2147483647, %v1155_v37  ;;  %v1170_v23 = vand.u32 2147483648, %v1155_v37 }
 0x405   : > { %v1158_v21 = vadd.f32 1.0, %v1957_v19  ;;  %1960 = vrcp.f32 %v1156_v18  ;;  %v1183_v24 = vand.u32 2147483647, %v1156_v18  ;;  %v1185_v30 = vand.u32 2147483648, %v1156_v18 }
 0x406   : > { %1962 = vrcp.f32 %v1157_v20  ;;  %vm1164_vm8 = vweird.f32 %v1155_v37  ;;  %vm2944_vm9 = vcmp.eq.f32.partialorder %v1168_v22, 8.507059e+37  ;;  %vm1179_vm10 = vweird.f32 %v1156_v18 }
 0x407   : > { %1964 = vrcp.f32 %v1158_v21  ;;  %v1171_v38 = vor.u32 1.1754944e-38, %v1170_v23  ;;  %vm1194_vm11 = vweird.f32 %v1157_v20  ;;  %vm2948_vm12 = vcmp.eq.f32.partialorder %v1183_v24, 8.507059e+37 }
 0x408   : > { %v1200_v41 = vand.u32 2147483648, %v1157_v20  ;;  %v1186_v44 = vor.u32 1.1754944e-38, %v1185_v30  ;;  %v1198_v48 = vand.u32 2147483647, %v1157_v20  ;;  %v1215_v51 = vand.u32 2147483648, %v1158_v21 }
 0x409   : > { %v1213_v54 = vand.u32 2147483647, %v1158_v21  ;;  %vm1209_vm6 = vweird.f32 %v1158_v21 }
 0x40a   : > { %v1959_v13 = vpop.eup %1958  ;;  %v1201_v55 = vor.u32 1.1754944e-38, %v1200_v41  ;;  %vm1199_vm1 = vcmp.eq.f32.partialorder %v1198_v48, 8.507059e+37  ;;  %v1216_v63 = vor.u32 1.1754944e-38, %v1215_v51 }
 0x40b   : > { %v1961_v27 = vpop.eup %1960  ;;  %v1160_v28 = vmul.f32 %v1959_v13, %v1155_v37  ;;  %vm1165_vm14 = vweird.f32 %v1959_v13 }
 0x40c   : > { %v1963_v32 = vpop.eup %1962  ;;  %v1175_v35 = vmul.f32 %v1961_v27, %v1156_v18  ;;  %vm1180_vm15 = vweird.f32 %v1961_v27  ;;  %vm1166_vm3 = vmor %vm1164_vm8, %vm1165_vm14 }
 0x40d   : > { %v1965_v14 = vpop.eup %1964  ;;  %v1161_v36 = vsub.f32 1.0, %v1160_v28  ;;  %v1190_v39 = vmul.f32 %v1963_v32, %v1157_v20  ;;  %vm1195_vm0 = vweird.f32 %v1963_v32  ;;  %vm1181_vm5 = vmor %vm1179_vm10, %vm1180_vm15  ;;  %vm1214_vm10 = vcmp.eq.f32.partialorder %v1213_v54, 8.507059e+37 }
 0x40e   : > { %v1176_v40 = vsub.f32 1.0, %v1175_v35  ;;  %v1205_v42 = vmul.f32 %v1965_v14, %v1158_v21  ;;  %vm1210_vm4 = vweird.f32 %v1965_v14  ;;  %vm1196_vm7 = vmor %vm1194_vm11, %vm1195_vm0  ;;  %vm1256_vm11 = vcmask 1043459  }
 0x40f   : > { %v1162_v43 = vmul.f32 %v1959_v13, %v1161_v36  ;;  %v1191_v45 = vsub.f32 1.0, %v1190_v39  ;;  %vm1211_vm8 = vmor %vm1209_vm6, %vm1210_vm4 }
 0x410   : > { %v1177_v46 = vmul.f32 %v1961_v27, %v1176_v40  ;;  %v1206_v47 = vsub.f32 1.0, %v1205_v42 }
 0x411   : > { %v1163_v49 = vadd.f32 %v1959_v13, %v1162_v43  ;;  %v1192_v50 = vmul.f32 %v1963_v32, %v1191_v45 }
 0x412   : > { %v1178_v52 = vadd.f32 %v1961_v27, %v1177_v46  ;;  %v1207_v53 = vmul.f32 %v1965_v14, %v1206_v47 }
 0x413   : > { %v1167_v56 = vsel %vm1166_vm3, %v1959_v13, %v1163_v49  ;;  %v1193_v57 = vadd.f32 %v1963_v32, %v1192_v50 }
 0x414   : > { %v1172_v58 = vsel %vm2944_vm9, %v1171_v38, %v1167_v56  ;;  %v1182_v59 = vsel %vm1181_vm5, %v1961_v27, %v1178_v52  ;;  %v1208_v60 = vadd.f32 %v1965_v14, %v1207_v53  ;;  %vm1254_vm9 = vcmask 1042434  }
 0x415   : > { %v1187_v61 = vsel %vm2948_vm12, %v1186_v44, %v1182_v59  ;;  %v1197_v62 = vsel %vm1196_vm7, %v1963_v32, %v1193_v57  ;;  %v1262_v0 = vadd.f32 1.0, %v1172_v58 }
 0x416   : > { %v1202_v2 = vsel %vm1199_vm1, %v1201_v55, %v1197_v62  ;;  %v1212_v4 = vsel %vm1211_vm8, %v1965_v14, %v1208_v60  ;;  %v1263_v6 = vadd.f32 1.0, %v1187_v61  ;;  %vm1252_vm1 = vcmask 1041409  }
 0x417   : > { %v1217_v10 = vsel %vm1214_vm10, %v1216_v63, %v1212_v4  ;;  %v1264_v7 = vadd.f32 1.0, %v1202_v2  ;;  %v1266_v12 = vmul.f32 %v1262_v0, %v2803_v3 }
 0x418   : > { %v1265_v16 = vadd.f32 1.0, %v1217_v10  ;;  %v1267_v17 = vmul.f32 %v1263_v6, %v2803_v3 }
 0x419   : > { %v1268_v33 = vmul.f32 %v1264_v7, %v2803_v3  ;;  %v1271_v25 = vsel %vm1270_vm13, %v1266_v12, 0.0  ;;  %v1934_v12 = vld [vmem:[#allocation13] ss:$0 sm:$0xff] }
 0x41a   : > { %v1269_v29 = vmul.f32 %v1265_v16, %v2803_v3  ;;  %v1272_v37 = vrot.slane %v1271_v25, 4  ;;  %v1278_v8 = vsel %vm1270_vm13, %v1267_v17, 0.0 }
 0x41b   : > { %v1279_v18 = vrot.slane %v1278_v8, 4  ;;  %v1285_v19 = vsel %vm1270_vm13, %v1268_v33, 0.0 }
 0x41c   : > { %v1273_v20 = vadd.f32 %v1272_v37, %v1271_v25  ;;  %v1286_v21 = vrot.slane %v1285_v19, 4  ;;  %v1292_v22 = vsel %vm1270_vm13, %v1269_v29, 0.0  ;;  %v1935_v29 = vld [vmem:[#allocation15] ss:$0 sm:$0xff] }
 0x41d   : > { %v1280_v23 = vadd.f32 %v1279_v18, %v1278_v8  ;;  %v1293_v13 = vrot.slane %v1292_v22, 4 }
 0x41e   : > { %v1274_v24 = vrot.slane %v1273_v20, 2  ;;  %v1287_v27 = vadd.f32 %v1286_v21, %v1285_v19 }
 0x41f   : > { %v1281_v28 = vrot.slane %v1280_v23, 2  ;;  %v1294_v30 = vadd.f32 %v1293_v13, %v1292_v22 }
 0x420   : > { %v1275_v32 = vadd.f32 %v1274_v24, %v1273_v20  ;;  %v1288_v34 = vrot.slane %v1287_v27, 2 }
 0x421   : > { %v1282_v35 = vadd.f32 %v1281_v28, %v1280_v23  ;;  %v1295_v3 = vrot.slane %v1294_v30, 2 }
 0x422   : > { %v1276_v14 = vrot.slane %v1275_v32, 1  ;;  %v1289_v36 = vadd.f32 %v1288_v34, %v1287_v27 }
 0x423   : > { %v1283_v38 = vrot.slane %v1282_v35, 1  ;;  %v1296_v39 = vadd.f32 %v1295_v3, %v1294_v30 }
 0x424   : > { %v1277_v40 = vadd.f32 %v1276_v14, %v1275_v32  ;;  %v1290_v9 = vrot.slane %v1289_v36, 1 }
 0x425   : > { %v1284_v41 = vadd.f32 %v1283_v38, %v1282_v35  ;;  %v1297_v42 = vrot.slane %v1296_v39, 1 }
 0x426   : > { %v1291_v43 = vadd.f32 %v1290_v9, %v1289_v36 }
 0x427   : > { %v1298_v44 = vadd.f32 %v1297_v42, %v1296_v39  ;;  %v1303_v45 = vsel %vm1252_vm1, %v1284_v41, %v1277_v40 }
 0x428   : > { %v1304_v46 = vsel %vm1254_vm9, %v1291_v43, %v1303_v45 }
 0x429   : > { %v1305_v47 = vsel %vm1256_vm11, %v1298_v44, %v1304_v46 }
 0x42a   : > { %1306 = vrot.lane.b32.xlu2 %v1305_v47, %s2514_s1 }
 0x44f   : > { %v927_v48 = vpop.xlane.xlu2 %926 }
 0x450   : > { %v937_v49 = vmul.f32 %v927_v48, %v2807_v11 }
 0x452   : > { %v941_v50 = vadd.f32 1e-05, %v937_v49 }
 0x454   : > { %1966 = vrsqrt.f32 %v941_v50  ;;  %vm951_vm13 = vweird.f32 %v941_v50 }
 0x457   : > { %v930_v51 = vpop.xlane.xlu2 %929  ;;  %v936_v52 = vpop.xlane.xlu0 %935 }
 0x458   : > { %v938_v53 = vmul.f32 %v930_v51, %v2807_v11  ;;  %v933_v54 = vpop.xlane.xlu1 %932  ;;  %v940_v55 = vmul.f32 %v936_v52, %v2807_v11 }
 0x459   : > { %v939_v56 = vmul.f32 %v933_v54, %v2807_v11 }
 0x45a   : > { %v1967_v57 = vpop.eup %1966  ;;  %v942_v58 = vadd.f32 1e-05, %v938_v53  ;;  %v944_v59 = vadd.f32 1e-05, %v940_v55 }
 0x45b   : > { %v946_v60 = vmul.f32 %v1967_v57, %v941_v50  ;;  %v943_v61 = vadd.f32 1e-05, %v939_v56  ;;  %vm952_vm12 = vweird.f32 %v1967_v57 }
 0x45c   : > { %1968 = vrsqrt.f32 %v942_v58  ;;  %vm953_vm14 = vmor %vm951_vm13, %vm952_vm12  ;;  %vm961_vm3 = vweird.f32 %v942_v58  ;;  %vm981_vm8 = vweird.f32 %v944_v59  ;;  %vm3105_vm12 = vcmask 257024  }
 0x45d   : > { %v947_v62 = vmul.f32 %v1967_v57, %v946_v60  ;;  %1970 = vrsqrt.f32 %v943_v61  ;;  %vm971_vm6 = vweird.f32 %v943_v61  ;;  %vm3106_vm13 = vmmov %vm3105_vm12 }
 0x45e   : > { %1972 = vrsqrt.f32 %v944_v59 }
 0x45f   : > { %v948_v63 = vmul.f32 0.5, %v947_v62 }
 0x461   : > { %v949_v0 = vsub.f32 1.5, %v948_v63 }
 0x462   : > { %v1969_v2 = vpop.eup %1968 }
 0x463   : > { %v1971_v4 = vpop.eup %1970  ;;  %v950_v6 = vmul.f32 %v1967_v57, %v949_v0  ;;  %v956_v10 = vmul.f32 %v1969_v2, %v942_v58  ;;  %vm962_vm15 = vweird.f32 %v1969_v2 }
 0x464   : > { %v1973_v7 = vpop.eup %1972  ;;  %v966_v16 = vmul.f32 %v1971_v4, %v943_v61  ;;  %vm972_vm0 = vweird.f32 %v1971_v4  ;;  %vm963_vm5 = vmor %vm961_vm3, %vm962_vm15 }
 0x465   : > { %v954_v17 = vsel %vm953_vm14, %v1967_v57, %v950_v6  ;;  %v957_v33 = vmul.f32 %v1969_v2, %v956_v10  ;;  %v976_v25 = vmul.f32 %v1973_v7, %v944_v59  ;;  %vm982_vm4 = vweird.f32 %v1973_v7  ;;  %vm973_vm7 = vmor %vm971_vm6, %vm972_vm0  ;;  %v1219_v10 = vld [vmem:[#allocation2] sm:$0xf] }
 0x466   : > { %v985_v37 = vmul.f32 %v954_v17, %v2893_v5  ;;  %v967_v8 = vmul.f32 %v1971_v4, %v966_v16  ;;  %vm983_vm10 = vmor %vm981_vm8, %vm982_vm4  ;;  %v1261_v16 = vld [vmem:[#allocation3] sm:$0xf] }
 0x467   : > { %v958_v18 = vmul.f32 0.5, %v957_v33  ;;  %v977_v19 = vmul.f32 %v1973_v7, %v976_v25 }
 0x468   : > { %v992_v20 = vmul.f32 %v1934_v12, %v985_v37  ;;  %v968_v21 = vmul.f32 0.5, %v967_v8 }
 0x469   : > { %v959_v22 = vsub.f32 1.5, %v958_v18  ;;  %v978_v23 = vmul.f32 0.5, %v977_v19 }
 0x46a   : > { %v999_v13 = vadd.f32 %v1935_v29, %v992_v20  ;;  %v969_v24 = vsub.f32 1.5, %v968_v21 }
 0x46b   : > { %v960_v27 = vmul.f32 %v1969_v2, %v959_v22  ;;  %v979_v28 = vsub.f32 1.5, %v978_v23 }
 0x46c   : > { %v1220_v30 = vsel %vm805_vm2, %v999_v13, 0.0  ;;  %v970_v32 = vmul.f32 %v1971_v4, %v969_v24 }
 0x46d   : > { %v1221_v5 = vrot.slane %v1220_v30, 4  ;;  %v964_v34 = vsel %vm963_vm5, %v1969_v2, %v960_v27  ;;  %v980_v35 = vmul.f32 %v1973_v7, %v979_v28 }
 0x46e   : > { %v986_v3 = vmul.f32 %v964_v34, %v2903_v15  ;;  %v974_v14 = vsel %vm973_vm7, %v1971_v4, %v970_v32 }
 0x46f   : > { %v1222_v36 = vadd.f32 %v1221_v5, %v1220_v30  ;;  %v987_v38 = vmul.f32 %v974_v14, %v2921_v31  ;;  %v984_v39 = vsel %vm983_vm10, %v1973_v7, %v980_v35 }
 0x470   : > { %v993_v40 = vmul.f32 %v1934_v12, %v986_v3  ;;  %v988_v9 = vmul.f32 %v984_v39, %v2914_v26 }
 0x471   : > { %v994_v41 = vmul.f32 %v1934_v12, %v987_v38  ;;  %v1223_v44 = vrot.slane %v1222_v36, 2 }
 0x472   : > { %v1000_v42 = vadd.f32 %v1935_v29, %v993_v40  ;;  %v995_v43 = vmul.f32 %v1934_v12, %v988_v9 }
 0x473   : > { %v1001_v45 = vadd.f32 %v1935_v29, %v994_v41  ;;  %v1224_v51 = vadd.f32 %v1223_v44, %v1222_v36 }
 0x474   : > { %v1227_v46 = vsel %vm805_vm2, %v1000_v42, 0.0  ;;  %v1002_v47 = vadd.f32 %v1935_v29, %v995_v43 }
 0x475   : > { %v1228_v48 = vrot.slane %v1227_v46, 4  ;;  %v1234_v15 = vsel %vm805_vm2, %v1001_v45, 0.0  ;;  %v1225_v56 = vrot.slane %v1224_v51, 1 }
 0x476   : > { %v1235_v49 = vrot.slane %v1234_v15, 4  ;;  %v1241_v50 = vsel %vm805_vm2, %v1002_v47, 0.0 }
 0x477   : > { %v1229_v31 = vadd.f32 %v1228_v48, %v1227_v46  ;;  %v1242_v52 = vrot.slane %v1241_v50, 4  ;;  %v1226_v63 = vadd.f32 %v1225_v56, %v1224_v51 }
 0x478   : > { %v1236_v53 = vadd.f32 %v1235_v49, %v1234_v15 }
 0x479   : > { %v1230_v54 = vrot.slane %v1229_v31, 2  ;;  %v1243_v26 = vadd.f32 %v1242_v52, %v1241_v50 }
 0x47a   : > { %v1237_v55 = vrot.slane %v1236_v53, 2 }
 0x47b   : > { %v1231_v57 = vadd.f32 %v1230_v54, %v1229_v31  ;;  %v1244_v58 = vrot.slane %v1243_v26, 2 }
 0x47c   : > { %v1238_v59 = vadd.f32 %v1237_v55, %v1236_v53 }
 0x47d   : > { %v1232_v60 = vrot.slane %v1231_v57, 1  ;;  %v1245_v61 = vadd.f32 %v1244_v58, %v1243_v26 }
 0x47e   : > { %v1239_v62 = vrot.slane %v1238_v59, 1 }
 0x47f   : > { %v1233_v0 = vadd.f32 %v1232_v60, %v1231_v57  ;;  %v1246_v2 = vrot.slane %v1245_v61, 1 }
 0x480   : > { %v1240_v4 = vadd.f32 %v1239_v62, %v1238_v59 }
 0x481   : > { %v1253_v6 = vsel %vm1252_vm1, %v1233_v0, %v1226_v63  ;;  %v1247_v7 = vadd.f32 %v1246_v2, %v1245_v61 }
 0x482   : > { %v1255_v12 = vsel %vm1254_vm9, %v1240_v4, %v1253_v6 }
 0x483   : > { %v1257_v17 = vsel %vm1256_vm11, %v1247_v7, %v1255_v12  ;;  %1314 = sbr.rel (%p1697_p5) target bundleno = 1682 (0x692), region = 144 }
 0x484   : > { %v1259_v33 = vadd.f32 %v1257_v17, %v1219_v10  ;;  %v1307_v25 = vpop.permute.xlu2 %1306 }
 0x485   : > { %v1309_v29 = vadd.f32 %v1307_v25, %v1261_v16 }
 0x486   : > { %1260 = vst.msk [vmem:[#allocation2] sm:$0xf] %vm3105_vm12, %v1259_v33 }
 0x487   : > { %1310 = vst.msk [vmem:[#allocation3] sm:$0xf] %vm3106_vm13, %v1309_v29 }
 0x488   : > { %1338 = vrot.lane.b32.xlu0 %v2799_v1, %s2516_s23  ;;  %v1715_v21 = vld [vmem:[#allocation19 + $0x8] sm:$0xff]  ;;  %v1714_v22 = vld [vmem:[#allocation19] sm:$0xff]  ;;  %v1974_v41 = vld [vmem:[#allocation21] ss:$0 sm:$0xff]  ;;  %vm3107_vm15 = vcmask 257024  }
 0x489   : > { %1376 = vmatpush.bf16.msra.mxu0 %v1715_v21  ;;  %vm3108_vm0 = vmmov %vm3107_vm15  ;;  %v1975_v57 = vld [vmem:[#allocation22] ss:$0 sm:$0xff]  ;;  %v1976_v59 = vld [vmem:[#allocation24] ss:$0 sm:$0xff] }
 0x48a   : > { %vm3109_vm5 = vmmov %vm3108_vm0 }
 0x48d   : > { %v1315_v37 = vld [vmem:[#allocation2] sm:$0xf]  ;;  %1377 = vmatpush.bf16.msra.mxu0 %v1714_v22 }
 0x48e   : > { %v1698_v8 = vmul.f32 -0.0625, %v1315_v37  ;;  %v1342_v35 = vld [vmem:[#allocation3] sm:$0xf] }
 0x48f   : > { %v1343_v14 = vmul.f32 0.0625, %v1342_v35 }
 0x490   : > { %v1318_v18 = vmul.f32 1.442695, %v1698_v8 }
 0x492   : > { %1977 = vpow2.f32 %v1318_v18 }
 0x498   : > { %v1978_v19 = vpop.eup %1977 }
 0x499   : > { %v1320_v20 = vadd.f32 1.0, %v1978_v19 }
 0x49b   : > { %1979 = vrcp.f32 %v1320_v20  ;;  %vm1326_vm1 = vweird.f32 %v1320_v20  ;;  %v1332_v28 = vand.u32 2147483648, %v1320_v20  ;;  %v1330_v1 = vand.u32 2147483647, %v1320_v20 }
 0x49d   : > { %v1333_v32 = vor.u32 1.1754944e-38, %v1332_v28  ;;  %vm1331_vm14 = vcmp.eq.f32.partialorder %v1330_v1, 8.507059e+37 }
 0x4a1   : > { %v1980_v23 = vpop.eup %1979 }
 0x4a2   : > { %v1322_v13 = vmul.f32 %v1980_v23, %v1320_v20  ;;  %vm1327_vm9 = vweird.f32 %v1980_v23 }
 0x4a3   : > { %vm1328_vm11 = vmor %vm1326_vm1, %vm1327_vm9 }
 0x4a4   : > { %v1323_v24 = vsub.f32 1.0, %v1322_v13 }
 0x4a6   : > { %v1324_v27 = vmul.f32 %v1980_v23, %v1323_v24 }
 0x4a8   : > { %v1325_v30 = vadd.f32 %v1980_v23, %v1324_v27 }
 0x4aa   : > { %v1329_v5 = vsel %vm1328_vm11, %v1980_v23, %v1325_v30 }
 0x4ab   : > { %v1334_v34 = vsel %vm1331_vm14, %v1333_v32, %v1329_v5 }
 0x4ac   : > { %v1336_v3 = vadd.f32 1.0, %v1334_v34 }
 0x4fa   : > { %v1339_v36 = vpop.permute.xlu0 %1338 }
 0x4fb   : > { %v1341_v38 = vmul.f32 %v1339_v36, %v1336_v3 }
 0x4fd   : > { %v1344_v39 = vadd.f32 %v1343_v14, %v1341_v38 }
 0x4ff   : > { %v1345_v40 = vmul.f32 0.5, %v1344_v39 }
 0x501   : > { %v1346_v9 = vpack.c.bf16 %v1345_v40, %v1345_v40 }
 0x503   : > { %1707 = vmatmul.msk.bf16.vlgmr.msra.gmra.mxu0 %vm805_vm2, %v1346_v9 }
 0x580   : > { %v1379_v42 = vpop.f32.mrf.mxu0 }
 0x581   : > { %v1380_v43 = vadd.f32 %v1974_v41, %v1379_v42 }
 0x583   : > { %v1385_v44 = vsel %vm3107_vm15, %v1380_v43, 0.0 }
 0x584   : > { %1386 = vadd.xlane.f32.xlu0 %v1385_v44 }
 0x588   : > { %v1381_v45 = vpop.f32.mrf.mxu0 }
 0x5f7   : > { %v1387_v46 = vpop.xlane.xlu0 %1386 }
 0x5f8   : > { %v1388_v47 = vmul.f32 %v1387_v46, %v2807_v11 }
 0x5fa   : > { %v1389_v48 = vsub.f32 %v1380_v43, %v1388_v47 }
 0x5fc   : > { %v1390_v15 = vmul.f32 %v1389_v48, %v1389_v48 }
 0x5fe   : > { %v1391_v49 = vsel %vm3108_vm0, %v1390_v15, 0.0 }
 0x5ff   : > { %1392 = vadd.xlane.f32.xlu1 %v1391_v49 }
 0x672   : > { %v1393_v50 = vpop.xlane.xlu1 %1392 }
 0x673   : > { %v1394_v51 = vmul.f32 %v1393_v50, %v2807_v11 }
 0x675   : > { %v1395_v31 = vadd.f32 1e-05, %v1394_v51 }
 0x677   : > { %1981 = vrsqrt.f32 %v1395_v31  ;;  %vm1402_vm3 = vweird.f32 %v1395_v31 }
 0x67d   : > { %v1982_v52 = vpop.eup %1981 }
 0x67e   : > { %v1397_v53 = vmul.f32 %v1982_v52, %v1395_v31  ;;  %vm1403_vm2 = vweird.f32 %v1982_v52 }
 0x67f   : > { %vm1404_vm4 = vmor %vm1402_vm3, %vm1403_vm2 }
 0x680   : > { %v1398_v54 = vmul.f32 %v1982_v52, %v1397_v53 }
 0x682   : > { %v1399_v26 = vmul.f32 0.5, %v1398_v54 }
 0x684   : > { %v1400_v55 = vsub.f32 1.5, %v1399_v26 }
 0x686   : > { %v1401_v56 = vmul.f32 %v1982_v52, %v1400_v55 }
 0x688   : > { %v1405_v58 = vsel %vm1404_vm4, %v1982_v52, %v1401_v56 }
 0x689   : > { %v1406_v60 = vmul.f32 %v1405_v58, %v1389_v48 }
 0x68b   : > { %v1410_v61 = vmul.f32 %v1975_v57, %v1406_v60 }
 0x68d   : > { %v1414_v62 = vadd.f32 %v1976_v59, %v1410_v61 }
 0x68f   : > { %v1415_v63 = vmax.f32 %v1414_v62, 0.0 }
 0x691   : > { %1416 = vst.msk [vmem:[%s740_s2] sm:$0xf] %vm3109_vm5, %v1415_v63 }
 0x692 PF: > { %s1709_s30 = sshll.u32 %s2483_s25, 2  ;;  %s3111_s19 = sld [smem:[#allocation50_spill]] }
 0x693   : > { %s1430_s27 = sshll.u32 %s740_s2, 4  ;;  %s1418_s4 = scalar_lea.sflag [#allocation6], %s738_s0  ;;  %s1431_s27 = int_to_ptr.vmem [resolvable:$true] %s1430_s27 }
 0x698   : > { %s1428_s21 = scalar_lea.hbm %s3111_s19, %s1709_s30  ;;  %s2393_s6 = scalar_lea.hbm %s3111_s19, 8 }
 0x699   : > { %s1432_s16 = sshll.u32 %s1428_s21, 4  ;;  %s1433_s16 = int_to_ptr.hbm [resolvable:$true] %s1432_s16 }
 0x69a   : > { %s2387_s8 = sshra.s32 %s1433_s16, 4  ;;  %s2388_s8 = int_to_ptr.hbm [resolvable:$true] %s2387_s8 }
 0x69b   : > { %s2389_s18 = scalar_lea.hbm %s2388_s8, 4  ;;  %p2394_p10 = scmp.lt.s32.totalorder %s2388_s8, %s3111_s19 }
 0x69c   : > { %p2390_p6 = scmp.ne.s32.totalorder %s2388_s8, %s2389_s18  ;;  %p2395_p11 = scmp.lt.s32.totalorder %s2393_s6, %s2389_s18 }
 0x69e   : > { %p2391_p7 = pnand %p2390_p6, %p2652_p3  ;;  %p2396_p12 = por %p2395_p11, %p2394_p10 }
 0x6a0   : > { %p2392_p8 = pneg %p2391_p7 }
 0x6a2   : > { %p2397_p13 = pnand %p2396_p12, %p2392_p8 }
 0x6a4   : > { %2400 = shalt.err (!%p2397_p13)
}
 0x6a5   : > { %1770 = dma.vmem_to_hbm [thread:$0]  (%p2652_p3), %s1431_s27, 64, %s1433_s16, %s1418_s4  }
 0x6a6 PF: > { %s3112_s0 = sld [smem:[#allocation38_spill]] }
 0x6a7   : > { %s3113_s20 = sld [smem:[#allocation34_spill]] }
 0x6ac   : > { %p1842_p0 = scmp.ge.s32.totalorder %s3112_s0, 2 }
 0x6ad   : > { %s1444_s23 = sand.u32 1, %s3113_s20  }
 0x6ae   : > { %p1813_p1 = pnand %p1842_p0, %p2662_p9  ;;  %s1445_s30 = scalar_lea.sflag [#allocation6], %s1444_s23 }
 0x6b0   : > { %p1814_p2 = pneg %p1813_p1 }
 0x6b2   : > { %2462 = dma.done.wait (%p1814_p2), %s1445_s30, 64  }
 0x6b3   : > { %2464 = vsyncadd (%p1814_p2), %s1445_s30, 4294967232  ;;  %s36_s28 = sadd.s32 1, %s3112_s0   ;;  %s3115_s29 = sld [smem:[#allocation35_spill]] }
 0x6b4   : > { %p33_p4 = scmp.ge.s32.totalorder %s36_s28, 6   ;;  %s3116_s23 = sld [smem:[#allocation43_spill]] }
 0x6b5   : > { %s3117_s24 = sld [smem:[#allocation36_spill]]  ;;  %s3121_s21 = smov %s2471_s22 }
 0x6b6   : > { %s3118_s25 = sld [smem:[#allocation37_spill]]  ;;  %35 = sbr.rel (!%p33_p4) target bundleno = 20 (0x14), region = 183 }
 0x6b7   : > { %s3119_s26 = sld [smem:[#allocation39_spill]] }
 0x6b8   : > { %s3120_s27 = sld [smem:[#allocation41_spill]] }
 0x6b9   : > { %s3122_s22 = smov %s3115_s29 }
 0x6bb   :  { %1451 = vsyncpa [#allocation5], 1 }
 0x6bc   :  { %1453 = vsyncpa [#allocation5 + $0x1], 1 }
 0x6bd   :  { %1454 = vsyncpa [#allocation8], 1 }
 0x6be   :  { %1455 = vsyncpa [#allocation11], 1 }
 0x6bf   :  { %1456 = vsyncpa [#allocation14], 1 }
 0x6c0   :  { %1457 = vsyncpa [#allocation17], 1 }
 0x6c1   :  { %1458 = vsyncpa [#allocation20], 1 }
 0x6c2   :  { %1459 = vsyncpa [#allocation23], 1 }
 0x6c3   :  { %1460 = vsyncpa [#allocation6], 1 }
 0x6c4   :  { %1462 = vsyncpa [#allocation6 + $0x1], 1 }

</bundles_post_ra>
